<compile_context>
chip_gen: v6e
topology: v6e:2x2x1
jax: 0.10.0
libtpu: 0.0.40
codegen_flags: <defaults>
</compile_context>

<pallas_src>
import math

import jax
import jax.numpy as jnp
from jax.experimental import pallas as pl
from jax.experimental.pallas import tpu as pltpu


def rotary_attn_kernel(x_ref, w_ref, trig_q_ref, trig_k_ref, o_ref):
    Bblk, T, D = x_ref.shape
    Dh = D // 2

    # Cast in-kernel (hides under the MXU pass) and fold the batch block into M so the
    # fused QKV matmul fills the 256-row MXU on v6e/v7x. Reshape is layout-free
    # (T is a multiple of 8, D unchanged).
    x = x_ref[...].astype(jnp.bfloat16).reshape(Bblk * T, D)
    h = jnp.dot(x, w_ref[...], preferred_element_type=jnp.float32)  # (Bblk*T, 3D) f32

    trig_q = trig_q_ref[...]  # (T, D) f32 = [cos/sqrt(D) | sin/sqrt(D)], pre-broadcast
    trig_k = trig_k_ref[...]  # (T, D) f32 = [cos | sin], pre-broadcast

    # Causal mask hoisted out of the per-batch loop (JAX does not CSE broadcasts/iotas).
    row = jax.lax.broadcasted_iota(jnp.int32, (T, T), 0)
    col = jax.lax.broadcasted_iota(jnp.int32, (T, T), 1)
    causal = col <= row

    for b in range(Bblk):  # static unroll — Bblk is a small compile-time constant
        hb = h[b * T:(b + 1) * T]                       # (T, 3D) f32, static slice
        q, k, v = hb[:, :D], hb[:, D:2 * D], hb[:, 2 * D:]
        q_e, q_o = q[:, :Dh], q[:, Dh:]
        k_e, k_o = k[:, :Dh], k[:, Dh:]

        # Rotation via pre-permuted [evens | odds] weight columns: pure f32 VPU math.
        # 1/sqrt(D) is folded into trig_q, so scores come out of the MXU pre-scaled.
        q_rot = (trig_q * jnp.concatenate([q_e + q_o, q_o - q_e], axis=-1)
                 ).astype(jnp.bfloat16)
        k_rot = (trig_k * jnp.concatenate([k_e + k_o, k_o - k_e], axis=-1)
                 ).astype(jnp.bfloat16)

        # Scores: (T, T) = q_rot @ k_rot^T on the MXU (bf16 in, f32 accumulate).
        s = jax.lax.dot_general(
            q_rot, k_rot,
            dimension_numbers=(((1,), (1,)), ((), ())),
            preferred_element_type=jnp.float32)

        # Causal mask + exact softmax in f32 (exact reciprocal for PyTorch parity).
        s = jnp.where(causal, s, -jnp.inf)
        m = jnp.max(s, axis=-1, keepdims=True)
        p = jnp.exp(s - m)
        p = p * pl.reciprocal(jnp.sum(p, axis=-1, keepdims=True), approx=False)

        out = jnp.dot(p.astype(jnp.bfloat16), v.astype(jnp.bfloat16),
                      preferred_element_type=jnp.float32)  # (T, D) f32

        # TODO(synk): attn_dropout (p=0.1) is train-time only; inference forward == identity.
        o_ref[b] = out.astype(o_ref.dtype)


def rotary_trig(T, D):
    """Faithful to RotaryEmbeddings.init_matrix (one angle per position,
    theta_t = 10000**(-2*(t-1)/D), same angle for every dim pair).
    Returned pre-broadcast to (T, D) = [cos | sin] halves; the q-side copy folds the
    1/sqrt(D) attention scale so no (T,T) scaling multiply is needed in-kernel."""
    Dh = D // 2
    pos = jnp.arange(T, dtype=jnp.float32)
    theta = jnp.power(jnp.float32(10000.0), -2.0 * (pos - 1.0) / D)
    ang = pos * theta
    cos = jnp.broadcast_to(jnp.cos(ang)[:, None], (T, Dh))
    sin = jnp.broadcast_to(jnp.sin(ang)[:, None], (T, Dh))
    scale = jnp.float32(1.0 / math.sqrt(D))
    trig_q = jnp.concatenate([cos * scale, sin * scale], axis=1).astype(jnp.float32)
    trig_k = jnp.concatenate([cos, sin], axis=1).astype(jnp.float32)
    return trig_q, trig_k


def prepare_weights(wq, wk, wv):
    """PyTorch nn.Linear weights (out, in) -> fused, column-permuted (D, 3D) bf16.
    Do this once at parameter-load time, not per call."""
    D = wq.shape[0]
    perm = jnp.concatenate([jnp.arange(0, D, 2), jnp.arange(1, D, 2)])
    wq_t = wq.T[:, perm]  # x @ wq_t == (x @ Wq^T) with features reordered [evens | odds]
    wk_t = wk.T[:, perm]
    wv_t = wv.T           # V is never rotated: keep natural feature order
    return jnp.concatenate([wq_t, wk_t, wv_t], axis=1).astype(jnp.bfloat16)


def rotary_attention_head(x, w_fused, trig_q, trig_k, *, block_b=None, out_dtype=None):
    """x: (B, T, D) f32. w_fused: (D, 3D) bf16 from prepare_weights.
    trig_q/trig_k: (T, D) f32 from rotary_trig. Returns (B, T, D) in out_dtype
    (default: x.dtype; pass jnp.bfloat16 to halve writeback traffic if acceptable)."""
    B, T, D = x.shape
    assert D % 2 == 0
    assert w_fused.shape == (D, 3 * D)
    assert trig_q.shape == (T, D) and trig_k.shape == (T, D)
    if out_dtype is None:
        out_dtype = x.dtype

    if block_b is None:
        # Fatten the QKV matmul M-dim (v6e/v7x MXU is 256 rows deep) while keeping at
        # least 2 grid steps so both v7x TensorCores get work; cap to bound VMEM.
        block_b = 1
        for cand in (4, 3, 2):
            if B % cand == 0 and B // cand >= 2:
                block_b = cand
                break
    assert B % block_b == 0, "block_b must divide the batch"
    grid_b = B // block_b

    x_itemsize = jnp.dtype(x.dtype).itemsize
    out_itemsize = jnp.dtype(out_dtype).itemsize

    # VMEM footprint at the chosen block size (weights/trig single-buffered; x/out
    # double-buffered; f32 intermediates). No blanket 32 MiB floor for a small kernel.
    footprint = (
        D * 3 * D * 2                              # fused weights (bf16), single buffer
        + 2 * T * D * 4                            # trig_q + trig_k (f32), single buffer
        + 2 * block_b * T * D * x_itemsize         # x tile, double-buffered
        + 2 * block_b * T * D * out_itemsize       # out tile, double-buffered
        + block_b * T * 3 * D * 4                  # fused Q|K|V f32
        + 6 * T * D * 4                            # rotary temps + bf16 casts (over-est.)
        + 3 * T * T * 4                            # scores / probs f32
    )
    # TODO(synk): at production sizes (D=768, long block_size) add a query-T tiling path
    # gated on pltpu.get_tpu_info() so the footprint stays inside v7x's 64 MiB VMEM.
    vmem_limit = int(min(max(int(footprint * 1.5), 4 * 1024 * 1024), 64 * 1024 * 1024))

    flops = B * (2 * T * D * 3 * D + 4 * T * T * D)
    bytes_accessed = (x.size * x_itemsize + w_fused.size * 2
                      + (trig_q.size + trig_k.size) * 4 + B * T * D * out_itemsize)
    cost = pl.CostEstimate(flops=int(flops), transcendentals=int(B * T * T),
                           bytes_accessed=int(bytes_accessed))

    def call(single_buffer_consts):
        def const_spec(shape):
            # Constant block index -> no need to double-buffer; saves a full weight copy.
            if single_buffer_consts:
                return pl.BlockSpec(shape, lambda b: (0, 0),
                                    pipeline_mode=pl.Buffered(1))
            return pl.BlockSpec(shape, lambda b: (0, 0))

        return pl.pallas_call(
            rotary_attn_kernel,
            out_shape=jax.ShapeDtypeStruct((B, T, D), out_dtype),
            grid_spec=pltpu.PrefetchScalarGridSpec(
                num_scalar_prefetch=0,
                grid=(grid_b,),
                in_specs=[
                    pl.BlockSpec((block_b, T, D), lambda b: (b, 0, 0)),  # streamed x (f32)
                    const_spec((D, 3 * D)),                              # resident Wq|Wk|Wv
                    const_spec((T, D)),                                  # resident [cos*s|sin*s]
                    const_spec((T, D)),                                  # resident [cos|sin]
                ],
                out_specs=pl.BlockSpec((block_b, T, D), lambda b: (b, 0, 0)),
            ),
            compiler_params=pltpu.CompilerParams(
                # TODO(synk): on v7x, pltpu.CORE_PARALLEL / core_map would *guarantee*
                # the batch split across both TensorCores; PARALLEL is kept here for
                # portability with single-core v5e/v6e.
                dimension_semantics=(pltpu.PARALLEL,),
                vmem_limit_bytes=vmem_limit,
            ),
            cost_estimate=cost,
        )(x, w_fused, trig_q, trig_k)

    # TODO(synk): MHA-level fusion (fold all heads into one (D, 3*H*Dh) weight and one
    # pallas_call) amortizes launch/prologue cost far better than per-head micro-opts.
    try:
        return jax.block_until_ready(call(True))
    except Exception:
        # Older jax without BlockSpec(pipeline_mode=...): resident inputs fall back to
        # default double-buffering (costs one extra weight copy of VMEM, same numerics).
        return jax.block_until_ready(call(False))


# ----------------------------- pure-JAX f32 reference -----------------------------

def build_rotary_matrix(T, D):
    """Exact re-implementation of RotaryEmbeddings.init_matrix (including its quirks)."""
    pos = jnp.arange(T, dtype=jnp.float32)
    theta = jnp.power(jnp.float32(10000.0), -2.0 * (pos - 1.0) / D)
    ang = pos * theta
    cos = jnp.broadcast_to(jnp.cos(ang)[:, None], (T, D // 2))
    sin = jnp.broadcast_to(jnp.sin(ang)[:, None], (T, D // 2))
    ev = jnp.arange(0, D, 2)
    od = jnp.arange(1, D, 2)
    m = jnp.zeros((T, D, D), jnp.float32)
    m = m.at[:, ev, ev].set(cos)
    m = m.at[:, od, od].set(sin)
    m = m.at[:, od, ev].set(-sin)
    m = m.at[:, ev, od].set(cos)
    return m


def rotary_attention_reference(x, wq, wk, wv):
    B, T, D = x.shape
    q = jnp.einsum("btd,od->bto", x, wq)
    k = jnp.einsum("btd,od->bto", x, wk)
    v = jnp.einsum("btd,od->bto", x, wv)
    m = build_rotary_matrix(T, D)
    rq = jnp.einsum("tde,bte->btd", m, q)   # matrix @ query.permute(1,2,0), then back
    rk = jnp.einsum("tde,bte->btd", m, k)
    s = jnp.einsum("btd,bsd->bts", rq, rk)
    mask = jnp.tril(jnp.ones((T, T), jnp.float32))
    s = jnp.where(mask == 0, -jnp.inf, s)
    s = s / jnp.sqrt(jnp.float32(D))
    p = jax.nn.softmax(s, axis=-1)
    return jnp.einsum("bts,bsd->btd", p, v)


if __name__ == "__main__":
    # Scaled-down ModelArgs: block_size kept at 128, embeddings_dims 768 -> 256, batch 4
    # (so the default block_b=2 fattens the QKV matmul while leaving 2 grid steps).
    B, T, D = 4, 128, 256
    key = jax.random.PRNGKey(0)
    kx, kq, kk, kv = jax.random.split(key, 4)

    x = jax.random.normal(kx, (B, T, D), dtype=jnp.float32)
    bound = 1.0 / math.sqrt(D)  # nn.Linear default init: U(-1/sqrt(in), 1/sqrt(in))
    wq = jax.random.uniform(kq, (D, D), jnp.float32, -bound, bound)
    wk = jax.random.uniform(kk, (D, D), jnp.float32, -bound, bound)
    wv = jax.random.uniform(kv, (D, D), jnp.float32, -bound, bound)

    w_fused = prepare_weights(wq, wk, wv)   # one-time, outside the hot path
    trig_q, trig_k = rotary_trig(T, D)      # one-time, outside the hot path

    out = rotary_attention_head(x, w_fused, trig_q, trig_k)
    out = jax.block_until_ready(out)

    ref = rotary_attention_reference(x, wq, wk, wv)
    assert out.shape == (B, T, D)
    # bf16 MXU inputs vs f32 PyTorch-style reference -> tolerance loosened accordingly.
    assert jnp.allclose(out, ref, atol=3e-2, rtol=3e-2), (
        f"mismatch: max abs err {jnp.max(jnp.abs(out - ref)):.4e}")

    print("KERNEL_OK")
</pallas_src>

<mosaic_0001>
module attributes {stable_mosaic.version = 11 : i64} {
  func.func @rotary_attn_kernel(%arg0: i32, %arg1: memref<2x128x256xf32, #tpu.memory_space<vmem>>, %arg2: memref<256x768xbf16, #tpu.memory_space<vmem>>, %arg3: memref<128x256xf32, #tpu.memory_space<vmem>>, %arg4: memref<128x256xf32, #tpu.memory_space<vmem>>, %arg5: memref<2x128x256xf32, #tpu.memory_space<vmem>>) attributes {dimension_semantics = [#tpu.dimension_semantics<parallel>], iteration_bounds = array<i64: 2>, scalar_prefetch = 0 : i64, scratch_operands = 0 : i64, tpu.core_type = #tpu.core_type<tc>, window_params = [{transform_indices = @transform_0, window_bounds = array<i64: 2, 128, 256>}, {pipeline_mode = #tpu.pipeline_mode<synchronous>, transform_indices = @transform_1, window_bounds = array<i64: 256, 768>}, {pipeline_mode = #tpu.pipeline_mode<synchronous>, transform_indices = @transform_2, window_bounds = array<i64: 128, 256>}, {pipeline_mode = #tpu.pipeline_mode<synchronous>, transform_indices = @transform_3, window_bounds = array<i64: 128, 256>}, {transform_indices = @transform_4, window_bounds = array<i64: 2, 128, 256>}]} {
    %c0 = arith.constant 0 : index
    %c0_0 = arith.constant 0 : index
    %c0_1 = arith.constant 0 : index
    %0 = vector.load %arg1[%c0, %c0_0, %c0_1] : memref<2x128x256xf32, #tpu.memory_space<vmem>>, vector<2x128x256xf32>
    %1 = arith.truncf %0 : vector<2x128x256xf32> to vector<2x128x256xbf16>
    %2 = vector.shape_cast %1 : vector<2x128x256xbf16> to vector<256x256xbf16>
    %c0_2 = arith.constant 0 : index
    %c0_3 = arith.constant 0 : index
    %3 = vector.load %arg2[%c0_2, %c0_3] : memref<256x768xbf16, #tpu.memory_space<vmem>>, vector<256x768xbf16>
    %cst = arith.constant dense<0.000000e+00> : vector<256x768xf32>
    %4 = tpu.matmul %2, %3, %cst {dimension_numbers = #tpu.dot_dimension_numbers<[1], [0], [0], [1], [0, 0, 1, 1], [], []>} : vector<256x256xbf16>, vector<256x768xbf16>, vector<256x768xf32> -> vector<256x768xf32>
    %c0_4 = arith.constant 0 : index
    %c0_5 = arith.constant 0 : index
    %5 = vector.load %arg3[%c0_4, %c0_5] : memref<128x256xf32, #tpu.memory_space<vmem>>, vector<128x256xf32>
    %c0_6 = arith.constant 0 : index
    %c0_7 = arith.constant 0 : index
    %6 = vector.load %arg4[%c0_6, %c0_7] : memref<128x256xf32, #tpu.memory_space<vmem>>, vector<128x256xf32>
    %7 = tpu.iota {dimensions = array<i32: 0>} : vector<128x128xi32>
    %8 = tpu.iota {dimensions = array<i32: 1>} : vector<128x128xi32>
    %9 = arith.cmpi sle, %8, %7 : vector<128x128xi32>
    %10 = vector.extract_strided_slice %4 {offsets = [0, 0], sizes = [128, 768], strides = [1, 1]} : vector<256x768xf32> to vector<128x768xf32>
    %11 = vector.extract_strided_slice %10 {offsets = [0, 0], sizes = [128, 256], strides = [1, 1]} : vector<128x768xf32> to vector<128x256xf32>
    %12 = vector.extract_strided_slice %10 {offsets = [0, 256], sizes = [128, 256], strides = [1, 1]} : vector<128x768xf32> to vector<128x256xf32>
    %13 = vector.extract_strided_slice %10 {offsets = [0, 512], sizes = [128, 256], strides = [1, 1]} : vector<128x768xf32> to vector<128x256xf32>
    %14 = vector.extract_strided_slice %11 {offsets = [0, 0], sizes = [128, 128], strides = [1, 1]} : vector<128x256xf32> to vector<128x128xf32>
    %15 = vector.extract_strided_slice %11 {offsets = [0, 128], sizes = [128, 128], strides = [1, 1]} : vector<128x256xf32> to vector<128x128xf32>
    %16 = vector.extract_strided_slice %12 {offsets = [0, 0], sizes = [128, 128], strides = [1, 1]} : vector<128x256xf32> to vector<128x128xf32>
    %17 = vector.extract_strided_slice %12 {offsets = [0, 128], sizes = [128, 128], strides = [1, 1]} : vector<128x256xf32> to vector<128x128xf32>
    %18 = arith.addf %14, %15 : vector<128x128xf32>
    %19 = arith.subf %15, %14 : vector<128x128xf32>
    %20 = tpu.concatenate %18, %19 in 1 : vector<128x128xf32>, vector<128x128xf32> -> vector<128x256xf32>
    %21 = arith.mulf %5, %20 : vector<128x256xf32>
    %22 = arith.truncf %21 : vector<128x256xf32> to vector<128x256xbf16>
    %23 = arith.addf %16, %17 : vector<128x128xf32>
    %24 = arith.subf %17, %16 : vector<128x128xf32>
    %25 = tpu.concatenate %23, %24 in 1 : vector<128x128xf32>, vector<128x128xf32> -> vector<128x256xf32>
    %26 = arith.mulf %6, %25 : vector<128x256xf32>
    %27 = arith.truncf %26 : vector<128x256xf32> to vector<128x256xbf16>
    %cst_8 = arith.constant dense<0.000000e+00> : vector<128x128xf32>
    %28 = tpu.matmul %22, %27, %cst_8 {dimension_numbers = #tpu.dot_dimension_numbers<[1], [1], [0], [0], [0, 0, 1, 0], [], []>} : vector<128x256xbf16>, vector<128x256xbf16>, vector<128x128xf32> -> vector<128x128xf32>
    %cst_9 = arith.constant 0xFF800000 : f32
    %29 = vector.broadcast %cst_9 : f32 to vector<128x128xf32>
    %30 = arith.select %9, %28, %29 : vector<128x128xi1>, vector<128x128xf32>
    %cst_10 = arith.constant dense<0xFF800000> : vector<128xf32>
    %31 = vector.multi_reduction <maximumf>, %30, %cst_10 [1] : vector<128x128xf32> to vector<128xf32>
    %32 = vector.shape_cast %31 : vector<128xf32> to vector<128x1xf32>
    %33 = vector.broadcast %32 : vector<128x1xf32> to vector<128x128xf32>
    %34 = arith.subf %30, %33 : vector<128x128xf32>
    %35 = math.exp %34 : vector<128x128xf32>
    %cst_11 = arith.constant dense<0.000000e+00> : vector<128xf32>
    %36 = vector.multi_reduction <add>, %35, %cst_11 [1] : vector<128x128xf32> to vector<128xf32>
    %37 = vector.shape_cast %36 : vector<128xf32> to vector<128x1xf32>
    %38 = tpu.reciprocal %37 : vector<128x1xf32> -> vector<128x1xf32>
    %39 = vector.broadcast %38 : vector<128x1xf32> to vector<128x128xf32>
    %40 = arith.mulf %35, %39 : vector<128x128xf32>
    %41 = arith.truncf %40 : vector<128x128xf32> to vector<128x128xbf16>
    %42 = arith.truncf %13 : vector<128x256xf32> to vector<128x256xbf16>
    %cst_12 = arith.constant dense<0.000000e+00> : vector<128x256xf32>
    %43 = tpu.matmul %41, %42, %cst_12 {dimension_numbers = #tpu.dot_dimension_numbers<[1], [0], [0], [1], [0, 0, 1, 1], [], []>} : vector<128x128xbf16>, vector<128x256xbf16>, vector<128x256xf32> -> vector<128x256xf32>
    %c0_13 = arith.constant 0 : index
    %c0_14 = arith.constant 0 : index
    %c0_15 = arith.constant 0 : index
    %44 = vector.load %arg5[%c0_13, %c0_14, %c0_15] : memref<2x128x256xf32, #tpu.memory_space<vmem>>, vector<1x128x256xf32>
    %45 = vector.shape_cast %44 : vector<1x128x256xf32> to vector<128x256xf32>
    %46 = vector.shape_cast %43 : vector<128x256xf32> to vector<1x128x256xf32>
    tpu.vector_store %arg5[%c0_13, %c0_14, %c0_15], %46 {strides = array<i32>} : memref<2x128x256xf32, #tpu.memory_space<vmem>>, vector<1x128x256xf32>,
    %47 = vector.extract_strided_slice %4 {offsets = [128, 0], sizes = [128, 768], strides = [1, 1]} : vector<256x768xf32> to vector<128x768xf32>
    %48 = vector.extract_strided_slice %47 {offsets = [0, 0], sizes = [128, 256], strides = [1, 1]} : vector<128x768xf32> to vector<128x256xf32>
    %49 = vector.extract_strided_slice %47 {offsets = [0, 256], sizes = [128, 256], strides = [1, 1]} : vector<128x768xf32> to vector<128x256xf32>
    %50 = vector.extract_strided_slice %47 {offsets = [0, 512], sizes = [128, 256], strides = [1, 1]} : vector<128x768xf32> to vector<128x256xf32>
    %51 = vector.extract_strided_slice %48 {offsets = [0, 0], sizes = [128, 128], strides = [1, 1]} : vector<128x256xf32> to vector<128x128xf32>
    %52 = vector.extract_strided_slice %48 {offsets = [0, 128], sizes = [128, 128], strides = [1, 1]} : vector<128x256xf32> to vector<128x128xf32>
    %53 = vector.extract_strided_slice %49 {offsets = [0, 0], sizes = [128, 128], strides = [1, 1]} : vector<128x256xf32> to vector<128x128xf32>
    %54 = vector.extract_strided_slice %49 {offsets = [0, 128], sizes = [128, 128], strides = [1, 1]} : vector<128x256xf32> to vector<128x128xf32>
    %55 = arith.addf %51, %52 : vector<128x128xf32>
    %56 = arith.subf %52, %51 : vector<128x128xf32>
    %57 = tpu.concatenate %55, %56 in 1 : vector<128x128xf32>, vector<128x128xf32> -> vector<128x256xf32>
    %58 = arith.mulf %5, %57 : vector<128x256xf32>
    %59 = arith.truncf %58 : vector<128x256xf32> to vector<128x256xbf16>
    %60 = arith.addf %53, %54 : vector<128x128xf32>
    %61 = arith.subf %54, %53 : vector<128x128xf32>
    %62 = tpu.concatenate %60, %61 in 1 : vector<128x128xf32>, vector<128x128xf32> -> vector<128x256xf32>
    %63 = arith.mulf %6, %62 : vector<128x256xf32>
    %64 = arith.truncf %63 : vector<128x256xf32> to vector<128x256xbf16>
    %cst_16 = arith.constant dense<0.000000e+00> : vector<128x128xf32>
    %65 = tpu.matmul %59, %64, %cst_16 {dimension_numbers = #tpu.dot_dimension_numbers<[1], [1], [0], [0], [0, 0, 1, 0], [], []>} : vector<128x256xbf16>, vector<128x256xbf16>, vector<128x128xf32> -> vector<128x128xf32>
    %cst_17 = arith.constant 0xFF800000 : f32
    %66 = vector.broadcast %cst_17 : f32 to vector<128x128xf32>
    %67 = arith.select %9, %65, %66 : vector<128x128xi1>, vector<128x128xf32>
    %cst_18 = arith.constant dense<0xFF800000> : vector<128xf32>
    %68 = vector.multi_reduction <maximumf>, %67, %cst_18 [1] : vector<128x128xf32> to vector<128xf32>
    %69 = vector.shape_cast %68 : vector<128xf32> to vector<128x1xf32>
    %70 = vector.broadcast %69 : vector<128x1xf32> to vector<128x128xf32>
    %71 = arith.subf %67, %70 : vector<128x128xf32>
    %72 = math.exp %71 : vector<128x128xf32>
    %cst_19 = arith.constant dense<0.000000e+00> : vector<128xf32>
    %73 = vector.multi_reduction <add>, %72, %cst_19 [1] : vector<128x128xf32> to vector<128xf32>
    %74 = vector.shape_cast %73 : vector<128xf32> to vector<128x1xf32>
    %75 = tpu.reciprocal %74 : vector<128x1xf32> -> vector<128x1xf32>
    %76 = vector.broadcast %75 : vector<128x1xf32> to vector<128x128xf32>
    %77 = arith.mulf %72, %76 : vector<128x128xf32>
    %78 = arith.truncf %77 : vector<128x128xf32> to vector<128x128xbf16>
    %79 = arith.truncf %50 : vector<128x256xf32> to vector<128x256xbf16>
    %cst_20 = arith.constant dense<0.000000e+00> : vector<128x256xf32>
    %80 = tpu.matmul %78, %79, %cst_20 {dimension_numbers = #tpu.dot_dimension_numbers<[1], [0], [0], [1], [0, 0, 1, 1], [], []>} : vector<128x128xbf16>, vector<128x256xbf16>, vector<128x256xf32> -> vector<128x256xf32>
    %c1 = arith.constant 1 : index
    %c0_21 = arith.constant 0 : index
    %c0_22 = arith.constant 0 : index
    %81 = vector.load %arg5[%c1, %c0_21, %c0_22] : memref<2x128x256xf32, #tpu.memory_space<vmem>>, vector<1x128x256xf32>
    %82 = vector.shape_cast %81 : vector<1x128x256xf32> to vector<128x256xf32>
    %83 = vector.shape_cast %80 : vector<128x256xf32> to vector<1x128x256xf32>
    tpu.vector_store %arg5[%c1, %c0_21, %c0_22], %83 {strides = array<i32>} : memref<2x128x256xf32, #tpu.memory_space<vmem>>, vector<1x128x256xf32>,
    return
  }
  func.func @transform_0(%arg0: i32) -> (i32, i32, i32) {
    %c0_i32 = arith.constant 0 : i32
    %c0_i32_0 = arith.constant 0 : i32
    %c0_i32_1 = arith.constant 0 : i32
    return %arg0, %c0_i32, %c0_i32_0 : i32, i32, i32
  }
  func.func @transform_1(%arg0: i32) -> (i32, i32) {
    %c0_i32 = arith.constant 0 : i32
    %c0_i32_0 = arith.constant 0 : i32
    %c0_i32_1 = arith.constant 0 : i32
    return %c0_i32, %c0_i32_0 : i32, i32
  }
  func.func @transform_2(%arg0: i32) -> (i32, i32) {
    %c0_i32 = arith.constant 0 : i32
    %c0_i32_0 = arith.constant 0 : i32
    %c0_i32_1 = arith.constant 0 : i32
    return %c0_i32, %c0_i32_0 : i32, i32
  }
  func.func @transform_3(%arg0: i32) -> (i32, i32) {
    %c0_i32 = arith.constant 0 : i32
    %c0_i32_0 = arith.constant 0 : i32
    %c0_i32_1 = arith.constant 0 : i32
    return %c0_i32, %c0_i32_0 : i32, i32
  }
  func.func @transform_4(%arg0: i32) -> (i32, i32, i32) {
    %c0_i32 = arith.constant 0 : i32
    %c0_i32_0 = arith.constant 0 : i32
    %c0_i32_1 = arith.constant 0 : i32
    return %arg0, %c0_i32, %c0_i32_0 : i32, i32, i32
  }
}

module attributes {stable_mosaic.version = 11 : i64} {
  func.func @rotary_attn_kernel(%arg0: i32, %arg1: memref<2x128x256xf32, #tpu.memory_space<vmem>>, %arg2: memref<256x768xbf16, #tpu.memory_space<vmem>>, %arg3: memref<128x256xf32, #tpu.memory_space<vmem>>, %arg4: memref<128x256xf32, #tpu.memory_space<vmem>>, %arg5: memref<2x128x256xf32, #tpu.memory_space<vmem>>) attributes {dimension_semantics = [#tpu.dimension_semantics<parallel>], iteration_bounds = array<i64: 2>, scalar_prefetch = 0 : i64, scratch_operands = 0 : i64, tpu.core_type = #tpu.core_type<tc>, window_params = [{transform_indices = @transform_0, window_bounds = array<i64: 2, 128, 256>}, {pipeline_mode = #tpu.pipeline_mode<synchronous>, transform_indices = @transform_1, window_bounds = array<i64: 256, 768>}, {pipeline_mode = #tpu.pipeline_mode<synchronous>, transform_indices = @transform_2, window_bounds = array<i64: 128, 256>}, {pipeline_mode = #tpu.pipeline_mode<synchronous>, transform_indices = @transform_3, window_bounds = array<i64: 128, 256>}, {transform_indices = @transform_4, window_bounds = array<i64: 2, 128, 256>}]} {
    %c0 = arith.constant 0 : index
    %c0_0 = arith.constant 0 : index
    %c0_1 = arith.constant 0 : index
    %0 = vector.load %arg1[%c0, %c0_0, %c0_1] : memref<2x128x256xf32, #tpu.memory_space<vmem>>, vector<2x128x256xf32>
    %1 = arith.truncf %0 : vector<2x128x256xf32> to vector<2x128x256xbf16>
    %2 = vector.shape_cast %1 : vector<2x128x256xbf16> to vector<256x256xbf16>
    %c0_2 = arith.constant 0 : index
    %c0_3 = arith.constant 0 : index
    %3 = vector.load %arg2[%c0_2, %c0_3] : memref<256x768xbf16, #tpu.memory_space<vmem>>, vector<256x768xbf16>
    %cst = arith.constant dense<0.000000e+00> : vector<256x768xf32>
    %4 = tpu.matmul %2, %3, %cst {dimension_numbers = #tpu.dot_dimension_numbers<[1], [0], [0], [1], [0, 0, 1, 1], [], []>} : vector<256x256xbf16>, vector<256x768xbf16>, vector<256x768xf32> -> vector<256x768xf32>
    %c0_4 = arith.constant 0 : index
    %c0_5 = arith.constant 0 : index
    %5 = vector.load %arg3[%c0_4, %c0_5] : memref<128x256xf32, #tpu.memory_space<vmem>>, vector<128x256xf32>
    %c0_6 = arith.constant 0 : index
    %c0_7 = arith.constant 0 : index
    %6 = vector.load %arg4[%c0_6, %c0_7] : memref<128x256xf32, #tpu.memory_space<vmem>>, vector<128x256xf32>
    %7 = tpu.iota {dimensions = array<i32: 0>} : vector<128x128xi32>
    %8 = tpu.iota {dimensions = array<i32: 1>} : vector<128x128xi32>
    %9 = arith.cmpi sle, %8, %7 : vector<128x128xi32>
    %10 = vector.extract_strided_slice %4 {offsets = [0, 0], sizes = [128, 768], strides = [1, 1]} : vector<256x768xf32> to vector<128x768xf32>
    %11 = vector.extract_strided_slice %10 {offsets = [0, 0], sizes = [128, 256], strides = [1, 1]} : vector<128x768xf32> to vector<128x256xf32>
    %12 = vector.extract_strided_slice %10 {offsets = [0, 256], sizes = [128, 256], strides = [1, 1]} : vector<128x768xf32> to vector<128x256xf32>
    %13 = vector.extract_strided_slice %10 {offsets = [0, 512], sizes = [128, 256], strides = [1, 1]} : vector<128x768xf32> to vector<128x256xf32>
    %14 = vector.extract_strided_slice %11 {offsets = [0, 0], sizes = [128, 128], strides = [1, 1]} : vector<128x256xf32> to vector<128x128xf32>
    %15 = vector.extract_strided_slice %11 {offsets = [0, 128], sizes = [128, 128], strides = [1, 1]} : vector<128x256xf32> to vector<128x128xf32>
    %16 = vector.extract_strided_slice %12 {offsets = [0, 0], sizes = [128, 128], strides = [1, 1]} : vector<128x256xf32> to vector<128x128xf32>
    %17 = vector.extract_strided_slice %12 {offsets = [0, 128], sizes = [128, 128], strides = [1, 1]} : vector<128x256xf32> to vector<128x128xf32>
    %18 = arith.addf %14, %15 : vector<128x128xf32>
    %19 = arith.subf %15, %14 : vector<128x128xf32>
    %20 = tpu.concatenate %18, %19 in 1 : vector<128x128xf32>, vector<128x128xf32> -> vector<128x256xf32>
    %21 = arith.mulf %5, %20 : vector<128x256xf32>
    %22 = arith.truncf %21 : vector<128x256xf32> to vector<128x256xbf16>
    %23 = arith.addf %16, %17 : vector<128x128xf32>
    %24 = arith.subf %17, %16 : vector<128x128xf32>
    %25 = tpu.concatenate %23, %24 in 1 : vector<128x128xf32>, vector<128x128xf32> -> vector<128x256xf32>
    %26 = arith.mulf %6, %25 : vector<128x256xf32>
    %27 = arith.truncf %26 : vector<128x256xf32> to vector<128x256xbf16>
    %cst_8 = arith.constant dense<0.000000e+00> : vector<128x128xf32>
    %28 = tpu.matmul %22, %27, %cst_8 {dimension_numbers = #tpu.dot_dimension_numbers<[1], [1], [0], [0], [0, 0, 1, 0], [], []>} : vector<128x256xbf16>, vector<128x256xbf16>, vector<128x128xf32> -> vector<128x128xf32>
    %cst_9 = arith.constant 0xFF800000 : f32
    %29 = vector.broadcast %cst_9 : f32 to vector<128x128xf32>
    %30 = arith.select %9, %28, %29 : vector<128x128xi1>, vector<128x128xf32>
    %cst_10 = arith.constant dense<0xFF800000> : vector<128xf32>
    %31 = vector.multi_reduction <maximumf>, %30, %cst_10 [1] : vector<128x128xf32> to vector<128xf32>
    %32 = vector.shape_cast %31 : vector<128xf32> to vector<128x1xf32>
    %33 = vector.broadcast %32 : vector<128x1xf32> to vector<128x128xf32>
    %34 = arith.subf %30, %33 : vector<128x128xf32>
    %35 = math.exp %34 : vector<128x128xf32>
    %cst_11 = arith.constant dense<0.000000e+00> : vector<128xf32>
    %36 = vector.multi_reduction <add>, %35, %cst_11 [1] : vector<128x128xf32> to vector<128xf32>
    %37 = vector.shape_cast %36 : vector<128xf32> to vector<128x1xf32>
    %38 = tpu.reciprocal %37 : vector<128x1xf32> -> vector<128x1xf32>
    %39 = vector.broadcast %38 : vector<128x1xf32> to vector<128x128xf32>
    %40 = arith.mulf %35, %39 : vector<128x128xf32>
    %41 = arith.truncf %40 : vector<128x128xf32> to vector<128x128xbf16>
    %42 = arith.truncf %13 : vector<128x256xf32> to vector<128x256xbf16>
    %cst_12 = arith.constant dense<0.000000e+00> : vector<128x256xf32>
    %43 = tpu.matmul %41, %42, %cst_12 {dimension_numbers = #tpu.dot_dimension_numbers<[1], [0], [0], [1], [0, 0, 1, 1], [], []>} : vector<128x128xbf16>, vector<128x256xbf16>, vector<128x256xf32> -> vector<128x256xf32>
    %c0_13 = arith.constant 0 : index
    %c0_14 = arith.constant 0 : index
    %c0_15 = arith.constant 0 : index
    %44 = vector.load %arg5[%c0_13, %c0_14, %c0_15] : memref<2x128x256xf32, #tpu.memory_space<vmem>>, vector<1x128x256xf32>
    %45 = vector.shape_cast %44 : vector<1x128x256xf32> to vector<128x256xf32>
    %46 = vector.shape_cast %43 : vector<128x256xf32> to vector<1x128x256xf32>
    tpu.vector_store %arg5[%c0_13, %c0_14, %c0_15], %46 {strides = array<i32>} : memref<2x128x256xf32, #tpu.memory_space<vmem>>, vector<1x128x256xf32>,
    %47 = vector.extract_strided_slice %4 {offsets = [128, 0], sizes = [128, 768], strides = [1, 1]} : vector<256x768xf32> to vector<128x768xf32>
    %48 = vector.extract_strided_slice %47 {offsets = [0, 0], sizes = [128, 256], strides = [1, 1]} : vector<128x768xf32> to vector<128x256xf32>
    %49 = vector.extract_strided_slice %47 {offsets = [0, 256], sizes = [128, 256], strides = [1, 1]} : vector<128x768xf32> to vector<128x256xf32>
    %50 = vector.extract_strided_slice %47 {offsets = [0, 512], sizes = [128, 256], strides = [1, 1]} : vector<128x768xf32> to vector<128x256xf32>
    %51 = vector.extract_strided_slice %48 {offsets = [0, 0], sizes = [128, 128], strides = [1, 1]} : vector<128x256xf32> to vector<128x128xf32>
    %52 = vector.extract_strided_slice %48 {offsets = [0, 128], sizes = [128, 128], strides = [1, 1]} : vector<128x256xf32> to vector<128x128xf32>
    %53 = vector.extract_strided_slice %49 {offsets = [0, 0], sizes = [128, 128], strides = [1, 1]} : vector<128x256xf32> to vector<128x128xf32>
    %54 = vector.extract_strided_slice %49 {offsets = [0, 128], sizes = [128, 128], strides = [1, 1]} : vector<128x256xf32> to vector<128x128xf32>
    %55 = arith.addf %51, %52 : vector<128x128xf32>
    %56 = arith.subf %52, %51 : vector<128x128xf32>
    %57 = tpu.concatenate %55, %56 in 1 : vector<128x128xf32>, vector<128x128xf32> -> vector<128x256xf32>
    %58 = arith.mulf %5, %57 : vector<128x256xf32>
    %59 = arith.truncf %58 : vector<128x256xf32> to vector<128x256xbf16>
    %60 = arith.addf %53, %54 : vector<128x128xf32>
    %61 = arith.subf %54, %53 : vector<128x128xf32>
    %62 = tpu.concatenate %60, %61 in 1 : vector<128x128xf32>, vector<128x128xf32> -> vector<128x256xf32>
    %63 = arith.mulf %6, %62 : vector<128x256xf32>
    %64 = arith.truncf %63 : vector<128x256xf32> to vector<128x256xbf16>
    %cst_16 = arith.constant dense<0.000000e+00> : vector<128x128xf32>
    %65 = tpu.matmul %59, %64, %cst_16 {dimension_numbers = #tpu.dot_dimension_numbers<[1], [1], [0], [0], [0, 0, 1, 0], [], []>} : vector<128x256xbf16>, vector<128x256xbf16>, vector<128x128xf32> -> vector<128x128xf32>
    %cst_17 = arith.constant 0xFF800000 : f32
    %66 = vector.broadcast %cst_17 : f32 to vector<128x128xf32>
    %67 = arith.select %9, %65, %66 : vector<128x128xi1>, vector<128x128xf32>
    %cst_18 = arith.constant dense<0xFF800000> : vector<128xf32>
    %68 = vector.multi_reduction <maximumf>, %67, %cst_18 [1] : vector<128x128xf32> to vector<128xf32>
    %69 = vector.shape_cast %68 : vector<128xf32> to vector<128x1xf32>
    %70 = vector.broadcast %69 : vector<128x1xf32> to vector<128x128xf32>
    %71 = arith.subf %67, %70 : vector<128x128xf32>
    %72 = math.exp %71 : vector<128x128xf32>
    %cst_19 = arith.constant dense<0.000000e+00> : vector<128xf32>
    %73 = vector.multi_reduction <add>, %72, %cst_19 [1] : vector<128x128xf32> to vector<128xf32>
    %74 = vector.shape_cast %73 : vector<128xf32> to vector<128x1xf32>
    %75 = tpu.reciprocal %74 : vector<128x1xf32> -> vector<128x1xf32>
    %76 = vector.broadcast %75 : vector<128x1xf32> to vector<128x128xf32>
    %77 = arith.mulf %72, %76 : vector<128x128xf32>
    %78 = arith.truncf %77 : vector<128x128xf32> to vector<128x128xbf16>
    %79 = arith.truncf %50 : vector<128x256xf32> to vector<128x256xbf16>
    %cst_20 = arith.constant dense<0.000000e+00> : vector<128x256xf32>
    %80 = tpu.matmul %78, %79, %cst_20 {dimension_numbers = #tpu.dot_dimension_numbers<[1], [0], [0], [1], [0, 0, 1, 1], [], []>} : vector<128x128xbf16>, vector<128x256xbf16>, vector<128x256xf32> -> vector<128x256xf32>
    %c1 = arith.constant 1 : index
    %c0_21 = arith.constant 0 : index
    %c0_22 = arith.constant 0 : index
    %81 = vector.load %arg5[%c1, %c0_21, %c0_22] : memref<2x128x256xf32, #tpu.memory_space<vmem>>, vector<1x128x256xf32>
    %82 = vector.shape_cast %81 : vector<1x128x256xf32> to vector<128x256xf32>
    %83 = vector.shape_cast %80 : vector<128x256xf32> to vector<1x128x256xf32>
    tpu.vector_store %arg5[%c1, %c0_21, %c0_22], %83 {strides = array<i32>} : memref<2x128x256xf32, #tpu.memory_space<vmem>>, vector<1x128x256xf32>,
    return
  }
  func.func @transform_0(%arg0: i32) -> (i32, i32, i32) {
    %c0_i32 = arith.constant 0 : i32
    %c0_i32_0 = arith.constant 0 : i32
    %c0_i32_1 = arith.constant 0 : i32
    return %arg0, %c0_i32, %c0_i32_0 : i32, i32, i32
  }
  func.func @transform_1(%arg0: i32) -> (i32, i32) {
    %c0_i32 = arith.constant 0 : i32
    %c0_i32_0 = arith.constant 0 : i32
    %c0_i32_1 = arith.constant 0 : i32
    return %c0_i32, %c0_i32_0 : i32, i32
  }
  func.func @transform_2(%arg0: i32) -> (i32, i32) {
    %c0_i32 = arith.constant 0 : i32
    %c0_i32_0 = arith.constant 0 : i32
    %c0_i32_1 = arith.constant 0 : i32
    return %c0_i32, %c0_i32_0 : i32, i32
  }
  func.func @transform_3(%arg0: i32) -> (i32, i32) {
    %c0_i32 = arith.constant 0 : i32
    %c0_i32_0 = arith.constant 0 : i32
    %c0_i32_1 = arith.constant 0 : i32
    return %c0_i32, %c0_i32_0 : i32, i32
  }
  func.func @transform_4(%arg0: i32) -> (i32, i32, i32) {
    %c0_i32 = arith.constant 0 : i32
    %c0_i32_0 = arith.constant 0 : i32
    %c0_i32_1 = arith.constant 0 : i32
    return %arg0, %c0_i32, %c0_i32_0 : i32, i32, i32
  }
}

</mosaic_0001>

<bundles_post_ra>
// kernel: tpu_custom_call.1
= control target key start
LH: loop header
LB: loop body
LE: loop exit
PB: predicated region body
PF: predicated region fallthrough
CT: control target
= control target key end

     0   :  { %9 = vsyncpa [#allocation3], 0  ;;  %s5534_s0 = inlined_call_operand.hbm [shape: f32[4,128,256], index: 0, kind: input, shape index: {}]   ;;  %s5535_s1 = inlined_call_operand.hbm [shape: bf16[256,768], index: 1, kind: input, shape index: {}]   ;;  %s5536_s2 = inlined_call_operand.hbm [shape: f32[128,256], index: 2, kind: input, shape index: {}]   ;;  %s5537_s3 = inlined_call_operand.hbm [shape: f32[128,256], index: 3, kind: input, shape index: {}]   ;;  %s5538_s4 = inlined_call_operand.hbm [shape: f32[4,128,256], index: 4, kind: output, shape index: {}]  }
   0x1   :  { %11 = vsyncpa [#allocation3 + $0x1], 0 }
   0x2   :  { %12 = vsyncpa [#allocation6], 0 }
   0x3   :  { %13 = vsyncpa [#allocation9], 0 }
   0x4   :  { %14 = vsyncpa [#allocation4], 0 }
   0x5   :  { %16 = vsyncpa [#allocation4 + $0x1], 0  ;;  %s3631_s15 = smov 0   ;;  %s3633_s16 = smov 0  }
   0x6   :  { %s3635_s17 = smov 0   ;;  %s3637_s18 = smov 0  }
   0x7 LB: > { %s3652_s19 = sadd.s32 4294967295, %s3592_s18   ;;  %s2904_s20 = sadd.s32 4294967294, %s3592_s18   ;;  %s3592_s18 = sphi %s3637_s18, %s5898_s18   ;;  %s3588_s17 = sphi %s3635_s17, %s5897_s17   ;;  %s3584_s16 = sphi %s3633_s16, %s5896_s16   ;;  %s3580_s15 = sphi %s3631_s15, %s5895_s15  }
   0x8   : > { %p42_p0 = scmp.ne.s32.totalorder %s3584_s16, %s3580_s15  ;;  %p5539_p1 = scmp.eq.s32.totalorder %s3652_s19, 0 }
   0x9   : > { %p135_p3 = scmp.eq.s32.totalorder %s2904_s20, 1  ;;  %p2905_p5 = scmp.ge.s32.totalorder %s3592_s18, 1 }
   0xa   : > { %p3661_p4 = por %p5539_p1, %p42_p0  ;;  %p142_p7 = scmp.lt.s32.totalorder %s3592_s18, 3 }
   0xb   : > { %p3666_p6 = por %p135_p3, %p42_p0  ;;  %s3594_s24 = smov [#allocation5]  }
   0xc   : > { %s5635_s21 = scalar_select %p3661_p4, 1, 0 }
   0xd   : > { %s5636_s22 = scalar_select %p3666_p6, 1, 0 }
   0xe   : > { %p3671_p8 = pnand %p2905_p5, %p142_p7  ;;  %s154_s25 = sshll.u32 %s3594_s24, 4  ;;  %s155_s25 = int_to_ptr.vmem [resolvable:$true] %s154_s25 }
   0xf   : > { %s3595_s27 = smov [#allocation7]   ;;  %s3425_s29 = scalar_lea.vmem %s155_s25, 12288 }
  0x10   : > { %s5637_s23 = scalar_select %p3671_p8, 1, 0 }
  0x11   : > { %p3074_p9 = pneg %p3671_p8  ;;  %s167_s28 = sshll.u32 %s3595_s27, 4  ;;  %s168_s28 = int_to_ptr.vmem [resolvable:$true] %s167_s28 }
  0x12   : > { %p3426_p13 = scmp.ne.s32.totalorder %s155_s25, %s3425_s29  ;;  %p3433_p5 = scmp.lt.s32.totalorder %s155_s25, %s155_s25 }
  0x13   : > { %p3680_p11 = pnand %p3074_p9, %p5539_p1  ;;  %p3434_p7 = scmp.lt.s32.totalorder %s3425_s29, %s3425_s29 }
  0x15   : > { %p3416_p12 = pneg %p3680_p11  ;;  %p3435_p10 = por %p3434_p7, %p3433_p5 }
  0x17   : > { %p3428_p0 = pnand %p3426_p13, %p3416_p12 }
  0x19   : > { %p3429_p3 = pneg %p3428_p0 }
  0x1b   : > { %p3436_p9 = pnand %p3435_p10, %p3429_p3 }
  0x1d   : > { %3439 = shalt.err (!%p3436_p9)
}
  0x1e   : > { %s3596_s30 = smov 384   ;;  %s3597_s5 = smov 24  }
  0x1f   : > { %3077 = dma.hbm_to_vmem [thread:$0]  (!%p3680_p11), %s5535_s1, 12288, %s155_s25, [#allocation6], %s3596_s30, %s3596_s30, %s3597_s5  }
  0x20   : > { %s3451_s8 = scalar_lea.vmem %s168_s28, 4096  ;;  %p3459_p2 = scmp.lt.s32.totalorder %s168_s28, %s168_s28 }
  0x21   : > { %p3452_p1 = scmp.ne.s32.totalorder %s168_s28, %s3451_s8  ;;  %p3460_p6 = scmp.lt.s32.totalorder %s3451_s8, %s3451_s8 }
  0x23   : > { %p3454_p13 = pnand %p3452_p1, %p3416_p12  ;;  %p3461_p5 = por %p3460_p6, %p3459_p2 }
  0x25   : > { %p3455_p0 = pneg %p3454_p13 }
  0x27   : > { %p3462_p10 = pnand %p3461_p5, %p3455_p0 }
  0x29   : > { %3465 = shalt.err (!%p3462_p10)
}
  0x2a   : > { %s3598_s9 = smov 256   ;;  %s3599_s10 = smov 16  }
  0x2b   : > { %3080 = dma.hbm_to_vmem [thread:$0]  (!%p3680_p11), %s5536_s2, 4096, %s168_s28, [#allocation6], %s3598_s9, %s3598_s9, %s3599_s10  }
  0x2c   : > { %s3600_s13 = smov [#allocation8]   ;;  %s3706_s20 = sadd.s32 1, %s3592_s18  }
  0x2d   : > { %s180_s14 = sshll.u32 %s3600_s13, 4  ;;  %s181_s14 = int_to_ptr.vmem [resolvable:$true] %s180_s14 }
  0x2e   : > { %s3477_s24 = scalar_lea.vmem %s181_s14, 4096  ;;  %p3485_p3 = scmp.lt.s32.totalorder %s181_s14, %s181_s14 }
  0x2f   : > { %p3478_p1 = scmp.ne.s32.totalorder %s181_s14, %s3477_s24  ;;  %p3486_p7 = scmp.lt.s32.totalorder %s3477_s24, %s3477_s24 }
  0x31   : > { %p3480_p2 = pnand %p3478_p1, %p3416_p12  ;;  %p3487_p9 = por %p3486_p7, %p3485_p3 }
  0x33   : > { %p3481_p6 = pneg %p3480_p2 }
  0x35   : > { %p3488_p13 = pnand %p3487_p9, %p3481_p6 }
  0x37   : > { %3491 = shalt.err (!%p3488_p13)
}
  0x38   : > { %3083 = dma.hbm_to_vmem [thread:$0]  (!%p3680_p11), %s5537_s3, 4096, %s181_s14, [#allocation9], %s3598_s9, %s3598_s9, %s3599_s10  }
  0x39   : > { %s26_s28 = ssub.s32 %s3592_s18, %s3706_s20  ;;  %s29_s26 = sadd.s32 1, %s3588_s17 }
  0x3a   : > { %p27_p12 = scmp.eq.s32.totalorder %s26_s28, 0  ;;  %p36_p0 = scmp.ne.s32.totalorder %s3588_s17, %s3584_s16 }
  0x3b   : > { %p37_p5 = scmp.eq.s32.totalorder %s3592_s18, 0  ;;  %p3095_p10 = scmp.lt.s32.totalorder %s3592_s18, 2 }
  0x3c   : > { %s3727_s29 = scalar_select %p27_p12, %s3588_s17, %s29_s26  }
  0x3d   : > { %p38_p1 = por %p37_p5, %p36_p0  ;;  %p5639_p2 = scmp.eq.s32.totalorder %s3652_s19, 1 }
  0x3e   : > { %s194_s5 = sand.u32 1, %s3588_s17   ;;  %s3055_s6 = sshll.u32 %s3592_s18, 13 }
  0x3f   : > { %p3731_p6 = por %p5639_p2, %p36_p0  ;;  %s2910_s7 = sshll.u32 %s194_s5, 9 }
  0x40   : > { %s3740_s12 = scalar_lea.hbm %s5534_s0, %s3055_s6  ;;  %s198_s13 = scalar_lea.vmem [#allocation2], %s2910_s7 }
  0x41   : > { %s5640_s30 = scalar_select %p3731_p6, 1, 0 }
  0x42   : > { %s206_s14 = sshll.u32 %s198_s13, 4  ;;  %p3742_p11 = pnand %p3095_p10, %p38_p1  ;;  %s3746_s14 = int_to_ptr.vmem [resolvable:$true] %s206_s14 }
  0x43   : > { %s3748_s25 = scalar_lea.sflag [#allocation3], %s194_s5  ;;  %s3492_s27 = scalar_lea.hbm %s3740_s12, 8192 }
  0x44   : > { %p3493_p3 = scmp.ne.s32.totalorder %s3740_s12, %s3492_s27  ;;  %p3494_p7 = pneg %p3742_p11 }
  0x45   : > { %s3497_s6 = scalar_lea.hbm %s5534_s0, 16384  ;;  %p3498_p12 = scmp.lt.s32.totalorder %s3740_s12, %s5534_s0 }
  0x46   : > { %p3495_p9 = pnand %p3494_p7, %p3493_p3  ;;  %p3499_p0 = scmp.lt.s32.totalorder %s3497_s6, %s3492_s27 }
  0x48   : > { %p3496_p13 = pneg %p3495_p9  ;;  %p3500_p5 = por %p3499_p0, %p3498_p12 }
  0x4a   : > { %p3501_p10 = pnand %p3500_p5, %p3496_p13 }
  0x4c   : > { %3504 = shalt.err (!%p3501_p10)
}
  0x4d   : > { %s3505_s5 = scalar_lea.vmem %s3746_s14, 8192  ;;  %s3601_s11 = smov [#allocation2]  }
  0x4e   : > { %p3506_p1 = scmp.ne.s32.totalorder %s3746_s14, %s3505_s5  ;;  %s3510_s13 = sshll.u32 %s3601_s11, 4  ;;  %s3511_s13 = int_to_ptr.vmem [resolvable:$false] %s3510_s13 }
  0x4f   : > { %s3512_s28 = scalar_lea.vmem %s3511_s13, 16384  ;;  %p3513_p9 = scmp.lt.s32.totalorder %s3746_s14, %s3511_s13 }
  0x50   : > { %p3508_p2 = pnand %p3506_p1, %p3494_p7  ;;  %p3514_p6 = scmp.lt.s32.totalorder %s3512_s28, %s3505_s5 }
  0x52   : > { %p3509_p3 = pneg %p3508_p2  ;;  %p3515_p4 = por %p3514_p6, %p3513_p9 }
  0x54   : > { %p3516_p8 = pnand %p3515_p4, %p3509_p3 }
  0x56   : > { %3519 = shalt.err (!%p3516_p8)
}
  0x57   : > { %3087 = dma.hbm_to_vmem [thread:$0]  (!%p3742_p11), %s3740_s12, 8192, %s3746_s14, %s3748_s25, %s3598_s9, %s3598_s9, %s3599_s10  }
  0x58   : > { %p5642_p7 = scmp.ne.s32.totalorder %s5637_s23, 0 }
  0x5a   : > { %218 = sbr.rel (%p5642_p7) target bundleno = 1411 (0x583), region = 36 }
  0x5f   : > { %s3775_s27 = sand.u32 1, %s3584_s16   ;;  %p5643_p4 = scmp.ne.s32.totalorder %s5635_s21, 0 }
  0x60   : > { %s2915_s26 = sshll.u32 %s3775_s27, 9  ;;  %s221_s6 = scalar_lea.sflag [#allocation3], %s3775_s27 }
  0x61   : > { %s3781_s24 = scalar_lea.vmem [#allocation2], %s2915_s26 }
  0x62   : > { %3563 = dma.done.wait (%p5643_p4), %s221_s6, 8192  }
  0x63   : > { %3565 = vsyncadd (%p5643_p4), %s221_s6, 4294959104  ;;  %p5644_p8 = scmp.eq.s32.totalorder %s3652_s19, 0 }
  0x65   : > { %3567 = dma.done.wait (%p5644_p8), [#allocation6], 16384   ;;  %p5645_p6 = pmov %p5644_p8 }
  0x67   : > { %3569 = vsyncadd (%p5645_p6), [#allocation6], 4294950912  ;;  %p5646_p11 = pmov %p5645_p6 }
  0x68   : > { %p5647_p13 = pmov %p5645_p6 }
  0x69   : > { %3571 = dma.done.wait (%p5646_p11), [#allocation9], 4096  }
  0x6a   : > { %3573 = vsyncadd (%p5647_p13), [#allocation9], 4294963200  ;;  %v3142_v0 = vld [vmem:[#allocation5 + $0x15c] ss:$24 sps:$4 sm:$0xff]   ;;  %v3144_v1 = vld [vmem:[#allocation5 + $0x158] ss:$24 sps:$4 sm:$0xff]  }
  0x6b   : > { %1129 = vmatprep.subr.bf16.mxu1 %v3142_v0  ;;  %v3145_v2 = vld [vmem:[#allocation5 + $0x12c] ss:$24 sps:$4 sm:$0xff]   ;;  %v3147_v3 = vld [vmem:[#allocation5 + $0x128] ss:$24 sps:$4 sm:$0xff]   ;;  %v3148_v4 = vld [vmem:[#allocation5 + $0xfc] ss:$24 sps:$4 sm:$0xff]  }
  0x6c   : > { %1130 = vmatpush1.bf16.msra.mxu1 %v3144_v1  ;;  %v3150_v5 = vld [vmem:[#allocation5 + $0xf8] ss:$24 sps:$4 sm:$0xff]   ;;  %v3151_v6 = vld [vmem:[#allocation5 + $0xcc] ss:$24 sps:$4 sm:$0xff]   ;;  %v3153_v7 = vld [vmem:[#allocation5 + $0xc8] ss:$24 sps:$4 sm:$0xff]  }
  0x6d   : > { %1131 = vmatprep.subr.bf16.mxu1 %v3145_v2  ;;  %v3154_v8 = vld [vmem:[#allocation5 + $0x9c] ss:$24 sps:$4 sm:$0xff]   ;;  %v3156_v9 = vld [vmem:[#allocation5 + $0x98] ss:$24 sps:$4 sm:$0xff]   ;;  %v3157_v10 = vld [vmem:[#allocation5 + $0x6c] ss:$24 sps:$4 sm:$0xff]  }
  0x6e   : > { %v3159_v11 = vld [vmem:[#allocation5 + $0x68] ss:$24 sps:$4 sm:$0xff]   ;;  %v3160_v12 = vld [vmem:[#allocation5 + $0x3c] ss:$24 sps:$4 sm:$0xff]   ;;  %v3162_v16 = vld [vmem:[#allocation5 + $0x38] ss:$24 sps:$4 sm:$0xff]  }
  0x6f   : > { %v265_v13 = vld [vmem:[%s3781_s24 + $0x8] sm:$0xff]  ;;  %v267_v14 = vld [vmem:[%s3781_s24 + $0x18] sm:$0xff]  ;;  %v264_v50 = vld [vmem:[%s3781_s24] sm:$0xff]  ;;  %s5418_s21 = scalar_lea.vmem [#allocation10], %s2915_s26  ;;  %s3057_s23 = sshll.u32 %s3652_s19, 13 }
  0x70   : > { %1132 = vmatpush1.bf16.msra.mxu1 %v3147_v3  ;;  %v3797_v15 = vpack.c.bf16 %v267_v14, %v265_v13  ;;  %v3163_v17 = vld [vmem:[#allocation5 + $0xc] ss:$24 sps:$4 sm:$0xff]   ;;  %v3165_v18 = vld [vmem:[#allocation5 + $0x8] ss:$24 sps:$4 sm:$0xff]   ;;  %v3166_v19 = vld [vmem:[#allocation5 + $0x2dc] ss:$24 sps:$4 sm:$0xff]   ;;  %s5487_s14 = scalar_lea.hbm %s5538_s4, %s3057_s23 }
  0x71   : > { %1133 = vmatprep.subr.bf16.mxu1 %v3148_v4  ;;  %v3168_v20 = vld [vmem:[#allocation5 + $0x2d8] ss:$24 sps:$4 sm:$0xff]   ;;  %v3190_v21 = vld [vmem:[#allocation5 + $0x154] ss:$24 sps:$4 sm:$0xff]   ;;  %v3193_v24 = vld [vmem:[#allocation5 + $0x124] ss:$24 sps:$4 sm:$0xff]  }
  0x72   : > { %1161 = vmatprep.mubr.bf16.mxu1 %v3797_v15  ;;  %968 = vmatprep.mubr.bf16.mxu0 %v3797_v15  ;;  %v3169_v22 = vld [vmem:[#allocation5 + $0x2ac] ss:$24 sps:$4 sm:$0xff]   ;;  %v3192_v23 = vld [vmem:[#allocation5 + $0x150] ss:$24 sps:$4 sm:$0xff]   ;;  %v3195_v25 = vld [vmem:[#allocation5 + $0x120] ss:$24 sps:$4 sm:$0xff]  }
  0x73   : > { %936 = vmatprep.subr.bf16.mxu0 %v3190_v21  ;;  %v3171_v26 = vld [vmem:[#allocation5 + $0x2a8] ss:$24 sps:$4 sm:$0xff]   ;;  %v3196_v27 = vld [vmem:[#allocation5 + $0xf4] ss:$24 sps:$4 sm:$0xff]   ;;  %v3174_v30 = vld [vmem:[#allocation5 + $0x278] ss:$24 sps:$4 sm:$0xff]  }
  0x74   : > { %1134 = vmatpush1.bf16.msra.mxu1 %v3150_v5  ;;  %937 = vmatpush1.bf16.msra.mxu0 %v3192_v23  ;;  %v3172_v28 = vld [vmem:[#allocation5 + $0x27c] ss:$24 sps:$4 sm:$0xff]   ;;  %v3198_v29 = vld [vmem:[#allocation5 + $0xf0] ss:$24 sps:$4 sm:$0xff]   ;;  %v3175_v32 = vld [vmem:[#allocation5 + $0x24c] ss:$24 sps:$4 sm:$0xff]  }
  0x75   : > { %1135 = vmatprep.subr.bf16.mxu1 %v3151_v6  ;;  %938 = vmatprep.subr.bf16.mxu0 %v3193_v24  ;;  %v3199_v31 = vld [vmem:[#allocation5 + $0xc4] ss:$24 sps:$4 sm:$0xff]   ;;  %v3201_v33 = vld [vmem:[#allocation5 + $0xc0] ss:$24 sps:$4 sm:$0xff]   ;;  %v3202_v35 = vld [vmem:[#allocation5 + $0x94] ss:$24 sps:$4 sm:$0xff]  }
  0x76   : > { %v3177_v34 = vld [vmem:[#allocation5 + $0x248] ss:$24 sps:$4 sm:$0xff]   ;;  %v3178_v36 = vld [vmem:[#allocation5 + $0x21c] ss:$24 sps:$4 sm:$0xff]   ;;  %v3180_v38 = vld [vmem:[#allocation5 + $0x218] ss:$24 sps:$4 sm:$0xff]  }
  0x77   : > { %v3204_v37 = vld [vmem:[#allocation5 + $0x90] ss:$24 sps:$4 sm:$0xff]   ;;  %v3205_v39 = vld [vmem:[#allocation5 + $0x64] ss:$24 sps:$4 sm:$0xff]   ;;  %v3207_v41 = vld [vmem:[#allocation5 + $0x60] ss:$24 sps:$4 sm:$0xff]  }
  0x78   : > { %1136 = vmatpush1.bf16.msra.mxu1 %v3153_v7  ;;  %939 = vmatpush1.bf16.msra.mxu0 %v3195_v25  ;;  %v3181_v40 = vld [vmem:[#allocation5 + $0x1ec] ss:$24 sps:$4 sm:$0xff]   ;;  %v3183_v42 = vld [vmem:[#allocation5 + $0x1e8] ss:$24 sps:$4 sm:$0xff]   ;;  %v3184_v44 = vld [vmem:[#allocation5 + $0x1bc] ss:$24 sps:$4 sm:$0xff]  }
  0x79   : > { %1137 = vmatprep.subr.bf16.mxu1 %v3154_v8  ;;  %940 = vmatprep.subr.bf16.mxu0 %v3196_v27  ;;  %v3208_v43 = vld [vmem:[#allocation5 + $0x34] ss:$24 sps:$4 sm:$0xff]   ;;  %v3210_v45 = vld [vmem:[#allocation5 + $0x30] ss:$24 sps:$4 sm:$0xff]   ;;  %v3211_v47 = vld [vmem:[#allocation5 + $0x4] ss:$24 sps:$4 sm:$0xff]  }
  0x7a   : > { %v3186_v46 = vld [vmem:[#allocation5 + $0x1b8] ss:$24 sps:$4 sm:$0xff]   ;;  %v3187_v48 = vld [vmem:[#allocation5 + $0x18c] ss:$24 sps:$4 sm:$0xff]   ;;  %v3189_v49 = vld [vmem:[#allocation5 + $0x188] ss:$24 sps:$4 sm:$0xff]  }
  0x7b   : > { %v3213_v51 = vld [vmem:[#allocation5] ss:$24 sps:$4 sm:$0xff]   ;;  %v266_v52 = vld [vmem:[%s3781_s24 + $0x10] sm:$0xff]  ;;  %v269_v54 = vld [vmem:[%s3781_s24 + $0x28] sm:$0xff]  ;;  %s2802_s9 = sshll.u32 %s5418_s21, 4  ;;  %s2788_s25 = scalar_lea.sflag [#allocation4], %s3775_s27  ;;  %s5489_s9 = int_to_ptr.vmem [resolvable:$true] %s2802_s9 }
  0x7c   : > { %1138 = vmatpush1.bf16.msra.mxu1 %v3156_v9  ;;  %941 = vmatpush1.bf16.msra.mxu0 %v3198_v29  ;;  %v3214_v53 = vld [vmem:[#allocation5 + $0x2d4] ss:$24 sps:$4 sm:$0xff]   ;;  %v271_v55 = vld [vmem:[%s3781_s24 + $0x38] sm:$0xff]  ;;  %v3805_v56 = vpack.c.bf16 %v266_v52, %v264_v50  ;;  %v3216_v57 = vld [vmem:[#allocation5 + $0x2d0] ss:$24 sps:$4 sm:$0xff]   ;;  %s3520_s7 = scalar_lea.vmem %s5489_s9, 8192 }
  0x7d   : > { %1139 = vmatprep.subr.bf16.mxu1 %v3157_v10  ;;  %942 = vmatprep.subr.bf16.mxu0 %v3199_v31  ;;  %v3807_v58 = vpack.c.bf16 %v271_v55, %v269_v54  ;;  %v3217_v59 = vld [vmem:[#allocation5 + $0x2a4] ss:$24 sps:$4 sm:$0xff]   ;;  %v3219_v60 = vld [vmem:[#allocation5 + $0x2a0] ss:$24 sps:$4 sm:$0xff]   ;;  %v270_v62 = vld [vmem:[%s3781_s24 + $0x30] sm:$0xff]  ;;  %p3521_p12 = scmp.ne.s32.totalorder %s5489_s9, %s3520_s7  ;;  %p5892_p0 = scmp.ne.s32.totalorder %s5640_s30, 0 }
  0x7e   : > { %v268_v61 = vld [vmem:[%s3781_s24 + $0x20] sm:$0xff]  ;;  %v3220_v63 = vld [vmem:[#allocation5 + $0x274] ss:$24 sps:$4 sm:$0xff]   ;;  %v275_v1 = vld [vmem:[%s3781_s24 + $0x58] sm:$0xff]  ;;  %s3603_s19 = smov [#allocation10]  }
  0x7f   : > { %v273_v0 = vld [vmem:[%s3781_s24 + $0x48] sm:$0xff]  ;;  %v3223_v3 = vld [vmem:[#allocation5 + $0x244] ss:$24 sps:$4 sm:$0xff]   ;;  %v3815_v4 = vpack.c.bf16 %v270_v62, %v268_v61  ;;  %v3225_v6 = vld [vmem:[#allocation5 + $0x240] ss:$24 sps:$4 sm:$0xff]   ;;  %p3522_p5 = pnand %p3521_p12, %p5892_p0  ;;  %s3524_s8 = sshll.u32 %s3603_s19, 4  ;;  %s3525_s8 = int_to_ptr.vmem [resolvable:$false] %s3524_s8 }
  0x80   : > { %1140 = vmatpush1.bf16.msra.mxu1 %v3159_v11  ;;  %943 = vmatpush1.bf16.msra.mxu0 %v3201_v33  ;;  %v3222_v2 = vld [vmem:[#allocation5 + $0x270] ss:$24 sps:$4 sm:$0xff]   ;;  %v3817_v5 = vpack.c.bf16 %v275_v1, %v273_v0  ;;  %v272_v7 = vld [vmem:[%s3781_s24 + $0x40] sm:$0xff]  ;;  %v3226_v9 = vld [vmem:[#allocation5 + $0x214] ss:$24 sps:$4 sm:$0xff]   ;;  %s3526_s5 = scalar_lea.vmem %s3525_s8, 16384  ;;  %p3527_p1 = scmp.lt.s32.totalorder %s5489_s9, %s3525_s8 }
  0x81   : > { %1141 = vmatprep.subr.bf16.mxu1 %v3160_v12  ;;  %944 = vmatprep.subr.bf16.mxu0 %v3202_v35  ;;  %v274_v8 = vld [vmem:[%s3781_s24 + $0x50] sm:$0xff]  ;;  %v277_v10 = vld [vmem:[%s3781_s24 + $0x68] sm:$0xff]  ;;  %v279_v11 = vld [vmem:[%s3781_s24 + $0x78] sm:$0xff]  ;;  %p3523_p10 = pneg %p3522_p5  ;;  %p3528_p2 = scmp.lt.s32.totalorder %s3526_s5, %s3520_s7 }
  0x82   : > { %v3825_v12 = vpack.c.bf16 %v274_v8, %v272_v7  ;;  %v3228_v13 = vld [vmem:[#allocation5 + $0x210] ss:$24 sps:$4 sm:$0xff]   ;;  %v3827_v14 = vpack.c.bf16 %v279_v11, %v277_v10  ;;  %v3237_v27 = vld [vmem:[#allocation5 + $0x180] ss:$24 sps:$4 sm:$0xff]   ;;  %v3246_v55 = vld [vmem:[#allocation5 + $0x104] ss:$24 sps:$4 sm:$0xff]  }
  0x83   : > { %v281_v21 = vld [vmem:[%s3781_s24 + $0x88] sm:$0xff]  ;;  %v282_v29 = vld [vmem:[%s3781_s24 + $0x90] sm:$0xff]  ;;  %v287_v31 = vld [vmem:[%s3781_s24 + $0xb8] sm:$0xff]  ;;  %p3529_p3 = por %p3528_p2, %p3527_p1 }
  0x84   : > { %1142 = vmatpush1.bf16.msra.mxu1 %v3162_v16  ;;  %945 = vmatpush1.bf16.msra.mxu0 %v3204_v37  ;;  %v3229_v16 = vld [vmem:[#allocation5 + $0x1e4] ss:$24 sps:$4 sm:$0xff]   ;;  %v3234_v24 = vld [vmem:[#allocation5 + $0x1b0] ss:$24 sps:$4 sm:$0xff]   ;;  %v3250_v7 = vld [vmem:[#allocation5 + $0xa0] ss:$24 sps:$4 sm:$0xff]  }
  0x85   : > { %1143 = vmatprep.subr.bf16.mxu1 %v3163_v17  ;;  %946 = vmatprep.subr.bf16.mxu0 %v3205_v39  ;;  %v3231_v17 = vld [vmem:[#allocation5 + $0x1e0] ss:$24 sps:$4 sm:$0xff]   ;;  %v286_v35 = vld [vmem:[%s3781_s24 + $0xb0] sm:$0xff]  ;;  %v297_v52 = vld [vmem:[%s3781_s24 + $0x108] sm:$0xff]  ;;  %p3530_p9 = pnand %p3529_p3, %p3523_p10 }
  0x86   : > { %v291_v37 = vld [vmem:[%s3781_s24 + $0xd8] sm:$0xff]  ;;  %v294_v50 = vld [vmem:[%s3781_s24 + $0xf0] sm:$0xff]  ;;  %v296_v61 = vld [vmem:[%s3781_s24 + $0x100] sm:$0xff] }
  0x87   : > { %v298_v62 = vld [vmem:[%s3781_s24 + $0x110] sm:$0xff]  ;;  %v301_v0 = vld [vmem:[%s3781_s24 + $0x128] sm:$0xff]  ;;  %v303_v1 = vld [vmem:[%s3781_s24 + $0x138] sm:$0xff] }
  0x88   : > { %1144 = vmatpush1.bf16.msra.mxu1 %v3165_v18  ;;  %947 = vmatpush1.bf16.msra.mxu0 %v3207_v41  ;;  %v276_v18 = vld [vmem:[%s3781_s24 + $0x60] sm:$0xff]  ;;  %v290_v41 = vld [vmem:[%s3781_s24 + $0xd0] sm:$0xff] }
  0x89   : > { %1145 = vmatprep.subr.bf16.mxu1 %v3166_v19  ;;  %948 = vmatprep.subr.bf16.mxu0 %v3208_v43  ;;  %v278_v19 = vld [vmem:[%s3781_s24 + $0x70] sm:$0xff]  ;;  %v295_v43 = vld [vmem:[%s3781_s24 + $0xf8] sm:$0xff] }
  0x8a   : > { %v3835_v23 = vpack.c.bf16 %v278_v19, %v276_v18  ;;  %v3255_v8 = vld [vmem:[#allocation5 + $0x74] ss:$24 sps:$4 sm:$0xff]   ;;  %v3253_v11 = vld [vmem:[#allocation5 + $0x70] ss:$24 sps:$4 sm:$0xff]   ;;  %v3258_v18 = vld [vmem:[#allocation5 + $0x44] ss:$24 sps:$4 sm:$0xff]  }
  0x8b   : > { %v302_v10 = vld [vmem:[%s3781_s24 + $0x130] sm:$0xff] }
  0x8c   : > { %1146 = vmatpush2.bf16.msra.mxu1 %v3168_v20  ;;  %949 = vmatpush1.bf16.msra.mxu0 %v3210_v45  ;;  %v3232_v20 = vld [vmem:[#allocation5 + $0x1b4] ss:$24 sps:$4 sm:$0xff]   ;;  %v3240_v45 = vld [vmem:[#allocation5 + $0x164] ss:$24 sps:$4 sm:$0xff]  }
  0x8d   : > { %1147 = vmatprep.subr.bf16.mxu1 %v3169_v22  ;;  %950 = vmatprep.subr.bf16.mxu0 %v3211_v47  ;;  %v283_v22 = vld [vmem:[%s3781_s24 + $0x98] sm:$0xff] }
  0x8e   : > { %v3837_v25 = vpack.c.bf16 %v283_v22, %v281_v21  ;;  %v3238_v47 = vld [vmem:[#allocation5 + $0x160] ss:$24 sps:$4 sm:$0xff]   ;;  %v3261_v21 = vld [vmem:[#allocation5 + $0x14] ss:$24 sps:$4 sm:$0xff]  }
  0x8f   : > { %v304_v22 = vld [vmem:[%s3781_s24 + $0x140] sm:$0xff] }
  0x90   : > { %1148 = vmatpush2.bf16.msra.mxu1 %v3171_v26  ;;  %951 = vmatpush1.bf16.msra.mxu0 %v3213_v51  ;;  %v3235_v26 = vld [vmem:[#allocation5 + $0x184] ss:$24 sps:$4 sm:$0xff]   ;;  %v3241_v51 = vld [vmem:[#allocation5 + $0x130] ss:$24 sps:$4 sm:$0xff]  }
  0x91   : > { %1149 = vmatprep.subr.bf16.mxu1 %v3172_v28  ;;  %952 = vmatprep.subr.bf16.mxu0 %v3214_v53  ;;  %v280_v28 = vld [vmem:[%s3781_s24 + $0x80] sm:$0xff]  ;;  %v299_v53 = vld [vmem:[%s3781_s24 + $0x118] sm:$0xff] }
  0x94   : > { %1150 = vmatpush2.bf16.msra.mxu1 %v3174_v30  ;;  %953 = vmatpush2.bf16.msra.mxu0 %v3216_v57  ;;  %v285_v30 = vld [vmem:[%s3781_s24 + $0xa8] sm:$0xff]  ;;  %v3883_v57 = vpack.c.bf16 %v299_v53, %v297_v52 }
  0x95   : > { %1151 = vmatprep.subr.bf16.mxu1 %v3175_v32  ;;  %954 = vmatprep.subr.bf16.mxu0 %v3217_v59  ;;  %v3845_v32 = vpack.c.bf16 %v282_v29, %v280_v28  ;;  %v3847_v33 = vpack.c.bf16 %v287_v31, %v285_v30  ;;  %v3244_v59 = vld [vmem:[#allocation5 + $0x100] ss:$24 sps:$4 sm:$0xff]   ;;  %v3264_v30 = vld [vmem:[#allocation5 + $0x2e4] ss:$24 sps:$4 sm:$0xff]   ;;  %v3271_v52 = vld [vmem:[#allocation5 + $0x250] ss:$24 sps:$4 sm:$0xff]  }
  0x96   : > { %v311_v28 = vld [vmem:[%s3781_s24 + $0x178] sm:$0xff]  ;;  %v317_v53 = vld [vmem:[%s3781_s24 + $0x1a8] sm:$0xff] }
  0x98   : > { %1152 = vmatpush2.bf16.msra.mxu1 %v3177_v34  ;;  %955 = vmatpush2.bf16.msra.mxu0 %v3219_v60  ;;  %v284_v34 = vld [vmem:[%s3781_s24 + $0xa0] sm:$0xff]  ;;  %v3249_v60 = vld [vmem:[#allocation5 + $0xd4] ss:$24 sps:$4 sm:$0xff]  }
  0x99   : > { %1153 = vmatprep.subr.bf16.mxu1 %v3178_v36  ;;  %956 = vmatprep.subr.bf16.mxu0 %v3220_v63  ;;  %v289_v36 = vld [vmem:[%s3781_s24 + $0xc8] sm:$0xff] }
  0x9a   : > { %v3859_v39 = vpack.c.bf16 %v291_v37, %v289_v36  ;;  %v3247_v63 = vld [vmem:[#allocation5 + $0xd0] ss:$24 sps:$4 sm:$0xff]   ;;  %v308_v36 = vld [vmem:[%s3781_s24 + $0x160] sm:$0xff] }
  0x9b   : > { %v310_v37 = vld [vmem:[%s3781_s24 + $0x170] sm:$0xff] }
  0x9c   : > { %1154 = vmatpush2.bf16.msra.mxu1 %v3180_v38  ;;  %957 = vmatpush2.bf16.msra.mxu0 %v3222_v2  ;;  %v3857_v38 = vpack.c.bf16 %v286_v35, %v284_v34  ;;  %v3893_v2 = vpack.c.bf16 %v298_v62, %v296_v61  ;;  %v3262_v34 = vld [vmem:[#allocation5 + $0x2e0] ss:$24 sps:$4 sm:$0xff]   ;;  %v3267_v35 = vld [vmem:[#allocation5 + $0x2b4] ss:$24 sps:$4 sm:$0xff]  }
  0x9d   : > { %1155 = vmatprep.subr.bf16.mxu1 %v3181_v40  ;;  %958 = vmatprep.subr.bf16.mxu0 %v3223_v3  ;;  %v288_v40 = vld [vmem:[%s3781_s24 + $0xc0] sm:$0xff] }
  0x9e   : > { %v3252_v3 = vld [vmem:[#allocation5 + $0xa4] ss:$24 sps:$4 sm:$0xff]   ;;  %v3274_v62 = vld [vmem:[#allocation5 + $0x220] ss:$24 sps:$4 sm:$0xff]  }
  0xa0   : > { %1156 = vmatpush2.bf16.msra.mxu1 %v3183_v42  ;;  %959 = vmatpush2.bf16.msra.mxu0 %v3225_v6  ;;  %v293_v42 = vld [vmem:[%s3781_s24 + $0xe8] sm:$0xff]  ;;  %v3895_v6 = vpack.c.bf16 %v303_v1, %v301_v0  ;;  %v316_v0 = vld [vmem:[%s3781_s24 + $0x1a0] sm:$0xff]  ;;  %v318_v1 = vld [vmem:[%s3781_s24 + $0x1b0] sm:$0xff] }
  0xa1   : > { %1157 = vmatprep.subr.bf16.mxu1 %v3184_v44  ;;  %960 = vmatprep.subr.bf16.mxu0 %v3226_v9  ;;  %v3869_v44 = vpack.c.bf16 %v290_v41, %v288_v40  ;;  %v300_v9 = vld [vmem:[%s3781_s24 + $0x120] sm:$0xff]  ;;  %v3265_v40 = vld [vmem:[#allocation5 + $0x2b0] ss:$24 sps:$4 sm:$0xff]  }
  0xa2   : > { %v313_v41 = vld [vmem:[%s3781_s24 + $0x188] sm:$0xff] }
  0xa4   : > { %1158 = vmatpush2.bf16.msra.mxu1 %v3186_v46  ;;  %961 = vmatpush2.bf16.msra.mxu0 %v3228_v13  ;;  %v3871_v46 = vpack.c.bf16 %v295_v43, %v293_v42  ;;  %v305_v13 = vld [vmem:[%s3781_s24 + $0x148] sm:$0xff]  ;;  %v315_v42 = vld [vmem:[%s3781_s24 + $0x198] sm:$0xff]  ;;  %v3929_v43 = vpack.c.bf16 %v310_v37, %v308_v36  ;;  %v4002_v37 = vld [vmem:[#allocation8 + $0x10] sm:$0xff] }
  0xa5   : > { %1159 = vmatprep.subr.bf16.mxu1 %v3187_v48  ;;  %962 = vmatprep.subr.bf16.mxu0 %v3229_v16  ;;  %v3243_v48 = vld [vmem:[#allocation5 + $0x134] ss:$24 sps:$4 sm:$0xff]   ;;  %v307_v16 = vld [vmem:[%s3781_s24 + $0x158] sm:$0xff] }
  0xa6   : > { %v3907_v19 = vpack.c.bf16 %v307_v16, %v305_v13  ;;  %v3280_v13 = vld [vmem:[#allocation5 + $0x1c0] ss:$24 sps:$4 sm:$0xff]   ;;  %v3285_v16 = vld [vmem:[#allocation5 + $0x194] ss:$24 sps:$4 sm:$0xff]  }
  0xa8   : > { %1160 = vmatpush2.bf16.msra.mxu1 %v3189_v49  ;;  %963 = vmatpush2.bf16.msra.mxu0 %v3231_v17  ;;  %v292_v49 = vld [vmem:[%s3781_s24 + $0xe0] sm:$0xff]  ;;  %v3905_v17 = vpack.c.bf16 %v302_v10, %v300_v9  ;;  %v3953_v9 = vpack.c.bf16 %v318_v1, %v316_v0 }
  0xa9   : > { %964 = vmatprep.subr.bf16.mxu0 %v3232_v20  ;;  %v3881_v54 = vpack.c.bf16 %v294_v50, %v292_v49  ;;  %v3256_v20 = vld [vmem:[#allocation5 + $0x40] ss:$24 sps:$4 sm:$0xff]   ;;  %v3273_v49 = vld [vmem:[#allocation5 + $0x254] ss:$24 sps:$4 sm:$0xff]   ;;  %v3282_v10 = vld [vmem:[#allocation5 + $0x1c4] ss:$24 sps:$4 sm:$0xff]  }
  0xaa   : > { %v312_v50 = vld [vmem:[%s3781_s24 + $0x180] sm:$0xff] }
  0xab   : > { %1162 = vmatmul.mubr.bf16.vlgmr.msra.gmra.mxu1 %v3805_v56 }
  0xac   : > { %1171 = vmatprep.mubr.bf16.mxu1 %v3807_v58  ;;  %965 = vmatpush2.bf16.msra.mxu0 %v3234_v24  ;;  %v306_v24 = vld [vmem:[%s3781_s24 + $0x150] sm:$0xff] }
  0xad   : > { %966 = vmatprep.subr.bf16.mxu0 %v3235_v26  ;;  %v3259_v26 = vld [vmem:[#allocation5 + $0x10] ss:$24 sps:$4 sm:$0xff]   ;;  %v3917_v29 = vpack.c.bf16 %v306_v24, %v304_v22  ;;  %v327_v24 = vld [vmem:[%s3781_s24 + $0x1f8] sm:$0xff] }
  0xae   : > { %v325_v22 = vld [vmem:[%s3781_s24 + $0x1e8] sm:$0xff] }
  0xb0   : > { %967 = vmatpush2.bf16.msra.mxu0 %v3237_v27  ;;  %v309_v27 = vld [vmem:[%s3781_s24 + $0x168] sm:$0xff] }
  0xb1   : > { %1322 = vmatprep.subr.bf16.mxu0 %v3240_v45  ;;  %v3919_v31 = vpack.c.bf16 %v311_v28, %v309_v27  ;;  %v3270_v45 = vld [vmem:[#allocation5 + $0x284] ss:$24 sps:$4 sm:$0xff]   ;;  %v3967_v27 = vpack.c.bf16 %v327_v24, %v325_v22  ;;  %v4054_v24 = vld [vmem:[#allocation8 + $0x50] sm:$0xff] }
  0xb2   : > { %v324_v28 = vld [vmem:[%s3781_s24 + $0x1e0] sm:$0xff]  ;;  %5656 = vst [vmem:[#allocation23_spill] sm:$0xff] %v4054_v24 }
  0xb3   : > { %1172 = vmatmul.mubr.bf16.gmra.mxu1 %v3815_v4  ;;  %969 = vmatmul.mubr.bf16.vlgmr.msra.gmra.mxu0 %v3805_v56 }
  0xb4   : > { %1181 = vmatprep.mubr.bf16.mxu1 %v3817_v5  ;;  %978 = vmatprep.mubr.bf16.mxu0 %v3807_v58 }
  0xb5   : > { %1323 = vmatpush1.bf16.msra.mxu0 %v3238_v47  ;;  %v3931_v47 = vpack.c.bf16 %v315_v42, %v313_v41 }
  0xb6   : > { %1324 = vmatprep.subr.bf16.mxu0 %v3243_v48  ;;  %v3268_v48 = vld [vmem:[#allocation5 + $0x280] ss:$24 sps:$4 sm:$0xff]  }
  0xb9   : > { %1325 = vmatpush1.bf16.msra.mxu0 %v3241_v51  ;;  %v314_v51 = vld [vmem:[%s3781_s24 + $0x190] sm:$0xff] }
  0xba   : > { %1326 = vmatprep.subr.bf16.mxu0 %v3246_v55  ;;  %v319_v55 = vld [vmem:[%s3781_s24 + $0x1b8] sm:$0xff] }
  0xbb   : > { %1182 = vmatmul.mubr.bf16.gmra.mxu1 %v3825_v12  ;;  %979 = vmatmul.mubr.bf16.gmra.mxu0 %v3815_v4  ;;  %v3943_v61 = vpack.c.bf16 %v319_v55, %v317_v53  ;;  %v4028_v55 = vld [vmem:[#allocation8 + $0x30] sm:$0xff] }
  0xbc   : > { %1191 = vmatprep.mubr.bf16.mxu1 %v3827_v14  ;;  %988 = vmatprep.mubr.bf16.mxu0 %v3817_v5 }
  0xbd   : > { %1327 = vmatpush1.bf16.msra.mxu0 %v3244_v59  ;;  %v3941_v59 = vpack.c.bf16 %v314_v51, %v312_v50  ;;  %v4024_v51 = vld [vmem:[#allocation8 + $0x20] sm:$0xff] }
  0xbe   : > { %1328 = vmatprep.subr.bf16.mxu0 %v3249_v60  ;;  %v3276_v60 = vld [vmem:[#allocation5 + $0x224] ss:$24 sps:$4 sm:$0xff]  }
  0xc1   : > { %1329 = vmatpush1.bf16.msra.mxu0 %v3247_v63  ;;  %v3279_v63 = vld [vmem:[#allocation5 + $0x1f4] ss:$24 sps:$4 sm:$0xff]  }
  0xc2   : > { %1330 = vmatprep.subr.bf16.mxu0 %v3252_v3  ;;  %v3277_v3 = vld [vmem:[#allocation5 + $0x1f0] ss:$24 sps:$4 sm:$0xff]  }
  0xc3   : > { %1192 = vmatmul.mubr.bf16.gmra.mxu1 %v3835_v23  ;;  %989 = vmatmul.mubr.bf16.gmra.mxu0 %v3825_v12 }
  0xc4   : > { %1201 = vmatprep.mubr.bf16.mxu1 %v3837_v25  ;;  %998 = vmatprep.mubr.bf16.mxu0 %v3827_v14 }
  0xc5   : > { %1331 = vmatpush1.bf16.msra.mxu0 %v3250_v7  ;;  %v321_v7 = vld [vmem:[%s3781_s24 + $0x1c8] sm:$0xff] }
  0xc6   : > { %1332 = vmatprep.subr.bf16.mxu0 %v3255_v8  ;;  %v323_v8 = vld [vmem:[%s3781_s24 + $0x1d8] sm:$0xff] }
  0xc9   : > { %1333 = vmatpush1.bf16.msra.mxu0 %v3253_v11  ;;  %v3955_v11 = vpack.c.bf16 %v323_v8, %v321_v7 }
  0xca   : > { %1334 = vmatprep.subr.bf16.mxu0 %v3258_v18  ;;  %v320_v18 = vld [vmem:[%s3781_s24 + $0x1c0] sm:$0xff] }
  0xcb   : > { %1202 = vmatmul.mubr.bf16.gmra.mxu1 %v3845_v32  ;;  %999 = vmatmul.mubr.bf16.gmra.mxu0 %v3835_v23 }
  0xcc   : > { %1211 = vmatprep.mubr.bf16.mxu1 %v3847_v33  ;;  %1008 = vmatprep.mubr.bf16.mxu0 %v3837_v25 }
  0xcd   : > { %1335 = vmatpush1.bf16.msra.mxu0 %v3256_v20  ;;  %v322_v20 = vld [vmem:[%s3781_s24 + $0x1d0] sm:$0xff] }
  0xce   : > { %1336 = vmatprep.subr.bf16.mxu0 %v3261_v21  ;;  %v3283_v21 = vld [vmem:[#allocation5 + $0x190] ss:$24 sps:$4 sm:$0xff]  }
  0xd1   : > { %1337 = vmatpush1.bf16.msra.mxu0 %v3259_v26  ;;  %v3965_v26 = vpack.c.bf16 %v322_v20, %v320_v18  ;;  %v4050_v20 = vld [vmem:[#allocation8 + $0x40] sm:$0xff] }
  0xd2   : > { %1338 = vmatprep.subr.bf16.mxu0 %v3264_v30  ;;  %v326_v30 = vld [vmem:[%s3781_s24 + $0x1f0] sm:$0xff] }
  0xd3   : > { %1212 = vmatmul.mubr.bf16.gmra.mxu1 %v3857_v38  ;;  %1009 = vmatmul.mubr.bf16.gmra.mxu0 %v3845_v32 }
  0xd4   : > { %1221 = vmatprep.mubr.bf16.mxu1 %v3859_v39  ;;  %1018 = vmatprep.mubr.bf16.mxu0 %v3847_v33 }
  0xd5   : > { %1339 = vmatpush2.bf16.msra.mxu0 %v3262_v34  ;;  %v3975_v34 = vpack.c.bf16 %v326_v30, %v324_v28  ;;  %v4056_v28 = vld [vmem:[#allocation8 + $0x58] sm:$0xff] }
  0xd6   : > { %1340 = vmatprep.subr.bf16.mxu0 %v3267_v35  ;;  %5657 = vst [vmem:[#allocation24_spill] sm:$0xff] %v4056_v28 }
  0xd9   : > { %1341 = vmatpush2.bf16.msra.mxu0 %v3265_v40 }
  0xda   : > { %1342 = vmatprep.subr.bf16.mxu0 %v3270_v45 }
  0xdb   : > { %1222 = vmatmul.mubr.bf16.gmra.mxu1 %v3869_v44  ;;  %1019 = vmatmul.mubr.bf16.gmra.mxu0 %v3857_v38 }
  0xdc   : > { %1231 = vmatprep.mubr.bf16.mxu1 %v3871_v46  ;;  %1028 = vmatprep.mubr.bf16.mxu0 %v3859_v39 }
  0xdd   : > { %1343 = vmatpush2.bf16.msra.mxu0 %v3268_v48 }
  0xde   : > { %1344 = vmatprep.subr.bf16.mxu0 %v3273_v49 }
  0xe1   : > { %1345 = vmatpush2.bf16.msra.mxu0 %v3271_v52  ;;  %v4026_v52 = vld [vmem:[#allocation8 + $0x28] sm:$0xff] }
  0xe2   : > { %1346 = vmatprep.subr.bf16.mxu0 %v3276_v60  ;;  %v4030_v60 = vld [vmem:[#allocation8 + $0x38] sm:$0xff] }
  0xe3   : > { %1232 = vmatmul.mubr.bf16.gmra.mxu1 %v3881_v54  ;;  %1029 = vmatmul.mubr.bf16.gmra.mxu0 %v3869_v44 }
  0xe4   : > { %1241 = vmatprep.mubr.bf16.mxu1 %v3883_v57  ;;  %1038 = vmatprep.mubr.bf16.mxu0 %v3871_v46 }
  0xe5   : > { %1347 = vmatpush2.bf16.msra.mxu0 %v3274_v62 }
  0xe6   : > { %1348 = vmatprep.subr.bf16.mxu0 %v3279_v63 }
  0xe9   : > { %1349 = vmatpush2.bf16.msra.mxu0 %v3277_v3 }
  0xea   : > { %1350 = vmatprep.subr.bf16.mxu0 %v3282_v10 }
  0xeb   : > { %1242 = vmatmul.mubr.bf16.gmra.mxu1 %v3893_v2  ;;  %1039 = vmatmul.mubr.bf16.gmra.mxu0 %v3881_v54 }
  0xec   : > { %1251 = vmatprep.mubr.bf16.mxu1 %v3895_v6  ;;  %1048 = vmatprep.mubr.bf16.mxu0 %v3883_v57 }
  0xed   : > { %1351 = vmatpush2.bf16.msra.mxu0 %v3280_v13 }
  0xee   : > { %1352 = vmatprep.subr.bf16.mxu0 %v3285_v16 }
  0xf1   : > { %1353 = vmatpush2.bf16.msra.mxu0 %v3283_v21  ;;  %v4052_v21 = vld [vmem:[#allocation8 + $0x48] sm:$0xff] }
  0xf3   : > { %1252 = vmatmul.mubr.bf16.gmra.mxu1 %v3905_v17  ;;  %1049 = vmatmul.mubr.bf16.gmra.mxu0 %v3893_v2 }
  0xf4   : > { %1261 = vmatprep.mubr.bf16.mxu1 %v3907_v19  ;;  %1058 = vmatprep.mubr.bf16.mxu0 %v3895_v6 }
  0xfb   : > { %1262 = vmatmul.mubr.bf16.gmra.mxu1 %v3917_v29  ;;  %1059 = vmatmul.mubr.bf16.gmra.mxu0 %v3905_v17 }
  0xfc   : > { %1271 = vmatprep.mubr.bf16.mxu1 %v3919_v31  ;;  %1068 = vmatprep.mubr.bf16.mxu0 %v3907_v19 }
 0x103   : > { %1272 = vmatmul.mubr.bf16.gmra.mxu1 %v3929_v43  ;;  %1069 = vmatmul.mubr.bf16.gmra.mxu0 %v3917_v29 }
 0x104   : > { %1281 = vmatprep.mubr.bf16.mxu1 %v3931_v47  ;;  %1078 = vmatprep.mubr.bf16.mxu0 %v3919_v31 }
 0x10b   : > { %1282 = vmatmul.mubr.bf16.gmra.mxu1 %v3941_v59  ;;  %1079 = vmatmul.mubr.bf16.gmra.mxu0 %v3929_v43 }
 0x10c   : > { %1291 = vmatprep.mubr.bf16.mxu1 %v3943_v61  ;;  %1088 = vmatprep.mubr.bf16.mxu0 %v3931_v47 }
 0x113   : > { %1292 = vmatmul.mubr.bf16.gmra.mxu1 %v3953_v9  ;;  %1089 = vmatmul.mubr.bf16.gmra.mxu0 %v3941_v59 }
 0x114   : > { %1301 = vmatprep.mubr.bf16.mxu1 %v3955_v11  ;;  %1098 = vmatprep.mubr.bf16.mxu0 %v3943_v61 }
 0x11b   : > { %1302 = vmatmul.mubr.bf16.gmra.mxu1 %v3965_v26  ;;  %1099 = vmatmul.mubr.bf16.gmra.mxu0 %v3953_v9 }
 0x11c   : > { %1311 = vmatprep.mubr.bf16.mxu1 %v3967_v27  ;;  %1108 = vmatprep.mubr.bf16.mxu0 %v3955_v11 }
 0x123   : > { %1312 = vmatmul.mubr.bf16.gmra.mxu1 %v3975_v34  ;;  %1109 = vmatmul.mubr.bf16.gmra.mxu0 %v3965_v26 }
 0x124   : > { %1118 = vmatprep.mubr.bf16.mxu0 %v3967_v27 }
 0x12b   : > { %1119 = vmatmul.mubr.bf16.gmra.mxu0 %v3975_v34 }
 0x12c   : > { %1354 = vmatprep.mubr.bf16.mxu0 %v3797_v15 }
 0x133   : > { %1355 = vmatmul.mubr.bf16.vlgmr.msra.gmra.mxu0 %v3805_v56 }
 0x134   : > { %1364 = vmatprep.mubr.bf16.mxu0 %v3807_v58 }
 0x13b   : > { %1365 = vmatmul.mubr.bf16.gmra.mxu0 %v3815_v4  ;;  %v3998_v4 = vld [vmem:[#allocation8] sm:$0xff] }
 0x13c   : > { %1374 = vmatprep.mubr.bf16.mxu0 %v3817_v5  ;;  %v4000_v5 = vld [vmem:[#allocation8 + $0x8] sm:$0xff] }
 0x143   : > { %1375 = vmatmul.mubr.bf16.gmra.mxu0 %v3825_v12 }
 0x144   : > { %1384 = vmatprep.mubr.bf16.mxu0 %v3827_v14  ;;  %v4004_v14 = vld [vmem:[#allocation8 + $0x18] sm:$0xff] }
 0x14b   : > { %1385 = vmatmul.mubr.bf16.gmra.mxu0 %v3835_v23 }
 0x14c   : > { %1394 = vmatprep.mubr.bf16.mxu0 %v3837_v25 }
 0x153   : > { %1395 = vmatmul.mubr.bf16.gmra.mxu0 %v3845_v32 }
 0x154   : > { %1404 = vmatprep.mubr.bf16.mxu0 %v3847_v33 }
 0x15b   : > { %1405 = vmatmul.mubr.bf16.gmra.mxu0 %v3857_v38 }
 0x15c   : > { %1414 = vmatprep.mubr.bf16.mxu0 %v3859_v39  ;;  %v4112_v39 = vld [vmem:[#allocation7 + $0x10] sm:$0xff] }
 0x15d   : > { %5668 = vst [vmem:[#allocation35_spill] sm:$0xff] %v4112_v39 }
 0x163   : > { %1415 = vmatmul.mubr.bf16.gmra.mxu0 %v3869_v44 }
 0x164   : > { %1424 = vmatprep.mubr.bf16.mxu0 %v3871_v46 }
 0x16b   : > { %v1163_v35 = vpop.f32.mrf.mxu1  ;;  %1425 = vmatmul.mubr.bf16.gmra.mxu0 %v3881_v54 }
 0x16c   : > { %1434 = vmatprep.mubr.bf16.mxu0 %v3883_v57 }
 0x16d   : > { %v1165_v15 = vpop.f32.mrf.mxu1 }
 0x16e   : > { %v1694_v56 = vadd.f32 %v1165_v15, %v1163_v35  ;;  %v1710_v58 = vsub.f32 %v1165_v15, %v1163_v35 }
 0x16f   : > { %v1167_v36 = vpop.f32.mrf.mxu1 }
 0x170   : > { %v4009_v33 = vmul.f32 %v1694_v56, %v3998_v4  ;;  %v4012_v40 = vmul.f32 %v1710_v58, %v4000_v5 }
 0x171   : > { %v1169_v12 = vpop.f32.mrf.mxu1 }
 0x172   : > { %v1695_v23 = vadd.f32 %v1169_v12, %v1167_v36  ;;  %v1711_v25 = vsub.f32 %v1169_v12, %v1167_v36  ;;  %5648 = vst [vmem:[#allocation15_spill] sm:$0xff] %v4009_v33  ;;  %5649 = vst [vmem:[#allocation16_spill] sm:$0xff] %v4012_v40 }
 0x173   : > { %v1173_v32 = vpop.f32.mrf.mxu1  ;;  %1435 = vmatmul.mubr.bf16.gmra.mxu0 %v3893_v2  ;;  %v4108_v2 = vld [vmem:[#allocation7 + $0x8] sm:$0xff] }
 0x174   : > { %v4015_v41 = vmul.f32 %v1695_v23, %v4002_v37  ;;  %v4018_v42 = vmul.f32 %v1711_v25, %v4004_v14  ;;  %1444 = vmatprep.mubr.bf16.mxu0 %v3895_v6  ;;  %5667 = vst [vmem:[#allocation34_spill] sm:$0xff] %v4108_v2 }
 0x175   : > { %v1175_v45 = vpop.f32.mrf.mxu1 }
 0x176   : > { %5650 = vst [vmem:[#allocation17_spill] sm:$0xff] %v4015_v41  ;;  %5651 = vst [vmem:[#allocation18_spill] sm:$0xff] %v4018_v42  ;;  %v1696_v48 = vadd.f32 %v1175_v45, %v1173_v32  ;;  %v1712_v49 = vsub.f32 %v1175_v45, %v1173_v32  ;;  %v4084_v45 = vld [vmem:[#allocation8 + $0x60] sm:$0xff] }
 0x177   : > { %v1177_v50 = vpop.f32.mrf.mxu1  ;;  %5662 = vst [vmem:[#allocation29_spill] sm:$0xff] %v4084_v45  ;;  %v4134_v42 = vld [vmem:[#allocation7 + $0x20] sm:$0xff] }
 0x178   : > { %v4035_v1 = vmul.f32 %v1696_v48, %v4024_v51  ;;  %v4038_v3 = vmul.f32 %v1712_v49, %v4026_v52  ;;  %v4088_v49 = vld [vmem:[#allocation8 + $0x70] sm:$0xff]  ;;  %5672 = vst [vmem:[#allocation39_spill] sm:$0xff] %v4134_v42 }
 0x179   : > { %v1179_v53 = vpop.f32.mrf.mxu1  ;;  %5663 = vst [vmem:[#allocation30_spill] sm:$0xff] %v4088_v49 }
 0x17a   : > { %v1697_v62 = vadd.f32 %v1179_v53, %v1177_v50  ;;  %v1713_v63 = vsub.f32 %v1179_v53, %v1177_v50  ;;  %5652 = vst [vmem:[#allocation19_spill] sm:$0xff] %v4035_v1  ;;  %5653 = vst [vmem:[#allocation20_spill] sm:$0xff] %v4038_v3  ;;  %v970_v53 = vpop.f32.mrf.mxu0 }
 0x17b   : > { %v1183_v0 = vpop.f32.mrf.mxu1  ;;  %1445 = vmatmul.mubr.bf16.gmra.mxu0 %v3905_v17  ;;  %v4136_v17 = vld [vmem:[#allocation7 + $0x28] sm:$0xff] }
 0x17c   : > { %v4041_v7 = vmul.f32 %v1697_v62, %v4028_v55  ;;  %v4044_v8 = vmul.f32 %v1713_v63, %v4030_v60  ;;  %1454 = vmatprep.mubr.bf16.mxu0 %v3907_v19  ;;  %5673 = vst [vmem:[#allocation40_spill] sm:$0xff] %v4136_v17  ;;  %v4142_v19 = vld [vmem:[#allocation7 + $0x38] sm:$0xff] }
 0x17d   : > { %v1185_v10 = vpop.f32.mrf.mxu1  ;;  %5675 = vst [vmem:[#allocation42_spill] sm:$0xff] %v4142_v19 }
 0x17e   : > { %5654 = vst [vmem:[#allocation21_spill] sm:$0xff] %v4041_v7  ;;  %5655 = vst [vmem:[#allocation22_spill] sm:$0xff] %v4044_v8  ;;  %v1698_v13 = vadd.f32 %v1185_v10, %v1183_v0  ;;  %v1714_v16 = vsub.f32 %v1185_v10, %v1183_v0  ;;  %v972_v10 = vpop.f32.mrf.mxu0  ;;  %v4140_v7 = vld [vmem:[#allocation7 + $0x30] sm:$0xff] }
 0x17f   : > { %v1187_v18 = vpop.f32.mrf.mxu1  ;;  %5674 = vst [vmem:[#allocation41_spill] sm:$0xff] %v4140_v7 }
 0x180   : > { %v4063_v56 = vmul.f32 %v1698_v13, %v4050_v20  ;;  %v4066_v58 = vmul.f32 %v1714_v16, %v4052_v21  ;;  %v1614_v16 = vadd.f32 %v972_v10, %v970_v53 }
 0x181   : > { %v1189_v22 = vpop.f32.mrf.mxu1 }
 0x182   : > { %v1699_v30 = vadd.f32 %v1189_v22, %v1187_v18  ;;  %v1715_v35 = vsub.f32 %v1189_v22, %v1187_v18  ;;  %5658 = vst [vmem:[#allocation25_spill] sm:$0xff] %v4063_v56  ;;  %5659 = vst [vmem:[#allocation26_spill] sm:$0xff] %v4066_v58  ;;  %v1630_v18 = vsub.f32 %v972_v10, %v970_v53  ;;  %v4220_v58 = vld [vmem:[#allocation8 + $0xf8] sm:$0xff] }
 0x183   : > { %v4059_v15 = vpop.f32.mrf.mxu1  ;;  %1455 = vmatmul.mubr.bf16.gmra.mxu0 %v3917_v29 }
 0x184   : > { %v4069_v36 = vmul.f32 %v1699_v30, %v4054_v24  ;;  %v4072_v12 = vmul.f32 %v1715_v35, %v4056_v28  ;;  %v4106_v30 = vld [vmem:[#allocation7] sm:$0xff]  ;;  %v974_v35 = vpop.f32.mrf.mxu0  ;;  %v1647_v53 = vmul.f32 %v1630_v18, %v4108_v2  ;;  %1464 = vmatprep.mubr.bf16.mxu0 %v3919_v31  ;;  %v4174_v31 = vld [vmem:[#allocation7 + $0x50] sm:$0xff] }
 0x185   : > { %v4074_v23 = vpop.f32.mrf.mxu1  ;;  %5666 = vst [vmem:[#allocation33_spill] sm:$0xff] %v4106_v30  ;;  %v4119_v46 = vmul.f32 %v1614_v16, %v4106_v30  ;;  %5682 = vst [vmem:[#allocation49_spill] sm:$0xff] %v4174_v31 }
 0x186   : > { %5660 = vst [vmem:[#allocation27_spill] sm:$0xff] %v4069_v36  ;;  %5661 = vst [vmem:[#allocation28_spill] sm:$0xff] %v4072_v12  ;;  %v1700_v54 = vadd.f32 %v4074_v23, %v4059_v15  ;;  %v4176_v36 = vld [vmem:[#allocation7 + $0x58] sm:$0xff] }
 0x187   : > { %v4082_v32 = vpop.f32.mrf.mxu1  ;;  %5670 = vst [vmem:[#allocation37_spill] sm:$0xff] %v4119_v46  ;;  %5683 = vst [vmem:[#allocation50_spill] sm:$0xff] %v4176_v36 }
 0x188   : > { %v4097_v63 = vmul.f32 %v1700_v54, %v4084_v45  ;;  %v976_v54 = vpop.f32.mrf.mxu0 }
 0x189   : > { %v4086_v48 = vpop.f32.mrf.mxu1  ;;  %v1615_v10 = vadd.f32 %v976_v54, %v974_v35  ;;  %v1631_v44 = vsub.f32 %v976_v54, %v974_v35 }
 0x18a   : > { %v1701_v50 = vadd.f32 %v4086_v48, %v4082_v32  ;;  %5664 = vst [vmem:[#allocation31_spill] sm:$0xff] %v4097_v63  ;;  %v980_v25 = vpop.f32.mrf.mxu0 }
 0x18b   : > { %v4093_v62 = vpop.f32.mrf.mxu1  ;;  %v4126_v22 = vmul.f32 %v1615_v10, %v4112_v39  ;;  %1465 = vmatmul.mubr.bf16.gmra.mxu0 %v3929_v43  ;;  %v4198_v43 = vld [vmem:[#allocation7 + $0x60] sm:$0xff]  ;;  %v4218_v39 = vld [vmem:[#allocation8 + $0xf0] sm:$0xff] }
 0x18c   : > { %v4100_v0 = vmul.f32 %v1701_v50, %v4088_v49  ;;  %v4114_v50 = vld [vmem:[#allocation7 + $0x18] sm:$0xff]  ;;  %v982_v41 = vpop.f32.mrf.mxu0  ;;  %1474 = vmatprep.mubr.bf16.mxu0 %v3931_v47 }
 0x18d   : > { %v4102_v13 = vpop.f32.mrf.mxu1  ;;  %5669 = vst [vmem:[#allocation36_spill] sm:$0xff] %v4114_v50  ;;  %5671 = vst [vmem:[#allocation38_spill] sm:$0xff] %v4126_v22  ;;  %v1649_v33 = vmul.f32 %v1631_v44, %v4114_v50  ;;  %v1616_v18 = vadd.f32 %v982_v41, %v980_v25  ;;  %v1632_v35 = vsub.f32 %v982_v41, %v980_v25 }
 0x18e   : > { %5665 = vst [vmem:[#allocation32_spill] sm:$0xff] %v4100_v0  ;;  %v984_v1 = vpop.f32.mrf.mxu0 }
 0x18f   : > { %v4110_v6 = vpop.f32.mrf.mxu1  ;;  %v1679_v54 = vpack.c.bf16 %v1649_v33, %v1647_v53  ;;  %v4147_v16 = vmul.f32 %v1616_v18, %v4134_v42  ;;  %v4150_v33 = vmul.f32 %v1632_v35, %v4136_v17 }
 0x190   : > { %v986_v44 = vpop.f32.mrf.mxu0 }
 0x191   : > { %v4116_v38 = vpop.f32.mrf.mxu1  ;;  %1806 = vmatprep.mubr.bf16.mxu1 %v1679_v54  ;;  %5676 = vst [vmem:[#allocation43_spill] sm:$0xff] %v4147_v16  ;;  %5677 = vst [vmem:[#allocation44_spill] sm:$0xff] %v4150_v33  ;;  %v1617_v41 = vadd.f32 %v986_v44, %v984_v1  ;;  %v1633_v25 = vsub.f32 %v986_v44, %v984_v1  ;;  %v4168_v44 = vld [vmem:[#allocation7 + $0x40] sm:$0xff] }
 0x192   : > { %v990_v53 = vpop.f32.mrf.mxu0  ;;  %5680 = vst [vmem:[#allocation47_spill] sm:$0xff] %v4168_v44 }
 0x193   : > { %v4123_v57 = vpop.f32.mrf.mxu1  ;;  %v4156_v54 = vmul.f32 %v1617_v41, %v4140_v7  ;;  %v4159_v22 = vmul.f32 %v1633_v25, %v4142_v19  ;;  %v4170_v41 = vld [vmem:[#allocation7 + $0x48] sm:$0xff]  ;;  %1475 = vmatmul.mubr.bf16.gmra.mxu0 %v3941_v59 }
 0x194   : > { %v992_v18 = vpop.f32.mrf.mxu0  ;;  %5681 = vst [vmem:[#allocation48_spill] sm:$0xff] %v4170_v41  ;;  %1484 = vmatprep.mubr.bf16.mxu0 %v3943_v61 }
 0x195   : > { %v4130_v40 = vpop.f32.mrf.mxu1  ;;  %5678 = vst [vmem:[#allocation45_spill] sm:$0xff] %v4156_v54  ;;  %5679 = vst [vmem:[#allocation46_spill] sm:$0xff] %v4159_v22  ;;  %v1618_v35 = vadd.f32 %v992_v18, %v990_v53  ;;  %v1634_v56 = vsub.f32 %v992_v18, %v990_v53 }
 0x196   : > { %v994_v7 = vpop.f32.mrf.mxu0 }
 0x197   : > { %v4138_v10 = vpop.f32.mrf.mxu1  ;;  %v4181_v53 = vmul.f32 %v1618_v35, %v4168_v44  ;;  %v4184_v18 = vmul.f32 %v1634_v56, %v4170_v41  ;;  %v4210_v56 = vld [vmem:[#allocation8 + $0xe0] sm:$0xff] }
 0x198   : > { %v996_v19 = vpop.f32.mrf.mxu0  ;;  %5688 = vst [vmem:[#allocation55_spill] sm:$0xff] %v4210_v56 }
 0x199   : > { %v4144_v3 = vpop.f32.mrf.mxu1  ;;  %5684 = vst [vmem:[#allocation51_spill] sm:$0xff] %v4181_v53  ;;  %5685 = vst [vmem:[#allocation52_spill] sm:$0xff] %v4184_v18  ;;  %v1619_v29 = vadd.f32 %v996_v19, %v994_v7  ;;  %v1635_v1 = vsub.f32 %v996_v19, %v994_v7  ;;  %v4200_v19 = vld [vmem:[#allocation7 + $0x68] sm:$0xff] }
 0x19a   : > { %v1000_v16 = vpop.f32.mrf.mxu0 }
 0x19b   : > { %v4153_v46 = vpop.f32.mrf.mxu1  ;;  %v4188_v33 = vmul.f32 %v1619_v29, %v4174_v31  ;;  %v4191_v22 = vmul.f32 %v1635_v1, %v4176_v36  ;;  %v4202_v31 = vld [vmem:[#allocation8 + $0xc8] sm:$0xff]  ;;  %v4206_v1 = vld [vmem:[#allocation8 + $0xd8] sm:$0xff]  ;;  %1485 = vmatmul.mubr.bf16.gmra.mxu0 %v3953_v9 }
 0x19c   : > { %v1002_v42 = vpop.f32.mrf.mxu0  ;;  %v4216_v36 = vld [vmem:[#allocation8 + $0xe8] sm:$0xff]  ;;  %1494 = vmatprep.mubr.bf16.mxu0 %v3955_v11 }
 0x19d   : > { %v4162_v8 = vpop.f32.mrf.mxu1  ;;  %5686 = vst [vmem:[#allocation53_spill] sm:$0xff] %v4188_v33  ;;  %5687 = vst [vmem:[#allocation54_spill] sm:$0xff] %v4191_v22  ;;  %v1620_v44 = vadd.f32 %v1002_v42, %v1000_v16  ;;  %v1636_v50 = vsub.f32 %v1002_v42, %v1000_v16  ;;  %v4212_v33 = vld [vmem:[#allocation7 + $0x70] sm:$0xff]  ;;  %v4214_v22 = vld [vmem:[#allocation7 + $0x78] sm:$0xff] }
 0x19e   : > { %v1004_v29 = vpop.f32.mrf.mxu0  ;;  %v1722_v47 = vsub.f32 %v4162_v8, %v4153_v46  ;;  %5689 = vst [vmem:[#allocation56_spill] sm:$0xff] %v4212_v33  ;;  %5690 = vst [vmem:[#allocation57_spill] sm:$0xff] %v4214_v22 }
 0x19f   : > { %v4172_v25 = vpop.f32.mrf.mxu1  ;;  %v4223_v12 = vmul.f32 %v1620_v44, %v4198_v43  ;;  %v4226_v2 = vmul.f32 %v1636_v50, %v4200_v19 }
 0x1a0   : > { %v1006_v53 = vpop.f32.mrf.mxu0  ;;  %v1751_v49 = vmul.f32 %v1722_v47, %v4202_v31 }
 0x1a1   : > { %v4178_v17 = vpop.f32.mrf.mxu1  ;;  %5691 = vst [vmem:[#allocation58_spill] sm:$0xff] %v4223_v12  ;;  %5692 = vst [vmem:[#allocation59_spill] sm:$0xff] %v4226_v2  ;;  %v1621_v63 = vadd.f32 %v1006_v53, %v1004_v29  ;;  %v4268_v12 = vld [vmem:[#allocation7 + $0x90] sm:$0xff] }
 0x1a2   : > { %v1723_v42 = vsub.f32 %v4178_v17, %v4172_v25  ;;  %v1010_v30 = vpop.f32.mrf.mxu0 }
 0x1a3   : > { %v1233_v54 = vpop.f32.mrf.mxu1  ;;  %v4232_v24 = vmul.f32 %v1621_v63, %v4212_v33  ;;  %1495 = vmatmul.mubr.bf16.gmra.mxu0 %v3965_v26 }
 0x1a4   : > { %v1753_v45 = vmul.f32 %v1723_v42, %v4206_v1  ;;  %1504 = vmatprep.mubr.bf16.mxu0 %v3967_v27 }
 0x1a5   : > { %v1235_v35 = vpop.f32.mrf.mxu1  ;;  %5693 = vst [vmem:[#allocation60_spill] sm:$0xff] %v4232_v24  ;;  %v4270_v24 = vld [vmem:[#allocation7 + $0x98] sm:$0xff] }
 0x1a6   : > { %v1708_v18 = vadd.f32 %v1235_v35, %v1233_v54  ;;  %v1724_v7 = vsub.f32 %v1235_v35, %v1233_v54  ;;  %v1637_v54 = vsub.f32 %v1006_v53, %v1004_v29  ;;  %v1012_v29 = vpop.f32.mrf.mxu0 }
 0x1a7   : > { %v1237_v16 = vpop.f32.mrf.mxu1  ;;  %v1622_v42 = vadd.f32 %v1012_v29, %v1010_v30 }
 0x1a8   : > { %v4235_v44 = vmul.f32 %v1637_v54, %v4214_v22  ;;  %v1754_v50 = vmul.f32 %v1708_v18, %v4210_v56  ;;  %v4246_v56 = vld [vmem:[#allocation7 + $0x80] sm:$0xff]  ;;  %v1707_v54 = vadd.f32 %v4178_v17, %v4172_v25  ;;  %v4272_v17 = vld [vmem:[#allocation8 + $0xb8] sm:$0xff] }
 0x1a9   : > { %v1239_v41 = vpop.f32.mrf.mxu1  ;;  %v4274_v25 = vld [vmem:[#allocation8 + $0xc0] sm:$0xff] }
 0x1aa   : > { %v1709_v35 = vadd.f32 %v1239_v41, %v1237_v16  ;;  %v1725_v0 = vsub.f32 %v1239_v41, %v1237_v16  ;;  %5694 = vst [vmem:[#allocation61_spill] sm:$0xff] %v4235_v44  ;;  %v1755_v41 = vmul.f32 %v1724_v7, %v4216_v36  ;;  %v1638_v16 = vsub.f32 %v1012_v29, %v1010_v30  ;;  %v4248_v7 = vld [vmem:[#allocation7 + $0x88] sm:$0xff] }
 0x1ab   : > { %v1243_v28 = vpop.f32.mrf.mxu1  ;;  %v1720_v30 = vsub.f32 %v4130_v40, %v4123_v57  ;;  %v1721_v29 = vsub.f32 %v4144_v3, %v4138_v10  ;;  %1505 = vmatmul.mubr.bf16.gmra.mxu0 %v3975_v34 }
 0x1ac   : > { %v1756_v53 = vmul.f32 %v1709_v35, %v4218_v39  ;;  %v1757_v59 = vmul.f32 %v1725_v0, %v4220_v58  ;;  %v1014_v35 = vpop.f32.mrf.mxu0  ;;  %v4250_v0 = vld [vmem:[#allocation8 + $0xa8] sm:$0xff] }
 0x1ad   : > { %v1245_v47 = vpop.f32.mrf.mxu1 }
 0x1ae   : > { %v2280_v22 = vadd.f32 %v1245_v47, %v1243_v28  ;;  %v2296_v61 = vsub.f32 %v1245_v47, %v1243_v28  ;;  %v1773_v33 = vpack.c.bf16 %v1757_v59, %v1755_v41  ;;  %v1772_v18 = vpack.c.bf16 %v1756_v53, %v1754_v50  ;;  %v4260_v50 = vld [vmem:[#allocation8 + $0xd0] sm:$0xff]  ;;  %v1016_v47 = vpop.f32.mrf.mxu0 }
 0x1af   : > { %v1247_v63 = vpop.f32.mrf.mxu1  ;;  %v1706_v28 = vadd.f32 %v4162_v8, %v4153_v46  ;;  %v1771_v59 = vpack.c.bf16 %v1753_v45, %v1751_v49  ;;  %v4277_v46 = vmul.f32 %v1622_v42, %v4246_v56  ;;  %v1752_v2 = vmul.f32 %v1707_v54, %v4260_v50 }
 0x1b0   : > { %v4263_v41 = vmul.f32 %v2280_v22, %v3998_v4  ;;  %v4266_v53 = vmul.f32 %v2296_v61, %v4000_v5  ;;  %1774 = vmatprep.subr.bf16.mxu1 %v1773_v33  ;;  %v4280_v4 = vmul.f32 %v1638_v16, %v4248_v7  ;;  %v1623_v5 = vadd.f32 %v1016_v47, %v1014_v35  ;;  %v1020_v33 = vpop.f32.mrf.mxu0 }
 0x1b1   : > { %v1249_v8 = vpop.f32.mrf.mxu1  ;;  %1775 = vmatpush1.bf16.xpose.msra.mxu1 %v1772_v18  ;;  %5697 = vst [vmem:[#allocation64_spill] sm:$0xff] %v4277_v46  ;;  %v1639_v22 = vsub.f32 %v1016_v47, %v1014_v35  ;;  %v1747_v61 = vmul.f32 %v1720_v30, %v4250_v0  ;;  %v1749_v16 = vmul.f32 %v1721_v29, %v4272_v17  ;;  %v4332_v46 = vld [vmem:[#allocation7 + $0xb8] sm:$0xff] }
 0x1b2   : > { %5695 = vst [vmem:[#allocation62_spill] sm:$0xff] %v4263_v41  ;;  %5696 = vst [vmem:[#allocation63_spill] sm:$0xff] %v4266_v53  ;;  %v2281_v45 = vadd.f32 %v1249_v8, %v1247_v63  ;;  %v2297_v49 = vsub.f32 %v1249_v8, %v1247_v63  ;;  %1776 = vmatprep.subr.bf16.mxu1 %v1771_v59  ;;  %v4286_v18 = vmul.f32 %v1623_v5, %v4268_v12  ;;  %v1022_v54 = vpop.f32.mrf.mxu0 }
 0x1b3   : > { %v1253_v44 = vpop.f32.mrf.mxu1  ;;  %v4289_v42 = vmul.f32 %v1639_v22, %v4270_v24  ;;  %v1750_v63 = vmul.f32 %v1706_v28, %v4274_v25  ;;  %v1624_v59 = vadd.f32 %v1022_v54, %v1020_v33  ;;  %v1640_v47 = vsub.f32 %v1022_v54, %v1020_v33  ;;  %v4304_v22 = vld [vmem:[#allocation7 + $0xa0] sm:$0xff]  ;;  %v4306_v28 = vld [vmem:[#allocation7 + $0xa8] sm:$0xff] }
 0x1b4   : > { %5698 = vst [vmem:[#allocation65_spill] sm:$0xff] %v4286_v18  ;;  %v4295_v35 = vmul.f32 %v2281_v45, %v4002_v37  ;;  %v4298_v9 = vmul.f32 %v2297_v49, %v4004_v14  ;;  %v1024_v37 = vpop.f32.mrf.mxu0  ;;  %v4312_v49 = vld [vmem:[#allocation8 + $0x88] sm:$0xff]  ;;  %v1718_v33 = vsub.f32 %v4102_v13, %v4093_v62  ;;  %v1719_v54 = vsub.f32 %v4116_v38, %v4110_v6  ;;  %v4322_v14 = vld [vmem:[#allocation8 + $0xb0] sm:$0xff] }
 0x1b5   : > { %v1255_v30 = vpop.f32.mrf.mxu1  ;;  %v1770_v11 = vpack.c.bf16 %v1752_v2, %v1750_v63  ;;  %v1704_v8 = vadd.f32 %v4130_v40, %v4123_v57  ;;  %v4336_v2 = vld [vmem:[#allocation8 + $0xa0] sm:$0xff]  ;;  %v4339_v40 = vmul.f32 %v1624_v59, %v4304_v22 }
 0x1b6   : > { %5699 = vst [vmem:[#allocation66_spill] sm:$0xff] %v4295_v35  ;;  %5700 = vst [vmem:[#allocation67_spill] sm:$0xff] %v4298_v9  ;;  %v2282_v5 = vadd.f32 %v1255_v30, %v1253_v44  ;;  %v2298_v29 = vsub.f32 %v1255_v30, %v1253_v44  ;;  %v1705_v44 = vadd.f32 %v4144_v3, %v4138_v10  ;;  %v1026_v53 = vpop.f32.mrf.mxu0  ;;  %v4330_v9 = vld [vmem:[#allocation7 + $0xb0] sm:$0xff]  ;;  %v4334_v3 = vld [vmem:[#allocation8 + $0x98] sm:$0xff] }
 0x1b7   : > { %v1257_v30 = vpop.f32.mrf.mxu1  ;;  %v1769_v35 = vpack.c.bf16 %v1749_v16, %v1747_v61  ;;  %5703 = vst [vmem:[#allocation70_spill] sm:$0xff] %v4339_v40  ;;  %v1641_v57 = vsub.f32 %v1026_v53, %v1024_v37  ;;  %v4382_v40 = vld [vmem:[#allocation8 + $0x90] sm:$0xff] }
 0x1b8   : > { %v4325_v45 = vmul.f32 %v2282_v5, %v4024_v51  ;;  %v4328_v41 = vmul.f32 %v2298_v29, %v4026_v52  ;;  %v4342_v51 = vmul.f32 %v1640_v47, %v4306_v28  ;;  %v1625_v52 = vadd.f32 %v1026_v53, %v1024_v37  ;;  %v1030_v63 = vpop.f32.mrf.mxu0 }
 0x1b9   : > { %v1259_v10 = vpop.f32.mrf.mxu1  ;;  %1777 = vmatpush1.bf16.xpose.msra.mxu1 %v1770_v11  ;;  %v1743_v5 = vmul.f32 %v1718_v33, %v4312_v49  ;;  %v1748_v29 = vmul.f32 %v1705_v44, %v4322_v14  ;;  %v4351_v59 = vmul.f32 %v1641_v57, %v4332_v46  ;;  %v1745_v53 = vmul.f32 %v1719_v54, %v4334_v3  ;;  %v4366_v57 = vld [vmem:[#allocation7 + $0xc0] sm:$0xff] }
 0x1ba   : > { %5701 = vst [vmem:[#allocation68_spill] sm:$0xff] %v4325_v45  ;;  %5702 = vst [vmem:[#allocation69_spill] sm:$0xff] %v4328_v41  ;;  %v2283_v61 = vadd.f32 %v1259_v10, %v1257_v30  ;;  %v2299_v16 = vsub.f32 %v1259_v10, %v1257_v30  ;;  %1778 = vmatprep.subr.bf16.mxu1 %v1769_v35  ;;  %v4348_v11 = vmul.f32 %v1625_v52, %v4330_v9  ;;  %v1032_v37 = vpop.f32.mrf.mxu0  ;;  %v4390_v45 = vld [vmem:[#allocation7 + $0xd0] sm:$0xff] }
 0x1bb   : > { %5704 = vst [vmem:[#allocation71_spill] sm:$0xff] %v4342_v51  ;;  %v1263_v18 = vpop.f32.mrf.mxu1  ;;  %v1746_v35 = vmul.f32 %v1704_v8, %v4336_v2  ;;  %v1626_v44 = vadd.f32 %v1032_v37, %v1030_v63  ;;  %v1642_v30 = vsub.f32 %v1032_v37, %v1030_v63  ;;  %v4368_v8 = vld [vmem:[#allocation7 + $0xc8] sm:$0xff]  ;;  %v1716_v63 = vsub.f32 %v4074_v23, %v4059_v15 }
 0x1bc   : > { %5705 = vst [vmem:[#allocation72_spill] sm:$0xff] %v4348_v11  ;;  %v4357_v47 = vmul.f32 %v2283_v61, %v4028_v55  ;;  %v4360_v26 = vmul.f32 %v2299_v16, %v4030_v60  ;;  %v1034_v55 = vpop.f32.mrf.mxu0  ;;  %v1560_v16 = vld [vmem:[#allocation8 + $0x68] sm:$0xff]  ;;  %v1717_v37 = vsub.f32 %v4086_v48, %v4082_v32  ;;  %v1702_v10 = vadd.f32 %v4102_v13, %v4093_v62  ;;  %v4392_v32 = vld [vmem:[#allocation7 + $0xd8] sm:$0xff]  ;;  %v4394_v48 = vld [vmem:[#allocation8 + $0x80] sm:$0xff] }
 0x1bd   : > { %v1265_v33 = vpop.f32.mrf.mxu1  ;;  %v1768_v27 = vpack.c.bf16 %v1748_v29, %v1746_v35  ;;  %v1767_v15 = vpack.c.bf16 %v1745_v53, %v1743_v5  ;;  %v4397_v62 = vmul.f32 %v1626_v44, %v4366_v57  ;;  %v1739_v35 = vmul.f32 %v1716_v63, %v1560_v16  ;;  %v5726_v11 = vld [vmem:[#allocation32_spill] sm:$0xff] }
 0x1be   : > { %5706 = vst [vmem:[#allocation73_spill] sm:$0xff] %v4357_v47  ;;  %5707 = vst [vmem:[#allocation74_spill] sm:$0xff] %v4360_v26  ;;  %v2284_v52 = vadd.f32 %v1265_v33, %v1263_v18  ;;  %v2300_v54 = vsub.f32 %v1265_v33, %v1263_v18  ;;  %v1703_v18 = vadd.f32 %v4116_v38, %v4110_v6  ;;  %v1036_v23 = vpop.f32.mrf.mxu0  ;;  %v1562_v38 = vld [vmem:[#allocation8 + $0x78] sm:$0xff]  ;;  %v5718_v26 = vld [vmem:[#allocation29_spill] sm:$0xff] }
 0x1bf   : > { %v1267_v33 = vpop.f32.mrf.mxu1  ;;  %5710 = vst [vmem:[#allocation77_spill] sm:$0xff] %v4397_v62  ;;  %v1627_v13 = vadd.f32 %v1036_v23, %v1034_v55  ;;  %v1742_v47 = vmul.f32 %v1702_v10, %v4394_v48  ;;  %v4436_v10 = vld [vmem:[#allocation7 + $0xf8] sm:$0xff] }
 0x1c0   : > { %v4385_v60 = vmul.f32 %v2284_v52, %v4050_v20  ;;  %v4388_v61 = vmul.f32 %v2300_v54, %v4052_v21  ;;  %v4400_v20 = vmul.f32 %v1642_v30, %v4368_v8  ;;  %v1643_v21 = vsub.f32 %v1036_v23, %v1034_v55  ;;  %v1040_v53 = vpop.f32.mrf.mxu0  ;;  %v5714_v55 = vld [vmem:[#allocation23_spill] sm:$0xff] }
 0x1c1   : > { %v1269_v6 = vpop.f32.mrf.mxu1  ;;  %1779 = vmatpush1.bf16.xpose.msra.mxu1 %v1768_v27  ;;  %v1744_v52 = vmul.f32 %v1703_v18, %v4382_v40  ;;  %v4405_v27 = vmul.f32 %v1627_v13, %v4390_v45  ;;  %v1741_v30 = vmul.f32 %v1717_v37, %v1562_v38 }
 0x1c2   : > { %5708 = vst [vmem:[#allocation75_spill] sm:$0xff] %v4385_v60  ;;  %5709 = vst [vmem:[#allocation76_spill] sm:$0xff] %v4388_v61  ;;  %v2285_v29 = vadd.f32 %v1269_v6, %v1267_v33  ;;  %v2301_v5 = vsub.f32 %v1269_v6, %v1267_v33  ;;  %1780 = vmatprep.subr.bf16.mxu1 %v1767_v15  ;;  %v4408_v44 = vmul.f32 %v1643_v21, %v4392_v32  ;;  %v5716_v33 = vld [vmem:[#allocation24_spill] sm:$0xff]  ;;  %v1042_v34 = vpop.f32.mrf.mxu0 }
 0x1c3   : > { %5711 = vst [vmem:[#allocation78_spill] sm:$0xff] %v4400_v20  ;;  %v1273_v54 = vpop.f32.mrf.mxu1  ;;  %5712 = vst [vmem:[#allocation79_spill] sm:$0xff] %v4405_v27  ;;  %v1628_v6 = vadd.f32 %v1042_v34, %v1040_v53  ;;  %v1644_v18 = vsub.f32 %v1042_v34, %v1040_v53  ;;  %v1766_v34 = vpack.c.bf16 %v1744_v52, %v1742_v47 }
 0x1c4   : > { %5713 = vst [vmem:[#allocation80_spill] sm:$0xff] %v4408_v44  ;;  %v4412_v23 = vmul.f32 %v2285_v29, %v5714_v55  ;;  %v4415_v15 = vmul.f32 %v2301_v5, %v5716_v33  ;;  %v4425_v5 = vld [vmem:[#allocation7 + $0xe0] sm:$0xff]  ;;  %v4427_v55 = vld [vmem:[#allocation7 + $0xe8] sm:$0xff]  ;;  %v1044_v33 = vpop.f32.mrf.mxu0  ;;  %v1765_v21 = vpack.c.bf16 %v1741_v30, %v1739_v35 }
 0x1c5   : > { %v1275_v63 = vpop.f32.mrf.mxu1  ;;  %v4439_v29 = vmul.f32 %v1628_v6, %v4425_v5  ;;  %v4442_v27 = vmul.f32 %v1644_v18, %v4427_v55 }
 0x1c6   : > { %5715 = vst [vmem:[#allocation23_spill] sm:$0xff] %v4412_v23  ;;  %5717 = vst [vmem:[#allocation24_spill] sm:$0xff] %v4415_v15  ;;  %v2286_v41 = vadd.f32 %v1275_v63, %v1273_v54  ;;  %v2302_v37 = vsub.f32 %v1275_v63, %v1273_v54  ;;  %v1046_v54 = vpop.f32.mrf.mxu0  ;;  %v4434_v63 = vld [vmem:[#allocation7 + $0xf0] sm:$0xff] }
 0x1c7   : > { %v1277_v53 = vpop.f32.mrf.mxu1  ;;  %5719 = vst [vmem:[#allocation29_spill] sm:$0xff] %v4439_v29  ;;  %5720 = vst [vmem:[#allocation81_spill] sm:$0xff] %v4442_v27  ;;  %v1629_v47 = vadd.f32 %v1046_v54, %v1044_v33  ;;  %v1645_v52 = vsub.f32 %v1046_v54, %v1044_v33 }
 0x1c8   : > { %v4430_v13 = vmul.f32 %v2286_v41, %v5718_v26  ;;  %v4432_v20 = vmul.f32 %v2302_v37, %v1560_v16  ;;  %v1050_v16 = vpop.f32.mrf.mxu0 }
 0x1c9   : > { %v1279_v62 = vpop.f32.mrf.mxu1  ;;  %1781 = vmatpush1.bf16.xpose.msra.mxu1 %v1766_v34  ;;  %v4445_v30 = vmul.f32 %v1629_v47, %v4434_v63  ;;  %v4448_v37 = vmul.f32 %v1645_v52, %v4436_v10  ;;  %v5723_v34 = vld [vmem:[#allocation30_spill] sm:$0xff] }
 0x1ca   : > { %v2287_v41 = vadd.f32 %v1279_v62, %v1277_v53  ;;  %v2303_v26 = vsub.f32 %v1279_v62, %v1277_v53  ;;  %1782 = vmatprep.subr.bf16.mxu1 %v1765_v21  ;;  %v1052_v18 = vpop.f32.mrf.mxu0  ;;  %v5727_v62 = vld [vmem:[#allocation31_spill] sm:$0xff]  ;;  %v5729_v21 = vld [vmem:[#allocation34_spill] sm:$0xff] }
 0x1cb   : > { %v1283_v35 = vpop.f32.mrf.mxu1  ;;  %5721 = vst [vmem:[#allocation82_spill] sm:$0xff] %v4445_v30  ;;  %5722 = vst [vmem:[#allocation83_spill] sm:$0xff] %v4448_v37  ;;  %v2200_v23 = vadd.f32 %v1052_v18, %v1050_v16  ;;  %v2216_v33 = vsub.f32 %v1052_v18, %v1050_v16  ;;  %v5728_v27 = vpack.c.bf16 %v5726_v11, %v5727_v62  ;;  %v5733_v11 = vld [vmem:[#allocation35_spill] sm:$0xff] }
 0x1cc   : > { %v4451_v44 = vmul.f32 %v2287_v41, %v5723_v34  ;;  %v4453_v6 = vmul.f32 %v2303_v26, %v1562_v38  ;;  %v1054_v38 = vpop.f32.mrf.mxu0  ;;  %v5724_v26 = vld [vmem:[#allocation33_spill] sm:$0xff] }
 0x1cd   : > { %v1285_v60 = vpop.f32.mrf.mxu1  ;;  %v4464_v34 = vmul.f32 %v2200_v23, %v5724_v26  ;;  %v2233_v29 = vmul.f32 %v2216_v33, %v5729_v21  ;;  %v5730_v23 = vld [vmem:[#allocation28_spill] sm:$0xff]  ;;  %v5731_v26 = vld [vmem:[#allocation26_spill] sm:$0xff] }
 0x1ce   : > { %v2288_v53 = vadd.f32 %v1285_v60, %v1283_v35  ;;  %v2304_v54 = vsub.f32 %v1285_v60, %v1283_v35  ;;  %v1056_v16 = vpop.f32.mrf.mxu0  ;;  %v5732_v61 = vpack.c.bf16 %v5730_v23, %v5731_v26  ;;  %v5735_v33 = vld [vmem:[#allocation36_spill] sm:$0xff] }
 0x1cf   : > { %v1287_v41 = vpop.f32.mrf.mxu1  ;;  %5725 = vst [vmem:[#allocation30_spill] sm:$0xff] %v4464_v34  ;;  %v2201_v60 = vadd.f32 %v1056_v16, %v1054_v38  ;;  %v2217_v35 = vsub.f32 %v1056_v16, %v1054_v38  ;;  %v5738_v23 = vld [vmem:[#allocation40_spill] sm:$0xff]  ;;  %v5743_v16 = vld [vmem:[#allocation22_spill] sm:$0xff]  ;;  %v5746_v34 = vld [vmem:[#allocation41_spill] sm:$0xff] }
 0x1d0   : > { %v4471_v47 = vmul.f32 %v2288_v53, %v4394_v48  ;;  %v4474_v52 = vmul.f32 %v2304_v54, %v4312_v49  ;;  %v1060_v15 = vpop.f32.mrf.mxu0 }
 0x1d1   : > { %v1289_v18 = vpop.f32.mrf.mxu1  ;;  %1783 = vmatpush1.bf16.xpose.msra.mxu1 %v5728_v27  ;;  %v4480_v27 = vmul.f32 %v2201_v60, %v5733_v11  ;;  %v2235_v62 = vmul.f32 %v2217_v35, %v5735_v33  ;;  %v5741_v33 = vld [vmem:[#allocation25_spill] sm:$0xff] }
 0x1d2   : > { %v2289_v30 = vadd.f32 %v1289_v18, %v1287_v41  ;;  %v2305_v37 = vsub.f32 %v1289_v18, %v1287_v41  ;;  %1784 = vmatprep.subr.bf16.mxu1 %v5732_v61  ;;  %v1062_v49 = vpop.f32.mrf.mxu0 }
 0x1d3   : > { %v1293_v51 = vpop.f32.mrf.mxu1  ;;  %5734 = vst [vmem:[#allocation33_spill] sm:$0xff] %v4480_v27  ;;  %v2202_v38 = vadd.f32 %v1062_v49, %v1060_v15  ;;  %v2218_v61 = vsub.f32 %v1062_v49, %v1060_v15  ;;  %v2265_v41 = vpack.c.bf16 %v2235_v62, %v2233_v29  ;;  %v5740_v29 = vld [vmem:[#allocation27_spill] sm:$0xff] }
 0x1d4   : > { %v4484_v21 = vmul.f32 %v2289_v30, %v4382_v40  ;;  %v4487_v48 = vmul.f32 %v2305_v37, %v4334_v3  ;;  %v1064_v30 = vpop.f32.mrf.mxu0  ;;  %v5736_v3 = vld [vmem:[#allocation39_spill] sm:$0xff]  ;;  %v5742_v62 = vpack.c.bf16 %v5740_v29, %v5741_v33  ;;  %v5748_v29 = vld [vmem:[#allocation42_spill] sm:$0xff] }
 0x1d5   : > { %v1295_v53 = vpop.f32.mrf.mxu1  ;;  %v4496_v37 = vmul.f32 %v2202_v38, %v5736_v3  ;;  %v4499_v26 = vmul.f32 %v2218_v61, %v5738_v23  ;;  %2392 = vmatprep.mubr.bf16.mxu0 %v2265_v41  ;;  %v5744_v61 = vld [vmem:[#allocation20_spill] sm:$0xff] }
 0x1d6   : > { %v2290_v18 = vadd.f32 %v1295_v53, %v1293_v51  ;;  %v2306_v60 = vsub.f32 %v1295_v53, %v1293_v51  ;;  %v1066_v11 = vpop.f32.mrf.mxu0  ;;  %v5745_v23 = vpack.c.bf16 %v5743_v16, %v5744_v61 }
 0x1d7   : > { %v1297_v35 = vpop.f32.mrf.mxu1  ;;  %5737 = vst [vmem:[#allocation32_spill] sm:$0xff] %v4496_v37  ;;  %5739 = vst [vmem:[#allocation31_spill] sm:$0xff] %v4499_v26  ;;  %v2203_v49 = vadd.f32 %v1066_v11, %v1064_v30  ;;  %v2219_v51 = vsub.f32 %v1066_v11, %v1064_v30  ;;  %v5758_v26 = vld [vmem:[#allocation49_spill] sm:$0xff] }
 0x1d8   : > { %v4505_v53 = vmul.f32 %v2290_v18, %v4336_v2  ;;  %v4508_v54 = vmul.f32 %v2306_v60, %v4250_v0  ;;  %v1070_v41 = vpop.f32.mrf.mxu0 }
 0x1d9   : > { %v1299_v15 = vpop.f32.mrf.mxu1  ;;  %1785 = vmatpush1.bf16.xpose.msra.mxu1 %v5742_v62  ;;  %v4514_v27 = vmul.f32 %v2203_v49, %v5746_v34  ;;  %v4517_v33 = vmul.f32 %v2219_v51, %v5748_v29  ;;  %v5750_v51 = vld [vmem:[#allocation47_spill] sm:$0xff]  ;;  %v5752_v29 = vld [vmem:[#allocation21_spill] sm:$0xff] }
 0x1da   : > { %v2291_v38 = vadd.f32 %v1299_v15, %v1297_v35  ;;  %v2307_v3 = vsub.f32 %v1299_v15, %v1297_v35  ;;  %1786 = vmatprep.subr.bf16.mxu1 %v5745_v23  ;;  %v1072_v18 = vpop.f32.mrf.mxu0 }
 0x1db   : > { %v1303_v40 = vpop.f32.mrf.mxu1  ;;  %5747 = vst [vmem:[#allocation34_spill] sm:$0xff] %v4514_v27  ;;  %5749 = vst [vmem:[#allocation28_spill] sm:$0xff] %v4517_v33  ;;  %v2204_v30 = vadd.f32 %v1072_v18, %v1070_v41  ;;  %v2220_v35 = vsub.f32 %v1072_v18, %v1070_v41  ;;  %v5753_v18 = vld [vmem:[#allocation19_spill] sm:$0xff] }
 0x1dc   : > { %v4520_v2 = vmul.f32 %v2291_v38, %v4322_v14  ;;  %v4523_v0 = vmul.f32 %v2307_v3, %v4272_v17  ;;  %v1074_v17 = vpop.f32.mrf.mxu0  ;;  %v5751_v3 = vld [vmem:[#allocation48_spill] sm:$0xff]  ;;  %v5754_v34 = vpack.c.bf16 %v5752_v29, %v5753_v18  ;;  %v5759_v29 = vld [vmem:[#allocation50_spill] sm:$0xff] }
 0x1dd   : > { %v1305_v60 = vpop.f32.mrf.mxu1  ;;  %v4534_v38 = vmul.f32 %v2204_v30, %v5750_v51  ;;  %v4537_v61 = vmul.f32 %v2220_v35, %v5751_v3  ;;  %v5755_v30 = vld [vmem:[#allocation18_spill] sm:$0xff]  ;;  %v5756_v51 = vld [vmem:[#allocation16_spill] sm:$0xff] }
 0x1de   : > { %v2292_v15 = vadd.f32 %v1305_v60, %v1303_v40  ;;  %v2308_v62 = vsub.f32 %v1305_v60, %v1303_v40  ;;  %v1076_v23 = vpop.f32.mrf.mxu0  ;;  %v5757_v27 = vpack.c.bf16 %v5755_v30, %v5756_v51  ;;  %v5760_v51 = vld [vmem:[#allocation17_spill] sm:$0xff] }
 0x1df   : > { %v1307_v49 = vpop.f32.mrf.mxu1  ;;  %v2205_v16 = vadd.f32 %v1076_v23, %v1074_v17  ;;  %v2221_v11 = vsub.f32 %v1076_v23, %v1074_v17 }
 0x1e0   : > { %v4543_v40 = vmul.f32 %v2292_v15, %v4274_v25  ;;  %v2337_v60 = vmul.f32 %v2308_v62, %v4202_v31  ;;  %v1080_v35 = vpop.f32.mrf.mxu0 }
 0x1e1   : > { %v1309_v41 = vpop.f32.mrf.mxu1  ;;  %1787 = vmatpush1.bf16.xpose.msra.mxu1 %v5754_v34  ;;  %v4550_v33 = vmul.f32 %v2205_v16, %v5758_v26  ;;  %v4553_v34 = vmul.f32 %v2221_v11, %v5759_v29 }
 0x1e2   : > { %v2293_v14 = vadd.f32 %v1309_v41, %v1307_v49  ;;  %v2309_v37 = vsub.f32 %v1309_v41, %v1307_v49  ;;  %1788 = vmatprep.subr.bf16.mxu1 %v5757_v27  ;;  %v1082_v15 = vpop.f32.mrf.mxu0 }
 0x1e3   : > { %v1313_v3 = vpop.f32.mrf.mxu1  ;;  %v2206_v62 = vadd.f32 %v1082_v15, %v1080_v35  ;;  %v2222_v49 = vsub.f32 %v1082_v15, %v1080_v35  ;;  %v5761_v35 = vld [vmem:[#allocation15_spill] sm:$0xff] }
 0x1e4   : > { %v2338_v17 = vmul.f32 %v2293_v14, %v4260_v50  ;;  %v2339_v25 = vmul.f32 %v2309_v37, %v4206_v1  ;;  %v1084_v18 = vpop.f32.mrf.mxu0  ;;  %v5762_v29 = vpack.c.bf16 %v5760_v51, %v5761_v35 }
 0x1e5   : > { %v1315_v31 = vpop.f32.mrf.mxu1  ;;  %v4563_v50 = vmul.f32 %v2206_v62, %v4198_v43  ;;  %v4566_v1 = vmul.f32 %v2222_v49, %v4200_v19  ;;  %v5764_v43 = vld [vmem:[#allocation56_spill] sm:$0xff]  ;;  %v5765_v19 = vld [vmem:[#allocation57_spill] sm:$0xff] }
 0x1e6   : > { %v2356_v26 = vpack.c.bf16 %v2338_v17, %v4543_v40  ;;  %v2294_v16 = vadd.f32 %v1315_v31, %v1313_v3  ;;  %v2310_v41 = vsub.f32 %v1315_v31, %v1313_v3  ;;  %v2357_v11 = vpack.c.bf16 %v2339_v25, %v2337_v60  ;;  %v1086_v37 = vpop.f32.mrf.mxu0  ;;  %v5763_v40 = vld [vmem:[#allocation55_spill] sm:$0xff] }
 0x1e7   : > { %v1317_v30 = vpop.f32.mrf.mxu1  ;;  %v2207_v15 = vadd.f32 %v1086_v37, %v1084_v18  ;;  %v2223_v27 = vsub.f32 %v1086_v37, %v1084_v18 }
 0x1e8   : > { %v2340_v17 = vmul.f32 %v2294_v16, %v5763_v40  ;;  %v2341_v60 = vmul.f32 %v2310_v41, %v4216_v36  ;;  %v1090_v31 = vpop.f32.mrf.mxu0 }
 0x1e9   : > { %v1319_v14 = vpop.f32.mrf.mxu1  ;;  %1789 = vmatpush1.bf16.xpose.msra.mxu1 %v5762_v29  ;;  %v4574_v62 = vmul.f32 %v2207_v15, %v5764_v43  ;;  %v4577_v49 = vmul.f32 %v2223_v27, %v5765_v19 }
 0x1ea   : > { %v2295_v3 = vadd.f32 %v1319_v14, %v1317_v30  ;;  %v2311_v25 = vsub.f32 %v1319_v14, %v1317_v30  ;;  %v1092_v35 = vpop.f32.mrf.mxu0 }
 0x1eb   : > { %v2271_v18 = vpack.c.bf16 %v4577_v49, %v4566_v1  ;;  %v2270_v36 = vpack.c.bf16 %v4574_v62, %v4563_v50  ;;  %v2208_v16 = vadd.f32 %v1092_v35, %v1090_v31  ;;  %v2224_v41 = vsub.f32 %v1092_v35, %v1090_v31 }
 0x1ec   : > { %v2342_v23 = vmul.f32 %v2295_v3, %v4218_v39  ;;  %v2343_v51 = vmul.f32 %v2311_v25, %v4220_v58  ;;  %v1094_v14 = vpop.f32.mrf.mxu0  ;;  %v5766_v39 = vld [vmem:[#allocation38_spill] sm:$0xff]  ;;  %v5767_v58 = vld [vmem:[#allocation37_spill] sm:$0xff]  ;;  %v5770_v25 = vld [vmem:[#allocation44_spill] sm:$0xff] }
 0x1ed   : > { %v4586_v29 = vmul.f32 %v2208_v16, %v4246_v56  ;;  %v4589_v27 = vmul.f32 %v2224_v41, %v4248_v7  ;;  %v5768_v15 = vpack.c.bf16 %v5766_v39, %v5767_v58  ;;  %v5769_v3 = vld [vmem:[#allocation46_spill] sm:$0xff]  ;;  %v5776_v58 = vld [vmem:[#allocation52_spill] sm:$0xff] }
 0x1ee   : > { %v2358_v30 = vpack.c.bf16 %v2342_v23, %v2340_v17  ;;  %v2359_v37 = vpack.c.bf16 %v2343_v51, %v2341_v60  ;;  %v1096_v40 = vpop.f32.mrf.mxu0  ;;  %v5771_v43 = vpack.c.bf16 %v5769_v3, %v5770_v25  ;;  %v5775_v39 = vld [vmem:[#allocation54_spill] sm:$0xff]  ;;  %v5778_v25 = vpack.c.bf16 %v4523_v0, %v4508_v54 }
 0x1ef   : > { %v2209_v23 = vadd.f32 %v1096_v40, %v1094_v14  ;;  %v2225_v17 = vsub.f32 %v1096_v40, %v1094_v14 }
 0x1f0   : > { %1807 = vmatmul.mubr.bf16.vlgmr.msra.gmra.mxu1 %v5768_v15  ;;  %2360 = vmatprep.subr.bf16.mxu0 %v2359_v37  ;;  %v1100_v60 = vpop.f32.mrf.mxu0  ;;  %v5773_v37 = vld [vmem:[#allocation43_spill] sm:$0xff]  ;;  %v5777_v15 = vpack.c.bf16 %v5775_v39, %v5776_v58 }
 0x1f1   : > { %2361 = vmatpush1.bf16.xpose.msra.mxu0 %v2358_v30  ;;  %1814 = vmatprep.mubr.bf16.mxu1 %v5771_v43  ;;  %v4598_v56 = vmul.f32 %v2209_v23, %v4268_v12  ;;  %v4601_v7 = vmul.f32 %v2225_v17, %v4270_v24  ;;  %v5772_v12 = vld [vmem:[#allocation45_spill] sm:$0xff] }
 0x1f2   : > { %2362 = vmatprep.subr.bf16.mxu0 %v2357_v11  ;;  %v1102_v31 = vpop.f32.mrf.mxu0  ;;  %v5774_v24 = vpack.c.bf16 %v5772_v12, %v5773_v37  ;;  %v5782_v12 = vpack.c.bf16 %v4520_v2, %v4505_v53  ;;  %v5783_v37 = vld [vmem:[#allocation61_spill] sm:$0xff] }
 0x1f3   : > { %v2272_v19 = vpack.c.bf16 %v4598_v56, %v4586_v29  ;;  %v2210_v51 = vadd.f32 %v1102_v31, %v1100_v60  ;;  %v2226_v35 = vsub.f32 %v1102_v31, %v1100_v60  ;;  %v2273_v16 = vpack.c.bf16 %v4601_v7, %v4589_v27 }
 0x1f4   : > { %v1104_v41 = vpop.f32.mrf.mxu0 }
 0x1f5   : > { %v4608_v30 = vmul.f32 %v2210_v51, %v4304_v22  ;;  %v4611_v11 = vmul.f32 %v2226_v35, %v4306_v28  ;;  %v5780_v35 = vld [vmem:[#allocation51_spill] sm:$0xff] }
 0x1f6   : > { %v1106_v14 = vpop.f32.mrf.mxu0 }
 0x1f7   : > { %v2211_v40 = vadd.f32 %v1106_v14, %v1104_v41  ;;  %v2227_v3 = vsub.f32 %v1106_v14, %v1104_v41 }
 0x1f8   : > { %1815 = vmatmul.mubr.bf16.gmra.mxu1 %v5774_v24  ;;  %v1110_v22 = vpop.f32.mrf.mxu0  ;;  %v5784_v24 = vld [vmem:[#allocation59_spill] sm:$0xff] }
 0x1f9   : > { %2363 = vmatpush1.bf16.xpose.msra.mxu0 %v2356_v26  ;;  %1822 = vmatprep.mubr.bf16.mxu1 %v5777_v15  ;;  %v4623_v28 = vmul.f32 %v2211_v40, %v4330_v9  ;;  %v4626_v43 = vmul.f32 %v2227_v3, %v4332_v46  ;;  %v5779_v9 = vld [vmem:[#allocation53_spill] sm:$0xff]  ;;  %v5785_v14 = vpack.c.bf16 %v5783_v37, %v5784_v24  ;;  %v5794_v37 = vld [vmem:[#allocation64_spill] sm:$0xff] }
 0x1fa   : > { %2364 = vmatprep.subr.bf16.mxu0 %v5778_v25  ;;  %v1112_v23 = vpop.f32.mrf.mxu0  ;;  %v5781_v46 = vpack.c.bf16 %v5779_v9, %v5780_v35  ;;  %v5791_v9 = vpack.c.bf16 %v4289_v42, %v4280_v4 }
 0x1fb   : > { %v2212_v17 = vadd.f32 %v1112_v23, %v1110_v22  ;;  %v2228_v60 = vsub.f32 %v1112_v23, %v1110_v22  ;;  %v2275_v31 = vpack.c.bf16 %v4626_v43, %v4611_v11  ;;  %v5839_v22 = vld [vmem:[#allocation32_spill] sm:$0xff]  ;;  %v5850_v43 = vpack.c.bf16 %v4623_v28, %v4608_v30 }
 0x1fc   : > { %v1114_v51 = vpop.f32.mrf.mxu0 }
 0x1fd   : > { %v4633_v54 = vmul.f32 %v2212_v17, %v4366_v57  ;;  %v4636_v0 = vmul.f32 %v2228_v60, %v4368_v8  ;;  %v5786_v57 = vpack.c.bf16 %v4487_v48, %v4474_v52  ;;  %v5788_v17 = vld [vmem:[#allocation58_spill] sm:$0xff] }
 0x1fe   : > { %v1116_v41 = vpop.f32.mrf.mxu0 }
 0x1ff   : > { %v2213_v39 = vadd.f32 %v1116_v41, %v1114_v51  ;;  %v2229_v58 = vsub.f32 %v1116_v41, %v1114_v51  ;;  %v5790_v51 = vpack.c.bf16 %v4484_v21, %v4471_v47 }
 0x200   : > { %1823 = vmatmul.mubr.bf16.gmra.mxu1 %v5781_v46  ;;  %v1120_v8 = vpop.f32.mrf.mxu0 }
 0x201   : > { %2365 = vmatpush1.bf16.xpose.msra.mxu0 %v5782_v12  ;;  %1830 = vmatprep.mubr.bf16.mxu1 %v5785_v14  ;;  %v4651_v15 = vmul.f32 %v2213_v39, %v4390_v45  ;;  %v4654_v40 = vmul.f32 %v2229_v58, %v4392_v32  ;;  %v5787_v45 = vld [vmem:[#allocation60_spill] sm:$0xff]  ;;  %v5797_v14 = vld [vmem:[#allocation71_spill] sm:$0xff] }
 0x202   : > { %2366 = vmatprep.subr.bf16.mxu0 %v5786_v57  ;;  %v1122_v3 = vpop.f32.mrf.mxu0  ;;  %v5789_v32 = vpack.c.bf16 %v5787_v45, %v5788_v17  ;;  %v5798_v39 = vpack.c.bf16 %v4351_v59, %v5797_v14  ;;  %v5799_v57 = vld [vmem:[#allocation24_spill] sm:$0xff]  ;;  %v5803_v45 = vld [vmem:[#allocation70_spill] sm:$0xff] }
 0x203   : > { %v2214_v2 = vadd.f32 %v1122_v3, %v1120_v8  ;;  %v2230_v25 = vsub.f32 %v1122_v3, %v1120_v8  ;;  %v5800_v8 = vld [vmem:[#allocation76_spill] sm:$0xff] }
 0x204   : > { %v1124_v23 = vpop.f32.mrf.mxu0  ;;  %v5801_v3 = vpack.c.bf16 %v5799_v57, %v5800_v8  ;;  %v5814_v57 = vld [vmem:[#allocation79_spill] sm:$0xff]  ;;  %v5815_v8 = vld [vmem:[#allocation77_spill] sm:$0xff] }
 0x205   : > { %v4661_v52 = vmul.f32 %v2214_v2, %v4425_v5  ;;  %v4664_v48 = vmul.f32 %v2230_v25, %v4427_v55  ;;  %v5792_v5 = vpack.c.bf16 %v4453_v6, %v4432_v20  ;;  %v5793_v6 = vld [vmem:[#allocation65_spill] sm:$0xff] }
 0x206   : > { %v1126_v60 = vpop.f32.mrf.mxu0 }
 0x207   : > { %v2215_v35 = vadd.f32 %v1126_v60, %v1124_v23  ;;  %v2231_v46 = vsub.f32 %v1126_v60, %v1124_v23  ;;  %v5806_v60 = vld [vmem:[#allocation75_spill] sm:$0xff] }
 0x208   : > { %1831 = vmatmul.mubr.bf16.gmra.mxu1 %v5789_v32  ;;  %v4678_v55 = vpop.f32.mrf.mxu0  ;;  %v5805_v32 = vld [vmem:[#allocation23_spill] sm:$0xff] }
 0x209   : > { %2367 = vmatpush1.bf16.xpose.msra.mxu0 %v5790_v51  ;;  %1838 = vmatprep.mubr.bf16.mxu1 %v5791_v9  ;;  %v4681_v41 = vmul.f32 %v2215_v35, %v4434_v63  ;;  %v4684_v12 = vmul.f32 %v2231_v46, %v4436_v10  ;;  %v5795_v63 = vpack.c.bf16 %v5793_v6, %v5794_v37  ;;  %v5808_v9 = vld [vmem:[#allocation80_spill] sm:$0xff]  ;;  %v5809_v35 = vld [vmem:[#allocation78_spill] sm:$0xff]  ;;  %v5812_v37 = vld [vmem:[#allocation69_spill] sm:$0xff] }
 0x20a   : > { %2368 = vmatprep.subr.bf16.mxu0 %v5792_v5  ;;  %v4686_v47 = vpop.f32.mrf.mxu0  ;;  %v5796_v10 = vpack.c.bf16 %v4451_v44, %v4430_v13  ;;  %v5802_v13 = vld [vmem:[#allocation72_spill] sm:$0xff]  ;;  %v5807_v51 = vpack.c.bf16 %v5805_v32, %v5806_v60  ;;  %v5810_v46 = vpack.c.bf16 %v5808_v9, %v5809_v35  ;;  %v5811_v6 = vld [vmem:[#allocation74_spill] sm:$0xff]  ;;  %v5820_v60 = vld [vmem:[#allocation83_spill] sm:$0xff] }
 0x20b   : > { %v5804_v59 = vpack.c.bf16 %v5802_v13, %v5803_v45  ;;  %v5817_v45 = vld [vmem:[#allocation73_spill] sm:$0xff]  ;;  %v5823_v35 = vld [vmem:[#allocation67_spill] sm:$0xff]  ;;  %v5835_v44 = vld [vmem:[#allocation28_spill] sm:$0xff] }
 0x20c   : > { %v4692_v21 = vpop.f32.mrf.mxu0  ;;  %v5836_v5 = vld [vmem:[#allocation31_spill] sm:$0xff] }
 0x20d   : > { %v5837_v42 = vpack.c.bf16 %v5835_v44, %v5836_v5 }
 0x20e   : > { %v4699_v24 = vpop.f32.mrf.mxu0 }
 0x210   : > { %1839 = vmatmul.mubr.bf16.gmra.mxu1 %v5795_v63  ;;  %v4712_v2 = vpop.f32.mrf.mxu0  ;;  %v5813_v63 = vpack.c.bf16 %v5811_v6, %v5812_v37 }
 0x211   : > { %2369 = vmatpush1.bf16.xpose.msra.mxu0 %v5796_v10  ;;  %1846 = vmatprep.mubr.bf16.mxu1 %v5798_v39 }
 0x212   : > { %2370 = vmatprep.subr.bf16.mxu0 %v5801_v3  ;;  %v4714_v25 = vpop.f32.mrf.mxu0  ;;  %v5816_v3 = vpack.c.bf16 %v5814_v57, %v5815_v8  ;;  %v5826_v8 = vld [vmem:[#allocation82_spill] sm:$0xff] }
 0x214   : > { %v4716_v23 = vpop.f32.mrf.mxu0 }
 0x216   : > { %v4723_v17 = vpop.f32.mrf.mxu0 }
 0x218   : > { %1847 = vmatmul.mubr.bf16.gmra.mxu1 %v5804_v59  ;;  %v4736_v10 = vpop.f32.mrf.mxu0  ;;  %v5818_v59 = vld [vmem:[#allocation68_spill] sm:$0xff] }
 0x219   : > { %2371 = vmatpush1.bf16.xpose.msra.mxu0 %v5807_v51  ;;  %1854 = vmatprep.mubr.bf16.mxu1 %v5810_v46  ;;  %v5819_v32 = vpack.c.bf16 %v5817_v45, %v5818_v59  ;;  %v5821_v51 = vld [vmem:[#allocation81_spill] sm:$0xff]  ;;  %v5824_v46 = vld [vmem:[#allocation63_spill] sm:$0xff]  ;;  %v5829_v59 = vld [vmem:[#allocation66_spill] sm:$0xff] }
 0x21a   : > { %2372 = vmatprep.subr.bf16.mxu0 %v5813_v63  ;;  %v4738_v14 = vpop.f32.mrf.mxu0  ;;  %v5822_v9 = vpack.c.bf16 %v5820_v60, %v5821_v51  ;;  %v5825_v6 = vpack.c.bf16 %v5823_v35, %v5824_v46  ;;  %v5832_v35 = vld [vmem:[#allocation33_spill] sm:$0xff]  ;;  %v5833_v46 = vld [vmem:[#allocation30_spill] sm:$0xff] }
 0x21c   : > { %v4740_v39 = vpop.f32.mrf.mxu0 }
 0x21d   : > { %v2043_v30 = vpack.c.bf16 %v4740_v39, %v4736_v10  ;;  %v5859_v39 = vpack.c.bf16 %v4723_v17, %v4714_v25  ;;  %v5862_v25 = vpack.c.bf16 %v4681_v41, %v4661_v52 }
 0x21e   : > { %v4745_v13 = vpop.f32.mrf.mxu0 }
 0x220   : > { %1855 = vmatmul.mubr.bf16.gmra.mxu1 %v5816_v3  ;;  %v4756_v37 = vpop.f32.mrf.mxu0  ;;  %v5827_v3 = vld [vmem:[#allocation29_spill] sm:$0xff] }
 0x221   : > { %2373 = vmatpush1.bf16.xpose.msra.mxu0 %v5819_v32  ;;  %1862 = vmatprep.mubr.bf16.mxu1 %v5822_v9  ;;  %v5828_v20 = vpack.c.bf16 %v5826_v8, %v5827_v3  ;;  %v5830_v32 = vld [vmem:[#allocation62_spill] sm:$0xff] }
 0x222   : > { %2374 = vmatprep.subr.bf16.mxu0 %v5825_v6  ;;  %v4758_v63 = vpop.f32.mrf.mxu0  ;;  %v5831_v4 = vpack.c.bf16 %v5829_v59, %v5830_v32  ;;  %v5834_v6 = vpack.c.bf16 %v5832_v35, %v5833_v46  ;;  %v5838_v3 = vld [vmem:[#allocation34_spill] sm:$0xff]  ;;  %v5841_v59 = vpack.c.bf16 %v4553_v34, %v4537_v61 }
 0x223   : > { %v5840_v26 = vpack.c.bf16 %v5838_v3, %v5839_v22 }
 0x224   : > { %v4760_v57 = vpop.f32.mrf.mxu0 }
 0x225   : > { %v2045_v11 = vpack.c.bf16 %v4760_v57, %v4756_v37 }
 0x226   : > { %v1392_v45 = vpop.f32.mrf.mxu0 }
 0x227   : > { %v2046_v29 = vpack.c.bf16 %v1392_v45, %v4758_v63 }
 0x228   : > { %1863 = vmatmul.mubr.bf16.gmra.mxu1 %v5828_v20  ;;  %v1396_v60 = vpop.f32.mrf.mxu0 }
 0x229   : > { %2375 = vmatpush1.bf16.xpose.msra.mxu0 %v5831_v4 }
 0x22a   : > { %v1398_v51 = vpop.f32.mrf.mxu0 }
 0x22c   : > { %v1400_v9 = vpop.f32.mrf.mxu0 }
 0x22e   : > { %v1402_v58 = vpop.f32.mrf.mxu0 }
 0x22f   : > { %v2048_v27 = vpack.c.bf16 %v1402_v58, %v1398_v51  ;;  %v5852_v58 = vpack.c.bf16 %v4654_v40, %v4636_v0  ;;  %v5856_v0 = vpack.c.bf16 %v4651_v15, %v4633_v54  ;;  %v5860_v54 = vpack.c.bf16 %v4716_v23, %v4712_v2 }
 0x230   : > { %2393 = vmatmul.mubr.bf16.vlgmr.msra.gmra.mxu0 %v5834_v6  ;;  %v1406_v53 = vpop.f32.mrf.mxu0  ;;  %v5842_v6 = vpack.c.bf16 %v4550_v33, %v4534_v38  ;;  %v5861_v15 = vpack.c.bf16 %v4699_v24, %v4686_v47  ;;  %v5863_v51 = vpack.c.bf16 %v4692_v21, %v4678_v55 }
 0x231   : > { %2400 = vmatprep.mubr.bf16.mxu0 %v5837_v42 }
 0x232   : > { %v1408_v8 = vpop.f32.mrf.mxu0 }
 0x234   : > { %v1410_v20 = vpop.f32.mrf.mxu0 }
 0x235   : > { %v2049_v62 = vpack.c.bf16 %v1410_v20, %v1406_v53  ;;  %v2044_v53 = vpack.c.bf16 %v4745_v13, %v4738_v14  ;;  %v5858_v13 = vpack.c.bf16 %v4684_v12, %v4664_v48 }
 0x236   : > { %v1412_v4 = vpop.f32.mrf.mxu0 }
 0x238   : > { %2401 = vmatmul.mubr.bf16.gmra.mxu0 %v5840_v26  ;;  %v1416_v32 = vpop.f32.mrf.mxu0 }
 0x239   : > { %2408 = vmatprep.mubr.bf16.mxu0 %v5841_v59 }
 0x23a   : > { %v1418_v35 = vpop.f32.mrf.mxu0 }
 0x23c   : > { %v1420_v46 = vpop.f32.mrf.mxu0 }
 0x23d   : > { %v2051_v1 = vpack.c.bf16 %v1420_v46, %v1416_v32 }
 0x23e   : > { %v1422_v42 = vpop.f32.mrf.mxu0 }
 0x23f   : > { %v2052_v33 = vpack.c.bf16 %v1422_v42, %v1418_v35 }
 0x240   : > { %2409 = vmatmul.mubr.bf16.gmra.mxu0 %v5842_v6  ;;  %v1426_v44 = vpop.f32.mrf.mxu0 }
 0x241   : > { %2416 = vmatprep.mubr.bf16.mxu0 %v2271_v18  ;;  %v2050_v18 = vpack.c.bf16 %v1412_v4, %v1408_v8  ;;  %v2047_v8 = vpack.c.bf16 %v1400_v9, %v1396_v60 }
 0x242   : > { %v1428_v22 = vpop.f32.mrf.mxu0 }
 0x244   : > { %v1430_v26 = vpop.f32.mrf.mxu0 }
 0x245   : > { %v2053_v61 = vpack.c.bf16 %v1430_v26, %v1426_v44 }
 0x246   : > { %v1432_v34 = vpop.f32.mrf.mxu0 }
 0x247   : > { %v2054_v38 = vpack.c.bf16 %v1432_v34, %v1428_v22 }
 0x248   : > { %2417 = vmatmul.mubr.bf16.gmra.mxu0 %v2270_v36  ;;  %v4792_v5 = vpop.f32.mrf.mxu0 }
 0x249   : > { %2424 = vmatprep.mubr.bf16.mxu0 %v2273_v16  ;;  %5843 = vst [vmem:[#allocation26_spill] sm:$0xff] %v4792_v5  ;;  %2055 = vmatprep.subr.bf16.mxu1 %v2054_v38 }
 0x24a   : > { %v4794_v49 = vpop.f32.mrf.mxu0  ;;  %2056 = vmatpush1.bf16.msra.mxu1 %v2053_v61 }
 0x24b   : > { %5844 = vst [vmem:[#allocation35_spill] sm:$0xff] %v4794_v49  ;;  %2057 = vmatprep.subr.bf16.mxu1 %v2052_v33 }
 0x24c   : > { %v4796_v3 = vpop.f32.mrf.mxu0 }
 0x24d   : > { %5845 = vst [vmem:[#allocation36_spill] sm:$0xff] %v4796_v3 }
 0x24e   : > { %v4803_v36 = vpop.f32.mrf.mxu0  ;;  %2058 = vmatpush1.bf16.msra.mxu1 %v2051_v1 }
 0x24f   : > { %5846 = vst [vmem:[#allocation39_spill] sm:$0xff] %v4803_v36  ;;  %2059 = vmatprep.subr.bf16.mxu1 %v2050_v18 }
 0x250   : > { %2425 = vmatmul.mubr.bf16.gmra.mxu0 %v2272_v19  ;;  %v4810_v16 = vpop.f32.mrf.mxu0 }
 0x251   : > { %2432 = vmatprep.mubr.bf16.mxu0 %v2275_v31  ;;  %5847 = vst [vmem:[#allocation40_spill] sm:$0xff] %v4810_v16 }
 0x252   : > { %v4812_v4 = vpop.f32.mrf.mxu0  ;;  %2060 = vmatpush1.bf16.msra.mxu1 %v2049_v62  ;;  %v1579_v62 = vlaneseq }
 0x253   : > { %5848 = vst [vmem:[#allocation27_spill] sm:$0xff] %v4812_v4  ;;  %2061 = vmatprep.subr.bf16.mxu1 %v2048_v27 }
 0x254   : > { %v4815_v56 = vpop.f32.mrf.mxu0  ;;  %v4922_v27 = vshrl.u32 %v1579_v62, 7 }
 0x255   : > { %5849 = vst [vmem:[#allocation25_spill] sm:$0xff] %v4815_v56 }
 0x256   : > { %v4824_v31 = vpop.f32.mrf.mxu0  ;;  %2062 = vmatpush1.bf16.msra.mxu1 %v2047_v8  ;;  %v4924_v8 = vand.u32 127, %v1579_v62  ;;  %v4973_v62 = vadd.s32 40, %v4922_v27 }
 0x257   : > { %5851 = vst [vmem:[#allocation22_spill] sm:$0xff] %v4824_v31  ;;  %2063 = vmatprep.subr.bf16.mxu1 %v2046_v29  ;;  %v4929_v29 = vadd.s32 8, %v4922_v27 }
 0x258   : > { %2433 = vmatmul.mubr.bf16.gmra.mxu0 %v5850_v43  ;;  %v4833_v45 = vpop.f32.mrf.mxu0  ;;  %vm1598_vm0 = vcmp.le.s32.totalorder %v4924_v8, %v4922_v27  ;;  %vm1603_vm5 = vcmp.le.s32.totalorder %v4924_v8, %v4973_v62 }
 0x259   : > { %2440 = vmatprep.mubr.bf16.mxu0 %v5852_v58  ;;  %5853 = vst [vmem:[#allocation20_spill] sm:$0xff] %v4833_v45  ;;  %vm1599_vm1 = vcmp.le.s32.totalorder %v4924_v8, %v4929_v29  ;;  %v4940_v58 = vadd.s32 16, %v4922_v27 }
 0x25a   : > { %v4837_v28 = vpop.f32.mrf.mxu0  ;;  %2064 = vmatpush1.bf16.msra.mxu1 %v2045_v11 }
 0x25b   : > { %5854 = vst [vmem:[#allocation41_spill] sm:$0xff] %v4837_v28  ;;  %2065 = vmatprep.subr.bf16.mxu1 %v2044_v53  ;;  %vm1600_vm2 = vcmp.le.s32.totalorder %v4924_v8, %v4940_v58 }
 0x25c   : > { %v4839_v37 = vpop.f32.mrf.mxu0 }
 0x25d   : > { %5855 = vst [vmem:[#allocation42_spill] sm:$0xff] %v4839_v37 }
 0x25e   : > { %v4846_v40 = vpop.f32.mrf.mxu0  ;;  %2066 = vmatpush1.bf16.msra.mxu1 %v2043_v30 }
 0x25f   : > { %5857 = vst [vmem:[#allocation47_spill] sm:$0xff] %v4846_v40  ;;  %2067 = vmatprep.subr.bf16.mxu1 %v5859_v39  ;;  %v4951_v39 = vadd.s32 24, %v4922_v27 }
 0x260   : > { %2441 = vmatmul.mubr.bf16.gmra.mxu0 %v5856_v0  ;;  %v4856_v57 = vpop.f32.mrf.mxu0 }
 0x261   : > { %2448 = vmatprep.mubr.bf16.mxu0 %v5858_v13  ;;  %vm1601_vm3 = vcmp.le.s32.totalorder %v4924_v8, %v4951_v39 }
 0x262   : > { %v4858_v60 = vpop.f32.mrf.mxu0  ;;  %2068 = vmatpush1.bf16.msra.mxu1 %v5860_v54 }
 0x263   : > { %2069 = vmatprep.subr.bf16.mxu1 %v5861_v15 }
 0x264   : > { %v4866_v48 = vpop.f32.mrf.mxu0 }
 0x266   : > { %v4873_v17 = vpop.f32.mrf.mxu0  ;;  %2070 = vmatpush1.bf16.msra.mxu1 %v5863_v51  ;;  %v4962_v51 = vadd.s32 32, %v4922_v27 }
 0x268   : > { %2449 = vmatmul.mubr.bf16.gmra.mxu0 %v5862_v25  ;;  %v4880_v47 = vpop.f32.mrf.mxu0  ;;  %vm1602_vm4 = vcmp.le.s32.totalorder %v4924_v8, %v4962_v51 }
 0x26a   : > { %v4882_v24 = vpop.f32.mrf.mxu0 }
 0x26c   : > { %v4884_v23 = vpop.f32.mrf.mxu0 }
 0x26e   : > { %v4888_v52 = vpop.f32.mrf.mxu0 }
 0x270   : > { %v4892_v20 = vpop.f32.mrf.mxu0 }
 0x272   : > { %v4894_v55 = vpop.f32.mrf.mxu0 }
 0x274   : > { %v4896_v21 = vpop.f32.mrf.mxu0 }
 0x276   : > { %v4900_v32 = vpop.f32.mrf.mxu0 }
 0x278   : > { %v4904_v46 = vpop.f32.mrf.mxu0 }
 0x27a   : > { %v4906_v6 = vpop.f32.mrf.mxu0 }
 0x27c   : > { %v4908_v42 = vpop.f32.mrf.mxu0 }
 0x27e   : > { %v4912_v22 = vpop.f32.mrf.mxu0 }
 0x280   : > { %v4916_v61 = vpop.f32.mrf.mxu0 }
 0x282   : > { %v1508_v34 = vpop.f32.mrf.mxu0 }
 0x284   : > { %v4918_v33 = vpop.f32.mrf.mxu0 }
 0x286   : > { %v1512_v1 = vpop.f32.mrf.mxu0 }
 0x287   : > { %v2640_v18 = vpack.c.bf16 %v1512_v1, %v1508_v34 }
 0x289   : > { %2641 = vmatprep.subr.bf16.mxu1 %v2640_v18 }
 0x2b0   : > { %v1808_v11 = vpop.f32.mrf.mxu1 }
 0x2b1   : > { %v4934_v43 = vsel %vm1598_vm0, %v1808_v11, -inf }
 0x2b2   : > { %1887 = vmax.xlane.f32.xlu0 %v4934_v43  ;;  %v1810_v53 = vpop.f32.mrf.mxu1 }
 0x2b4   : > { %v1811_v30 = vpop.f32.mrf.mxu1 }
 0x2b5   : > { %v4945_v0 = vsel %vm1599_vm1, %v1811_v30, -inf }
 0x2b6   : > { %1889 = vmax.xlane.f32.xlu0 %v4945_v0  ;;  %v1813_v13 = vpop.f32.mrf.mxu1 }
 0x2b7   : > { %v4984_v13 = vadd.s32 48, %v4922_v27 }
 0x2b8   : > { %v1816_v54 = vpop.f32.mrf.mxu1 }
 0x2b9   : > { %v4956_v15 = vsel %vm1600_vm2, %v1816_v54, -inf  ;;  %vm1604_vm6 = vcmp.le.s32.totalorder %v4924_v8, %v4984_v13 }
 0x2ba   : > { %1891 = vmax.xlane.f32.xlu1 %v4956_v15  ;;  %v1818_v25 = vpop.f32.mrf.mxu1 }
 0x2bc   : > { %v1819_v34 = vpop.f32.mrf.mxu1 }
 0x2bd   : > { %v4967_v1 = vsel %vm1601_vm3, %v1819_v34, -inf }
 0x2be   : > { %1893 = vmax.xlane.f32.xlu1 %v4967_v1  ;;  %v1821_v18 = vpop.f32.mrf.mxu1 }
 0x2bf   : > { %v4995_v18 = vadd.s32 56, %v4922_v27 }
 0x2c0   : > { %v1824_v11 = vpop.f32.mrf.mxu1 }
 0x2c1   : > { %v4978_v53 = vsel %vm1602_vm4, %v1824_v11, -inf  ;;  %vm1605_vm7 = vcmp.le.s32.totalorder %v4924_v8, %v4995_v18 }
 0x2c2   : > { %1895 = vmax.xlane.f32.xlu0 %v4978_v53  ;;  %v1826_v30 = vpop.f32.mrf.mxu1 }
 0x2c4   : > { %v1827_v54 = vpop.f32.mrf.mxu1 }
 0x2c5   : > { %v4989_v25 = vsel %vm1603_vm5, %v1827_v54, -inf  ;;  %v5006_v54 = vadd.s32 64, %v4922_v27 }
 0x2c6   : > { %1897 = vmax.xlane.f32.xlu1 %v4989_v25  ;;  %v1829_v34 = vpop.f32.mrf.mxu1 }
 0x2c7   : > { %vm1606_vm8 = vcmp.le.s32.totalorder %v4924_v8, %v5006_v54 }
 0x2c8   : > { %v1832_v11 = vpop.f32.mrf.mxu1 }
 0x2c9   : > { %v5000_v30 = vsel %vm1604_vm6, %v1832_v11, -inf }
 0x2ca   : > { %1899 = vmax.xlane.f32.xlu0 %v5000_v30  ;;  %v1834_v50 = vpop.f32.mrf.mxu1 }
 0x2cb   : > { %v5017_v50 = vadd.s32 72, %v4922_v27 }
 0x2cc   : > { %v1835_v34 = vpop.f32.mrf.mxu1 }
 0x2cd   : > { %v5011_v7 = vsel %vm1605_vm7, %v1835_v34, -inf  ;;  %vm1607_vm9 = vcmp.le.s32.totalorder %v4924_v8, %v5017_v50 }
 0x2ce   : > { %1901 = vmax.xlane.f32.xlu1 %v5011_v7  ;;  %v1837_v19 = vpop.f32.mrf.mxu1 }
 0x2cf   : > { %v5028_v19 = vadd.s32 80, %v4922_v27 }
 0x2d0   : > { %v1840_v11 = vpop.f32.mrf.mxu1 }
 0x2d1   : > { %v5022_v63 = vsel %vm1606_vm8, %v1840_v11, -inf  ;;  %vm1608_vm10 = vcmp.le.s32.totalorder %v4924_v8, %v5028_v19 }
 0x2d2   : > { %1903 = vmax.xlane.f32.xlu0 %v5022_v63  ;;  %v1842_v14 = vpop.f32.mrf.mxu1 }
 0x2d3   : > { %v5039_v14 = vadd.s32 88, %v4922_v27 }
 0x2d4   : > { %v1843_v34 = vpop.f32.mrf.mxu1 }
 0x2d5   : > { %v5033_v10 = vsel %vm1607_vm9, %v1843_v34, -inf  ;;  %vm1609_vm11 = vcmp.le.s32.totalorder %v4924_v8, %v5039_v14 }
 0x2d6   : > { %1905 = vmax.xlane.f32.xlu1 %v5033_v10  ;;  %v1845_v12 = vpop.f32.mrf.mxu1 }
 0x2d7   : > { %v5050_v12 = vadd.s32 96, %v4922_v27 }
 0x2d8   : > { %v1848_v11 = vpop.f32.mrf.mxu1 }
 0x2d9   : > { %v5044_v2 = vsel %vm1608_vm10, %v1848_v11, -inf  ;;  %vm1610_vm12 = vcmp.le.s32.totalorder %v4924_v8, %v5050_v12 }
 0x2da   : > { %1907 = vmax.xlane.f32.xlu0 %v5044_v2  ;;  %v1850_v9 = vpop.f32.mrf.mxu1 }
 0x2db   : > { %v5061_v9 = vadd.s32 104, %v4922_v27 }
 0x2dc   : > { %v1851_v34 = vpop.f32.mrf.mxu1 }
 0x2dd   : > { %v5055_v41 = vsel %vm1609_vm11, %v1851_v34, -inf  ;;  %vm1611_vm13 = vcmp.le.s32.totalorder %v4924_v8, %v5061_v9 }
 0x2de   : > { %1909 = vmax.xlane.f32.xlu1 %v5055_v41  ;;  %v1853_v59 = vpop.f32.mrf.mxu1 }
 0x2df   : > { %v5072_v59 = vadd.s32 112, %v4922_v27 }
 0x2e0   : > { %v1856_v11 = vpop.f32.mrf.mxu1 }
 0x2e1   : > { %v5066_v35 = vsel %vm1610_vm12, %v1856_v11, -inf  ;;  %vm1612_vm14 = vcmp.le.s32.totalorder %v4924_v8, %v5072_v59 }
 0x2e2   : > { %1911 = vmax.xlane.f32.xlu0 %v5066_v35  ;;  %v1858_v44 = vpop.f32.mrf.mxu1 }
 0x2e3   : > { %v5083_v44 = vadd.s32 120, %v4922_v27 }
 0x2e4   : > { %v1859_v34 = vpop.f32.mrf.mxu1 }
 0x2e5   : > { %v5077_v26 = vsel %vm1611_vm13, %v1859_v34, -inf  ;;  %vm1613_vm15 = vcmp.le.s32.totalorder %v4924_v8, %v5083_v44 }
 0x2e6   : > { %1913 = vmax.xlane.f32.xlu1 %v5077_v26  ;;  %v1861_v38 = vpop.f32.mrf.mxu1 }
 0x2e8   : > { %v1864_v11 = vpop.f32.mrf.mxu1 }
 0x2e9   : > { %v5088_v5 = vsel %vm1612_vm14, %v1864_v11, -inf }
 0x2ea   : > { %1915 = vmax.xlane.f32.xlu0 %v5088_v5  ;;  %v1866_v3 = vpop.f32.mrf.mxu1 }
 0x2ec   : > { %v1867_v34 = vpop.f32.mrf.mxu1 }
 0x2ed   : > { %v5096_v38 = vsel %vm1613_vm15, %v1867_v34, -inf }
 0x2ee   : > { %1917 = vmax.xlane.f32.xlu1 %v5096_v38  ;;  %v1869_v49 = vpop.f32.mrf.mxu1 }
 0x2f0   : > { %v2394_v36 = vpop.f32.mrf.mxu0 }
 0x2f1   : > { %v5102_v11 = vsel %vm1598_vm0, %v2394_v36, -inf }
 0x2f2   : > { %2473 = vmax.xlane.f32.xlu0 %v5102_v11  ;;  %v2396_v3 = vpop.f32.mrf.mxu0 }
 0x2f4   : > { %v2397_v16 = vpop.f32.mrf.mxu0 }
 0x2f5   : > { %v5108_v56 = vsel %vm1599_vm1, %v2397_v16, -inf }
 0x2f6   : > { %2475 = vmax.xlane.f32.xlu1 %v5108_v56  ;;  %v2399_v34 = vpop.f32.mrf.mxu0 }
 0x2f8   : > { %v2402_v4 = vpop.f32.mrf.mxu0 }
 0x2f9   : > { %v5114_v49 = vsel %vm1600_vm2, %v2402_v4, -inf }
 0x2fa   : > { %2477 = vmax.xlane.f32.xlu0 %v5114_v49  ;;  %v2404_v36 = vpop.f32.mrf.mxu0 }
 0x2fc   : > { %v2405_v27 = vpop.f32.mrf.mxu0 }
 0x2fd   : > { %v5120_v3 = vsel %vm1601_vm3, %v2405_v27, -inf }
 0x2fe   : > { %2479 = vmax.xlane.f32.xlu1 %v5120_v3  ;;  %v2407_v16 = vpop.f32.mrf.mxu0 }
 0x300   : > { %v2410_v29 = vpop.f32.mrf.mxu0 }
 0x301   : > { %v5126_v34 = vsel %vm1602_vm4, %v2410_v29, -inf }
 0x302   : > { %2481 = vmax.xlane.f32.xlu0 %v5126_v34  ;;  %v2412_v4 = vpop.f32.mrf.mxu0 }
 0x304   : > { %v2413_v58 = vpop.f32.mrf.mxu0 }
 0x305   : > { %v5132_v36 = vsel %vm1603_vm5, %v2413_v58, -inf }
 0x306   : > { %2483 = vmax.xlane.f32.xlu1 %v5132_v36  ;;  %v2415_v39 = vpop.f32.mrf.mxu0 }
 0x308   : > { %v2418_v27 = vpop.f32.mrf.mxu0 }
 0x309   : > { %v5138_v16 = vsel %vm1604_vm6, %v2418_v27, -inf }
 0x30a   : > { %2485 = vmax.xlane.f32.xlu0 %v5138_v16  ;;  %v2420_v51 = vpop.f32.mrf.mxu0 }
 0x30c   : > { %v2421_v29 = vpop.f32.mrf.mxu0 }
 0x30d   : > { %v5144_v4 = vsel %vm1605_vm7, %v2421_v29, -inf }
 0x30e   : > { %2487 = vmax.xlane.f32.xlu1 %v5144_v4  ;;  %v2423_v62 = vpop.f32.mrf.mxu0 }
 0x310   : > { %v2426_v58 = vpop.f32.mrf.mxu0 }
 0x311   : > { %v5150_v39 = vsel %vm1606_vm8, %v2426_v58, -inf }
 0x312   : > { %v2428_v13 = vpop.f32.mrf.mxu0 }
 0x314   : > { %v2429_v27 = vpop.f32.mrf.mxu0 }
 0x315   : > { %v5155_v51 = vsel %vm1607_vm9, %v2429_v27, -inf }
 0x316   : > { %v2431_v31 = vpop.f32.mrf.mxu0 }
 0x318   : > { %v2434_v18 = vpop.f32.mrf.mxu0 }
 0x319   : > { %v5160_v29 = vsel %vm1608_vm10, %v2434_v18, -inf }
 0x31a   : > { %v2436_v62 = vpop.f32.mrf.mxu0 }
 0x31c   : > { %v2437_v45 = vpop.f32.mrf.mxu0 }
 0x31d   : > { %v5165_v54 = vsel %vm1609_vm11, %v2437_v45, -inf }
 0x31e   : > { %v2439_v58 = vpop.f32.mrf.mxu0 }
 0x320   : > { %v2442_v13 = vpop.f32.mrf.mxu0 }
 0x321   : > { %v5170_v50 = vsel %vm1610_vm12, %v2442_v13, -inf }
 0x322   : > { %v2444_v31 = vpop.f32.mrf.mxu0 }
 0x324   : > { %v2445_v27 = vpop.f32.mrf.mxu0 }
 0x325   : > { %v5175_v19 = vsel %vm1611_vm13, %v2445_v27, -inf }
 0x326   : > { %v2447_v18 = vpop.f32.mrf.mxu0 }
 0x328   : > { %v2450_v62 = vpop.f32.mrf.mxu0 }
 0x329   : > { %v5180_v45 = vsel %vm1612_vm14, %v2450_v62, -inf }
 0x32a   : > { %v2452_v14 = vpop.f32.mrf.mxu0 }
 0x32c   : > { %v2453_v58 = vpop.f32.mrf.mxu0 }
 0x32d   : > { %v5185_v12 = vsel %vm1613_vm15, %v2453_v58, -inf }
 0x32e   : > { %v2455_v13 = vpop.f32.mrf.mxu0 }
 0x33b   : > { %v1888_v31 = vpop.xlane.xlu0 %1887 }
 0x33c   : > { %v1919_v9 = vsub.f32 %v4934_v43, %v1888_v31 }
 0x33e   : > { %v1935_v27 = vmul.f32 1.442695, %v1919_v9 }
 0x33f   : > { %v1890_v37 = vpop.xlane.xlu0 %1889 }
 0x340   : > { %3286 = vpow2.f32 %v1935_v27  ;;  %v1920_v18 = vsub.f32 %v4945_v0, %v1890_v37 }
 0x342   : > { %v1937_v28 = vmul.f32 1.442695, %v1920_v18 }
 0x343   : > { %v1892_v59 = vpop.xlane.xlu1 %1891 }
 0x344   : > { %3288 = vpow2.f32 %v1937_v28  ;;  %v1921_v62 = vsub.f32 %v4956_v15, %v1892_v59 }
 0x346   : > { %v1939_v14 = vmul.f32 1.442695, %v1921_v62 }
 0x347   : > { %v1894_v40 = vpop.xlane.xlu1 %1893 }
 0x348   : > { %3290 = vpow2.f32 %v1939_v14  ;;  %v1922_v8 = vsub.f32 %v4967_v1, %v1894_v40 }
 0x34a   : > { %v1941_v44 = vmul.f32 1.442695, %v1922_v8 }
 0x34b   : > { %v1896_v58 = vpop.xlane.xlu0 %1895 }
 0x34c   : > { %3292 = vpow2.f32 %v1941_v44  ;;  %v1923_v43 = vsub.f32 %v4978_v53, %v1896_v58 }
 0x34d   : > { %v5192_v13 = vpop.eup %3286 }
 0x34e   : > { %v1943_v31 = vmul.f32 1.442695, %v1923_v43  ;;  %1967 = vadd.xlane.f32.xlu0 %v5192_v13 }
 0x34f   : > { %v1898_v37 = vpop.xlane.xlu1 %1897 }
 0x350   : > { %3294 = vpow2.f32 %v1943_v31  ;;  %v1924_v28 = vsub.f32 %v4989_v25, %v1898_v37 }
 0x351   : > { %v5196_v0 = vpop.eup %3288 }
 0x352   : > { %v1945_v15 = vmul.f32 1.442695, %v1924_v28  ;;  %1969 = vadd.xlane.f32.xlu1 %v5196_v0  ;;  %2489 = vmax.xlane.f32.xlu0 %v5150_v39 }
 0x353   : > { %v1900_v40 = vpop.xlane.xlu0 %1899 }
 0x354   : > { %3296 = vpow2.f32 %v1945_v15  ;;  %v1925_v1 = vsub.f32 %v5000_v30, %v1900_v40 }
 0x355   : > { %v5201_v53 = vpop.eup %3290 }
 0x356   : > { %v1947_v9 = vmul.f32 1.442695, %v1925_v1  ;;  %1971 = vadd.xlane.f32.xlu0 %v5201_v53  ;;  %2491 = vmax.xlane.f32.xlu1 %v5155_v51 }
 0x357   : > { %v1902_v27 = vpop.xlane.xlu1 %1901 }
 0x358   : > { %3298 = vpow2.f32 %v1947_v9  ;;  %v1926_v25 = vsub.f32 %v5011_v7, %v1902_v27 }
 0x359   : > { %v5206_v18 = vpop.eup %3292 }
 0x35a   : > { %v1949_v59 = vmul.f32 1.442695, %v1926_v25  ;;  %1973 = vadd.xlane.f32.xlu1 %v5206_v18  ;;  %2493 = vmax.xlane.f32.xlu0 %v5160_v29 }
 0x35b   : > { %v1904_v62 = vpop.xlane.xlu0 %1903 }
 0x35c   : > { %3300 = vpow2.f32 %v1949_v59  ;;  %v1927_v30 = vsub.f32 %v5022_v63, %v1904_v62  ;;  %v5633_v59 = vmov 0  }
 0x35d   : > { %v5211_v14 = vpop.eup %3294  ;;  %2087 = vmatprep.mubr.bf16.mxu1 %v5633_v59 }
 0x35e   : > { %v1951_v8 = vmul.f32 1.442695, %v1927_v30  ;;  %1975 = vadd.xlane.f32.xlu0 %v5211_v14  ;;  %2495 = vmax.xlane.f32.xlu1 %v5165_v54 }
 0x35f   : > { %v1906_v44 = vpop.xlane.xlu1 %1905 }
 0x360   : > { %3302 = vpow2.f32 %v1951_v8  ;;  %v1928_v7 = vsub.f32 %v5033_v10, %v1906_v44 }
 0x361   : > { %v5216_v58 = vpop.eup %3296 }
 0x362   : > { %v1953_v43 = vmul.f32 1.442695, %v1928_v7  ;;  %1977 = vadd.xlane.f32.xlu1 %v5216_v58  ;;  %2497 = vmax.xlane.f32.xlu0 %v5170_v50 }
 0x363   : > { %v1908_v31 = vpop.xlane.xlu0 %1907 }
 0x364   : > { %3304 = vpow2.f32 %v1953_v43  ;;  %v1929_v63 = vsub.f32 %v5044_v2, %v1908_v31 }
 0x365   : > { %v5221_v37 = vpop.eup %3298 }
 0x366   : > { %v1955_v28 = vmul.f32 1.442695, %v1929_v63  ;;  %1979 = vadd.xlane.f32.xlu0 %v5221_v37  ;;  %2499 = vmax.xlane.f32.xlu1 %v5175_v19 }
 0x367   : > { %v1910_v15 = vpop.xlane.xlu1 %1909 }
 0x368   : > { %3306 = vpow2.f32 %v1955_v28  ;;  %v1930_v10 = vsub.f32 %v5055_v41, %v1910_v15 }
 0x369   : > { %v5226_v40 = vpop.eup %3300 }
 0x36a   : > { %v1957_v1 = vmul.f32 1.442695, %v1930_v10  ;;  %1981 = vadd.xlane.f32.xlu1 %v5226_v40 }
 0x36b   : > { %v1912_v9 = vpop.xlane.xlu0 %1911 }
 0x36c   : > { %3308 = vpow2.f32 %v1957_v1  ;;  %v1931_v2 = vsub.f32 %v5066_v35, %v1912_v9 }
 0x36d   : > { %v5230_v27 = vpop.eup %3302 }
 0x36e   : > { %v1959_v25 = vmul.f32 1.442695, %v1931_v2  ;;  %1983 = vadd.xlane.f32.xlu0 %v5230_v27 }
 0x36f   : > { %v1914_v62 = vpop.xlane.xlu1 %1913 }
 0x370   : > { %3310 = vpow2.f32 %v1959_v25  ;;  %v1932_v41 = vsub.f32 %v5077_v26, %v1914_v62 }
 0x371   : > { %v5235_v30 = vpop.eup %3304 }
 0x372   : > { %v1961_v8 = vmul.f32 1.442695, %v1932_v41  ;;  %1985 = vadd.xlane.f32.xlu1 %v5235_v30  ;;  %2501 = vmax.xlane.f32.xlu0 %v5180_v45 }
 0x373   : > { %v1916_v35 = vpop.xlane.xlu0 %1915 }
 0x374   : > { %3312 = vpow2.f32 %v1961_v8  ;;  %v1933_v44 = vsub.f32 %v5088_v5, %v1916_v35 }
 0x375   : > { %v5240_v7 = vpop.eup %3306 }
 0x376   : > { %v1963_v43 = vmul.f32 1.442695, %v1933_v44  ;;  %1987 = vadd.xlane.f32.xlu0 %v5240_v7  ;;  %2503 = vmax.xlane.f32.xlu1 %v5185_v12 }
 0x377   : > { %v1918_v31 = vpop.xlane.xlu1 %1917 }
 0x378   : > { %3314 = vpow2.f32 %v1963_v43  ;;  %v1934_v26 = vsub.f32 %v5096_v38, %v1918_v31 }
 0x379   : > { %v5245_v63 = vpop.eup %3308 }
 0x37a   : > { %v1965_v28 = vmul.f32 1.442695, %v1934_v26  ;;  %1989 = vadd.xlane.f32.xlu1 %v5245_v63 }
 0x37b   : > { %v2474_v15 = vpop.xlane.xlu0 %2473 }
 0x37c   : > { %3316 = vpow2.f32 %v1965_v28  ;;  %v2505_v5 = vsub.f32 %v5102_v11, %v2474_v15 }
 0x37d   : > { %v5249_v10 = vpop.eup %3310 }
 0x37e   : > { %v2521_v1 = vmul.f32 1.442695, %v2505_v5  ;;  %1991 = vadd.xlane.f32.xlu0 %v5249_v10 }
 0x37f   : > { %v2476_v9 = vpop.xlane.xlu1 %2475 }
 0x380   : > { %3318 = vpow2.f32 %v2521_v1  ;;  %v2506_v2 = vsub.f32 %v5108_v56, %v2476_v9 }
 0x381   : > { %v5253_v25 = vpop.eup %3312 }
 0x382   : > { %v2523_v38 = vmul.f32 1.442695, %v2506_v2  ;;  %1993 = vadd.xlane.f32.xlu1 %v5253_v25 }
 0x383   : > { %v2478_v62 = vpop.xlane.xlu0 %2477 }
 0x384   : > { %3320 = vpow2.f32 %v2523_v38  ;;  %v2507_v41 = vsub.f32 %v5114_v49, %v2478_v62 }
 0x385   : > { %v5257_v8 = vpop.eup %3314 }
 0x386   : > { %v2525_v11 = vmul.f32 1.442695, %v2507_v41  ;;  %1995 = vadd.xlane.f32.xlu0 %v5257_v8 }
 0x387   : > { %v2480_v35 = vpop.xlane.xlu1 %2479 }
 0x388   : > { %3322 = vpow2.f32 %v2525_v11  ;;  %v2508_v44 = vsub.f32 %v5120_v3, %v2480_v35 }
 0x389   : > { %v5261_v43 = vpop.eup %3316 }
 0x38a   : > { %v2527_v56 = vmul.f32 1.442695, %v2508_v44  ;;  %1997 = vadd.xlane.f32.xlu1 %v5261_v43 }
 0x38b   : > { %v2482_v31 = vpop.xlane.xlu0 %2481 }
 0x38c   : > { %3324 = vpow2.f32 %v2527_v56  ;;  %v2509_v26 = vsub.f32 %v5126_v34, %v2482_v31 }
 0x38d   : > { %v5265_v28 = vpop.eup %3318 }
 0x38e   : > { %v2529_v49 = vmul.f32 1.442695, %v2509_v26  ;;  %2553 = vadd.xlane.f32.xlu0 %v5265_v28 }
 0x38f   : > { %v2484_v15 = vpop.xlane.xlu1 %2483 }
 0x390   : > { %3326 = vpow2.f32 %v2529_v49  ;;  %v2510_v5 = vsub.f32 %v5132_v36, %v2484_v15 }
 0x391   : > { %v5269_v1 = vpop.eup %3320 }
 0x392   : > { %v2531_v3 = vmul.f32 1.442695, %v2510_v5  ;;  %2555 = vadd.xlane.f32.xlu1 %v5269_v1 }
 0x393   : > { %v2486_v9 = vpop.xlane.xlu0 %2485 }
 0x394   : > { %3328 = vpow2.f32 %v2531_v3  ;;  %v2511_v2 = vsub.f32 %v5138_v16, %v2486_v9 }
 0x395   : > { %v5273_v38 = vpop.eup %3322 }
 0x396   : > { %v2533_v34 = vmul.f32 1.442695, %v2511_v2  ;;  %2557 = vadd.xlane.f32.xlu0 %v5273_v38 }
 0x397   : > { %v2488_v62 = vpop.xlane.xlu1 %2487 }
 0x398   : > { %3330 = vpow2.f32 %v2533_v34  ;;  %v2512_v41 = vsub.f32 %v5144_v4, %v2488_v62 }
 0x399   : > { %v5277_v11 = vpop.eup %3324 }
 0x39a   : > { %v2535_v36 = vmul.f32 1.442695, %v2512_v41  ;;  %2559 = vadd.xlane.f32.xlu1 %v5277_v11 }
 0x39c   : > { %3332 = vpow2.f32 %v2535_v36 }
 0x39d   : > { %v5280_v35 = vpop.eup %3326 }
 0x39e   : > { %2561 = vadd.xlane.f32.xlu0 %v5280_v35 }
 0x3a1   : > { %v5283_v16 = vpop.eup %3328 }
 0x3a2   : > { %2563 = vadd.xlane.f32.xlu1 %v5283_v16 }
 0x3a5   : > { %v5286_v44 = vpop.eup %3330 }
 0x3a6   : > { %2565 = vadd.xlane.f32.xlu0 %v5286_v44 }
 0x3a9   : > { %v5289_v56 = vpop.eup %3332 }
 0x3aa   : > { %2567 = vadd.xlane.f32.xlu1 %v5289_v56 }
 0x3d7   : > { %v1968_v4 = vpop.xlane.xlu0 %1967 }
 0x3d8   : > { %3334 = vrcp.f32 %v1968_v4 }
 0x3db   : > { %v1970_v31 = vpop.xlane.xlu1 %1969  ;;  %v2490_v26 = vpop.xlane.xlu0 %2489 }
 0x3dc   : > { %3336 = vrcp.f32 %v1970_v31  ;;  %v2513_v49 = vsub.f32 %v5150_v39, %v2490_v26 }
 0x3de   : > { %v2537_v15 = vmul.f32 1.442695, %v2513_v49 }
 0x3df   : > { %v1972_v5 = vpop.xlane.xlu0 %1971  ;;  %v2492_v3 = vpop.xlane.xlu1 %2491 }
 0x3e0   : > { %3338 = vpow2.f32 %v2537_v15  ;;  %v2514_v9 = vsub.f32 %v5155_v51, %v2492_v3 }
 0x3e1   : > { %3340 = vrcp.f32 %v1972_v5 }
 0x3e2   : > { %v2539_v2 = vmul.f32 1.442695, %v2514_v9 }
 0x3e3   : > { %v1974_v34 = vpop.xlane.xlu1 %1973  ;;  %v2494_v62 = vpop.xlane.xlu0 %2493 }
 0x3e4   : > { %3342 = vpow2.f32 %v2539_v2  ;;  %v2515_v41 = vsub.f32 %v5160_v29, %v2494_v62 }
 0x3e5   : > { %3344 = vrcp.f32 %v1974_v34  ;;  %v3335_v4 = vpop.eup %3334 }
 0x3e6   : > { %v2541_v36 = vmul.f32 1.442695, %v2515_v41  ;;  %v2015_v15 = vmul.f32 %v3335_v4, %v5192_v13 }
 0x3e7   : > { %v1976_v59 = vpop.xlane.xlu0 %1975  ;;  %v2496_v31 = vpop.xlane.xlu1 %2495 }
 0x3e8   : > { %3346 = vpow2.f32 %v2541_v36  ;;  %v2516_v39 = vsub.f32 %v5165_v54, %v2496_v31  ;;  %v5864_v54 = vpack.c.bf16 %v4918_v33, %v4916_v61  ;;  %v5867_v61 = vpack.c.bf16 %v4908_v42, %v4904_v46 }
 0x3e9   : > { %v3337_v26 = vpop.eup %3336  ;;  %3348 = vrcp.f32 %v1976_v59  ;;  %v5869_v42 = vpack.c.bf16 %v4896_v21, %v4892_v20  ;;  %v5871_v20 = vpack.c.bf16 %v4884_v23, %v4880_v47  ;;  %v5873_v47 = vpack.c.bf16 %v4866_v48, %v4856_v57 }
 0x3ea   : > { %v2543_v49 = vmul.f32 1.442695, %v2516_v39  ;;  %v2016_v51 = vmul.f32 %v3337_v26, %v5196_v0  ;;  %v5865_v0 = vmov 0  }
 0x3eb   : > { %v1978_v5 = vpop.xlane.xlu1 %1977  ;;  %v2498_v3 = vpop.xlane.xlu0 %2497 }
 0x3ec   : > { %3350 = vpow2.f32 %v2543_v49  ;;  %v2517_v29 = vsub.f32 %v5170_v50, %v2498_v3  ;;  %v2031_v9 = vpack.c.bf16 %v2016_v51, %v2015_v15  ;;  %v5866_v50 = vpack.c.bf16 %v4912_v22, %v4906_v6 }
 0x3ed   : > { %v5299_v2 = vpop.eup %3338  ;;  %3352 = vrcp.f32 %v1978_v5  ;;  %v5868_v22 = vpack.c.bf16 %v4900_v32, %v4894_v55  ;;  %v5870_v55 = vpack.c.bf16 %v4888_v52, %v4882_v24  ;;  %v5872_v24 = vpack.c.bf16 %v4873_v17, %v4858_v60  ;;  %v5874_v60 = vld [vmem:[#allocation47_spill] sm:$0xff]  ;;  %v5875_v17 = vld [vmem:[#allocation41_spill] sm:$0xff] }
 0x3ee   : > { %v2545_v34 = vmul.f32 1.442695, %v2517_v29  ;;  %2088 = vmatmul.mubr.bf16.vlgmr.msra.gmra.mxu1 %v2031_v9  ;;  %2569 = vadd.xlane.f32.xlu0 %v5299_v2  ;;  %v3341_v59 = vpop.eup %3340 }
 0x3ef   : > { %2642 = vmatpush1.bf16.msra.mxu1 %v5864_v54  ;;  %v2500_v13 = vpop.xlane.xlu1 %2499  ;;  %2097 = vmatprep.mubr.bf16.mxu1 %v5865_v0  ;;  %v1980_v62 = vpop.xlane.xlu0 %1979  ;;  %v2017_v39 = vmul.f32 %v3341_v59, %v5201_v53 }
 0x3f0   : > { %3354 = vpow2.f32 %v2545_v34  ;;  %2643 = vmatprep.subr.bf16.mxu1 %v5866_v50  ;;  %v2518_v41 = vsub.f32 %v5175_v19, %v2500_v13  ;;  %v5876_v34 = vpack.c.bf16 %v5874_v60, %v5875_v17  ;;  %v5878_v50 = vld [vmem:[#allocation20_spill] sm:$0xff] }
 0x3f1   : > { %v5310_v36 = vpop.eup %3342  ;;  %3356 = vrcp.f32 %v1980_v62 }
 0x3f2   : > { %v3345_v4 = vpop.eup %3344  ;;  %v2547_v31 = vmul.f32 1.442695, %v2518_v41  ;;  %2571 = vadd.xlane.f32.xlu1 %v5310_v36  ;;  %v5880_v41 = vld [vmem:[#allocation22_spill] sm:$0xff] }
 0x3f3   : > { %2644 = vmatpush1.bf16.msra.mxu1 %v5867_v61  ;;  %v1982_v33 = vpop.xlane.xlu1 %1981  ;;  %v2018_v6 = vmul.f32 %v3345_v4, %v5206_v18  ;;  %v5881_v4 = vld [vmem:[#allocation27_spill] sm:$0xff] }
 0x3f4   : > { %3358 = vpow2.f32 %v2547_v31  ;;  %2645 = vmatprep.subr.bf16.mxu1 %v5868_v22  ;;  %v5882_v31 = vpack.c.bf16 %v5880_v41, %v5881_v4  ;;  %v5884_v22 = vld [vmem:[#allocation40_spill] sm:$0xff] }
 0x3f5   : > { %v5321_v19 = vpop.eup %3346  ;;  %3360 = vrcp.f32 %v1982_v33  ;;  %v2032_v26 = vpack.c.bf16 %v2018_v6, %v2017_v39  ;;  %v5883_v6 = vld [vmem:[#allocation25_spill] sm:$0xff] }
 0x3f6   : > { %2573 = vadd.xlane.f32.xlu0 %v5321_v19  ;;  %v3349_v46 = vpop.eup %3348 }
 0x3f7   : > { %2098 = vmatmul.mubr.bf16.gmra.mxu1 %v2032_v26  ;;  %v1984_v49 = vpop.xlane.xlu0 %1983  ;;  %v2019_v51 = vmul.f32 %v3349_v46, %v5211_v14  ;;  %v5885_v26 = vpack.c.bf16 %v5883_v6, %v5884_v22 }
 0x3f8   : > { %2646 = vmatpush1.bf16.msra.mxu1 %v5869_v42  ;;  %2107 = vmatprep.mubr.bf16.mxu1 %v5865_v0  ;;  %3362 = vrcp.f32 %v1984_v49  ;;  %v5887_v49 = vld [vmem:[#allocation35_spill] sm:$0xff] }
 0x3f9   : > { %v5328_v53 = vpop.eup %3350  ;;  %2647 = vmatprep.subr.bf16.mxu1 %v5870_v55 }
 0x3fa   : > { %v3353_v32 = vpop.eup %3352  ;;  %2575 = vadd.xlane.f32.xlu1 %v5328_v53 }
 0x3fb   : > { %v1986_v18 = vpop.xlane.xlu1 %1985  ;;  %v2502_v15 = vpop.xlane.xlu0 %2501  ;;  %v2020_v5 = vmul.f32 %v3353_v32, %v5216_v58 }
 0x3fc   : > { %2648 = vmatpush1.bf16.msra.mxu1 %v5871_v20  ;;  %3364 = vrcp.f32 %v1986_v18  ;;  %v2519_v21 = vsub.f32 %v5180_v45, %v2502_v15  ;;  %v5889_v18 = vld [vmem:[#allocation36_spill] sm:$0xff]  ;;  %v5890_v15 = vld [vmem:[#allocation26_spill] sm:$0xff] }
 0x3fd   : > { %v5340_v3 = vpop.eup %3354  ;;  %2649 = vmatprep.subr.bf16.mxu1 %v5872_v24  ;;  %v2033_v52 = vpack.c.bf16 %v2020_v5, %v2019_v51  ;;  %v5891_v51 = vpack.c.bf16 %v5889_v18, %v5890_v15 }
 0x3fe   : > { %v2549_v29 = vmul.f32 1.442695, %v2519_v21  ;;  %2577 = vadd.xlane.f32.xlu0 %v5340_v3  ;;  %v3357_v58 = vpop.eup %3356 }
 0x3ff   : > { %2108 = vmatmul.mubr.bf16.gmra.mxu1 %v2033_v52  ;;  %v2504_v14 = vpop.xlane.xlu1 %2503  ;;  %v1988_v23 = vpop.xlane.xlu0 %1987  ;;  %v2021_v57 = vmul.f32 %v3357_v58, %v5221_v37 }
 0x400   : > { %3366 = vpow2.f32 %v2549_v29  ;;  %2650 = vmatpush1.bf16.msra.mxu1 %v5873_v47  ;;  %v2520_v45 = vsub.f32 %v5185_v12, %v2504_v14  ;;  %2117 = vmatprep.mubr.bf16.mxu1 %v5865_v0  ;;  %v5877_v12 = vld [vmem:[#allocation42_spill] sm:$0xff] }
 0x401   : > { %v5351_v9 = vpop.eup %3358  ;;  %2651 = vmatprep.subr.bf16.mxu1 %v5876_v34  ;;  %3368 = vrcp.f32 %v1988_v23  ;;  %v5879_v62 = vpack.c.bf16 %v5877_v12, %v5878_v50 }
 0x402   : > { %v3361_v54 = vpop.eup %3360  ;;  %v2551_v13 = vmul.f32 1.442695, %v2520_v45  ;;  %2579 = vadd.xlane.f32.xlu1 %v5351_v9 }
 0x403   : > { %v1990_v59 = vpop.xlane.xlu1 %1989  ;;  %v2022_v48 = vmul.f32 %v3361_v54, %v5226_v40  ;;  %v5886_v40 = vld [vmem:[#allocation39_spill] sm:$0xff] }
 0x404   : > { %3370 = vpow2.f32 %v2551_v13  ;;  %2652 = vmatpush1.bf16.msra.mxu1 %v5879_v62  ;;  %v5888_v46 = vpack.c.bf16 %v5886_v40, %v5887_v49 }
 0x405   : > { %2653 = vmatprep.subr.bf16.mxu1 %v5882_v31  ;;  %3372 = vrcp.f32 %v1990_v59  ;;  %v2034_v61 = vpack.c.bf16 %v2022_v48, %v2021_v57  ;;  %v3363_v33 = vpop.eup %3362 }
 0x406   : > { %v2023_v42 = vmul.f32 %v3363_v33, %v5230_v27 }
 0x407   : > { %2118 = vmatmul.mubr.bf16.gmra.mxu1 %v2034_v61  ;;  %v1992_v39 = vpop.xlane.xlu0 %1991 }
 0x408   : > { %2654 = vmatpush1.bf16.msra.mxu1 %v5885_v26  ;;  %2127 = vmatprep.mubr.bf16.mxu1 %v5865_v0  ;;  %3374 = vrcp.f32 %v1992_v39 }
 0x409   : > { %v3365_v37 = vpop.eup %3364  ;;  %2655 = vmatprep.subr.bf16.mxu1 %v5888_v46 }
 0x40a   : > { %v2024_v55 = vmul.f32 %v3365_v37, %v5235_v30 }
 0x40b   : > { %v1994_v32 = vpop.xlane.xlu1 %1993 }
 0x40c   : > { %2656 = vmatpush1.bf16.msra.mxu1 %v5891_v51  ;;  %3376 = vrcp.f32 %v1994_v32  ;;  %v2035_v5 = vpack.c.bf16 %v2024_v55, %v2023_v42 }
 0x40d   : > { %v5377_v20 = vpop.eup %3366 }
 0x40e   : > { %2581 = vadd.xlane.f32.xlu0 %v5377_v20  ;;  %v3369_v24 = vpop.eup %3368 }
 0x40f   : > { %2128 = vmatmul.mubr.bf16.gmra.mxu1 %v2035_v5  ;;  %v1996_v21 = vpop.xlane.xlu0 %1995  ;;  %v2025_v29 = vmul.f32 %v3369_v24, %v5240_v7 }
 0x410   : > { %2137 = vmatprep.mubr.bf16.mxu1 %v5865_v0  ;;  %3378 = vrcp.f32 %v1996_v21 }
 0x411   : > { %v5381_v52 = vpop.eup %3370 }
 0x412   : > { %v3373_v27 = vpop.eup %3372  ;;  %2583 = vadd.xlane.f32.xlu1 %v5381_v52 }
 0x413   : > { %v1998_v30 = vpop.xlane.xlu1 %1997  ;;  %v2026_v14 = vmul.f32 %v3373_v27, %v5245_v63 }
 0x414   : > { %3380 = vrcp.f32 %v1998_v30 }
 0x415   : > { %v2036_v58 = vpack.c.bf16 %v2026_v14, %v2025_v29  ;;  %v3375_v47 = vpop.eup %3374 }
 0x416   : > { %v2027_v60 = vmul.f32 %v3375_v47, %v5249_v10 }
 0x417   : > { %2138 = vmatmul.mubr.bf16.gmra.mxu1 %v2036_v58  ;;  %v2554_v23 = vpop.xlane.xlu0 %2553 }
 0x418   : > { %2147 = vmatprep.mubr.bf16.mxu1 %v5865_v0  ;;  %3382 = vrcp.f32 %v2554_v23 }
 0x419   : > { %v3377_v45 = vpop.eup %3376 }
 0x41a   : > { %v2028_v17 = vmul.f32 %v3377_v45, %v5253_v25 }
 0x41b   : > { %v2556_v34 = vpop.xlane.xlu1 %2555 }
 0x41c   : > { %3384 = vrcp.f32 %v2556_v34  ;;  %v2037_v54 = vpack.c.bf16 %v2028_v17, %v2027_v60 }
 0x41d   : > { %v3379_v13 = vpop.eup %3378 }
 0x41e   : > { %v2029_v59 = vmul.f32 %v3379_v13, %v5257_v8 }
 0x41f   : > { %2148 = vmatmul.mubr.bf16.gmra.mxu1 %v2037_v54  ;;  %v2558_v7 = vpop.xlane.xlu0 %2557 }
 0x420   : > { %2157 = vmatprep.mubr.bf16.mxu1 %v5865_v0  ;;  %3386 = vrcp.f32 %v2558_v7 }
 0x421   : > { %v3381_v63 = vpop.eup %3380 }
 0x422   : > { %v2030_v57 = vmul.f32 %v3381_v63, %v5261_v43 }
 0x423   : > { %v2560_v48 = vpop.xlane.xlu1 %2559 }
 0x424   : > { %3388 = vrcp.f32 %v2560_v48  ;;  %v2038_v12 = vpack.c.bf16 %v2030_v57, %v2029_v59 }
 0x425   : > { %v3383_v10 = vpop.eup %3382 }
 0x426   : > { %v2601_v62 = vmul.f32 %v3383_v10, %v5265_v28 }
 0x427   : > { %2158 = vmatmul.mubr.bf16.gmra.mxu1 %v2038_v12  ;;  %v2562_v25 = vpop.xlane.xlu0 %2561 }
 0x428   : > { %2673 = vmatprep.mubr.bf16.mxu1 %v5865_v0  ;;  %3390 = vrcp.f32 %v2562_v25 }
 0x429   : > { %v3385_v50 = vpop.eup %3384 }
 0x42a   : > { %v2602_v41 = vmul.f32 %v3385_v50, %v5269_v1 }
 0x42b   : > { %v2564_v4 = vpop.xlane.xlu1 %2563 }
 0x42c   : > { %v2617_v31 = vpack.c.bf16 %v2602_v41, %v2601_v62  ;;  %3392 = vrcp.f32 %v2564_v4 }
 0x42d   : > { %v3387_v8 = vpop.eup %3386 }
 0x42e   : > { %v2603_v33 = vmul.f32 %v3387_v8, %v5273_v38 }
 0x42f   : > { %2674 = vmatmul.mubr.bf16.vlgmr.msra.gmra.mxu1 %v2617_v31  ;;  %v2566_v43 = vpop.xlane.xlu0 %2565 }
 0x430   : > { %2683 = vmatprep.mubr.bf16.mxu1 %v5865_v0  ;;  %3394 = vrcp.f32 %v2566_v43 }
 0x431   : > { %v3389_v61 = vpop.eup %3388 }
 0x432   : > { %v2604_v39 = vmul.f32 %v3389_v61, %v5277_v11 }
 0x433   : > { %v2568_v6 = vpop.xlane.xlu1 %2567 }
 0x434   : > { %3396 = vrcp.f32 %v2568_v6  ;;  %v2618_v28 = vpack.c.bf16 %v2604_v39, %v2603_v33 }
 0x435   : > { %v3391_v22 = vpop.eup %3390 }
 0x436   : > { %v2605_v26 = vmul.f32 %v3391_v22, %v5280_v35 }
 0x437   : > { %2684 = vmatmul.mubr.bf16.gmra.mxu1 %v2618_v28 }
 0x438   : > { %2693 = vmatprep.mubr.bf16.mxu1 %v5865_v0 }
 0x439   : > { %v3393_v1 = vpop.eup %3392 }
 0x43a   : > { %v2606_v37 = vmul.f32 %v3393_v1, %v5283_v16 }
 0x43c   : > { %v2619_v40 = vpack.c.bf16 %v2606_v37, %v2605_v26 }
 0x43d   : > { %v3395_v49 = vpop.eup %3394 }
 0x43e   : > { %v2607_v11 = vmul.f32 %v3395_v49, %v5286_v44 }
 0x43f   : > { %2694 = vmatmul.mubr.bf16.gmra.mxu1 %v2619_v40 }
 0x440   : > { %2703 = vmatprep.mubr.bf16.mxu1 %v5865_v0 }
 0x441   : > { %v3397_v38 = vpop.eup %3396 }
 0x442   : > { %v2608_v46 = vmul.f32 %v3397_v38, %v5289_v56 }
 0x444   : > { %v2620_v42 = vpack.c.bf16 %v2608_v46, %v2607_v11 }
 0x447   : > { %2704 = vmatmul.mubr.bf16.gmra.mxu1 %v2620_v42 }
 0x448   : > { %2713 = vmatprep.mubr.bf16.mxu1 %v5865_v0 }
 0x477   : > { %v2570_v55 = vpop.xlane.xlu0 %2569 }
 0x478   : > { %3398 = vrcp.f32 %v2570_v55 }
 0x47b   : > { %v2572_v32 = vpop.xlane.xlu1 %2571 }
 0x47c   : > { %3400 = vrcp.f32 %v2572_v32 }
 0x47f   : > { %v2574_v35 = vpop.xlane.xlu0 %2573 }
 0x480   : > { %3402 = vrcp.f32 %v2574_v35 }
 0x483   : > { %v2576_v16 = vpop.xlane.xlu1 %2575 }
 0x484   : > { %3404 = vrcp.f32 %v2576_v16 }
 0x485   : > { %v3399_v18 = vpop.eup %3398 }
 0x486   : > { %v2609_v44 = vmul.f32 %v3399_v18, %v5299_v2 }
 0x487   : > { %v2578_v15 = vpop.xlane.xlu0 %2577 }
 0x488   : > { %3406 = vrcp.f32 %v2578_v15 }
 0x489   : > { %v3401_v51 = vpop.eup %3400 }
 0x48a   : > { %v2610_v56 = vmul.f32 %v3401_v51, %v5310_v36 }
 0x48b   : > { %v2580_v5 = vpop.xlane.xlu1 %2579 }
 0x48c   : > { %3408 = vrcp.f32 %v2580_v5  ;;  %v2621_v21 = vpack.c.bf16 %v2610_v56, %v2609_v44 }
 0x48d   : > { %v3403_v24 = vpop.eup %3402 }
 0x48e   : > { %2714 = vmatmul.mubr.bf16.gmra.mxu1 %v2621_v21  ;;  %v2611_v30 = vmul.f32 %v3403_v24, %v5321_v19 }
 0x48f   : > { %2723 = vmatprep.mubr.bf16.mxu1 %v5865_v0 }
 0x491   : > { %v3405_v27 = vpop.eup %3404 }
 0x492   : > { %v2612_v29 = vmul.f32 %v3405_v27, %v5328_v53 }
 0x494   : > { %v2622_v14 = vpack.c.bf16 %v2612_v29, %v2611_v30 }
 0x495   : > { %v3407_v58 = vpop.eup %3406 }
 0x496   : > { %2724 = vmatmul.mubr.bf16.gmra.mxu1 %v2622_v14  ;;  %v2613_v36 = vmul.f32 %v3407_v58, %v5340_v3 }
 0x497   : > { %v2582_v47 = vpop.xlane.xlu0 %2581  ;;  %2733 = vmatprep.mubr.bf16.mxu1 %v5865_v0 }
 0x498   : > { %3410 = vrcp.f32 %v2582_v47 }
 0x499   : > { %v3409_v2 = vpop.eup %3408 }
 0x49a   : > { %v2614_v23 = vmul.f32 %v3409_v2, %v5351_v9 }
 0x49b   : > { %v2584_v45 = vpop.xlane.xlu1 %2583 }
 0x49c   : > { %3412 = vrcp.f32 %v2584_v45  ;;  %v2623_v60 = vpack.c.bf16 %v2614_v23, %v2613_v36 }
 0x49e   : > { %2734 = vmatmul.mubr.bf16.gmra.mxu1 %v2623_v60 }
 0x49f   : > { %2743 = vmatprep.mubr.bf16.mxu1 %v5865_v0 }
 0x4a5   : > { %v3411_v19 = vpop.eup %3410 }
 0x4a6   : > { %v2615_v17 = vmul.f32 %v3411_v19, %v5377_v20 }
 0x4a9   : > { %v3413_v53 = vpop.eup %3412 }
 0x4aa   : > { %v2616_v34 = vmul.f32 %v3413_v53, %v5381_v52 }
 0x4ac   : > { %v2624_v54 = vpack.c.bf16 %v2616_v34, %v2615_v17 }
 0x4ae   : > { %v2089_v13 = vpop.f32.mrf.mxu1  ;;  %2744 = vmatmul.mubr.bf16.gmra.mxu1 %v2624_v54 }
 0x4af   : > { %2168 = vst [vmem:[%s5418_s21] sm:$0xff] %v2089_v13 }
 0x4b0   : > { %v2091_v0 = vpop.f32.mrf.mxu1 }
 0x4b1   : > { %2169 = vst [vmem:[%s5418_s21 + $0x8] sm:$0xff] %v2091_v0 }
 0x4b2   : > { %v2093_v3 = vpop.f32.mrf.mxu1 }
 0x4b3   : > { %2170 = vst [vmem:[%s5418_s21 + $0x10] sm:$0xff] %v2093_v3 }
 0x4b4   : > { %v2095_v9 = vpop.f32.mrf.mxu1 }
 0x4b5   : > { %2171 = vst [vmem:[%s5418_s21 + $0x18] sm:$0xff] %v2095_v9 }
 0x4b7   : > { %v2099_v20 = vpop.f32.mrf.mxu1 }
 0x4b8   : > { %2172 = vst [vmem:[%s5418_s21 + $0x20] sm:$0xff] %v2099_v20 }
 0x4b9   : > { %v2101_v52 = vpop.f32.mrf.mxu1 }
 0x4ba   : > { %2173 = vst [vmem:[%s5418_s21 + $0x28] sm:$0xff] %v2101_v52 }
 0x4bb   : > { %v2103_v7 = vpop.f32.mrf.mxu1 }
 0x4bc   : > { %2174 = vst [vmem:[%s5418_s21 + $0x30] sm:$0xff] %v2103_v7 }
 0x4bd   : > { %v2105_v63 = vpop.f32.mrf.mxu1 }
 0x4be   : > { %2175 = vst [vmem:[%s5418_s21 + $0x38] sm:$0xff] %v2105_v63 }
 0x4bf   : > { %v2109_v59 = vpop.f32.mrf.mxu1 }
 0x4c0   : > { %2176 = vst [vmem:[%s5418_s21 + $0x40] sm:$0xff] %v2109_v59 }
 0x4c1   : > { %v2111_v57 = vpop.f32.mrf.mxu1 }
 0x4c2   : > { %2177 = vst [vmem:[%s5418_s21 + $0x48] sm:$0xff] %v2111_v57 }
 0x4c3   : > { %v2113_v48 = vpop.f32.mrf.mxu1 }
 0x4c4   : > { %2178 = vst [vmem:[%s5418_s21 + $0x50] sm:$0xff] %v2113_v48 }
 0x4c5   : > { %v2115_v12 = vpop.f32.mrf.mxu1 }
 0x4c6   : > { %2179 = vst [vmem:[%s5418_s21 + $0x58] sm:$0xff] %v2115_v12 }
 0x4c7   : > { %v2119_v10 = vpop.f32.mrf.mxu1 }
 0x4c8   : > { %2180 = vst [vmem:[%s5418_s21 + $0x60] sm:$0xff] %v2119_v10 }
 0x4c9   : > { %v2121_v25 = vpop.f32.mrf.mxu1 }
 0x4ca   : > { %2181 = vst [vmem:[%s5418_s21 + $0x68] sm:$0xff] %v2121_v25 }
 0x4cb   : > { %v2123_v50 = vpop.f32.mrf.mxu1 }
 0x4cc   : > { %2182 = vst [vmem:[%s5418_s21 + $0x70] sm:$0xff] %v2123_v50 }
 0x4cd   : > { %v2125_v62 = vpop.f32.mrf.mxu1 }
 0x4ce   : > { %2183 = vst [vmem:[%s5418_s21 + $0x78] sm:$0xff] %v2125_v62 }
 0x4cf   : > { %v2129_v41 = vpop.f32.mrf.mxu1 }
 0x4d0   : > { %2184 = vst [vmem:[%s5418_s21 + $0x80] sm:$0xff] %v2129_v41 }
 0x4d1   : > { %v2131_v4 = vpop.f32.mrf.mxu1 }
 0x4d2   : > { %2185 = vst [vmem:[%s5418_s21 + $0x88] sm:$0xff] %v2131_v4 }
 0x4d3   : > { %v2133_v31 = vpop.f32.mrf.mxu1 }
 0x4d4   : > { %2186 = vst [vmem:[%s5418_s21 + $0x90] sm:$0xff] %v2133_v31 }
 0x4d5   : > { %v2135_v8 = vpop.f32.mrf.mxu1 }
 0x4d6   : > { %2187 = vst [vmem:[%s5418_s21 + $0x98] sm:$0xff] %v2135_v8 }
 0x4d7   : > { %v2139_v43 = vpop.f32.mrf.mxu1 }
 0x4d8   : > { %2188 = vst [vmem:[%s5418_s21 + $0xa0] sm:$0xff] %v2139_v43 }
 0x4d9   : > { %v2141_v61 = vpop.f32.mrf.mxu1 }
 0x4da   : > { %2189 = vst [vmem:[%s5418_s21 + $0xa8] sm:$0xff] %v2141_v61 }
 0x4db   : > { %v2143_v33 = vpop.f32.mrf.mxu1 }
 0x4dc   : > { %2190 = vst [vmem:[%s5418_s21 + $0xb0] sm:$0xff] %v2143_v33 }
 0x4dd   : > { %v2145_v39 = vpop.f32.mrf.mxu1 }
 0x4de   : > { %2191 = vst [vmem:[%s5418_s21 + $0xb8] sm:$0xff] %v2145_v39 }
 0x4df   : > { %v2149_v6 = vpop.f32.mrf.mxu1 }
 0x4e0   : > { %2192 = vst [vmem:[%s5418_s21 + $0xc0] sm:$0xff] %v2149_v6 }
 0x4e1   : > { %v2151_v28 = vpop.f32.mrf.mxu1 }
 0x4e2   : > { %2193 = vst [vmem:[%s5418_s21 + $0xc8] sm:$0xff] %v2151_v28 }
 0x4e3   : > { %v2153_v22 = vpop.f32.mrf.mxu1 }
 0x4e4   : > { %2194 = vst [vmem:[%s5418_s21 + $0xd0] sm:$0xff] %v2153_v22 }
 0x4e5   : > { %v2155_v1 = vpop.f32.mrf.mxu1 }
 0x4e6   : > { %2195 = vst [vmem:[%s5418_s21 + $0xd8] sm:$0xff] %v2155_v1 }
 0x4e7   : > { %v2159_v26 = vpop.f32.mrf.mxu1 }
 0x4e8   : > { %2196 = vst [vmem:[%s5418_s21 + $0xe0] sm:$0xff] %v2159_v26 }
 0x4e9   : > { %v2161_v37 = vpop.f32.mrf.mxu1 }
 0x4ea   : > { %2197 = vst [vmem:[%s5418_s21 + $0xe8] sm:$0xff] %v2161_v37 }
 0x4eb   : > { %v2163_v40 = vpop.f32.mrf.mxu1 }
 0x4ec   : > { %2198 = vst [vmem:[%s5418_s21 + $0xf0] sm:$0xff] %v2163_v40 }
 0x4ed   : > { %v2165_v49 = vpop.f32.mrf.mxu1 }
 0x4ee   : > { %2199 = vst [vmem:[%s5418_s21 + $0xf8] sm:$0xff] %v2165_v49 }
 0x4ef   : > { %v2675_v38 = vpop.f32.mrf.mxu1 }
 0x4f0   : > { %3016 = vst [vmem:[%s5418_s21 + $0x100] sm:$0xff] %v2675_v38 }
 0x4f1   : > { %v2677_v11 = vpop.f32.mrf.mxu1 }
 0x4f2   : > { %3017 = vst [vmem:[%s5418_s21 + $0x108] sm:$0xff] %v2677_v11 }
 0x4f3   : > { %v2679_v46 = vpop.f32.mrf.mxu1 }
 0x4f4   : > { %3018 = vst [vmem:[%s5418_s21 + $0x110] sm:$0xff] %v2679_v46 }
 0x4f5   : > { %v2681_v42 = vpop.f32.mrf.mxu1 }
 0x4f6   : > { %3019 = vst [vmem:[%s5418_s21 + $0x118] sm:$0xff] %v2681_v42 }
 0x4f7   : > { %v2685_v55 = vpop.f32.mrf.mxu1 }
 0x4f8   : > { %3020 = vst [vmem:[%s5418_s21 + $0x120] sm:$0xff] %v2685_v55 }
 0x4f9   : > { %v2687_v32 = vpop.f32.mrf.mxu1 }
 0x4fa   : > { %3021 = vst [vmem:[%s5418_s21 + $0x128] sm:$0xff] %v2687_v32 }
 0x4fb   : > { %v2689_v35 = vpop.f32.mrf.mxu1 }
 0x4fc   : > { %3022 = vst [vmem:[%s5418_s21 + $0x130] sm:$0xff] %v2689_v35 }
 0x4fd   : > { %v2691_v16 = vpop.f32.mrf.mxu1 }
 0x4fe   : > { %3023 = vst [vmem:[%s5418_s21 + $0x138] sm:$0xff] %v2691_v16 }
 0x4ff   : > { %v2695_v18 = vpop.f32.mrf.mxu1 }
 0x500   : > { %3024 = vst [vmem:[%s5418_s21 + $0x140] sm:$0xff] %v2695_v18 }
 0x501   : > { %v2697_v15 = vpop.f32.mrf.mxu1 }
 0x502   : > { %3025 = vst [vmem:[%s5418_s21 + $0x148] sm:$0xff] %v2697_v15 }
 0x503   : > { %v2699_v51 = vpop.f32.mrf.mxu1 }
 0x504   : > { %3026 = vst [vmem:[%s5418_s21 + $0x150] sm:$0xff] %v2699_v51 }
 0x505   : > { %v2701_v44 = vpop.f32.mrf.mxu1 }
 0x506   : > { %3027 = vst [vmem:[%s5418_s21 + $0x158] sm:$0xff] %v2701_v44 }
 0x507   : > { %v2705_v56 = vpop.f32.mrf.mxu1 }
 0x508   : > { %3028 = vst [vmem:[%s5418_s21 + $0x160] sm:$0xff] %v2705_v56 }
 0x509   : > { %v2707_v5 = vpop.f32.mrf.mxu1 }
 0x50a   : > { %3029 = vst [vmem:[%s5418_s21 + $0x168] sm:$0xff] %v2707_v5 }
 0x50b   : > { %v2709_v21 = vpop.f32.mrf.mxu1 }
 0x50c   : > { %3030 = vst [vmem:[%s5418_s21 + $0x170] sm:$0xff] %v2709_v21 }
 0x50d   : > { %v2711_v24 = vpop.f32.mrf.mxu1 }
 0x50e   : > { %3031 = vst [vmem:[%s5418_s21 + $0x178] sm:$0xff] %v2711_v24 }
 0x54e   : > { %v2715_v27 = vpop.f32.mrf.mxu1 }
 0x54f   : > { %3032 = vst [vmem:[%s5418_s21 + $0x180] sm:$0xff] %v2715_v27 }
 0x550   : > { %v2717_v30 = vpop.f32.mrf.mxu1 }
 0x551   : > { %3033 = vst [vmem:[%s5418_s21 + $0x188] sm:$0xff] %v2717_v30 }
 0x552   : > { %v2719_v29 = vpop.f32.mrf.mxu1 }
 0x553   : > { %3034 = vst [vmem:[%s5418_s21 + $0x190] sm:$0xff] %v2719_v29 }
 0x554   : > { %v2721_v14 = vpop.f32.mrf.mxu1 }
 0x555   : > { %3035 = vst [vmem:[%s5418_s21 + $0x198] sm:$0xff] %v2721_v14 }
 0x556   : > { %v2725_v58 = vpop.f32.mrf.mxu1 }
 0x557   : > { %3036 = vst [vmem:[%s5418_s21 + $0x1a0] sm:$0xff] %v2725_v58 }
 0x558   : > { %v2727_v47 = vpop.f32.mrf.mxu1 }
 0x559   : > { %3037 = vst [vmem:[%s5418_s21 + $0x1a8] sm:$0xff] %v2727_v47 }
 0x55a   : > { %v2729_v2 = vpop.f32.mrf.mxu1 }
 0x55b   : > { %3038 = vst [vmem:[%s5418_s21 + $0x1b0] sm:$0xff] %v2729_v2 }
 0x55c   : > { %v2731_v36 = vpop.f32.mrf.mxu1 }
 0x55d   : > { %3039 = vst [vmem:[%s5418_s21 + $0x1b8] sm:$0xff] %v2731_v36 }
 0x55e   : > { %v2735_v23 = vpop.f32.mrf.mxu1 }
 0x55f   : > { %3040 = vst [vmem:[%s5418_s21 + $0x1c0] sm:$0xff] %v2735_v23 }
 0x560   : > { %v2737_v45 = vpop.f32.mrf.mxu1 }
 0x561   : > { %3041 = vst [vmem:[%s5418_s21 + $0x1c8] sm:$0xff] %v2737_v45 }
 0x562   : > { %v2739_v60 = vpop.f32.mrf.mxu1 }
 0x563   : > { %3042 = vst [vmem:[%s5418_s21 + $0x1d0] sm:$0xff] %v2739_v60 }
 0x564   : > { %v2741_v19 = vpop.f32.mrf.mxu1 }
 0x565   : > { %3043 = vst [vmem:[%s5418_s21 + $0x1d8] sm:$0xff] %v2741_v19 }
 0x56e   : > { %v2745_v53 = vpop.f32.mrf.mxu1 }
 0x56f   : > { %3044 = vst [vmem:[%s5418_s21 + $0x1e0] sm:$0xff] %v2745_v53 }
 0x570   : > { %v2747_v17 = vpop.f32.mrf.mxu1 }
 0x571   : > { %3045 = vst [vmem:[%s5418_s21 + $0x1e8] sm:$0xff] %v2747_v17 }
 0x572   : > { %v2749_v34 = vpop.f32.mrf.mxu1 }
 0x573   : > { %3046 = vst [vmem:[%s5418_s21 + $0x1f0] sm:$0xff] %v2749_v34 }
 0x574   : > { %v2751_v54 = vpop.f32.mrf.mxu1 }
 0x575   : > { %3047 = vst [vmem:[%s5418_s21 + $0x1f8] sm:$0xff] %v2751_v54 }
 0x576   : > { %3533 = shalt.err (!%p3530_p9)
}
 0x577   : > { %s3534_s11 = scalar_lea.hbm %s5487_s14, 8192  ;;  %s3538_s26 = scalar_lea.hbm %s5538_s4, 16384 }
 0x578   : > { %p3535_p7 = scmp.ne.s32.totalorder %s5487_s14, %s3534_s11  ;;  %p3539_p6 = scmp.lt.s32.totalorder %s5487_s14, %s5538_s4 }
 0x579   : > { %p3540_p11 = scmp.lt.s32.totalorder %s3538_s26, %s3534_s11 }
 0x57a   : > { %p3536_p4 = pnand %p3535_p7, %p5892_p0 }
 0x57b   : > { %p3541_p13 = por %p3540_p11, %p3539_p6 }
 0x57c   : > { %p3537_p8 = pneg %p3536_p4 }
 0x57e   : > { %p3542_p12 = pnand %p3541_p13, %p3537_p8 }
 0x580   : > { %3545 = shalt.err (!%p3542_p12)
}
 0x581   : > { %s3604_s21 = smov 256   ;;  %s3605_s23 = smov 16  }
 0x582   : > { %3072 = dma.vmem_to_hbm [thread:$0]  (%p5892_p0), %s5489_s9, 8192, %s5487_s14, %s2788_s25, %s3604_s21, %s3604_s21, %s3605_s23  }
 0x583 PF: > { %s2817_s10 = sand.u32 1, %s3580_s15   ;;  %p5893_p5 = scmp.ne.s32.totalorder %s5636_s22, 0 }
 0x584   : > { %p5894_p10 = scmp.ge.s32.totalorder %s3592_s18, 2  ;;  %s2818_s12 = scalar_lea.sflag [#allocation4], %s2817_s10 }
 0x586   : > { %p3089_p1 = pnand %p5894_p10, %p5893_p5 }
 0x588   : > { %p3090_p2 = pneg %p3089_p1 }
 0x58a   : > { %3575 = dma.done.wait (%p3090_p2), %s2818_s12, 8192  }
 0x58b   : > { %3577 = vsyncadd (%p3090_p2), %s2818_s12, 4294959104  ;;  %p19_p3 = scmp.ge.s32.totalorder %s3706_s20, 4   ;;  %s5895_s15 = smov %s3584_s16 }
 0x58c   : > { %s5896_s16 = smov %s3588_s17  ;;  %s5897_s17 = smov %s3727_s29 }
 0x58d   : > { %s5898_s18 = smov %s3706_s20  ;;  %21 = sbr.rel (!%p19_p3) target bundleno = 7 (0x7), region = 94 }
 0x592   :  { %2823 = vsyncpa [#allocation3], 1 }
 0x593   :  { %2825 = vsyncpa [#allocation3 + $0x1], 1 }
 0x594   :  { %2826 = vsyncpa [#allocation6], 1 }
 0x595   :  { %2827 = vsyncpa [#allocation9], 1 }
 0x596   :  { %2828 = vsyncpa [#allocation4], 1 }
 0x597   :  { %2830 = vsyncpa [#allocation4 + $0x1], 1 }

// kernel: tpu_custom_call.1
= control target key start
LH: loop header
LB: loop body
LE: loop exit
PB: predicated region body
PF: predicated region fallthrough
CT: control target
= control target key end

     0   :  { %9 = vsyncpa [#allocation3], 0  ;;  %s5534_s0 = inlined_call_operand.hbm [shape: f32[4,128,256], index: 0, kind: input, shape index: {}]   ;;  %s5535_s1 = inlined_call_operand.hbm [shape: bf16[256,768], index: 1, kind: input, shape index: {}]   ;;  %s5536_s2 = inlined_call_operand.hbm [shape: f32[128,256], index: 2, kind: input, shape index: {}]   ;;  %s5537_s3 = inlined_call_operand.hbm [shape: f32[128,256], index: 3, kind: input, shape index: {}]   ;;  %s5538_s4 = inlined_call_operand.hbm [shape: f32[4,128,256], index: 4, kind: output, shape index: {}]  }
   0x1   :  { %11 = vsyncpa [#allocation3 + $0x1], 0 }
   0x2   :  { %12 = vsyncpa [#allocation6], 0 }
   0x3   :  { %13 = vsyncpa [#allocation9], 0 }
   0x4   :  { %14 = vsyncpa [#allocation4], 0 }
   0x5   :  { %16 = vsyncpa [#allocation4 + $0x1], 0  ;;  %s3631_s15 = smov 0   ;;  %s3633_s16 = smov 0  }
   0x6   :  { %s3635_s17 = smov 0   ;;  %s3637_s18 = smov 0  }
   0x7 LB: > { %s3652_s19 = sadd.s32 4294967295, %s3592_s18   ;;  %s2904_s20 = sadd.s32 4294967294, %s3592_s18   ;;  %s3592_s18 = sphi %s3637_s18, %s5898_s18   ;;  %s3588_s17 = sphi %s3635_s17, %s5897_s17   ;;  %s3584_s16 = sphi %s3633_s16, %s5896_s16   ;;  %s3580_s15 = sphi %s3631_s15, %s5895_s15  }
   0x8   : > { %p42_p0 = scmp.ne.s32.totalorder %s3584_s16, %s3580_s15  ;;  %p5539_p1 = scmp.eq.s32.totalorder %s3652_s19, 0 }
   0x9   : > { %p135_p3 = scmp.eq.s32.totalorder %s2904_s20, 1  ;;  %p2905_p5 = scmp.ge.s32.totalorder %s3592_s18, 1 }
   0xa   : > { %p3661_p4 = por %p5539_p1, %p42_p0  ;;  %p142_p7 = scmp.lt.s32.totalorder %s3592_s18, 3 }
   0xb   : > { %p3666_p6 = por %p135_p3, %p42_p0  ;;  %s3594_s24 = smov [#allocation5]  }
   0xc   : > { %s5635_s21 = scalar_select %p3661_p4, 1, 0 }
   0xd   : > { %s5636_s22 = scalar_select %p3666_p6, 1, 0 }
   0xe   : > { %p3671_p8 = pnand %p2905_p5, %p142_p7  ;;  %s154_s25 = sshll.u32 %s3594_s24, 4  ;;  %s155_s25 = int_to_ptr.vmem [resolvable:$true] %s154_s25 }
   0xf   : > { %s3595_s27 = smov [#allocation7]   ;;  %s3425_s29 = scalar_lea.vmem %s155_s25, 12288 }
  0x10   : > { %s5637_s23 = scalar_select %p3671_p8, 1, 0 }
  0x11   : > { %p3074_p9 = pneg %p3671_p8  ;;  %s167_s28 = sshll.u32 %s3595_s27, 4  ;;  %s168_s28 = int_to_ptr.vmem [resolvable:$true] %s167_s28 }
  0x12   : > { %p3426_p13 = scmp.ne.s32.totalorder %s155_s25, %s3425_s29  ;;  %p3433_p5 = scmp.lt.s32.totalorder %s155_s25, %s155_s25 }
  0x13   : > { %p3680_p11 = pnand %p3074_p9, %p5539_p1  ;;  %p3434_p7 = scmp.lt.s32.totalorder %s3425_s29, %s3425_s29 }
  0x15   : > { %p3416_p12 = pneg %p3680_p11  ;;  %p3435_p10 = por %p3434_p7, %p3433_p5 }
  0x17   : > { %p3428_p0 = pnand %p3426_p13, %p3416_p12 }
  0x19   : > { %p3429_p3 = pneg %p3428_p0 }
  0x1b   : > { %p3436_p9 = pnand %p3435_p10, %p3429_p3 }
  0x1d   : > { %3439 = shalt.err (!%p3436_p9)
}
  0x1e   : > { %s3596_s30 = smov 384   ;;  %s3597_s5 = smov 24  }
  0x1f   : > { %3077 = dma.hbm_to_vmem [thread:$0]  (!%p3680_p11), %s5535_s1, 12288, %s155_s25, [#allocation6], %s3596_s30, %s3596_s30, %s3597_s5  }
  0x20   : > { %s3451_s8 = scalar_lea.vmem %s168_s28, 4096  ;;  %p3459_p2 = scmp.lt.s32.totalorder %s168_s28, %s168_s28 }
  0x21   : > { %p3452_p1 = scmp.ne.s32.totalorder %s168_s28, %s3451_s8  ;;  %p3460_p6 = scmp.lt.s32.totalorder %s3451_s8, %s3451_s8 }
  0x23   : > { %p3454_p13 = pnand %p3452_p1, %p3416_p12  ;;  %p3461_p5 = por %p3460_p6, %p3459_p2 }
  0x25   : > { %p3455_p0 = pneg %p3454_p13 }
  0x27   : > { %p3462_p10 = pnand %p3461_p5, %p3455_p0 }
  0x29   : > { %3465 = shalt.err (!%p3462_p10)
}
  0x2a   : > { %s3598_s9 = smov 256   ;;  %s3599_s10 = smov 16  }
  0x2b   : > { %3080 = dma.hbm_to_vmem [thread:$0]  (!%p3680_p11), %s5536_s2, 4096, %s168_s28, [#allocation6], %s3598_s9, %s3598_s9, %s3599_s10  }
  0x2c   : > { %s3600_s13 = smov [#allocation8]   ;;  %s3706_s20 = sadd.s32 1, %s3592_s18  }
  0x2d   : > { %s180_s14 = sshll.u32 %s3600_s13, 4  ;;  %s181_s14 = int_to_ptr.vmem [resolvable:$true] %s180_s14 }
  0x2e   : > { %s3477_s24 = scalar_lea.vmem %s181_s14, 4096  ;;  %p3485_p3 = scmp.lt.s32.totalorder %s181_s14, %s181_s14 }
  0x2f   : > { %p3478_p1 = scmp.ne.s32.totalorder %s181_s14, %s3477_s24  ;;  %p3486_p7 = scmp.lt.s32.totalorder %s3477_s24, %s3477_s24 }
  0x31   : > { %p3480_p2 = pnand %p3478_p1, %p3416_p12  ;;  %p3487_p9 = por %p3486_p7, %p3485_p3 }
  0x33   : > { %p3481_p6 = pneg %p3480_p2 }
  0x35   : > { %p3488_p13 = pnand %p3487_p9, %p3481_p6 }
  0x37   : > { %3491 = shalt.err (!%p3488_p13)
}
  0x38   : > { %3083 = dma.hbm_to_vmem [thread:$0]  (!%p3680_p11), %s5537_s3, 4096, %s181_s14, [#allocation9], %s3598_s9, %s3598_s9, %s3599_s10  }
  0x39   : > { %s26_s28 = ssub.s32 %s3592_s18, %s3706_s20  ;;  %s29_s26 = sadd.s32 1, %s3588_s17 }
  0x3a   : > { %p27_p12 = scmp.eq.s32.totalorder %s26_s28, 0  ;;  %p36_p0 = scmp.ne.s32.totalorder %s3588_s17, %s3584_s16 }
  0x3b   : > { %p37_p5 = scmp.eq.s32.totalorder %s3592_s18, 0  ;;  %p3095_p10 = scmp.lt.s32.totalorder %s3592_s18, 2 }
  0x3c   : > { %s3727_s29 = scalar_select %p27_p12, %s3588_s17, %s29_s26  }
  0x3d   : > { %p38_p1 = por %p37_p5, %p36_p0  ;;  %p5639_p2 = scmp.eq.s32.totalorder %s3652_s19, 1 }
  0x3e   : > { %s194_s5 = sand.u32 1, %s3588_s17   ;;  %s3055_s6 = sshll.u32 %s3592_s18, 13 }
  0x3f   : > { %p3731_p6 = por %p5639_p2, %p36_p0  ;;  %s2910_s7 = sshll.u32 %s194_s5, 9 }
  0x40   : > { %s3740_s12 = scalar_lea.hbm %s5534_s0, %s3055_s6  ;;  %s198_s13 = scalar_lea.vmem [#allocation2], %s2910_s7 }
  0x41   : > { %s5640_s30 = scalar_select %p3731_p6, 1, 0 }
  0x42   : > { %s206_s14 = sshll.u32 %s198_s13, 4  ;;  %p3742_p11 = pnand %p3095_p10, %p38_p1  ;;  %s3746_s14 = int_to_ptr.vmem [resolvable:$true] %s206_s14 }
  0x43   : > { %s3748_s25 = scalar_lea.sflag [#allocation3], %s194_s5  ;;  %s3492_s27 = scalar_lea.hbm %s3740_s12, 8192 }
  0x44   : > { %p3493_p3 = scmp.ne.s32.totalorder %s3740_s12, %s3492_s27  ;;  %p3494_p7 = pneg %p3742_p11 }
  0x45   : > { %s3497_s6 = scalar_lea.hbm %s5534_s0, 16384  ;;  %p3498_p12 = scmp.lt.s32.totalorder %s3740_s12, %s5534_s0 }
  0x46   : > { %p3495_p9 = pnand %p3494_p7, %p3493_p3  ;;  %p3499_p0 = scmp.lt.s32.totalorder %s3497_s6, %s3492_s27 }
  0x48   : > { %p3496_p13 = pneg %p3495_p9  ;;  %p3500_p5 = por %p3499_p0, %p3498_p12 }
  0x4a   : > { %p3501_p10 = pnand %p3500_p5, %p3496_p13 }
  0x4c   : > { %3504 = shalt.err (!%p3501_p10)
}
  0x4d   : > { %s3505_s5 = scalar_lea.vmem %s3746_s14, 8192  ;;  %s3601_s11 = smov [#allocation2]  }
  0x4e   : > { %p3506_p1 = scmp.ne.s32.totalorder %s3746_s14, %s3505_s5  ;;  %s3510_s13 = sshll.u32 %s3601_s11, 4  ;;  %s3511_s13 = int_to_ptr.vmem [resolvable:$false] %s3510_s13 }
  0x4f   : > { %s3512_s28 = scalar_lea.vmem %s3511_s13, 16384  ;;  %p3513_p9 = scmp.lt.s32.totalorder %s3746_s14, %s3511_s13 }
  0x50   : > { %p3508_p2 = pnand %p3506_p1, %p3494_p7  ;;  %p3514_p6 = scmp.lt.s32.totalorder %s3512_s28, %s3505_s5 }
  0x52   : > { %p3509_p3 = pneg %p3508_p2  ;;  %p3515_p4 = por %p3514_p6, %p3513_p9 }
  0x54   : > { %p3516_p8 = pnand %p3515_p4, %p3509_p3 }
  0x56   : > { %3519 = shalt.err (!%p3516_p8)
}
  0x57   : > { %3087 = dma.hbm_to_vmem [thread:$0]  (!%p3742_p11), %s3740_s12, 8192, %s3746_s14, %s3748_s25, %s3598_s9, %s3598_s9, %s3599_s10  }
  0x58   : > { %p5642_p7 = scmp.ne.s32.totalorder %s5637_s23, 0 }
  0x5a   : > { %218 = sbr.rel (%p5642_p7) target bundleno = 1411 (0x583), region = 36 }
  0x5f   : > { %s3775_s27 = sand.u32 1, %s3584_s16   ;;  %p5643_p4 = scmp.ne.s32.totalorder %s5635_s21, 0 }
  0x60   : > { %s2915_s26 = sshll.u32 %s3775_s27, 9  ;;  %s221_s6 = scalar_lea.sflag [#allocation3], %s3775_s27 }
  0x61   : > { %s3781_s24 = scalar_lea.vmem [#allocation2], %s2915_s26 }
  0x62   : > { %3563 = dma.done.wait (%p5643_p4), %s221_s6, 8192  }
  0x63   : > { %3565 = vsyncadd (%p5643_p4), %s221_s6, 4294959104  ;;  %p5644_p8 = scmp.eq.s32.totalorder %s3652_s19, 0 }
  0x65   : > { %3567 = dma.done.wait (%p5644_p8), [#allocation6], 16384   ;;  %p5645_p6 = pmov %p5644_p8 }
  0x67   : > { %3569 = vsyncadd (%p5645_p6), [#allocation6], 4294950912  ;;  %p5646_p11 = pmov %p5645_p6 }
  0x68   : > { %p5647_p13 = pmov %p5645_p6 }
  0x69   : > { %3571 = dma.done.wait (%p5646_p11), [#allocation9], 4096  }
  0x6a   : > { %3573 = vsyncadd (%p5647_p13), [#allocation9], 4294963200  ;;  %v3142_v0 = vld [vmem:[#allocation5 + $0x15c] ss:$24 sps:$4 sm:$0xff]   ;;  %v3144_v1 = vld [vmem:[#allocation5 + $0x158] ss:$24 sps:$4 sm:$0xff]  }
  0x6b   : > { %1129 = vmatprep.subr.bf16.mxu1 %v3142_v0  ;;  %v3145_v2 = vld [vmem:[#allocation5 + $0x12c] ss:$24 sps:$4 sm:$0xff]   ;;  %v3147_v3 = vld [vmem:[#allocation5 + $0x128] ss:$24 sps:$4 sm:$0xff]   ;;  %v3148_v4 = vld [vmem:[#allocation5 + $0xfc] ss:$24 sps:$4 sm:$0xff]  }
  0x6c   : > { %1130 = vmatpush1.bf16.msra.mxu1 %v3144_v1  ;;  %v3150_v5 = vld [vmem:[#allocation5 + $0xf8] ss:$24 sps:$4 sm:$0xff]   ;;  %v3151_v6 = vld [vmem:[#allocation5 + $0xcc] ss:$24 sps:$4 sm:$0xff]   ;;  %v3153_v7 = vld [vmem:[#allocation5 + $0xc8] ss:$24 sps:$4 sm:$0xff]  }
  0x6d   : > { %1131 = vmatprep.subr.bf16.mxu1 %v3145_v2  ;;  %v3154_v8 = vld [vmem:[#allocation5 + $0x9c] ss:$24 sps:$4 sm:$0xff]   ;;  %v3156_v9 = vld [vmem:[#allocation5 + $0x98] ss:$24 sps:$4 sm:$0xff]   ;;  %v3157_v10 = vld [vmem:[#allocation5 + $0x6c] ss:$24 sps:$4 sm:$0xff]  }
  0x6e   : > { %v3159_v11 = vld [vmem:[#allocation5 + $0x68] ss:$24 sps:$4 sm:$0xff]   ;;  %v3160_v12 = vld [vmem:[#allocation5 + $0x3c] ss:$24 sps:$4 sm:$0xff]   ;;  %v3162_v16 = vld [vmem:[#allocation5 + $0x38] ss:$24 sps:$4 sm:$0xff]  }
  0x6f   : > { %v265_v13 = vld [vmem:[%s3781_s24 + $0x8] sm:$0xff]  ;;  %v267_v14 = vld [vmem:[%s3781_s24 + $0x18] sm:$0xff]  ;;  %v264_v50 = vld [vmem:[%s3781_s24] sm:$0xff]  ;;  %s5418_s21 = scalar_lea.vmem [#allocation10], %s2915_s26  ;;  %s3057_s23 = sshll.u32 %s3652_s19, 13 }
  0x70   : > { %1132 = vmatpush1.bf16.msra.mxu1 %v3147_v3  ;;  %v3797_v15 = vpack.c.bf16 %v267_v14, %v265_v13  ;;  %v3163_v17 = vld [vmem:[#allocation5 + $0xc] ss:$24 sps:$4 sm:$0xff]   ;;  %v3165_v18 = vld [vmem:[#allocation5 + $0x8] ss:$24 sps:$4 sm:$0xff]   ;;  %v3166_v19 = vld [vmem:[#allocation5 + $0x2dc] ss:$24 sps:$4 sm:$0xff]   ;;  %s5487_s14 = scalar_lea.hbm %s5538_s4, %s3057_s23 }
  0x71   : > { %1133 = vmatprep.subr.bf16.mxu1 %v3148_v4  ;;  %v3168_v20 = vld [vmem:[#allocation5 + $0x2d8] ss:$24 sps:$4 sm:$0xff]   ;;  %v3190_v21 = vld [vmem:[#allocation5 + $0x154] ss:$24 sps:$4 sm:$0xff]   ;;  %v3193_v24 = vld [vmem:[#allocation5 + $0x124] ss:$24 sps:$4 sm:$0xff]  }
  0x72   : > { %1161 = vmatprep.mubr.bf16.mxu1 %v3797_v15  ;;  %968 = vmatprep.mubr.bf16.mxu0 %v3797_v15  ;;  %v3169_v22 = vld [vmem:[#allocation5 + $0x2ac] ss:$24 sps:$4 sm:$0xff]   ;;  %v3192_v23 = vld [vmem:[#allocation5 + $0x150] ss:$24 sps:$4 sm:$0xff]   ;;  %v3195_v25 = vld [vmem:[#allocation5 + $0x120] ss:$24 sps:$4 sm:$0xff]  }
  0x73   : > { %936 = vmatprep.subr.bf16.mxu0 %v3190_v21  ;;  %v3171_v26 = vld [vmem:[#allocation5 + $0x2a8] ss:$24 sps:$4 sm:$0xff]   ;;  %v3196_v27 = vld [vmem:[#allocation5 + $0xf4] ss:$24 sps:$4 sm:$0xff]   ;;  %v3174_v30 = vld [vmem:[#allocation5 + $0x278] ss:$24 sps:$4 sm:$0xff]  }
  0x74   : > { %1134 = vmatpush1.bf16.msra.mxu1 %v3150_v5  ;;  %937 = vmatpush1.bf16.msra.mxu0 %v3192_v23  ;;  %v3172_v28 = vld [vmem:[#allocation5 + $0x27c] ss:$24 sps:$4 sm:$0xff]   ;;  %v3198_v29 = vld [vmem:[#allocation5 + $0xf0] ss:$24 sps:$4 sm:$0xff]   ;;  %v3175_v32 = vld [vmem:[#allocation5 + $0x24c] ss:$24 sps:$4 sm:$0xff]  }
  0x75   : > { %1135 = vmatprep.subr.bf16.mxu1 %v3151_v6  ;;  %938 = vmatprep.subr.bf16.mxu0 %v3193_v24  ;;  %v3199_v31 = vld [vmem:[#allocation5 + $0xc4] ss:$24 sps:$4 sm:$0xff]   ;;  %v3201_v33 = vld [vmem:[#allocation5 + $0xc0] ss:$24 sps:$4 sm:$0xff]   ;;  %v3202_v35 = vld [vmem:[#allocation5 + $0x94] ss:$24 sps:$4 sm:$0xff]  }
  0x76   : > { %v3177_v34 = vld [vmem:[#allocation5 + $0x248] ss:$24 sps:$4 sm:$0xff]   ;;  %v3178_v36 = vld [vmem:[#allocation5 + $0x21c] ss:$24 sps:$4 sm:$0xff]   ;;  %v3180_v38 = vld [vmem:[#allocation5 + $0x218] ss:$24 sps:$4 sm:$0xff]  }
  0x77   : > { %v3204_v37 = vld [vmem:[#allocation5 + $0x90] ss:$24 sps:$4 sm:$0xff]   ;;  %v3205_v39 = vld [vmem:[#allocation5 + $0x64] ss:$24 sps:$4 sm:$0xff]   ;;  %v3207_v41 = vld [vmem:[#allocation5 + $0x60] ss:$24 sps:$4 sm:$0xff]  }
  0x78   : > { %1136 = vmatpush1.bf16.msra.mxu1 %v3153_v7  ;;  %939 = vmatpush1.bf16.msra.mxu0 %v3195_v25  ;;  %v3181_v40 = vld [vmem:[#allocation5 + $0x1ec] ss:$24 sps:$4 sm:$0xff]   ;;  %v3183_v42 = vld [vmem:[#allocation5 + $0x1e8] ss:$24 sps:$4 sm:$0xff]   ;;  %v3184_v44 = vld [vmem:[#allocation5 + $0x1bc] ss:$24 sps:$4 sm:$0xff]  }
  0x79   : > { %1137 = vmatprep.subr.bf16.mxu1 %v3154_v8  ;;  %940 = vmatprep.subr.bf16.mxu0 %v3196_v27  ;;  %v3208_v43 = vld [vmem:[#allocation5 + $0x34] ss:$24 sps:$4 sm:$0xff]   ;;  %v3210_v45 = vld [vmem:[#allocation5 + $0x30] ss:$24 sps:$4 sm:$0xff]   ;;  %v3211_v47 = vld [vmem:[#allocation5 + $0x4] ss:$24 sps:$4 sm:$0xff]  }
  0x7a   : > { %v3186_v46 = vld [vmem:[#allocation5 + $0x1b8] ss:$24 sps:$4 sm:$0xff]   ;;  %v3187_v48 = vld [vmem:[#allocation5 + $0x18c] ss:$24 sps:$4 sm:$0xff]   ;;  %v3189_v49 = vld [vmem:[#allocation5 + $0x188] ss:$24 sps:$4 sm:$0xff]  }
  0x7b   : > { %v3213_v51 = vld [vmem:[#allocation5] ss:$24 sps:$4 sm:$0xff]   ;;  %v266_v52 = vld [vmem:[%s3781_s24 + $0x10] sm:$0xff]  ;;  %v269_v54 = vld [vmem:[%s3781_s24 + $0x28] sm:$0xff]  ;;  %s2802_s9 = sshll.u32 %s5418_s21, 4  ;;  %s2788_s25 = scalar_lea.sflag [#allocation4], %s3775_s27  ;;  %s5489_s9 = int_to_ptr.vmem [resolvable:$true] %s2802_s9 }
  0x7c   : > { %1138 = vmatpush1.bf16.msra.mxu1 %v3156_v9  ;;  %941 = vmatpush1.bf16.msra.mxu0 %v3198_v29  ;;  %v3214_v53 = vld [vmem:[#allocation5 + $0x2d4] ss:$24 sps:$4 sm:$0xff]   ;;  %v271_v55 = vld [vmem:[%s3781_s24 + $0x38] sm:$0xff]  ;;  %v3805_v56 = vpack.c.bf16 %v266_v52, %v264_v50  ;;  %v3216_v57 = vld [vmem:[#allocation5 + $0x2d0] ss:$24 sps:$4 sm:$0xff]   ;;  %s3520_s7 = scalar_lea.vmem %s5489_s9, 8192 }
  0x7d   : > { %1139 = vmatprep.subr.bf16.mxu1 %v3157_v10  ;;  %942 = vmatprep.subr.bf16.mxu0 %v3199_v31  ;;  %v3807_v58 = vpack.c.bf16 %v271_v55, %v269_v54  ;;  %v3217_v59 = vld [vmem:[#allocation5 + $0x2a4] ss:$24 sps:$4 sm:$0xff]   ;;  %v3219_v60 = vld [vmem:[#allocation5 + $0x2a0] ss:$24 sps:$4 sm:$0xff]   ;;  %v270_v62 = vld [vmem:[%s3781_s24 + $0x30] sm:$0xff]  ;;  %p3521_p12 = scmp.ne.s32.totalorder %s5489_s9, %s3520_s7  ;;  %p5892_p0 = scmp.ne.s32.totalorder %s5640_s30, 0 }
  0x7e   : > { %v268_v61 = vld [vmem:[%s3781_s24 + $0x20] sm:$0xff]  ;;  %v3220_v63 = vld [vmem:[#allocation5 + $0x274] ss:$24 sps:$4 sm:$0xff]   ;;  %v275_v1 = vld [vmem:[%s3781_s24 + $0x58] sm:$0xff]  ;;  %s3603_s19 = smov [#allocation10]  }
  0x7f   : > { %v273_v0 = vld [vmem:[%s3781_s24 + $0x48] sm:$0xff]  ;;  %v3223_v3 = vld [vmem:[#allocation5 + $0x244] ss:$24 sps:$4 sm:$0xff]   ;;  %v3815_v4 = vpack.c.bf16 %v270_v62, %v268_v61  ;;  %v3225_v6 = vld [vmem:[#allocation5 + $0x240] ss:$24 sps:$4 sm:$0xff]   ;;  %p3522_p5 = pnand %p3521_p12, %p5892_p0  ;;  %s3524_s8 = sshll.u32 %s3603_s19, 4  ;;  %s3525_s8 = int_to_ptr.vmem [resolvable:$false] %s3524_s8 }
  0x80   : > { %1140 = vmatpush1.bf16.msra.mxu1 %v3159_v11  ;;  %943 = vmatpush1.bf16.msra.mxu0 %v3201_v33  ;;  %v3222_v2 = vld [vmem:[#allocation5 + $0x270] ss:$24 sps:$4 sm:$0xff]   ;;  %v3817_v5 = vpack.c.bf16 %v275_v1, %v273_v0  ;;  %v272_v7 = vld [vmem:[%s3781_s24 + $0x40] sm:$0xff]  ;;  %v3226_v9 = vld [vmem:[#allocation5 + $0x214] ss:$24 sps:$4 sm:$0xff]   ;;  %s3526_s5 = scalar_lea.vmem %s3525_s8, 16384  ;;  %p3527_p1 = scmp.lt.s32.totalorder %s5489_s9, %s3525_s8 }
  0x81   : > { %1141 = vmatprep.subr.bf16.mxu1 %v3160_v12  ;;  %944 = vmatprep.subr.bf16.mxu0 %v3202_v35  ;;  %v274_v8 = vld [vmem:[%s3781_s24 + $0x50] sm:$0xff]  ;;  %v277_v10 = vld [vmem:[%s3781_s24 + $0x68] sm:$0xff]  ;;  %v279_v11 = vld [vmem:[%s3781_s24 + $0x78] sm:$0xff]  ;;  %p3523_p10 = pneg %p3522_p5  ;;  %p3528_p2 = scmp.lt.s32.totalorder %s3526_s5, %s3520_s7 }
  0x82   : > { %v3825_v12 = vpack.c.bf16 %v274_v8, %v272_v7  ;;  %v3228_v13 = vld [vmem:[#allocation5 + $0x210] ss:$24 sps:$4 sm:$0xff]   ;;  %v3827_v14 = vpack.c.bf16 %v279_v11, %v277_v10  ;;  %v3237_v27 = vld [vmem:[#allocation5 + $0x180] ss:$24 sps:$4 sm:$0xff]   ;;  %v3246_v55 = vld [vmem:[#allocation5 + $0x104] ss:$24 sps:$4 sm:$0xff]  }
  0x83   : > { %v281_v21 = vld [vmem:[%s3781_s24 + $0x88] sm:$0xff]  ;;  %v282_v29 = vld [vmem:[%s3781_s24 + $0x90] sm:$0xff]  ;;  %v287_v31 = vld [vmem:[%s3781_s24 + $0xb8] sm:$0xff]  ;;  %p3529_p3 = por %p3528_p2, %p3527_p1 }
  0x84   : > { %1142 = vmatpush1.bf16.msra.mxu1 %v3162_v16  ;;  %945 = vmatpush1.bf16.msra.mxu0 %v3204_v37  ;;  %v3229_v16 = vld [vmem:[#allocation5 + $0x1e4] ss:$24 sps:$4 sm:$0xff]   ;;  %v3234_v24 = vld [vmem:[#allocation5 + $0x1b0] ss:$24 sps:$4 sm:$0xff]   ;;  %v3250_v7 = vld [vmem:[#allocation5 + $0xa0] ss:$24 sps:$4 sm:$0xff]  }
  0x85   : > { %1143 = vmatprep.subr.bf16.mxu1 %v3163_v17  ;;  %946 = vmatprep.subr.bf16.mxu0 %v3205_v39  ;;  %v3231_v17 = vld [vmem:[#allocation5 + $0x1e0] ss:$24 sps:$4 sm:$0xff]   ;;  %v286_v35 = vld [vmem:[%s3781_s24 + $0xb0] sm:$0xff]  ;;  %v297_v52 = vld [vmem:[%s3781_s24 + $0x108] sm:$0xff]  ;;  %p3530_p9 = pnand %p3529_p3, %p3523_p10 }
  0x86   : > { %v291_v37 = vld [vmem:[%s3781_s24 + $0xd8] sm:$0xff]  ;;  %v294_v50 = vld [vmem:[%s3781_s24 + $0xf0] sm:$0xff]  ;;  %v296_v61 = vld [vmem:[%s3781_s24 + $0x100] sm:$0xff] }
  0x87   : > { %v298_v62 = vld [vmem:[%s3781_s24 + $0x110] sm:$0xff]  ;;  %v301_v0 = vld [vmem:[%s3781_s24 + $0x128] sm:$0xff]  ;;  %v303_v1 = vld [vmem:[%s3781_s24 + $0x138] sm:$0xff] }
  0x88   : > { %1144 = vmatpush1.bf16.msra.mxu1 %v3165_v18  ;;  %947 = vmatpush1.bf16.msra.mxu0 %v3207_v41  ;;  %v276_v18 = vld [vmem:[%s3781_s24 + $0x60] sm:$0xff]  ;;  %v290_v41 = vld [vmem:[%s3781_s24 + $0xd0] sm:$0xff] }
  0x89   : > { %1145 = vmatprep.subr.bf16.mxu1 %v3166_v19  ;;  %948 = vmatprep.subr.bf16.mxu0 %v3208_v43  ;;  %v278_v19 = vld [vmem:[%s3781_s24 + $0x70] sm:$0xff]  ;;  %v295_v43 = vld [vmem:[%s3781_s24 + $0xf8] sm:$0xff] }
  0x8a   : > { %v3835_v23 = vpack.c.bf16 %v278_v19, %v276_v18  ;;  %v3255_v8 = vld [vmem:[#allocation5 + $0x74] ss:$24 sps:$4 sm:$0xff]   ;;  %v3253_v11 = vld [vmem:[#allocation5 + $0x70] ss:$24 sps:$4 sm:$0xff]   ;;  %v3258_v18 = vld [vmem:[#allocation5 + $0x44] ss:$24 sps:$4 sm:$0xff]  }
  0x8b   : > { %v302_v10 = vld [vmem:[%s3781_s24 + $0x130] sm:$0xff] }
  0x8c   : > { %1146 = vmatpush2.bf16.msra.mxu1 %v3168_v20  ;;  %949 = vmatpush1.bf16.msra.mxu0 %v3210_v45  ;;  %v3232_v20 = vld [vmem:[#allocation5 + $0x1b4] ss:$24 sps:$4 sm:$0xff]   ;;  %v3240_v45 = vld [vmem:[#allocation5 + $0x164] ss:$24 sps:$4 sm:$0xff]  }
  0x8d   : > { %1147 = vmatprep.subr.bf16.mxu1 %v3169_v22  ;;  %950 = vmatprep.subr.bf16.mxu0 %v3211_v47  ;;  %v283_v22 = vld [vmem:[%s3781_s24 + $0x98] sm:$0xff] }
  0x8e   : > { %v3837_v25 = vpack.c.bf16 %v283_v22, %v281_v21  ;;  %v3238_v47 = vld [vmem:[#allocation5 + $0x160] ss:$24 sps:$4 sm:$0xff]   ;;  %v3261_v21 = vld [vmem:[#allocation5 + $0x14] ss:$24 sps:$4 sm:$0xff]  }
  0x8f   : > { %v304_v22 = vld [vmem:[%s3781_s24 + $0x140] sm:$0xff] }
  0x90   : > { %1148 = vmatpush2.bf16.msra.mxu1 %v3171_v26  ;;  %951 = vmatpush1.bf16.msra.mxu0 %v3213_v51  ;;  %v3235_v26 = vld [vmem:[#allocation5 + $0x184] ss:$24 sps:$4 sm:$0xff]   ;;  %v3241_v51 = vld [vmem:[#allocation5 + $0x130] ss:$24 sps:$4 sm:$0xff]  }
  0x91   : > { %1149 = vmatprep.subr.bf16.mxu1 %v3172_v28  ;;  %952 = vmatprep.subr.bf16.mxu0 %v3214_v53  ;;  %v280_v28 = vld [vmem:[%s3781_s24 + $0x80] sm:$0xff]  ;;  %v299_v53 = vld [vmem:[%s3781_s24 + $0x118] sm:$0xff] }
  0x94   : > { %1150 = vmatpush2.bf16.msra.mxu1 %v3174_v30  ;;  %953 = vmatpush2.bf16.msra.mxu0 %v3216_v57  ;;  %v285_v30 = vld [vmem:[%s3781_s24 + $0xa8] sm:$0xff]  ;;  %v3883_v57 = vpack.c.bf16 %v299_v53, %v297_v52 }
  0x95   : > { %1151 = vmatprep.subr.bf16.mxu1 %v3175_v32  ;;  %954 = vmatprep.subr.bf16.mxu0 %v3217_v59  ;;  %v3845_v32 = vpack.c.bf16 %v282_v29, %v280_v28  ;;  %v3847_v33 = vpack.c.bf16 %v287_v31, %v285_v30  ;;  %v3244_v59 = vld [vmem:[#allocation5 + $0x100] ss:$24 sps:$4 sm:$0xff]   ;;  %v3264_v30 = vld [vmem:[#allocation5 + $0x2e4] ss:$24 sps:$4 sm:$0xff]   ;;  %v3271_v52 = vld [vmem:[#allocation5 + $0x250] ss:$24 sps:$4 sm:$0xff]  }
  0x96   : > { %v311_v28 = vld [vmem:[%s3781_s24 + $0x178] sm:$0xff]  ;;  %v317_v53 = vld [vmem:[%s3781_s24 + $0x1a8] sm:$0xff] }
  0x98   : > { %1152 = vmatpush2.bf16.msra.mxu1 %v3177_v34  ;;  %955 = vmatpush2.bf16.msra.mxu0 %v3219_v60  ;;  %v284_v34 = vld [vmem:[%s3781_s24 + $0xa0] sm:$0xff]  ;;  %v3249_v60 = vld [vmem:[#allocation5 + $0xd4] ss:$24 sps:$4 sm:$0xff]  }
  0x99   : > { %1153 = vmatprep.subr.bf16.mxu1 %v3178_v36  ;;  %956 = vmatprep.subr.bf16.mxu0 %v3220_v63  ;;  %v289_v36 = vld [vmem:[%s3781_s24 + $0xc8] sm:$0xff] }
  0x9a   : > { %v3859_v39 = vpack.c.bf16 %v291_v37, %v289_v36  ;;  %v3247_v63 = vld [vmem:[#allocation5 + $0xd0] ss:$24 sps:$4 sm:$0xff]   ;;  %v308_v36 = vld [vmem:[%s3781_s24 + $0x160] sm:$0xff] }
  0x9b   : > { %v310_v37 = vld [vmem:[%s3781_s24 + $0x170] sm:$0xff] }
  0x9c   : > { %1154 = vmatpush2.bf16.msra.mxu1 %v3180_v38  ;;  %957 = vmatpush2.bf16.msra.mxu0 %v3222_v2  ;;  %v3857_v38 = vpack.c.bf16 %v286_v35, %v284_v34  ;;  %v3893_v2 = vpack.c.bf16 %v298_v62, %v296_v61  ;;  %v3262_v34 = vld [vmem:[#allocation5 + $0x2e0] ss:$24 sps:$4 sm:$0xff]   ;;  %v3267_v35 = vld [vmem:[#allocation5 + $0x2b4] ss:$24 sps:$4 sm:$0xff]  }
  0x9d   : > { %1155 = vmatprep.subr.bf16.mxu1 %v3181_v40  ;;  %958 = vmatprep.subr.bf16.mxu0 %v3223_v3  ;;  %v288_v40 = vld [vmem:[%s3781_s24 + $0xc0] sm:$0xff] }
  0x9e   : > { %v3252_v3 = vld [vmem:[#allocation5 + $0xa4] ss:$24 sps:$4 sm:$0xff]   ;;  %v3274_v62 = vld [vmem:[#allocation5 + $0x220] ss:$24 sps:$4 sm:$0xff]  }
  0xa0   : > { %1156 = vmatpush2.bf16.msra.mxu1 %v3183_v42  ;;  %959 = vmatpush2.bf16.msra.mxu0 %v3225_v6  ;;  %v293_v42 = vld [vmem:[%s3781_s24 + $0xe8] sm:$0xff]  ;;  %v3895_v6 = vpack.c.bf16 %v303_v1, %v301_v0  ;;  %v316_v0 = vld [vmem:[%s3781_s24 + $0x1a0] sm:$0xff]  ;;  %v318_v1 = vld [vmem:[%s3781_s24 + $0x1b0] sm:$0xff] }
  0xa1   : > { %1157 = vmatprep.subr.bf16.mxu1 %v3184_v44  ;;  %960 = vmatprep.subr.bf16.mxu0 %v3226_v9  ;;  %v3869_v44 = vpack.c.bf16 %v290_v41, %v288_v40  ;;  %v300_v9 = vld [vmem:[%s3781_s24 + $0x120] sm:$0xff]  ;;  %v3265_v40 = vld [vmem:[#allocation5 + $0x2b0] ss:$24 sps:$4 sm:$0xff]  }
  0xa2   : > { %v313_v41 = vld [vmem:[%s3781_s24 + $0x188] sm:$0xff] }
  0xa4   : > { %1158 = vmatpush2.bf16.msra.mxu1 %v3186_v46  ;;  %961 = vmatpush2.bf16.msra.mxu0 %v3228_v13  ;;  %v3871_v46 = vpack.c.bf16 %v295_v43, %v293_v42  ;;  %v305_v13 = vld [vmem:[%s3781_s24 + $0x148] sm:$0xff]  ;;  %v315_v42 = vld [vmem:[%s3781_s24 + $0x198] sm:$0xff]  ;;  %v3929_v43 = vpack.c.bf16 %v310_v37, %v308_v36  ;;  %v4002_v37 = vld [vmem:[#allocation8 + $0x10] sm:$0xff] }
  0xa5   : > { %1159 = vmatprep.subr.bf16.mxu1 %v3187_v48  ;;  %962 = vmatprep.subr.bf16.mxu0 %v3229_v16  ;;  %v3243_v48 = vld [vmem:[#allocation5 + $0x134] ss:$24 sps:$4 sm:$0xff]   ;;  %v307_v16 = vld [vmem:[%s3781_s24 + $0x158] sm:$0xff] }
  0xa6   : > { %v3907_v19 = vpack.c.bf16 %v307_v16, %v305_v13  ;;  %v3280_v13 = vld [vmem:[#allocation5 + $0x1c0] ss:$24 sps:$4 sm:$0xff]   ;;  %v3285_v16 = vld [vmem:[#allocation5 + $0x194] ss:$24 sps:$4 sm:$0xff]  }
  0xa8   : > { %1160 = vmatpush2.bf16.msra.mxu1 %v3189_v49  ;;  %963 = vmatpush2.bf16.msra.mxu0 %v3231_v17  ;;  %v292_v49 = vld [vmem:[%s3781_s24 + $0xe0] sm:$0xff]  ;;  %v3905_v17 = vpack.c.bf16 %v302_v10, %v300_v9  ;;  %v3953_v9 = vpack.c.bf16 %v318_v1, %v316_v0 }
  0xa9   : > { %964 = vmatprep.subr.bf16.mxu0 %v3232_v20  ;;  %v3881_v54 = vpack.c.bf16 %v294_v50, %v292_v49  ;;  %v3256_v20 = vld [vmem:[#allocation5 + $0x40] ss:$24 sps:$4 sm:$0xff]   ;;  %v3273_v49 = vld [vmem:[#allocation5 + $0x254] ss:$24 sps:$4 sm:$0xff]   ;;  %v3282_v10 = vld [vmem:[#allocation5 + $0x1c4] ss:$24 sps:$4 sm:$0xff]  }
  0xaa   : > { %v312_v50 = vld [vmem:[%s3781_s24 + $0x180] sm:$0xff] }
  0xab   : > { %1162 = vmatmul.mubr.bf16.vlgmr.msra.gmra.mxu1 %v3805_v56 }
  0xac   : > { %1171 = vmatprep.mubr.bf16.mxu1 %v3807_v58  ;;  %965 = vmatpush2.bf16.msra.mxu0 %v3234_v24  ;;  %v306_v24 = vld [vmem:[%s3781_s24 + $0x150] sm:$0xff] }
  0xad   : > { %966 = vmatprep.subr.bf16.mxu0 %v3235_v26  ;;  %v3259_v26 = vld [vmem:[#allocation5 + $0x10] ss:$24 sps:$4 sm:$0xff]   ;;  %v3917_v29 = vpack.c.bf16 %v306_v24, %v304_v22  ;;  %v327_v24 = vld [vmem:[%s3781_s24 + $0x1f8] sm:$0xff] }
  0xae   : > { %v325_v22 = vld [vmem:[%s3781_s24 + $0x1e8] sm:$0xff] }
  0xb0   : > { %967 = vmatpush2.bf16.msra.mxu0 %v3237_v27  ;;  %v309_v27 = vld [vmem:[%s3781_s24 + $0x168] sm:$0xff] }
  0xb1   : > { %1322 = vmatprep.subr.bf16.mxu0 %v3240_v45  ;;  %v3919_v31 = vpack.c.bf16 %v311_v28, %v309_v27  ;;  %v3270_v45 = vld [vmem:[#allocation5 + $0x284] ss:$24 sps:$4 sm:$0xff]   ;;  %v3967_v27 = vpack.c.bf16 %v327_v24, %v325_v22  ;;  %v4054_v24 = vld [vmem:[#allocation8 + $0x50] sm:$0xff] }
  0xb2   : > { %v324_v28 = vld [vmem:[%s3781_s24 + $0x1e0] sm:$0xff]  ;;  %5656 = vst [vmem:[#allocation23_spill] sm:$0xff] %v4054_v24 }
  0xb3   : > { %1172 = vmatmul.mubr.bf16.gmra.mxu1 %v3815_v4  ;;  %969 = vmatmul.mubr.bf16.vlgmr.msra.gmra.mxu0 %v3805_v56 }
  0xb4   : > { %1181 = vmatprep.mubr.bf16.mxu1 %v3817_v5  ;;  %978 = vmatprep.mubr.bf16.mxu0 %v3807_v58 }
  0xb5   : > { %1323 = vmatpush1.bf16.msra.mxu0 %v3238_v47  ;;  %v3931_v47 = vpack.c.bf16 %v315_v42, %v313_v41 }
  0xb6   : > { %1324 = vmatprep.subr.bf16.mxu0 %v3243_v48  ;;  %v3268_v48 = vld [vmem:[#allocation5 + $0x280] ss:$24 sps:$4 sm:$0xff]  }
  0xb9   : > { %1325 = vmatpush1.bf16.msra.mxu0 %v3241_v51  ;;  %v314_v51 = vld [vmem:[%s3781_s24 + $0x190] sm:$0xff] }
  0xba   : > { %1326 = vmatprep.subr.bf16.mxu0 %v3246_v55  ;;  %v319_v55 = vld [vmem:[%s3781_s24 + $0x1b8] sm:$0xff] }
  0xbb   : > { %1182 = vmatmul.mubr.bf16.gmra.mxu1 %v3825_v12  ;;  %979 = vmatmul.mubr.bf16.gmra.mxu0 %v3815_v4  ;;  %v3943_v61 = vpack.c.bf16 %v319_v55, %v317_v53  ;;  %v4028_v55 = vld [vmem:[#allocation8 + $0x30] sm:$0xff] }
  0xbc   : > { %1191 = vmatprep.mubr.bf16.mxu1 %v3827_v14  ;;  %988 = vmatprep.mubr.bf16.mxu0 %v3817_v5 }
  0xbd   : > { %1327 = vmatpush1.bf16.msra.mxu0 %v3244_v59  ;;  %v3941_v59 = vpack.c.bf16 %v314_v51, %v312_v50  ;;  %v4024_v51 = vld [vmem:[#allocation8 + $0x20] sm:$0xff] }
  0xbe   : > { %1328 = vmatprep.subr.bf16.mxu0 %v3249_v60  ;;  %v3276_v60 = vld [vmem:[#allocation5 + $0x224] ss:$24 sps:$4 sm:$0xff]  }
  0xc1   : > { %1329 = vmatpush1.bf16.msra.mxu0 %v3247_v63  ;;  %v3279_v63 = vld [vmem:[#allocation5 + $0x1f4] ss:$24 sps:$4 sm:$0xff]  }
  0xc2   : > { %1330 = vmatprep.subr.bf16.mxu0 %v3252_v3  ;;  %v3277_v3 = vld [vmem:[#allocation5 + $0x1f0] ss:$24 sps:$4 sm:$0xff]  }
  0xc3   : > { %1192 = vmatmul.mubr.bf16.gmra.mxu1 %v3835_v23  ;;  %989 = vmatmul.mubr.bf16.gmra.mxu0 %v3825_v12 }
  0xc4   : > { %1201 = vmatprep.mubr.bf16.mxu1 %v3837_v25  ;;  %998 = vmatprep.mubr.bf16.mxu0 %v3827_v14 }
  0xc5   : > { %1331 = vmatpush1.bf16.msra.mxu0 %v3250_v7  ;;  %v321_v7 = vld [vmem:[%s3781_s24 + $0x1c8] sm:$0xff] }
  0xc6   : > { %1332 = vmatprep.subr.bf16.mxu0 %v3255_v8  ;;  %v323_v8 = vld [vmem:[%s3781_s24 + $0x1d8] sm:$0xff] }
  0xc9   : > { %1333 = vmatpush1.bf16.msra.mxu0 %v3253_v11  ;;  %v3955_v11 = vpack.c.bf16 %v323_v8, %v321_v7 }
  0xca   : > { %1334 = vmatprep.subr.bf16.mxu0 %v3258_v18  ;;  %v320_v18 = vld [vmem:[%s3781_s24 + $0x1c0] sm:$0xff] }
  0xcb   : > { %1202 = vmatmul.mubr.bf16.gmra.mxu1 %v3845_v32  ;;  %999 = vmatmul.mubr.bf16.gmra.mxu0 %v3835_v23 }
  0xcc   : > { %1211 = vmatprep.mubr.bf16.mxu1 %v3847_v33  ;;  %1008 = vmatprep.mubr.bf16.mxu0 %v3837_v25 }
  0xcd   : > { %1335 = vmatpush1.bf16.msra.mxu0 %v3256_v20  ;;  %v322_v20 = vld [vmem:[%s3781_s24 + $0x1d0] sm:$0xff] }
  0xce   : > { %1336 = vmatprep.subr.bf16.mxu0 %v3261_v21  ;;  %v3283_v21 = vld [vmem:[#allocation5 + $0x190] ss:$24 sps:$4 sm:$0xff]  }
  0xd1   : > { %1337 = vmatpush1.bf16.msra.mxu0 %v3259_v26  ;;  %v3965_v26 = vpack.c.bf16 %v322_v20, %v320_v18  ;;  %v4050_v20 = vld [vmem:[#allocation8 + $0x40] sm:$0xff] }
  0xd2   : > { %1338 = vmatprep.subr.bf16.mxu0 %v3264_v30  ;;  %v326_v30 = vld [vmem:[%s3781_s24 + $0x1f0] sm:$0xff] }
  0xd3   : > { %1212 = vmatmul.mubr.bf16.gmra.mxu1 %v3857_v38  ;;  %1009 = vmatmul.mubr.bf16.gmra.mxu0 %v3845_v32 }
  0xd4   : > { %1221 = vmatprep.mubr.bf16.mxu1 %v3859_v39  ;;  %1018 = vmatprep.mubr.bf16.mxu0 %v3847_v33 }
  0xd5   : > { %1339 = vmatpush2.bf16.msra.mxu0 %v3262_v34  ;;  %v3975_v34 = vpack.c.bf16 %v326_v30, %v324_v28  ;;  %v4056_v28 = vld [vmem:[#allocation8 + $0x58] sm:$0xff] }
  0xd6   : > { %1340 = vmatprep.subr.bf16.mxu0 %v3267_v35  ;;  %5657 = vst [vmem:[#allocation24_spill] sm:$0xff] %v4056_v28 }
  0xd9   : > { %1341 = vmatpush2.bf16.msra.mxu0 %v3265_v40 }
  0xda   : > { %1342 = vmatprep.subr.bf16.mxu0 %v3270_v45 }
  0xdb   : > { %1222 = vmatmul.mubr.bf16.gmra.mxu1 %v3869_v44  ;;  %1019 = vmatmul.mubr.bf16.gmra.mxu0 %v3857_v38 }
  0xdc   : > { %1231 = vmatprep.mubr.bf16.mxu1 %v3871_v46  ;;  %1028 = vmatprep.mubr.bf16.mxu0 %v3859_v39 }
  0xdd   : > { %1343 = vmatpush2.bf16.msra.mxu0 %v3268_v48 }
  0xde   : > { %1344 = vmatprep.subr.bf16.mxu0 %v3273_v49 }
  0xe1   : > { %1345 = vmatpush2.bf16.msra.mxu0 %v3271_v52  ;;  %v4026_v52 = vld [vmem:[#allocation8 + $0x28] sm:$0xff] }
  0xe2   : > { %1346 = vmatprep.subr.bf16.mxu0 %v3276_v60  ;;  %v4030_v60 = vld [vmem:[#allocation8 + $0x38] sm:$0xff] }
  0xe3   : > { %1232 = vmatmul.mubr.bf16.gmra.mxu1 %v3881_v54  ;;  %1029 = vmatmul.mubr.bf16.gmra.mxu0 %v3869_v44 }
  0xe4   : > { %1241 = vmatprep.mubr.bf16.mxu1 %v3883_v57  ;;  %1038 = vmatprep.mubr.bf16.mxu0 %v3871_v46 }
  0xe5   : > { %1347 = vmatpush2.bf16.msra.mxu0 %v3274_v62 }
  0xe6   : > { %1348 = vmatprep.subr.bf16.mxu0 %v3279_v63 }
  0xe9   : > { %1349 = vmatpush2.bf16.msra.mxu0 %v3277_v3 }
  0xea   : > { %1350 = vmatprep.subr.bf16.mxu0 %v3282_v10 }
  0xeb   : > { %1242 = vmatmul.mubr.bf16.gmra.mxu1 %v3893_v2  ;;  %1039 = vmatmul.mubr.bf16.gmra.mxu0 %v3881_v54 }
  0xec   : > { %1251 = vmatprep.mubr.bf16.mxu1 %v3895_v6  ;;  %1048 = vmatprep.mubr.bf16.mxu0 %v3883_v57 }
  0xed   : > { %1351 = vmatpush2.bf16.msra.mxu0 %v3280_v13 }
  0xee   : > { %1352 = vmatprep.subr.bf16.mxu0 %v3285_v16 }
  0xf1   : > { %1353 = vmatpush2.bf16.msra.mxu0 %v3283_v21  ;;  %v4052_v21 = vld [vmem:[#allocation8 + $0x48] sm:$0xff] }
  0xf3   : > { %1252 = vmatmul.mubr.bf16.gmra.mxu1 %v3905_v17  ;;  %1049 = vmatmul.mubr.bf16.gmra.mxu0 %v3893_v2 }
  0xf4   : > { %1261 = vmatprep.mubr.bf16.mxu1 %v3907_v19  ;;  %1058 = vmatprep.mubr.bf16.mxu0 %v3895_v6 }
  0xfb   : > { %1262 = vmatmul.mubr.bf16.gmra.mxu1 %v3917_v29  ;;  %1059 = vmatmul.mubr.bf16.gmra.mxu0 %v3905_v17 }
  0xfc   : > { %1271 = vmatprep.mubr.bf16.mxu1 %v3919_v31  ;;  %1068 = vmatprep.mubr.bf16.mxu0 %v3907_v19 }
 0x103   : > { %1272 = vmatmul.mubr.bf16.gmra.mxu1 %v3929_v43  ;;  %1069 = vmatmul.mubr.bf16.gmra.mxu0 %v3917_v29 }
 0x104   : > { %1281 = vmatprep.mubr.bf16.mxu1 %v3931_v47  ;;  %1078 = vmatprep.mubr.bf16.mxu0 %v3919_v31 }
 0x10b   : > { %1282 = vmatmul.mubr.bf16.gmra.mxu1 %v3941_v59  ;;  %1079 = vmatmul.mubr.bf16.gmra.mxu0 %v3929_v43 }
 0x10c   : > { %1291 = vmatprep.mubr.bf16.mxu1 %v3943_v61  ;;  %1088 = vmatprep.mubr.bf16.mxu0 %v3931_v47 }
 0x113   : > { %1292 = vmatmul.mubr.bf16.gmra.mxu1 %v3953_v9  ;;  %1089 = vmatmul.mubr.bf16.gmra.mxu0 %v3941_v59 }
 0x114   : > { %1301 = vmatprep.mubr.bf16.mxu1 %v3955_v11  ;;  %1098 = vmatprep.mubr.bf16.mxu0 %v3943_v61 }
 0x11b   : > { %1302 = vmatmul.mubr.bf16.gmra.mxu1 %v3965_v26  ;;  %1099 = vmatmul.mubr.bf16.gmra.mxu0 %v3953_v9 }
 0x11c   : > { %1311 = vmatprep.mubr.bf16.mxu1 %v3967_v27  ;;  %1108 = vmatprep.mubr.bf16.mxu0 %v3955_v11 }
 0x123   : > { %1312 = vmatmul.mubr.bf16.gmra.mxu1 %v3975_v34  ;;  %1109 = vmatmul.mubr.bf16.gmra.mxu0 %v3965_v26 }
 0x124   : > { %1118 = vmatprep.mubr.bf16.mxu0 %v3967_v27 }
 0x12b   : > { %1119 = vmatmul.mubr.bf16.gmra.mxu0 %v3975_v34 }
 0x12c   : > { %1354 = vmatprep.mubr.bf16.mxu0 %v3797_v15 }
 0x133   : > { %1355 = vmatmul.mubr.bf16.vlgmr.msra.gmra.mxu0 %v3805_v56 }
 0x134   : > { %1364 = vmatprep.mubr.bf16.mxu0 %v3807_v58 }
 0x13b   : > { %1365 = vmatmul.mubr.bf16.gmra.mxu0 %v3815_v4  ;;  %v3998_v4 = vld [vmem:[#allocation8] sm:$0xff] }
 0x13c   : > { %1374 = vmatprep.mubr.bf16.mxu0 %v3817_v5  ;;  %v4000_v5 = vld [vmem:[#allocation8 + $0x8] sm:$0xff] }
 0x143   : > { %1375 = vmatmul.mubr.bf16.gmra.mxu0 %v3825_v12 }
 0x144   : > { %1384 = vmatprep.mubr.bf16.mxu0 %v3827_v14  ;;  %v4004_v14 = vld [vmem:[#allocation8 + $0x18] sm:$0xff] }
 0x14b   : > { %1385 = vmatmul.mubr.bf16.gmra.mxu0 %v3835_v23 }
 0x14c   : > { %1394 = vmatprep.mubr.bf16.mxu0 %v3837_v25 }
 0x153   : > { %1395 = vmatmul.mubr.bf16.gmra.mxu0 %v3845_v32 }
 0x154   : > { %1404 = vmatprep.mubr.bf16.mxu0 %v3847_v33 }
 0x15b   : > { %1405 = vmatmul.mubr.bf16.gmra.mxu0 %v3857_v38 }
 0x15c   : > { %1414 = vmatprep.mubr.bf16.mxu0 %v3859_v39  ;;  %v4112_v39 = vld [vmem:[#allocation7 + $0x10] sm:$0xff] }
 0x15d   : > { %5668 = vst [vmem:[#allocation35_spill] sm:$0xff] %v4112_v39 }
 0x163   : > { %1415 = vmatmul.mubr.bf16.gmra.mxu0 %v3869_v44 }
 0x164   : > { %1424 = vmatprep.mubr.bf16.mxu0 %v3871_v46 }
 0x16b   : > { %v1163_v35 = vpop.f32.mrf.mxu1  ;;  %1425 = vmatmul.mubr.bf16.gmra.mxu0 %v3881_v54 }
 0x16c   : > { %1434 = vmatprep.mubr.bf16.mxu0 %v3883_v57 }
 0x16d   : > { %v1165_v15 = vpop.f32.mrf.mxu1 }
 0x16e   : > { %v1694_v56 = vadd.f32 %v1165_v15, %v1163_v35  ;;  %v1710_v58 = vsub.f32 %v1165_v15, %v1163_v35 }
 0x16f   : > { %v1167_v36 = vpop.f32.mrf.mxu1 }
 0x170   : > { %v4009_v33 = vmul.f32 %v1694_v56, %v3998_v4  ;;  %v4012_v40 = vmul.f32 %v1710_v58, %v4000_v5 }
 0x171   : > { %v1169_v12 = vpop.f32.mrf.mxu1 }
 0x172   : > { %v1695_v23 = vadd.f32 %v1169_v12, %v1167_v36  ;;  %v1711_v25 = vsub.f32 %v1169_v12, %v1167_v36  ;;  %5648 = vst [vmem:[#allocation15_spill] sm:$0xff] %v4009_v33  ;;  %5649 = vst [vmem:[#allocation16_spill] sm:$0xff] %v4012_v40 }
 0x173   : > { %v1173_v32 = vpop.f32.mrf.mxu1  ;;  %1435 = vmatmul.mubr.bf16.gmra.mxu0 %v3893_v2  ;;  %v4108_v2 = vld [vmem:[#allocation7 + $0x8] sm:$0xff] }
 0x174   : > { %v4015_v41 = vmul.f32 %v1695_v23, %v4002_v37  ;;  %v4018_v42 = vmul.f32 %v1711_v25, %v4004_v14  ;;  %1444 = vmatprep.mubr.bf16.mxu0 %v3895_v6  ;;  %5667 = vst [vmem:[#allocation34_spill] sm:$0xff] %v4108_v2 }
 0x175   : > { %v1175_v45 = vpop.f32.mrf.mxu1 }
 0x176   : > { %5650 = vst [vmem:[#allocation17_spill] sm:$0xff] %v4015_v41  ;;  %5651 = vst [vmem:[#allocation18_spill] sm:$0xff] %v4018_v42  ;;  %v1696_v48 = vadd.f32 %v1175_v45, %v1173_v32  ;;  %v1712_v49 = vsub.f32 %v1175_v45, %v1173_v32  ;;  %v4084_v45 = vld [vmem:[#allocation8 + $0x60] sm:$0xff] }
 0x177   : > { %v1177_v50 = vpop.f32.mrf.mxu1  ;;  %5662 = vst [vmem:[#allocation29_spill] sm:$0xff] %v4084_v45  ;;  %v4134_v42 = vld [vmem:[#allocation7 + $0x20] sm:$0xff] }
 0x178   : > { %v4035_v1 = vmul.f32 %v1696_v48, %v4024_v51  ;;  %v4038_v3 = vmul.f32 %v1712_v49, %v4026_v52  ;;  %v4088_v49 = vld [vmem:[#allocation8 + $0x70] sm:$0xff]  ;;  %5672 = vst [vmem:[#allocation39_spill] sm:$0xff] %v4134_v42 }
 0x179   : > { %v1179_v53 = vpop.f32.mrf.mxu1  ;;  %5663 = vst [vmem:[#allocation30_spill] sm:$0xff] %v4088_v49 }
 0x17a   : > { %v1697_v62 = vadd.f32 %v1179_v53, %v1177_v50  ;;  %v1713_v63 = vsub.f32 %v1179_v53, %v1177_v50  ;;  %5652 = vst [vmem:[#allocation19_spill] sm:$0xff] %v4035_v1  ;;  %5653 = vst [vmem:[#allocation20_spill] sm:$0xff] %v4038_v3  ;;  %v970_v53 = vpop.f32.mrf.mxu0 }
 0x17b   : > { %v1183_v0 = vpop.f32.mrf.mxu1  ;;  %1445 = vmatmul.mubr.bf16.gmra.mxu0 %v3905_v17  ;;  %v4136_v17 = vld [vmem:[#allocation7 + $0x28] sm:$0xff] }
 0x17c   : > { %v4041_v7 = vmul.f32 %v1697_v62, %v4028_v55  ;;  %v4044_v8 = vmul.f32 %v1713_v63, %v4030_v60  ;;  %1454 = vmatprep.mubr.bf16.mxu0 %v3907_v19  ;;  %5673 = vst [vmem:[#allocation40_spill] sm:$0xff] %v4136_v17  ;;  %v4142_v19 = vld [vmem:[#allocation7 + $0x38] sm:$0xff] }
 0x17d   : > { %v1185_v10 = vpop.f32.mrf.mxu1  ;;  %5675 = vst [vmem:[#allocation42_spill] sm:$0xff] %v4142_v19 }
 0x17e   : > { %5654 = vst [vmem:[#allocation21_spill] sm:$0xff] %v4041_v7  ;;  %5655 = vst [vmem:[#allocation22_spill] sm:$0xff] %v4044_v8  ;;  %v1698_v13 = vadd.f32 %v1185_v10, %v1183_v0  ;;  %v1714_v16 = vsub.f32 %v1185_v10, %v1183_v0  ;;  %v972_v10 = vpop.f32.mrf.mxu0  ;;  %v4140_v7 = vld [vmem:[#allocation7 + $0x30] sm:$0xff] }
 0x17f   : > { %v1187_v18 = vpop.f32.mrf.mxu1  ;;  %5674 = vst [vmem:[#allocation41_spill] sm:$0xff] %v4140_v7 }
 0x180   : > { %v4063_v56 = vmul.f32 %v1698_v13, %v4050_v20  ;;  %v4066_v58 = vmul.f32 %v1714_v16, %v4052_v21  ;;  %v1614_v16 = vadd.f32 %v972_v10, %v970_v53 }
 0x181   : > { %v1189_v22 = vpop.f32.mrf.mxu1 }
 0x182   : > { %v1699_v30 = vadd.f32 %v1189_v22, %v1187_v18  ;;  %v1715_v35 = vsub.f32 %v1189_v22, %v1187_v18  ;;  %5658 = vst [vmem:[#allocation25_spill] sm:$0xff] %v4063_v56  ;;  %5659 = vst [vmem:[#allocation26_spill] sm:$0xff] %v4066_v58  ;;  %v1630_v18 = vsub.f32 %v972_v10, %v970_v53  ;;  %v4220_v58 = vld [vmem:[#allocation8 + $0xf8] sm:$0xff] }
 0x183   : > { %v4059_v15 = vpop.f32.mrf.mxu1  ;;  %1455 = vmatmul.mubr.bf16.gmra.mxu0 %v3917_v29 }
 0x184   : > { %v4069_v36 = vmul.f32 %v1699_v30, %v4054_v24  ;;  %v4072_v12 = vmul.f32 %v1715_v35, %v4056_v28  ;;  %v4106_v30 = vld [vmem:[#allocation7] sm:$0xff]  ;;  %v974_v35 = vpop.f32.mrf.mxu0  ;;  %v1647_v53 = vmul.f32 %v1630_v18, %v4108_v2  ;;  %1464 = vmatprep.mubr.bf16.mxu0 %v3919_v31  ;;  %v4174_v31 = vld [vmem:[#allocation7 + $0x50] sm:$0xff] }
 0x185   : > { %v4074_v23 = vpop.f32.mrf.mxu1  ;;  %5666 = vst [vmem:[#allocation33_spill] sm:$0xff] %v4106_v30  ;;  %v4119_v46 = vmul.f32 %v1614_v16, %v4106_v30  ;;  %5682 = vst [vmem:[#allocation49_spill] sm:$0xff] %v4174_v31 }
 0x186   : > { %5660 = vst [vmem:[#allocation27_spill] sm:$0xff] %v4069_v36  ;;  %5661 = vst [vmem:[#allocation28_spill] sm:$0xff] %v4072_v12  ;;  %v1700_v54 = vadd.f32 %v4074_v23, %v4059_v15  ;;  %v4176_v36 = vld [vmem:[#allocation7 + $0x58] sm:$0xff] }
 0x187   : > { %v4082_v32 = vpop.f32.mrf.mxu1  ;;  %5670 = vst [vmem:[#allocation37_spill] sm:$0xff] %v4119_v46  ;;  %5683 = vst [vmem:[#allocation50_spill] sm:$0xff] %v4176_v36 }
 0x188   : > { %v4097_v63 = vmul.f32 %v1700_v54, %v4084_v45  ;;  %v976_v54 = vpop.f32.mrf.mxu0 }
 0x189   : > { %v4086_v48 = vpop.f32.mrf.mxu1  ;;  %v1615_v10 = vadd.f32 %v976_v54, %v974_v35  ;;  %v1631_v44 = vsub.f32 %v976_v54, %v974_v35 }
 0x18a   : > { %v1701_v50 = vadd.f32 %v4086_v48, %v4082_v32  ;;  %5664 = vst [vmem:[#allocation31_spill] sm:$0xff] %v4097_v63  ;;  %v980_v25 = vpop.f32.mrf.mxu0 }
 0x18b   : > { %v4093_v62 = vpop.f32.mrf.mxu1  ;;  %v4126_v22 = vmul.f32 %v1615_v10, %v4112_v39  ;;  %1465 = vmatmul.mubr.bf16.gmra.mxu0 %v3929_v43  ;;  %v4198_v43 = vld [vmem:[#allocation7 + $0x60] sm:$0xff]  ;;  %v4218_v39 = vld [vmem:[#allocation8 + $0xf0] sm:$0xff] }
 0x18c   : > { %v4100_v0 = vmul.f32 %v1701_v50, %v4088_v49  ;;  %v4114_v50 = vld [vmem:[#allocation7 + $0x18] sm:$0xff]  ;;  %v982_v41 = vpop.f32.mrf.mxu0  ;;  %1474 = vmatprep.mubr.bf16.mxu0 %v3931_v47 }
 0x18d   : > { %v4102_v13 = vpop.f32.mrf.mxu1  ;;  %5669 = vst [vmem:[#allocation36_spill] sm:$0xff] %v4114_v50  ;;  %5671 = vst [vmem:[#allocation38_spill] sm:$0xff] %v4126_v22  ;;  %v1649_v33 = vmul.f32 %v1631_v44, %v4114_v50  ;;  %v1616_v18 = vadd.f32 %v982_v41, %v980_v25  ;;  %v1632_v35 = vsub.f32 %v982_v41, %v980_v25 }
 0x18e   : > { %5665 = vst [vmem:[#allocation32_spill] sm:$0xff] %v4100_v0  ;;  %v984_v1 = vpop.f32.mrf.mxu0 }
 0x18f   : > { %v4110_v6 = vpop.f32.mrf.mxu1  ;;  %v1679_v54 = vpack.c.bf16 %v1649_v33, %v1647_v53  ;;  %v4147_v16 = vmul.f32 %v1616_v18, %v4134_v42  ;;  %v4150_v33 = vmul.f32 %v1632_v35, %v4136_v17 }
 0x190   : > { %v986_v44 = vpop.f32.mrf.mxu0 }
 0x191   : > { %v4116_v38 = vpop.f32.mrf.mxu1  ;;  %1806 = vmatprep.mubr.bf16.mxu1 %v1679_v54  ;;  %5676 = vst [vmem:[#allocation43_spill] sm:$0xff] %v4147_v16  ;;  %5677 = vst [vmem:[#allocation44_spill] sm:$0xff] %v4150_v33  ;;  %v1617_v41 = vadd.f32 %v986_v44, %v984_v1  ;;  %v1633_v25 = vsub.f32 %v986_v44, %v984_v1  ;;  %v4168_v44 = vld [vmem:[#allocation7 + $0x40] sm:$0xff] }
 0x192   : > { %v990_v53 = vpop.f32.mrf.mxu0  ;;  %5680 = vst [vmem:[#allocation47_spill] sm:$0xff] %v4168_v44 }
 0x193   : > { %v4123_v57 = vpop.f32.mrf.mxu1  ;;  %v4156_v54 = vmul.f32 %v1617_v41, %v4140_v7  ;;  %v4159_v22 = vmul.f32 %v1633_v25, %v4142_v19  ;;  %v4170_v41 = vld [vmem:[#allocation7 + $0x48] sm:$0xff]  ;;  %1475 = vmatmul.mubr.bf16.gmra.mxu0 %v3941_v59 }
 0x194   : > { %v992_v18 = vpop.f32.mrf.mxu0  ;;  %5681 = vst [vmem:[#allocation48_spill] sm:$0xff] %v4170_v41  ;;  %1484 = vmatprep.mubr.bf16.mxu0 %v3943_v61 }
 0x195   : > { %v4130_v40 = vpop.f32.mrf.mxu1  ;;  %5678 = vst [vmem:[#allocation45_spill] sm:$0xff] %v4156_v54  ;;  %5679 = vst [vmem:[#allocation46_spill] sm:$0xff] %v4159_v22  ;;  %v1618_v35 = vadd.f32 %v992_v18, %v990_v53  ;;  %v1634_v56 = vsub.f32 %v992_v18, %v990_v53 }
 0x196   : > { %v994_v7 = vpop.f32.mrf.mxu0 }
 0x197   : > { %v4138_v10 = vpop.f32.mrf.mxu1  ;;  %v4181_v53 = vmul.f32 %v1618_v35, %v4168_v44  ;;  %v4184_v18 = vmul.f32 %v1634_v56, %v4170_v41  ;;  %v4210_v56 = vld [vmem:[#allocation8 + $0xe0] sm:$0xff] }
 0x198   : > { %v996_v19 = vpop.f32.mrf.mxu0  ;;  %5688 = vst [vmem:[#allocation55_spill] sm:$0xff] %v4210_v56 }
 0x199   : > { %v4144_v3 = vpop.f32.mrf.mxu1  ;;  %5684 = vst [vmem:[#allocation51_spill] sm:$0xff] %v4181_v53  ;;  %5685 = vst [vmem:[#allocation52_spill] sm:$0xff] %v4184_v18  ;;  %v1619_v29 = vadd.f32 %v996_v19, %v994_v7  ;;  %v1635_v1 = vsub.f32 %v996_v19, %v994_v7  ;;  %v4200_v19 = vld [vmem:[#allocation7 + $0x68] sm:$0xff] }
 0x19a   : > { %v1000_v16 = vpop.f32.mrf.mxu0 }
 0x19b   : > { %v4153_v46 = vpop.f32.mrf.mxu1  ;;  %v4188_v33 = vmul.f32 %v1619_v29, %v4174_v31  ;;  %v4191_v22 = vmul.f32 %v1635_v1, %v4176_v36  ;;  %v4202_v31 = vld [vmem:[#allocation8 + $0xc8] sm:$0xff]  ;;  %v4206_v1 = vld [vmem:[#allocation8 + $0xd8] sm:$0xff]  ;;  %1485 = vmatmul.mubr.bf16.gmra.mxu0 %v3953_v9 }
 0x19c   : > { %v1002_v42 = vpop.f32.mrf.mxu0  ;;  %v4216_v36 = vld [vmem:[#allocation8 + $0xe8] sm:$0xff]  ;;  %1494 = vmatprep.mubr.bf16.mxu0 %v3955_v11 }
 0x19d   : > { %v4162_v8 = vpop.f32.mrf.mxu1  ;;  %5686 = vst [vmem:[#allocation53_spill] sm:$0xff] %v4188_v33  ;;  %5687 = vst [vmem:[#allocation54_spill] sm:$0xff] %v4191_v22  ;;  %v1620_v44 = vadd.f32 %v1002_v42, %v1000_v16  ;;  %v1636_v50 = vsub.f32 %v1002_v42, %v1000_v16  ;;  %v4212_v33 = vld [vmem:[#allocation7 + $0x70] sm:$0xff]  ;;  %v4214_v22 = vld [vmem:[#allocation7 + $0x78] sm:$0xff] }
 0x19e   : > { %v1004_v29 = vpop.f32.mrf.mxu0  ;;  %v1722_v47 = vsub.f32 %v4162_v8, %v4153_v46  ;;  %5689 = vst [vmem:[#allocation56_spill] sm:$0xff] %v4212_v33  ;;  %5690 = vst [vmem:[#allocation57_spill] sm:$0xff] %v4214_v22 }
 0x19f   : > { %v4172_v25 = vpop.f32.mrf.mxu1  ;;  %v4223_v12 = vmul.f32 %v1620_v44, %v4198_v43  ;;  %v4226_v2 = vmul.f32 %v1636_v50, %v4200_v19 }
 0x1a0   : > { %v1006_v53 = vpop.f32.mrf.mxu0  ;;  %v1751_v49 = vmul.f32 %v1722_v47, %v4202_v31 }
 0x1a1   : > { %v4178_v17 = vpop.f32.mrf.mxu1  ;;  %5691 = vst [vmem:[#allocation58_spill] sm:$0xff] %v4223_v12  ;;  %5692 = vst [vmem:[#allocation59_spill] sm:$0xff] %v4226_v2  ;;  %v1621_v63 = vadd.f32 %v1006_v53, %v1004_v29  ;;  %v4268_v12 = vld [vmem:[#allocation7 + $0x90] sm:$0xff] }
 0x1a2   : > { %v1723_v42 = vsub.f32 %v4178_v17, %v4172_v25  ;;  %v1010_v30 = vpop.f32.mrf.mxu0 }
 0x1a3   : > { %v1233_v54 = vpop.f32.mrf.mxu1  ;;  %v4232_v24 = vmul.f32 %v1621_v63, %v4212_v33  ;;  %1495 = vmatmul.mubr.bf16.gmra.mxu0 %v3965_v26 }
 0x1a4   : > { %v1753_v45 = vmul.f32 %v1723_v42, %v4206_v1  ;;  %1504 = vmatprep.mubr.bf16.mxu0 %v3967_v27 }
 0x1a5   : > { %v1235_v35 = vpop.f32.mrf.mxu1  ;;  %5693 = vst [vmem:[#allocation60_spill] sm:$0xff] %v4232_v24  ;;  %v4270_v24 = vld [vmem:[#allocation7 + $0x98] sm:$0xff] }
 0x1a6   : > { %v1708_v18 = vadd.f32 %v1235_v35, %v1233_v54  ;;  %v1724_v7 = vsub.f32 %v1235_v35, %v1233_v54  ;;  %v1637_v54 = vsub.f32 %v1006_v53, %v1004_v29  ;;  %v1012_v29 = vpop.f32.mrf.mxu0 }
 0x1a7   : > { %v1237_v16 = vpop.f32.mrf.mxu1  ;;  %v1622_v42 = vadd.f32 %v1012_v29, %v1010_v30 }
 0x1a8   : > { %v4235_v44 = vmul.f32 %v1637_v54, %v4214_v22  ;;  %v1754_v50 = vmul.f32 %v1708_v18, %v4210_v56  ;;  %v4246_v56 = vld [vmem:[#allocation7 + $0x80] sm:$0xff]  ;;  %v1707_v54 = vadd.f32 %v4178_v17, %v4172_v25  ;;  %v4272_v17 = vld [vmem:[#allocation8 + $0xb8] sm:$0xff] }
 0x1a9   : > { %v1239_v41 = vpop.f32.mrf.mxu1  ;;  %v4274_v25 = vld [vmem:[#allocation8 + $0xc0] sm:$0xff] }
 0x1aa   : > { %v1709_v35 = vadd.f32 %v1239_v41, %v1237_v16  ;;  %v1725_v0 = vsub.f32 %v1239_v41, %v1237_v16  ;;  %5694 = vst [vmem:[#allocation61_spill] sm:$0xff] %v4235_v44  ;;  %v1755_v41 = vmul.f32 %v1724_v7, %v4216_v36  ;;  %v1638_v16 = vsub.f32 %v1012_v29, %v1010_v30  ;;  %v4248_v7 = vld [vmem:[#allocation7 + $0x88] sm:$0xff] }
 0x1ab   : > { %v1243_v28 = vpop.f32.mrf.mxu1  ;;  %v1720_v30 = vsub.f32 %v4130_v40, %v4123_v57  ;;  %v1721_v29 = vsub.f32 %v4144_v3, %v4138_v10  ;;  %1505 = vmatmul.mubr.bf16.gmra.mxu0 %v3975_v34 }
 0x1ac   : > { %v1756_v53 = vmul.f32 %v1709_v35, %v4218_v39  ;;  %v1757_v59 = vmul.f32 %v1725_v0, %v4220_v58  ;;  %v1014_v35 = vpop.f32.mrf.mxu0  ;;  %v4250_v0 = vld [vmem:[#allocation8 + $0xa8] sm:$0xff] }
 0x1ad   : > { %v1245_v47 = vpop.f32.mrf.mxu1 }
 0x1ae   : > { %v2280_v22 = vadd.f32 %v1245_v47, %v1243_v28  ;;  %v2296_v61 = vsub.f32 %v1245_v47, %v1243_v28  ;;  %v1773_v33 = vpack.c.bf16 %v1757_v59, %v1755_v41  ;;  %v1772_v18 = vpack.c.bf16 %v1756_v53, %v1754_v50  ;;  %v4260_v50 = vld [vmem:[#allocation8 + $0xd0] sm:$0xff]  ;;  %v1016_v47 = vpop.f32.mrf.mxu0 }
 0x1af   : > { %v1247_v63 = vpop.f32.mrf.mxu1  ;;  %v1706_v28 = vadd.f32 %v4162_v8, %v4153_v46  ;;  %v1771_v59 = vpack.c.bf16 %v1753_v45, %v1751_v49  ;;  %v4277_v46 = vmul.f32 %v1622_v42, %v4246_v56  ;;  %v1752_v2 = vmul.f32 %v1707_v54, %v4260_v50 }
 0x1b0   : > { %v4263_v41 = vmul.f32 %v2280_v22, %v3998_v4  ;;  %v4266_v53 = vmul.f32 %v2296_v61, %v4000_v5  ;;  %1774 = vmatprep.subr.bf16.mxu1 %v1773_v33  ;;  %v4280_v4 = vmul.f32 %v1638_v16, %v4248_v7  ;;  %v1623_v5 = vadd.f32 %v1016_v47, %v1014_v35  ;;  %v1020_v33 = vpop.f32.mrf.mxu0 }
 0x1b1   : > { %v1249_v8 = vpop.f32.mrf.mxu1  ;;  %1775 = vmatpush1.bf16.xpose.msra.mxu1 %v1772_v18  ;;  %5697 = vst [vmem:[#allocation64_spill] sm:$0xff] %v4277_v46  ;;  %v1639_v22 = vsub.f32 %v1016_v47, %v1014_v35  ;;  %v1747_v61 = vmul.f32 %v1720_v30, %v4250_v0  ;;  %v1749_v16 = vmul.f32 %v1721_v29, %v4272_v17  ;;  %v4332_v46 = vld [vmem:[#allocation7 + $0xb8] sm:$0xff] }
 0x1b2   : > { %5695 = vst [vmem:[#allocation62_spill] sm:$0xff] %v4263_v41  ;;  %5696 = vst [vmem:[#allocation63_spill] sm:$0xff] %v4266_v53  ;;  %v2281_v45 = vadd.f32 %v1249_v8, %v1247_v63  ;;  %v2297_v49 = vsub.f32 %v1249_v8, %v1247_v63  ;;  %1776 = vmatprep.subr.bf16.mxu1 %v1771_v59  ;;  %v4286_v18 = vmul.f32 %v1623_v5, %v4268_v12  ;;  %v1022_v54 = vpop.f32.mrf.mxu0 }
 0x1b3   : > { %v1253_v44 = vpop.f32.mrf.mxu1  ;;  %v4289_v42 = vmul.f32 %v1639_v22, %v4270_v24  ;;  %v1750_v63 = vmul.f32 %v1706_v28, %v4274_v25  ;;  %v1624_v59 = vadd.f32 %v1022_v54, %v1020_v33  ;;  %v1640_v47 = vsub.f32 %v1022_v54, %v1020_v33  ;;  %v4304_v22 = vld [vmem:[#allocation7 + $0xa0] sm:$0xff]  ;;  %v4306_v28 = vld [vmem:[#allocation7 + $0xa8] sm:$0xff] }
 0x1b4   : > { %5698 = vst [vmem:[#allocation65_spill] sm:$0xff] %v4286_v18  ;;  %v4295_v35 = vmul.f32 %v2281_v45, %v4002_v37  ;;  %v4298_v9 = vmul.f32 %v2297_v49, %v4004_v14  ;;  %v1024_v37 = vpop.f32.mrf.mxu0  ;;  %v4312_v49 = vld [vmem:[#allocation8 + $0x88] sm:$0xff]  ;;  %v1718_v33 = vsub.f32 %v4102_v13, %v4093_v62  ;;  %v1719_v54 = vsub.f32 %v4116_v38, %v4110_v6  ;;  %v4322_v14 = vld [vmem:[#allocation8 + $0xb0] sm:$0xff] }
 0x1b5   : > { %v1255_v30 = vpop.f32.mrf.mxu1  ;;  %v1770_v11 = vpack.c.bf16 %v1752_v2, %v1750_v63  ;;  %v1704_v8 = vadd.f32 %v4130_v40, %v4123_v57  ;;  %v4336_v2 = vld [vmem:[#allocation8 + $0xa0] sm:$0xff]  ;;  %v4339_v40 = vmul.f32 %v1624_v59, %v4304_v22 }
 0x1b6   : > { %5699 = vst [vmem:[#allocation66_spill] sm:$0xff] %v4295_v35  ;;  %5700 = vst [vmem:[#allocation67_spill] sm:$0xff] %v4298_v9  ;;  %v2282_v5 = vadd.f32 %v1255_v30, %v1253_v44  ;;  %v2298_v29 = vsub.f32 %v1255_v30, %v1253_v44  ;;  %v1705_v44 = vadd.f32 %v4144_v3, %v4138_v10  ;;  %v1026_v53 = vpop.f32.mrf.mxu0  ;;  %v4330_v9 = vld [vmem:[#allocation7 + $0xb0] sm:$0xff]  ;;  %v4334_v3 = vld [vmem:[#allocation8 + $0x98] sm:$0xff] }
 0x1b7   : > { %v1257_v30 = vpop.f32.mrf.mxu1  ;;  %v1769_v35 = vpack.c.bf16 %v1749_v16, %v1747_v61  ;;  %5703 = vst [vmem:[#allocation70_spill] sm:$0xff] %v4339_v40  ;;  %v1641_v57 = vsub.f32 %v1026_v53, %v1024_v37  ;;  %v4382_v40 = vld [vmem:[#allocation8 + $0x90] sm:$0xff] }
 0x1b8   : > { %v4325_v45 = vmul.f32 %v2282_v5, %v4024_v51  ;;  %v4328_v41 = vmul.f32 %v2298_v29, %v4026_v52  ;;  %v4342_v51 = vmul.f32 %v1640_v47, %v4306_v28  ;;  %v1625_v52 = vadd.f32 %v1026_v53, %v1024_v37  ;;  %v1030_v63 = vpop.f32.mrf.mxu0 }
 0x1b9   : > { %v1259_v10 = vpop.f32.mrf.mxu1  ;;  %1777 = vmatpush1.bf16.xpose.msra.mxu1 %v1770_v11  ;;  %v1743_v5 = vmul.f32 %v1718_v33, %v4312_v49  ;;  %v1748_v29 = vmul.f32 %v1705_v44, %v4322_v14  ;;  %v4351_v59 = vmul.f32 %v1641_v57, %v4332_v46  ;;  %v1745_v53 = vmul.f32 %v1719_v54, %v4334_v3  ;;  %v4366_v57 = vld [vmem:[#allocation7 + $0xc0] sm:$0xff] }
 0x1ba   : > { %5701 = vst [vmem:[#allocation68_spill] sm:$0xff] %v4325_v45  ;;  %5702 = vst [vmem:[#allocation69_spill] sm:$0xff] %v4328_v41  ;;  %v2283_v61 = vadd.f32 %v1259_v10, %v1257_v30  ;;  %v2299_v16 = vsub.f32 %v1259_v10, %v1257_v30  ;;  %1778 = vmatprep.subr.bf16.mxu1 %v1769_v35  ;;  %v4348_v11 = vmul.f32 %v1625_v52, %v4330_v9  ;;  %v1032_v37 = vpop.f32.mrf.mxu0  ;;  %v4390_v45 = vld [vmem:[#allocation7 + $0xd0] sm:$0xff] }
 0x1bb   : > { %5704 = vst [vmem:[#allocation71_spill] sm:$0xff] %v4342_v51  ;;  %v1263_v18 = vpop.f32.mrf.mxu1  ;;  %v1746_v35 = vmul.f32 %v1704_v8, %v4336_v2  ;;  %v1626_v44 = vadd.f32 %v1032_v37, %v1030_v63  ;;  %v1642_v30 = vsub.f32 %v1032_v37, %v1030_v63  ;;  %v4368_v8 = vld [vmem:[#allocation7 + $0xc8] sm:$0xff]  ;;  %v1716_v63 = vsub.f32 %v4074_v23, %v4059_v15 }
 0x1bc   : > { %5705 = vst [vmem:[#allocation72_spill] sm:$0xff] %v4348_v11  ;;  %v4357_v47 = vmul.f32 %v2283_v61, %v4028_v55  ;;  %v4360_v26 = vmul.f32 %v2299_v16, %v4030_v60  ;;  %v1034_v55 = vpop.f32.mrf.mxu0  ;;  %v1560_v16 = vld [vmem:[#allocation8 + $0x68] sm:$0xff]  ;;  %v1717_v37 = vsub.f32 %v4086_v48, %v4082_v32  ;;  %v1702_v10 = vadd.f32 %v4102_v13, %v4093_v62  ;;  %v4392_v32 = vld [vmem:[#allocation7 + $0xd8] sm:$0xff]  ;;  %v4394_v48 = vld [vmem:[#allocation8 + $0x80] sm:$0xff] }
 0x1bd   : > { %v1265_v33 = vpop.f32.mrf.mxu1  ;;  %v1768_v27 = vpack.c.bf16 %v1748_v29, %v1746_v35  ;;  %v1767_v15 = vpack.c.bf16 %v1745_v53, %v1743_v5  ;;  %v4397_v62 = vmul.f32 %v1626_v44, %v4366_v57  ;;  %v1739_v35 = vmul.f32 %v1716_v63, %v1560_v16  ;;  %v5726_v11 = vld [vmem:[#allocation32_spill] sm:$0xff] }
 0x1be   : > { %5706 = vst [vmem:[#allocation73_spill] sm:$0xff] %v4357_v47  ;;  %5707 = vst [vmem:[#allocation74_spill] sm:$0xff] %v4360_v26  ;;  %v2284_v52 = vadd.f32 %v1265_v33, %v1263_v18  ;;  %v2300_v54 = vsub.f32 %v1265_v33, %v1263_v18  ;;  %v1703_v18 = vadd.f32 %v4116_v38, %v4110_v6  ;;  %v1036_v23 = vpop.f32.mrf.mxu0  ;;  %v1562_v38 = vld [vmem:[#allocation8 + $0x78] sm:$0xff]  ;;  %v5718_v26 = vld [vmem:[#allocation29_spill] sm:$0xff] }
 0x1bf   : > { %v1267_v33 = vpop.f32.mrf.mxu1  ;;  %5710 = vst [vmem:[#allocation77_spill] sm:$0xff] %v4397_v62  ;;  %v1627_v13 = vadd.f32 %v1036_v23, %v1034_v55  ;;  %v1742_v47 = vmul.f32 %v1702_v10, %v4394_v48  ;;  %v4436_v10 = vld [vmem:[#allocation7 + $0xf8] sm:$0xff] }
 0x1c0   : > { %v4385_v60 = vmul.f32 %v2284_v52, %v4050_v20  ;;  %v4388_v61 = vmul.f32 %v2300_v54, %v4052_v21  ;;  %v4400_v20 = vmul.f32 %v1642_v30, %v4368_v8  ;;  %v1643_v21 = vsub.f32 %v1036_v23, %v1034_v55  ;;  %v1040_v53 = vpop.f32.mrf.mxu0  ;;  %v5714_v55 = vld [vmem:[#allocation23_spill] sm:$0xff] }
 0x1c1   : > { %v1269_v6 = vpop.f32.mrf.mxu1  ;;  %1779 = vmatpush1.bf16.xpose.msra.mxu1 %v1768_v27  ;;  %v1744_v52 = vmul.f32 %v1703_v18, %v4382_v40  ;;  %v4405_v27 = vmul.f32 %v1627_v13, %v4390_v45  ;;  %v1741_v30 = vmul.f32 %v1717_v37, %v1562_v38 }
 0x1c2   : > { %5708 = vst [vmem:[#allocation75_spill] sm:$0xff] %v4385_v60  ;;  %5709 = vst [vmem:[#allocation76_spill] sm:$0xff] %v4388_v61  ;;  %v2285_v29 = vadd.f32 %v1269_v6, %v1267_v33  ;;  %v2301_v5 = vsub.f32 %v1269_v6, %v1267_v33  ;;  %1780 = vmatprep.subr.bf16.mxu1 %v1767_v15  ;;  %v4408_v44 = vmul.f32 %v1643_v21, %v4392_v32  ;;  %v5716_v33 = vld [vmem:[#allocation24_spill] sm:$0xff]  ;;  %v1042_v34 = vpop.f32.mrf.mxu0 }
 0x1c3   : > { %5711 = vst [vmem:[#allocation78_spill] sm:$0xff] %v4400_v20  ;;  %v1273_v54 = vpop.f32.mrf.mxu1  ;;  %5712 = vst [vmem:[#allocation79_spill] sm:$0xff] %v4405_v27  ;;  %v1628_v6 = vadd.f32 %v1042_v34, %v1040_v53  ;;  %v1644_v18 = vsub.f32 %v1042_v34, %v1040_v53  ;;  %v1766_v34 = vpack.c.bf16 %v1744_v52, %v1742_v47 }
 0x1c4   : > { %5713 = vst [vmem:[#allocation80_spill] sm:$0xff] %v4408_v44  ;;  %v4412_v23 = vmul.f32 %v2285_v29, %v5714_v55  ;;  %v4415_v15 = vmul.f32 %v2301_v5, %v5716_v33  ;;  %v4425_v5 = vld [vmem:[#allocation7 + $0xe0] sm:$0xff]  ;;  %v4427_v55 = vld [vmem:[#allocation7 + $0xe8] sm:$0xff]  ;;  %v1044_v33 = vpop.f32.mrf.mxu0  ;;  %v1765_v21 = vpack.c.bf16 %v1741_v30, %v1739_v35 }
 0x1c5   : > { %v1275_v63 = vpop.f32.mrf.mxu1  ;;  %v4439_v29 = vmul.f32 %v1628_v6, %v4425_v5  ;;  %v4442_v27 = vmul.f32 %v1644_v18, %v4427_v55 }
 0x1c6   : > { %5715 = vst [vmem:[#allocation23_spill] sm:$0xff] %v4412_v23  ;;  %5717 = vst [vmem:[#allocation24_spill] sm:$0xff] %v4415_v15  ;;  %v2286_v41 = vadd.f32 %v1275_v63, %v1273_v54  ;;  %v2302_v37 = vsub.f32 %v1275_v63, %v1273_v54  ;;  %v1046_v54 = vpop.f32.mrf.mxu0  ;;  %v4434_v63 = vld [vmem:[#allocation7 + $0xf0] sm:$0xff] }
 0x1c7   : > { %v1277_v53 = vpop.f32.mrf.mxu1  ;;  %5719 = vst [vmem:[#allocation29_spill] sm:$0xff] %v4439_v29  ;;  %5720 = vst [vmem:[#allocation81_spill] sm:$0xff] %v4442_v27  ;;  %v1629_v47 = vadd.f32 %v1046_v54, %v1044_v33  ;;  %v1645_v52 = vsub.f32 %v1046_v54, %v1044_v33 }
 0x1c8   : > { %v4430_v13 = vmul.f32 %v2286_v41, %v5718_v26  ;;  %v4432_v20 = vmul.f32 %v2302_v37, %v1560_v16  ;;  %v1050_v16 = vpop.f32.mrf.mxu0 }
 0x1c9   : > { %v1279_v62 = vpop.f32.mrf.mxu1  ;;  %1781 = vmatpush1.bf16.xpose.msra.mxu1 %v1766_v34  ;;  %v4445_v30 = vmul.f32 %v1629_v47, %v4434_v63  ;;  %v4448_v37 = vmul.f32 %v1645_v52, %v4436_v10  ;;  %v5723_v34 = vld [vmem:[#allocation30_spill] sm:$0xff] }
 0x1ca   : > { %v2287_v41 = vadd.f32 %v1279_v62, %v1277_v53  ;;  %v2303_v26 = vsub.f32 %v1279_v62, %v1277_v53  ;;  %1782 = vmatprep.subr.bf16.mxu1 %v1765_v21  ;;  %v1052_v18 = vpop.f32.mrf.mxu0  ;;  %v5727_v62 = vld [vmem:[#allocation31_spill] sm:$0xff]  ;;  %v5729_v21 = vld [vmem:[#allocation34_spill] sm:$0xff] }
 0x1cb   : > { %v1283_v35 = vpop.f32.mrf.mxu1  ;;  %5721 = vst [vmem:[#allocation82_spill] sm:$0xff] %v4445_v30  ;;  %5722 = vst [vmem:[#allocation83_spill] sm:$0xff] %v4448_v37  ;;  %v2200_v23 = vadd.f32 %v1052_v18, %v1050_v16  ;;  %v2216_v33 = vsub.f32 %v1052_v18, %v1050_v16  ;;  %v5728_v27 = vpack.c.bf16 %v5726_v11, %v5727_v62  ;;  %v5733_v11 = vld [vmem:[#allocation35_spill] sm:$0xff] }
 0x1cc   : > { %v4451_v44 = vmul.f32 %v2287_v41, %v5723_v34  ;;  %v4453_v6 = vmul.f32 %v2303_v26, %v1562_v38  ;;  %v1054_v38 = vpop.f32.mrf.mxu0  ;;  %v5724_v26 = vld [vmem:[#allocation33_spill] sm:$0xff] }
 0x1cd   : > { %v1285_v60 = vpop.f32.mrf.mxu1  ;;  %v4464_v34 = vmul.f32 %v2200_v23, %v5724_v26  ;;  %v2233_v29 = vmul.f32 %v2216_v33, %v5729_v21  ;;  %v5730_v23 = vld [vmem:[#allocation28_spill] sm:$0xff]  ;;  %v5731_v26 = vld [vmem:[#allocation26_spill] sm:$0xff] }
 0x1ce   : > { %v2288_v53 = vadd.f32 %v1285_v60, %v1283_v35  ;;  %v2304_v54 = vsub.f32 %v1285_v60, %v1283_v35  ;;  %v1056_v16 = vpop.f32.mrf.mxu0  ;;  %v5732_v61 = vpack.c.bf16 %v5730_v23, %v5731_v26  ;;  %v5735_v33 = vld [vmem:[#allocation36_spill] sm:$0xff] }
 0x1cf   : > { %v1287_v41 = vpop.f32.mrf.mxu1  ;;  %5725 = vst [vmem:[#allocation30_spill] sm:$0xff] %v4464_v34  ;;  %v2201_v60 = vadd.f32 %v1056_v16, %v1054_v38  ;;  %v2217_v35 = vsub.f32 %v1056_v16, %v1054_v38  ;;  %v5738_v23 = vld [vmem:[#allocation40_spill] sm:$0xff]  ;;  %v5743_v16 = vld [vmem:[#allocation22_spill] sm:$0xff]  ;;  %v5746_v34 = vld [vmem:[#allocation41_spill] sm:$0xff] }
 0x1d0   : > { %v4471_v47 = vmul.f32 %v2288_v53, %v4394_v48  ;;  %v4474_v52 = vmul.f32 %v2304_v54, %v4312_v49  ;;  %v1060_v15 = vpop.f32.mrf.mxu0 }
 0x1d1   : > { %v1289_v18 = vpop.f32.mrf.mxu1  ;;  %1783 = vmatpush1.bf16.xpose.msra.mxu1 %v5728_v27  ;;  %v4480_v27 = vmul.f32 %v2201_v60, %v5733_v11  ;;  %v2235_v62 = vmul.f32 %v2217_v35, %v5735_v33  ;;  %v5741_v33 = vld [vmem:[#allocation25_spill] sm:$0xff] }
 0x1d2   : > { %v2289_v30 = vadd.f32 %v1289_v18, %v1287_v41  ;;  %v2305_v37 = vsub.f32 %v1289_v18, %v1287_v41  ;;  %1784 = vmatprep.subr.bf16.mxu1 %v5732_v61  ;;  %v1062_v49 = vpop.f32.mrf.mxu0 }
 0x1d3   : > { %v1293_v51 = vpop.f32.mrf.mxu1  ;;  %5734 = vst [vmem:[#allocation33_spill] sm:$0xff] %v4480_v27  ;;  %v2202_v38 = vadd.f32 %v1062_v49, %v1060_v15  ;;  %v2218_v61 = vsub.f32 %v1062_v49, %v1060_v15  ;;  %v2265_v41 = vpack.c.bf16 %v2235_v62, %v2233_v29  ;;  %v5740_v29 = vld [vmem:[#allocation27_spill] sm:$0xff] }
 0x1d4   : > { %v4484_v21 = vmul.f32 %v2289_v30, %v4382_v40  ;;  %v4487_v48 = vmul.f32 %v2305_v37, %v4334_v3  ;;  %v1064_v30 = vpop.f32.mrf.mxu0  ;;  %v5736_v3 = vld [vmem:[#allocation39_spill] sm:$0xff]  ;;  %v5742_v62 = vpack.c.bf16 %v5740_v29, %v5741_v33  ;;  %v5748_v29 = vld [vmem:[#allocation42_spill] sm:$0xff] }
 0x1d5   : > { %v1295_v53 = vpop.f32.mrf.mxu1  ;;  %v4496_v37 = vmul.f32 %v2202_v38, %v5736_v3  ;;  %v4499_v26 = vmul.f32 %v2218_v61, %v5738_v23  ;;  %2392 = vmatprep.mubr.bf16.mxu0 %v2265_v41  ;;  %v5744_v61 = vld [vmem:[#allocation20_spill] sm:$0xff] }
 0x1d6   : > { %v2290_v18 = vadd.f32 %v1295_v53, %v1293_v51  ;;  %v2306_v60 = vsub.f32 %v1295_v53, %v1293_v51  ;;  %v1066_v11 = vpop.f32.mrf.mxu0  ;;  %v5745_v23 = vpack.c.bf16 %v5743_v16, %v5744_v61 }
 0x1d7   : > { %v1297_v35 = vpop.f32.mrf.mxu1  ;;  %5737 = vst [vmem:[#allocation32_spill] sm:$0xff] %v4496_v37  ;;  %5739 = vst [vmem:[#allocation31_spill] sm:$0xff] %v4499_v26  ;;  %v2203_v49 = vadd.f32 %v1066_v11, %v1064_v30  ;;  %v2219_v51 = vsub.f32 %v1066_v11, %v1064_v30  ;;  %v5758_v26 = vld [vmem:[#allocation49_spill] sm:$0xff] }
 0x1d8   : > { %v4505_v53 = vmul.f32 %v2290_v18, %v4336_v2  ;;  %v4508_v54 = vmul.f32 %v2306_v60, %v4250_v0  ;;  %v1070_v41 = vpop.f32.mrf.mxu0 }
 0x1d9   : > { %v1299_v15 = vpop.f32.mrf.mxu1  ;;  %1785 = vmatpush1.bf16.xpose.msra.mxu1 %v5742_v62  ;;  %v4514_v27 = vmul.f32 %v2203_v49, %v5746_v34  ;;  %v4517_v33 = vmul.f32 %v2219_v51, %v5748_v29  ;;  %v5750_v51 = vld [vmem:[#allocation47_spill] sm:$0xff]  ;;  %v5752_v29 = vld [vmem:[#allocation21_spill] sm:$0xff] }
 0x1da   : > { %v2291_v38 = vadd.f32 %v1299_v15, %v1297_v35  ;;  %v2307_v3 = vsub.f32 %v1299_v15, %v1297_v35  ;;  %1786 = vmatprep.subr.bf16.mxu1 %v5745_v23  ;;  %v1072_v18 = vpop.f32.mrf.mxu0 }
 0x1db   : > { %v1303_v40 = vpop.f32.mrf.mxu1  ;;  %5747 = vst [vmem:[#allocation34_spill] sm:$0xff] %v4514_v27  ;;  %5749 = vst [vmem:[#allocation28_spill] sm:$0xff] %v4517_v33  ;;  %v2204_v30 = vadd.f32 %v1072_v18, %v1070_v41  ;;  %v2220_v35 = vsub.f32 %v1072_v18, %v1070_v41  ;;  %v5753_v18 = vld [vmem:[#allocation19_spill] sm:$0xff] }
 0x1dc   : > { %v4520_v2 = vmul.f32 %v2291_v38, %v4322_v14  ;;  %v4523_v0 = vmul.f32 %v2307_v3, %v4272_v17  ;;  %v1074_v17 = vpop.f32.mrf.mxu0  ;;  %v5751_v3 = vld [vmem:[#allocation48_spill] sm:$0xff]  ;;  %v5754_v34 = vpack.c.bf16 %v5752_v29, %v5753_v18  ;;  %v5759_v29 = vld [vmem:[#allocation50_spill] sm:$0xff] }
 0x1dd   : > { %v1305_v60 = vpop.f32.mrf.mxu1  ;;  %v4534_v38 = vmul.f32 %v2204_v30, %v5750_v51  ;;  %v4537_v61 = vmul.f32 %v2220_v35, %v5751_v3  ;;  %v5755_v30 = vld [vmem:[#allocation18_spill] sm:$0xff]  ;;  %v5756_v51 = vld [vmem:[#allocation16_spill] sm:$0xff] }
 0x1de   : > { %v2292_v15 = vadd.f32 %v1305_v60, %v1303_v40  ;;  %v2308_v62 = vsub.f32 %v1305_v60, %v1303_v40  ;;  %v1076_v23 = vpop.f32.mrf.mxu0  ;;  %v5757_v27 = vpack.c.bf16 %v5755_v30, %v5756_v51  ;;  %v5760_v51 = vld [vmem:[#allocation17_spill] sm:$0xff] }
 0x1df   : > { %v1307_v49 = vpop.f32.mrf.mxu1  ;;  %v2205_v16 = vadd.f32 %v1076_v23, %v1074_v17  ;;  %v2221_v11 = vsub.f32 %v1076_v23, %v1074_v17 }
 0x1e0   : > { %v4543_v40 = vmul.f32 %v2292_v15, %v4274_v25  ;;  %v2337_v60 = vmul.f32 %v2308_v62, %v4202_v31  ;;  %v1080_v35 = vpop.f32.mrf.mxu0 }
 0x1e1   : > { %v1309_v41 = vpop.f32.mrf.mxu1  ;;  %1787 = vmatpush1.bf16.xpose.msra.mxu1 %v5754_v34  ;;  %v4550_v33 = vmul.f32 %v2205_v16, %v5758_v26  ;;  %v4553_v34 = vmul.f32 %v2221_v11, %v5759_v29 }
 0x1e2   : > { %v2293_v14 = vadd.f32 %v1309_v41, %v1307_v49  ;;  %v2309_v37 = vsub.f32 %v1309_v41, %v1307_v49  ;;  %1788 = vmatprep.subr.bf16.mxu1 %v5757_v27  ;;  %v1082_v15 = vpop.f32.mrf.mxu0 }
 0x1e3   : > { %v1313_v3 = vpop.f32.mrf.mxu1  ;;  %v2206_v62 = vadd.f32 %v1082_v15, %v1080_v35  ;;  %v2222_v49 = vsub.f32 %v1082_v15, %v1080_v35  ;;  %v5761_v35 = vld [vmem:[#allocation15_spill] sm:$0xff] }
 0x1e4   : > { %v2338_v17 = vmul.f32 %v2293_v14, %v4260_v50  ;;  %v2339_v25 = vmul.f32 %v2309_v37, %v4206_v1  ;;  %v1084_v18 = vpop.f32.mrf.mxu0  ;;  %v5762_v29 = vpack.c.bf16 %v5760_v51, %v5761_v35 }
 0x1e5   : > { %v1315_v31 = vpop.f32.mrf.mxu1  ;;  %v4563_v50 = vmul.f32 %v2206_v62, %v4198_v43  ;;  %v4566_v1 = vmul.f32 %v2222_v49, %v4200_v19  ;;  %v5764_v43 = vld [vmem:[#allocation56_spill] sm:$0xff]  ;;  %v5765_v19 = vld [vmem:[#allocation57_spill] sm:$0xff] }
 0x1e6   : > { %v2356_v26 = vpack.c.bf16 %v2338_v17, %v4543_v40  ;;  %v2294_v16 = vadd.f32 %v1315_v31, %v1313_v3  ;;  %v2310_v41 = vsub.f32 %v1315_v31, %v1313_v3  ;;  %v2357_v11 = vpack.c.bf16 %v2339_v25, %v2337_v60  ;;  %v1086_v37 = vpop.f32.mrf.mxu0  ;;  %v5763_v40 = vld [vmem:[#allocation55_spill] sm:$0xff] }
 0x1e7   : > { %v1317_v30 = vpop.f32.mrf.mxu1  ;;  %v2207_v15 = vadd.f32 %v1086_v37, %v1084_v18  ;;  %v2223_v27 = vsub.f32 %v1086_v37, %v1084_v18 }
 0x1e8   : > { %v2340_v17 = vmul.f32 %v2294_v16, %v5763_v40  ;;  %v2341_v60 = vmul.f32 %v2310_v41, %v4216_v36  ;;  %v1090_v31 = vpop.f32.mrf.mxu0 }
 0x1e9   : > { %v1319_v14 = vpop.f32.mrf.mxu1  ;;  %1789 = vmatpush1.bf16.xpose.msra.mxu1 %v5762_v29  ;;  %v4574_v62 = vmul.f32 %v2207_v15, %v5764_v43  ;;  %v4577_v49 = vmul.f32 %v2223_v27, %v5765_v19 }
 0x1ea   : > { %v2295_v3 = vadd.f32 %v1319_v14, %v1317_v30  ;;  %v2311_v25 = vsub.f32 %v1319_v14, %v1317_v30  ;;  %v1092_v35 = vpop.f32.mrf.mxu0 }
 0x1eb   : > { %v2271_v18 = vpack.c.bf16 %v4577_v49, %v4566_v1  ;;  %v2270_v36 = vpack.c.bf16 %v4574_v62, %v4563_v50  ;;  %v2208_v16 = vadd.f32 %v1092_v35, %v1090_v31  ;;  %v2224_v41 = vsub.f32 %v1092_v35, %v1090_v31 }
 0x1ec   : > { %v2342_v23 = vmul.f32 %v2295_v3, %v4218_v39  ;;  %v2343_v51 = vmul.f32 %v2311_v25, %v4220_v58  ;;  %v1094_v14 = vpop.f32.mrf.mxu0  ;;  %v5766_v39 = vld [vmem:[#allocation38_spill] sm:$0xff]  ;;  %v5767_v58 = vld [vmem:[#allocation37_spill] sm:$0xff]  ;;  %v5770_v25 = vld [vmem:[#allocation44_spill] sm:$0xff] }
 0x1ed   : > { %v4586_v29 = vmul.f32 %v2208_v16, %v4246_v56  ;;  %v4589_v27 = vmul.f32 %v2224_v41, %v4248_v7  ;;  %v5768_v15 = vpack.c.bf16 %v5766_v39, %v5767_v58  ;;  %v5769_v3 = vld [vmem:[#allocation46_spill] sm:$0xff]  ;;  %v5776_v58 = vld [vmem:[#allocation52_spill] sm:$0xff] }
 0x1ee   : > { %v2358_v30 = vpack.c.bf16 %v2342_v23, %v2340_v17  ;;  %v2359_v37 = vpack.c.bf16 %v2343_v51, %v2341_v60  ;;  %v1096_v40 = vpop.f32.mrf.mxu0  ;;  %v5771_v43 = vpack.c.bf16 %v5769_v3, %v5770_v25  ;;  %v5775_v39 = vld [vmem:[#allocation54_spill] sm:$0xff]  ;;  %v5778_v25 = vpack.c.bf16 %v4523_v0, %v4508_v54 }
 0x1ef   : > { %v2209_v23 = vadd.f32 %v1096_v40, %v1094_v14  ;;  %v2225_v17 = vsub.f32 %v1096_v40, %v1094_v14 }
 0x1f0   : > { %1807 = vmatmul.mubr.bf16.vlgmr.msra.gmra.mxu1 %v5768_v15  ;;  %2360 = vmatprep.subr.bf16.mxu0 %v2359_v37  ;;  %v1100_v60 = vpop.f32.mrf.mxu0  ;;  %v5773_v37 = vld [vmem:[#allocation43_spill] sm:$0xff]  ;;  %v5777_v15 = vpack.c.bf16 %v5775_v39, %v5776_v58 }
 0x1f1   : > { %2361 = vmatpush1.bf16.xpose.msra.mxu0 %v2358_v30  ;;  %1814 = vmatprep.mubr.bf16.mxu1 %v5771_v43  ;;  %v4598_v56 = vmul.f32 %v2209_v23, %v4268_v12  ;;  %v4601_v7 = vmul.f32 %v2225_v17, %v4270_v24  ;;  %v5772_v12 = vld [vmem:[#allocation45_spill] sm:$0xff] }
 0x1f2   : > { %2362 = vmatprep.subr.bf16.mxu0 %v2357_v11  ;;  %v1102_v31 = vpop.f32.mrf.mxu0  ;;  %v5774_v24 = vpack.c.bf16 %v5772_v12, %v5773_v37  ;;  %v5782_v12 = vpack.c.bf16 %v4520_v2, %v4505_v53  ;;  %v5783_v37 = vld [vmem:[#allocation61_spill] sm:$0xff] }
 0x1f3   : > { %v2272_v19 = vpack.c.bf16 %v4598_v56, %v4586_v29  ;;  %v2210_v51 = vadd.f32 %v1102_v31, %v1100_v60  ;;  %v2226_v35 = vsub.f32 %v1102_v31, %v1100_v60  ;;  %v2273_v16 = vpack.c.bf16 %v4601_v7, %v4589_v27 }
 0x1f4   : > { %v1104_v41 = vpop.f32.mrf.mxu0 }
 0x1f5   : > { %v4608_v30 = vmul.f32 %v2210_v51, %v4304_v22  ;;  %v4611_v11 = vmul.f32 %v2226_v35, %v4306_v28  ;;  %v5780_v35 = vld [vmem:[#allocation51_spill] sm:$0xff] }
 0x1f6   : > { %v1106_v14 = vpop.f32.mrf.mxu0 }
 0x1f7   : > { %v2211_v40 = vadd.f32 %v1106_v14, %v1104_v41  ;;  %v2227_v3 = vsub.f32 %v1106_v14, %v1104_v41 }
 0x1f8   : > { %1815 = vmatmul.mubr.bf16.gmra.mxu1 %v5774_v24  ;;  %v1110_v22 = vpop.f32.mrf.mxu0  ;;  %v5784_v24 = vld [vmem:[#allocation59_spill] sm:$0xff] }
 0x1f9   : > { %2363 = vmatpush1.bf16.xpose.msra.mxu0 %v2356_v26  ;;  %1822 = vmatprep.mubr.bf16.mxu1 %v5777_v15  ;;  %v4623_v28 = vmul.f32 %v2211_v40, %v4330_v9  ;;  %v4626_v43 = vmul.f32 %v2227_v3, %v4332_v46  ;;  %v5779_v9 = vld [vmem:[#allocation53_spill] sm:$0xff]  ;;  %v5785_v14 = vpack.c.bf16 %v5783_v37, %v5784_v24  ;;  %v5794_v37 = vld [vmem:[#allocation64_spill] sm:$0xff] }
 0x1fa   : > { %2364 = vmatprep.subr.bf16.mxu0 %v5778_v25  ;;  %v1112_v23 = vpop.f32.mrf.mxu0  ;;  %v5781_v46 = vpack.c.bf16 %v5779_v9, %v5780_v35  ;;  %v5791_v9 = vpack.c.bf16 %v4289_v42, %v4280_v4 }
 0x1fb   : > { %v2212_v17 = vadd.f32 %v1112_v23, %v1110_v22  ;;  %v2228_v60 = vsub.f32 %v1112_v23, %v1110_v22  ;;  %v2275_v31 = vpack.c.bf16 %v4626_v43, %v4611_v11  ;;  %v5839_v22 = vld [vmem:[#allocation32_spill] sm:$0xff]  ;;  %v5850_v43 = vpack.c.bf16 %v4623_v28, %v4608_v30 }
 0x1fc   : > { %v1114_v51 = vpop.f32.mrf.mxu0 }
 0x1fd   : > { %v4633_v54 = vmul.f32 %v2212_v17, %v4366_v57  ;;  %v4636_v0 = vmul.f32 %v2228_v60, %v4368_v8  ;;  %v5786_v57 = vpack.c.bf16 %v4487_v48, %v4474_v52  ;;  %v5788_v17 = vld [vmem:[#allocation58_spill] sm:$0xff] }
 0x1fe   : > { %v1116_v41 = vpop.f32.mrf.mxu0 }
 0x1ff   : > { %v2213_v39 = vadd.f32 %v1116_v41, %v1114_v51  ;;  %v2229_v58 = vsub.f32 %v1116_v41, %v1114_v51  ;;  %v5790_v51 = vpack.c.bf16 %v4484_v21, %v4471_v47 }
 0x200   : > { %1823 = vmatmul.mubr.bf16.gmra.mxu1 %v5781_v46  ;;  %v1120_v8 = vpop.f32.mrf.mxu0 }
 0x201   : > { %2365 = vmatpush1.bf16.xpose.msra.mxu0 %v5782_v12  ;;  %1830 = vmatprep.mubr.bf16.mxu1 %v5785_v14  ;;  %v4651_v15 = vmul.f32 %v2213_v39, %v4390_v45  ;;  %v4654_v40 = vmul.f32 %v2229_v58, %v4392_v32  ;;  %v5787_v45 = vld [vmem:[#allocation60_spill] sm:$0xff]  ;;  %v5797_v14 = vld [vmem:[#allocation71_spill] sm:$0xff] }
 0x202   : > { %2366 = vmatprep.subr.bf16.mxu0 %v5786_v57  ;;  %v1122_v3 = vpop.f32.mrf.mxu0  ;;  %v5789_v32 = vpack.c.bf16 %v5787_v45, %v5788_v17  ;;  %v5798_v39 = vpack.c.bf16 %v4351_v59, %v5797_v14  ;;  %v5799_v57 = vld [vmem:[#allocation24_spill] sm:$0xff]  ;;  %v5803_v45 = vld [vmem:[#allocation70_spill] sm:$0xff] }
 0x203   : > { %v2214_v2 = vadd.f32 %v1122_v3, %v1120_v8  ;;  %v2230_v25 = vsub.f32 %v1122_v3, %v1120_v8  ;;  %v5800_v8 = vld [vmem:[#allocation76_spill] sm:$0xff] }
 0x204   : > { %v1124_v23 = vpop.f32.mrf.mxu0  ;;  %v5801_v3 = vpack.c.bf16 %v5799_v57, %v5800_v8  ;;  %v5814_v57 = vld [vmem:[#allocation79_spill] sm:$0xff]  ;;  %v5815_v8 = vld [vmem:[#allocation77_spill] sm:$0xff] }
 0x205   : > { %v4661_v52 = vmul.f32 %v2214_v2, %v4425_v5  ;;  %v4664_v48 = vmul.f32 %v2230_v25, %v4427_v55  ;;  %v5792_v5 = vpack.c.bf16 %v4453_v6, %v4432_v20  ;;  %v5793_v6 = vld [vmem:[#allocation65_spill] sm:$0xff] }
 0x206   : > { %v1126_v60 = vpop.f32.mrf.mxu0 }
 0x207   : > { %v2215_v35 = vadd.f32 %v1126_v60, %v1124_v23  ;;  %v2231_v46 = vsub.f32 %v1126_v60, %v1124_v23  ;;  %v5806_v60 = vld [vmem:[#allocation75_spill] sm:$0xff] }
 0x208   : > { %1831 = vmatmul.mubr.bf16.gmra.mxu1 %v5789_v32  ;;  %v4678_v55 = vpop.f32.mrf.mxu0  ;;  %v5805_v32 = vld [vmem:[#allocation23_spill] sm:$0xff] }
 0x209   : > { %2367 = vmatpush1.bf16.xpose.msra.mxu0 %v5790_v51  ;;  %1838 = vmatprep.mubr.bf16.mxu1 %v5791_v9  ;;  %v4681_v41 = vmul.f32 %v2215_v35, %v4434_v63  ;;  %v4684_v12 = vmul.f32 %v2231_v46, %v4436_v10  ;;  %v5795_v63 = vpack.c.bf16 %v5793_v6, %v5794_v37  ;;  %v5808_v9 = vld [vmem:[#allocation80_spill] sm:$0xff]  ;;  %v5809_v35 = vld [vmem:[#allocation78_spill] sm:$0xff]  ;;  %v5812_v37 = vld [vmem:[#allocation69_spill] sm:$0xff] }
 0x20a   : > { %2368 = vmatprep.subr.bf16.mxu0 %v5792_v5  ;;  %v4686_v47 = vpop.f32.mrf.mxu0  ;;  %v5796_v10 = vpack.c.bf16 %v4451_v44, %v4430_v13  ;;  %v5802_v13 = vld [vmem:[#allocation72_spill] sm:$0xff]  ;;  %v5807_v51 = vpack.c.bf16 %v5805_v32, %v5806_v60  ;;  %v5810_v46 = vpack.c.bf16 %v5808_v9, %v5809_v35  ;;  %v5811_v6 = vld [vmem:[#allocation74_spill] sm:$0xff]  ;;  %v5820_v60 = vld [vmem:[#allocation83_spill] sm:$0xff] }
 0x20b   : > { %v5804_v59 = vpack.c.bf16 %v5802_v13, %v5803_v45  ;;  %v5817_v45 = vld [vmem:[#allocation73_spill] sm:$0xff]  ;;  %v5823_v35 = vld [vmem:[#allocation67_spill] sm:$0xff]  ;;  %v5835_v44 = vld [vmem:[#allocation28_spill] sm:$0xff] }
 0x20c   : > { %v4692_v21 = vpop.f32.mrf.mxu0  ;;  %v5836_v5 = vld [vmem:[#allocation31_spill] sm:$0xff] }
 0x20d   : > { %v5837_v42 = vpack.c.bf16 %v5835_v44, %v5836_v5 }
 0x20e   : > { %v4699_v24 = vpop.f32.mrf.mxu0 }
 0x210   : > { %1839 = vmatmul.mubr.bf16.gmra.mxu1 %v5795_v63  ;;  %v4712_v2 = vpop.f32.mrf.mxu0  ;;  %v5813_v63 = vpack.c.bf16 %v5811_v6, %v5812_v37 }
 0x211   : > { %2369 = vmatpush1.bf16.xpose.msra.mxu0 %v5796_v10  ;;  %1846 = vmatprep.mubr.bf16.mxu1 %v5798_v39 }
 0x212   : > { %2370 = vmatprep.subr.bf16.mxu0 %v5801_v3  ;;  %v4714_v25 = vpop.f32.mrf.mxu0  ;;  %v5816_v3 = vpack.c.bf16 %v5814_v57, %v5815_v8  ;;  %v5826_v8 = vld [vmem:[#allocation82_spill] sm:$0xff] }
 0x214   : > { %v4716_v23 = vpop.f32.mrf.mxu0 }
 0x216   : > { %v4723_v17 = vpop.f32.mrf.mxu0 }
 0x218   : > { %1847 = vmatmul.mubr.bf16.gmra.mxu1 %v5804_v59  ;;  %v4736_v10 = vpop.f32.mrf.mxu0  ;;  %v5818_v59 = vld [vmem:[#allocation68_spill] sm:$0xff] }
 0x219   : > { %2371 = vmatpush1.bf16.xpose.msra.mxu0 %v5807_v51  ;;  %1854 = vmatprep.mubr.bf16.mxu1 %v5810_v46  ;;  %v5819_v32 = vpack.c.bf16 %v5817_v45, %v5818_v59  ;;  %v5821_v51 = vld [vmem:[#allocation81_spill] sm:$0xff]  ;;  %v5824_v46 = vld [vmem:[#allocation63_spill] sm:$0xff]  ;;  %v5829_v59 = vld [vmem:[#allocation66_spill] sm:$0xff] }
 0x21a   : > { %2372 = vmatprep.subr.bf16.mxu0 %v5813_v63  ;;  %v4738_v14 = vpop.f32.mrf.mxu0  ;;  %v5822_v9 = vpack.c.bf16 %v5820_v60, %v5821_v51  ;;  %v5825_v6 = vpack.c.bf16 %v5823_v35, %v5824_v46  ;;  %v5832_v35 = vld [vmem:[#allocation33_spill] sm:$0xff]  ;;  %v5833_v46 = vld [vmem:[#allocation30_spill] sm:$0xff] }
 0x21c   : > { %v4740_v39 = vpop.f32.mrf.mxu0 }
 0x21d   : > { %v2043_v30 = vpack.c.bf16 %v4740_v39, %v4736_v10  ;;  %v5859_v39 = vpack.c.bf16 %v4723_v17, %v4714_v25  ;;  %v5862_v25 = vpack.c.bf16 %v4681_v41, %v4661_v52 }
 0x21e   : > { %v4745_v13 = vpop.f32.mrf.mxu0 }
 0x220   : > { %1855 = vmatmul.mubr.bf16.gmra.mxu1 %v5816_v3  ;;  %v4756_v37 = vpop.f32.mrf.mxu0  ;;  %v5827_v3 = vld [vmem:[#allocation29_spill] sm:$0xff] }
 0x221   : > { %2373 = vmatpush1.bf16.xpose.msra.mxu0 %v5819_v32  ;;  %1862 = vmatprep.mubr.bf16.mxu1 %v5822_v9  ;;  %v5828_v20 = vpack.c.bf16 %v5826_v8, %v5827_v3  ;;  %v5830_v32 = vld [vmem:[#allocation62_spill] sm:$0xff] }
 0x222   : > { %2374 = vmatprep.subr.bf16.mxu0 %v5825_v6  ;;  %v4758_v63 = vpop.f32.mrf.mxu0  ;;  %v5831_v4 = vpack.c.bf16 %v5829_v59, %v5830_v32  ;;  %v5834_v6 = vpack.c.bf16 %v5832_v35, %v5833_v46  ;;  %v5838_v3 = vld [vmem:[#allocation34_spill] sm:$0xff]  ;;  %v5841_v59 = vpack.c.bf16 %v4553_v34, %v4537_v61 }
 0x223   : > { %v5840_v26 = vpack.c.bf16 %v5838_v3, %v5839_v22 }
 0x224   : > { %v4760_v57 = vpop.f32.mrf.mxu0 }
 0x225   : > { %v2045_v11 = vpack.c.bf16 %v4760_v57, %v4756_v37 }
 0x226   : > { %v1392_v45 = vpop.f32.mrf.mxu0 }
 0x227   : > { %v2046_v29 = vpack.c.bf16 %v1392_v45, %v4758_v63 }
 0x228   : > { %1863 = vmatmul.mubr.bf16.gmra.mxu1 %v5828_v20  ;;  %v1396_v60 = vpop.f32.mrf.mxu0 }
 0x229   : > { %2375 = vmatpush1.bf16.xpose.msra.mxu0 %v5831_v4 }
 0x22a   : > { %v1398_v51 = vpop.f32.mrf.mxu0 }
 0x22c   : > { %v1400_v9 = vpop.f32.mrf.mxu0 }
 0x22e   : > { %v1402_v58 = vpop.f32.mrf.mxu0 }
 0x22f   : > { %v2048_v27 = vpack.c.bf16 %v1402_v58, %v1398_v51  ;;  %v5852_v58 = vpack.c.bf16 %v4654_v40, %v4636_v0  ;;  %v5856_v0 = vpack.c.bf16 %v4651_v15, %v4633_v54  ;;  %v5860_v54 = vpack.c.bf16 %v4716_v23, %v4712_v2 }
 0x230   : > { %2393 = vmatmul.mubr.bf16.vlgmr.msra.gmra.mxu0 %v5834_v6  ;;  %v1406_v53 = vpop.f32.mrf.mxu0  ;;  %v5842_v6 = vpack.c.bf16 %v4550_v33, %v4534_v38  ;;  %v5861_v15 = vpack.c.bf16 %v4699_v24, %v4686_v47  ;;  %v5863_v51 = vpack.c.bf16 %v4692_v21, %v4678_v55 }
 0x231   : > { %2400 = vmatprep.mubr.bf16.mxu0 %v5837_v42 }
 0x232   : > { %v1408_v8 = vpop.f32.mrf.mxu0 }
 0x234   : > { %v1410_v20 = vpop.f32.mrf.mxu0 }
 0x235   : > { %v2049_v62 = vpack.c.bf16 %v1410_v20, %v1406_v53  ;;  %v2044_v53 = vpack.c.bf16 %v4745_v13, %v4738_v14  ;;  %v5858_v13 = vpack.c.bf16 %v4684_v12, %v4664_v48 }
 0x236   : > { %v1412_v4 = vpop.f32.mrf.mxu0 }
 0x238   : > { %2401 = vmatmul.mubr.bf16.gmra.mxu0 %v5840_v26  ;;  %v1416_v32 = vpop.f32.mrf.mxu0 }
 0x239   : > { %2408 = vmatprep.mubr.bf16.mxu0 %v5841_v59 }
 0x23a   : > { %v1418_v35 = vpop.f32.mrf.mxu0 }
 0x23c   : > { %v1420_v46 = vpop.f32.mrf.mxu0 }
 0x23d   : > { %v2051_v1 = vpack.c.bf16 %v1420_v46, %v1416_v32 }
 0x23e   : > { %v1422_v42 = vpop.f32.mrf.mxu0 }
 0x23f   : > { %v2052_v33 = vpack.c.bf16 %v1422_v42, %v1418_v35 }
 0x240   : > { %2409 = vmatmul.mubr.bf16.gmra.mxu0 %v5842_v6  ;;  %v1426_v44 = vpop.f32.mrf.mxu0 }
 0x241   : > { %2416 = vmatprep.mubr.bf16.mxu0 %v2271_v18  ;;  %v2050_v18 = vpack.c.bf16 %v1412_v4, %v1408_v8  ;;  %v2047_v8 = vpack.c.bf16 %v1400_v9, %v1396_v60 }
 0x242   : > { %v1428_v22 = vpop.f32.mrf.mxu0 }
 0x244   : > { %v1430_v26 = vpop.f32.mrf.mxu0 }
 0x245   : > { %v2053_v61 = vpack.c.bf16 %v1430_v26, %v1426_v44 }
 0x246   : > { %v1432_v34 = vpop.f32.mrf.mxu0 }
 0x247   : > { %v2054_v38 = vpack.c.bf16 %v1432_v34, %v1428_v22 }
 0x248   : > { %2417 = vmatmul.mubr.bf16.gmra.mxu0 %v2270_v36  ;;  %v4792_v5 = vpop.f32.mrf.mxu0 }
 0x249   : > { %2424 = vmatprep.mubr.bf16.mxu0 %v2273_v16  ;;  %5843 = vst [vmem:[#allocation26_spill] sm:$0xff] %v4792_v5  ;;  %2055 = vmatprep.subr.bf16.mxu1 %v2054_v38 }
 0x24a   : > { %v4794_v49 = vpop.f32.mrf.mxu0  ;;  %2056 = vmatpush1.bf16.msra.mxu1 %v2053_v61 }
 0x24b   : > { %5844 = vst [vmem:[#allocation35_spill] sm:$0xff] %v4794_v49  ;;  %2057 = vmatprep.subr.bf16.mxu1 %v2052_v33 }
 0x24c   : > { %v4796_v3 = vpop.f32.mrf.mxu0 }
 0x24d   : > { %5845 = vst [vmem:[#allocation36_spill] sm:$0xff] %v4796_v3 }
 0x24e   : > { %v4803_v36 = vpop.f32.mrf.mxu0  ;;  %2058 = vmatpush1.bf16.msra.mxu1 %v2051_v1 }
 0x24f   : > { %5846 = vst [vmem:[#allocation39_spill] sm:$0xff] %v4803_v36  ;;  %2059 = vmatprep.subr.bf16.mxu1 %v2050_v18 }
 0x250   : > { %2425 = vmatmul.mubr.bf16.gmra.mxu0 %v2272_v19  ;;  %v4810_v16 = vpop.f32.mrf.mxu0 }
 0x251   : > { %2432 = vmatprep.mubr.bf16.mxu0 %v2275_v31  ;;  %5847 = vst [vmem:[#allocation40_spill] sm:$0xff] %v4810_v16 }
 0x252   : > { %v4812_v4 = vpop.f32.mrf.mxu0  ;;  %2060 = vmatpush1.bf16.msra.mxu1 %v2049_v62  ;;  %v1579_v62 = vlaneseq }
 0x253   : > { %5848 = vst [vmem:[#allocation27_spill] sm:$0xff] %v4812_v4  ;;  %2061 = vmatprep.subr.bf16.mxu1 %v2048_v27 }
 0x254   : > { %v4815_v56 = vpop.f32.mrf.mxu0  ;;  %v4922_v27 = vshrl.u32 %v1579_v62, 7 }
 0x255   : > { %5849 = vst [vmem:[#allocation25_spill] sm:$0xff] %v4815_v56 }
 0x256   : > { %v4824_v31 = vpop.f32.mrf.mxu0  ;;  %2062 = vmatpush1.bf16.msra.mxu1 %v2047_v8  ;;  %v4924_v8 = vand.u32 127, %v1579_v62  ;;  %v4973_v62 = vadd.s32 40, %v4922_v27 }
 0x257   : > { %5851 = vst [vmem:[#allocation22_spill] sm:$0xff] %v4824_v31  ;;  %2063 = vmatprep.subr.bf16.mxu1 %v2046_v29  ;;  %v4929_v29 = vadd.s32 8, %v4922_v27 }
 0x258   : > { %2433 = vmatmul.mubr.bf16.gmra.mxu0 %v5850_v43  ;;  %v4833_v45 = vpop.f32.mrf.mxu0  ;;  %vm1598_vm0 = vcmp.le.s32.totalorder %v4924_v8, %v4922_v27  ;;  %vm1603_vm5 = vcmp.le.s32.totalorder %v4924_v8, %v4973_v62 }
 0x259   : > { %2440 = vmatprep.mubr.bf16.mxu0 %v5852_v58  ;;  %5853 = vst [vmem:[#allocation20_spill] sm:$0xff] %v4833_v45  ;;  %vm1599_vm1 = vcmp.le.s32.totalorder %v4924_v8, %v4929_v29  ;;  %v4940_v58 = vadd.s32 16, %v4922_v27 }
 0x25a   : > { %v4837_v28 = vpop.f32.mrf.mxu0  ;;  %2064 = vmatpush1.bf16.msra.mxu1 %v2045_v11 }
 0x25b   : > { %5854 = vst [vmem:[#allocation41_spill] sm:$0xff] %v4837_v28  ;;  %2065 = vmatprep.subr.bf16.mxu1 %v2044_v53  ;;  %vm1600_vm2 = vcmp.le.s32.totalorder %v4924_v8, %v4940_v58 }
 0x25c   : > { %v4839_v37 = vpop.f32.mrf.mxu0 }
 0x25d   : > { %5855 = vst [vmem:[#allocation42_spill] sm:$0xff] %v4839_v37 }
 0x25e   : > { %v4846_v40 = vpop.f32.mrf.mxu0  ;;  %2066 = vmatpush1.bf16.msra.mxu1 %v2043_v30 }
 0x25f   : > { %5857 = vst [vmem:[#allocation47_spill] sm:$0xff] %v4846_v40  ;;  %2067 = vmatprep.subr.bf16.mxu1 %v5859_v39  ;;  %v4951_v39 = vadd.s32 24, %v4922_v27 }
 0x260   : > { %2441 = vmatmul.mubr.bf16.gmra.mxu0 %v5856_v0  ;;  %v4856_v57 = vpop.f32.mrf.mxu0 }
 0x261   : > { %2448 = vmatprep.mubr.bf16.mxu0 %v5858_v13  ;;  %vm1601_vm3 = vcmp.le.s32.totalorder %v4924_v8, %v4951_v39 }
 0x262   : > { %v4858_v60 = vpop.f32.mrf.mxu0  ;;  %2068 = vmatpush1.bf16.msra.mxu1 %v5860_v54 }
 0x263   : > { %2069 = vmatprep.subr.bf16.mxu1 %v5861_v15 }
 0x264   : > { %v4866_v48 = vpop.f32.mrf.mxu0 }
 0x266   : > { %v4873_v17 = vpop.f32.mrf.mxu0  ;;  %2070 = vmatpush1.bf16.msra.mxu1 %v5863_v51  ;;  %v4962_v51 = vadd.s32 32, %v4922_v27 }
 0x268   : > { %2449 = vmatmul.mubr.bf16.gmra.mxu0 %v5862_v25  ;;  %v4880_v47 = vpop.f32.mrf.mxu0  ;;  %vm1602_vm4 = vcmp.le.s32.totalorder %v4924_v8, %v4962_v51 }
 0x26a   : > { %v4882_v24 = vpop.f32.mrf.mxu0 }
 0x26c   : > { %v4884_v23 = vpop.f32.mrf.mxu0 }
 0x26e   : > { %v4888_v52 = vpop.f32.mrf.mxu0 }
 0x270   : > { %v4892_v20 = vpop.f32.mrf.mxu0 }
 0x272   : > { %v4894_v55 = vpop.f32.mrf.mxu0 }
 0x274   : > { %v4896_v21 = vpop.f32.mrf.mxu0 }
 0x276   : > { %v4900_v32 = vpop.f32.mrf.mxu0 }
 0x278   : > { %v4904_v46 = vpop.f32.mrf.mxu0 }
 0x27a   : > { %v4906_v6 = vpop.f32.mrf.mxu0 }
 0x27c   : > { %v4908_v42 = vpop.f32.mrf.mxu0 }
 0x27e   : > { %v4912_v22 = vpop.f32.mrf.mxu0 }
 0x280   : > { %v4916_v61 = vpop.f32.mrf.mxu0 }
 0x282   : > { %v1508_v34 = vpop.f32.mrf.mxu0 }
 0x284   : > { %v4918_v33 = vpop.f32.mrf.mxu0 }
 0x286   : > { %v1512_v1 = vpop.f32.mrf.mxu0 }
 0x287   : > { %v2640_v18 = vpack.c.bf16 %v1512_v1, %v1508_v34 }
 0x289   : > { %2641 = vmatprep.subr.bf16.mxu1 %v2640_v18 }
 0x2b0   : > { %v1808_v11 = vpop.f32.mrf.mxu1 }
 0x2b1   : > { %v4934_v43 = vsel %vm1598_vm0, %v1808_v11, -inf }
 0x2b2   : > { %1887 = vmax.xlane.f32.xlu0 %v4934_v43  ;;  %v1810_v53 = vpop.f32.mrf.mxu1 }
 0x2b4   : > { %v1811_v30 = vpop.f32.mrf.mxu1 }
 0x2b5   : > { %v4945_v0 = vsel %vm1599_vm1, %v1811_v30, -inf }
 0x2b6   : > { %1889 = vmax.xlane.f32.xlu0 %v4945_v0  ;;  %v1813_v13 = vpop.f32.mrf.mxu1 }
 0x2b7   : > { %v4984_v13 = vadd.s32 48, %v4922_v27 }
 0x2b8   : > { %v1816_v54 = vpop.f32.mrf.mxu1 }
 0x2b9   : > { %v4956_v15 = vsel %vm1600_vm2, %v1816_v54, -inf  ;;  %vm1604_vm6 = vcmp.le.s32.totalorder %v4924_v8, %v4984_v13 }
 0x2ba   : > { %1891 = vmax.xlane.f32.xlu1 %v4956_v15  ;;  %v1818_v25 = vpop.f32.mrf.mxu1 }
 0x2bc   : > { %v1819_v34 = vpop.f32.mrf.mxu1 }
 0x2bd   : > { %v4967_v1 = vsel %vm1601_vm3, %v1819_v34, -inf }
 0x2be   : > { %1893 = vmax.xlane.f32.xlu1 %v4967_v1  ;;  %v1821_v18 = vpop.f32.mrf.mxu1 }
 0x2bf   : > { %v4995_v18 = vadd.s32 56, %v4922_v27 }
 0x2c0   : > { %v1824_v11 = vpop.f32.mrf.mxu1 }
 0x2c1   : > { %v4978_v53 = vsel %vm1602_vm4, %v1824_v11, -inf  ;;  %vm1605_vm7 = vcmp.le.s32.totalorder %v4924_v8, %v4995_v18 }
 0x2c2   : > { %1895 = vmax.xlane.f32.xlu0 %v4978_v53  ;;  %v1826_v30 = vpop.f32.mrf.mxu1 }
 0x2c4   : > { %v1827_v54 = vpop.f32.mrf.mxu1 }
 0x2c5   : > { %v4989_v25 = vsel %vm1603_vm5, %v1827_v54, -inf  ;;  %v5006_v54 = vadd.s32 64, %v4922_v27 }
 0x2c6   : > { %1897 = vmax.xlane.f32.xlu1 %v4989_v25  ;;  %v1829_v34 = vpop.f32.mrf.mxu1 }
 0x2c7   : > { %vm1606_vm8 = vcmp.le.s32.totalorder %v4924_v8, %v5006_v54 }
 0x2c8   : > { %v1832_v11 = vpop.f32.mrf.mxu1 }
 0x2c9   : > { %v5000_v30 = vsel %vm1604_vm6, %v1832_v11, -inf }
 0x2ca   : > { %1899 = vmax.xlane.f32.xlu0 %v5000_v30  ;;  %v1834_v50 = vpop.f32.mrf.mxu1 }
 0x2cb   : > { %v5017_v50 = vadd.s32 72, %v4922_v27 }
 0x2cc   : > { %v1835_v34 = vpop.f32.mrf.mxu1 }
 0x2cd   : > { %v5011_v7 = vsel %vm1605_vm7, %v1835_v34, -inf  ;;  %vm1607_vm9 = vcmp.le.s32.totalorder %v4924_v8, %v5017_v50 }
 0x2ce   : > { %1901 = vmax.xlane.f32.xlu1 %v5011_v7  ;;  %v1837_v19 = vpop.f32.mrf.mxu1 }
 0x2cf   : > { %v5028_v19 = vadd.s32 80, %v4922_v27 }
 0x2d0   : > { %v1840_v11 = vpop.f32.mrf.mxu1 }
 0x2d1   : > { %v5022_v63 = vsel %vm1606_vm8, %v1840_v11, -inf  ;;  %vm1608_vm10 = vcmp.le.s32.totalorder %v4924_v8, %v5028_v19 }
 0x2d2   : > { %1903 = vmax.xlane.f32.xlu0 %v5022_v63  ;;  %v1842_v14 = vpop.f32.mrf.mxu1 }
 0x2d3   : > { %v5039_v14 = vadd.s32 88, %v4922_v27 }
 0x2d4   : > { %v1843_v34 = vpop.f32.mrf.mxu1 }
 0x2d5   : > { %v5033_v10 = vsel %vm1607_vm9, %v1843_v34, -inf  ;;  %vm1609_vm11 = vcmp.le.s32.totalorder %v4924_v8, %v5039_v14 }
 0x2d6   : > { %1905 = vmax.xlane.f32.xlu1 %v5033_v10  ;;  %v1845_v12 = vpop.f32.mrf.mxu1 }
 0x2d7   : > { %v5050_v12 = vadd.s32 96, %v4922_v27 }
 0x2d8   : > { %v1848_v11 = vpop.f32.mrf.mxu1 }
 0x2d9   : > { %v5044_v2 = vsel %vm1608_vm10, %v1848_v11, -inf  ;;  %vm1610_vm12 = vcmp.le.s32.totalorder %v4924_v8, %v5050_v12 }
 0x2da   : > { %1907 = vmax.xlane.f32.xlu0 %v5044_v2  ;;  %v1850_v9 = vpop.f32.mrf.mxu1 }
 0x2db   : > { %v5061_v9 = vadd.s32 104, %v4922_v27 }
 0x2dc   : > { %v1851_v34 = vpop.f32.mrf.mxu1 }
 0x2dd   : > { %v5055_v41 = vsel %vm1609_vm11, %v1851_v34, -inf  ;;  %vm1611_vm13 = vcmp.le.s32.totalorder %v4924_v8, %v5061_v9 }
 0x2de   : > { %1909 = vmax.xlane.f32.xlu1 %v5055_v41  ;;  %v1853_v59 = vpop.f32.mrf.mxu1 }
 0x2df   : > { %v5072_v59 = vadd.s32 112, %v4922_v27 }
 0x2e0   : > { %v1856_v11 = vpop.f32.mrf.mxu1 }
 0x2e1   : > { %v5066_v35 = vsel %vm1610_vm12, %v1856_v11, -inf  ;;  %vm1612_vm14 = vcmp.le.s32.totalorder %v4924_v8, %v5072_v59 }
 0x2e2   : > { %1911 = vmax.xlane.f32.xlu0 %v5066_v35  ;;  %v1858_v44 = vpop.f32.mrf.mxu1 }
 0x2e3   : > { %v5083_v44 = vadd.s32 120, %v4922_v27 }
 0x2e4   : > { %v1859_v34 = vpop.f32.mrf.mxu1 }
 0x2e5   : > { %v5077_v26 = vsel %vm1611_vm13, %v1859_v34, -inf  ;;  %vm1613_vm15 = vcmp.le.s32.totalorder %v4924_v8, %v5083_v44 }
 0x2e6   : > { %1913 = vmax.xlane.f32.xlu1 %v5077_v26  ;;  %v1861_v38 = vpop.f32.mrf.mxu1 }
 0x2e8   : > { %v1864_v11 = vpop.f32.mrf.mxu1 }
 0x2e9   : > { %v5088_v5 = vsel %vm1612_vm14, %v1864_v11, -inf }
 0x2ea   : > { %1915 = vmax.xlane.f32.xlu0 %v5088_v5  ;;  %v1866_v3 = vpop.f32.mrf.mxu1 }
 0x2ec   : > { %v1867_v34 = vpop.f32.mrf.mxu1 }
 0x2ed   : > { %v5096_v38 = vsel %vm1613_vm15, %v1867_v34, -inf }
 0x2ee   : > { %1917 = vmax.xlane.f32.xlu1 %v5096_v38  ;;  %v1869_v49 = vpop.f32.mrf.mxu1 }
 0x2f0   : > { %v2394_v36 = vpop.f32.mrf.mxu0 }
 0x2f1   : > { %v5102_v11 = vsel %vm1598_vm0, %v2394_v36, -inf }
 0x2f2   : > { %2473 = vmax.xlane.f32.xlu0 %v5102_v11  ;;  %v2396_v3 = vpop.f32.mrf.mxu0 }
 0x2f4   : > { %v2397_v16 = vpop.f32.mrf.mxu0 }
 0x2f5   : > { %v5108_v56 = vsel %vm1599_vm1, %v2397_v16, -inf }
 0x2f6   : > { %2475 = vmax.xlane.f32.xlu1 %v5108_v56  ;;  %v2399_v34 = vpop.f32.mrf.mxu0 }
 0x2f8   : > { %v2402_v4 = vpop.f32.mrf.mxu0 }
 0x2f9   : > { %v5114_v49 = vsel %vm1600_vm2, %v2402_v4, -inf }
 0x2fa   : > { %2477 = vmax.xlane.f32.xlu0 %v5114_v49  ;;  %v2404_v36 = vpop.f32.mrf.mxu0 }
 0x2fc   : > { %v2405_v27 = vpop.f32.mrf.mxu0 }
 0x2fd   : > { %v5120_v3 = vsel %vm1601_vm3, %v2405_v27, -inf }
 0x2fe   : > { %2479 = vmax.xlane.f32.xlu1 %v5120_v3  ;;  %v2407_v16 = vpop.f32.mrf.mxu0 }
 0x300   : > { %v2410_v29 = vpop.f32.mrf.mxu0 }
 0x301   : > { %v5126_v34 = vsel %vm1602_vm4, %v2410_v29, -inf }
 0x302   : > { %2481 = vmax.xlane.f32.xlu0 %v5126_v34  ;;  %v2412_v4 = vpop.f32.mrf.mxu0 }
 0x304   : > { %v2413_v58 = vpop.f32.mrf.mxu0 }
 0x305   : > { %v5132_v36 = vsel %vm1603_vm5, %v2413_v58, -inf }
 0x306   : > { %2483 = vmax.xlane.f32.xlu1 %v5132_v36  ;;  %v2415_v39 = vpop.f32.mrf.mxu0 }
 0x308   : > { %v2418_v27 = vpop.f32.mrf.mxu0 }
 0x309   : > { %v5138_v16 = vsel %vm1604_vm6, %v2418_v27, -inf }
 0x30a   : > { %2485 = vmax.xlane.f32.xlu0 %v5138_v16  ;;  %v2420_v51 = vpop.f32.mrf.mxu0 }
 0x30c   : > { %v2421_v29 = vpop.f32.mrf.mxu0 }
 0x30d   : > { %v5144_v4 = vsel %vm1605_vm7, %v2421_v29, -inf }
 0x30e   : > { %2487 = vmax.xlane.f32.xlu1 %v5144_v4  ;;  %v2423_v62 = vpop.f32.mrf.mxu0 }
 0x310   : > { %v2426_v58 = vpop.f32.mrf.mxu0 }
 0x311   : > { %v5150_v39 = vsel %vm1606_vm8, %v2426_v58, -inf }
 0x312   : > { %v2428_v13 = vpop.f32.mrf.mxu0 }
 0x314   : > { %v2429_v27 = vpop.f32.mrf.mxu0 }
 0x315   : > { %v5155_v51 = vsel %vm1607_vm9, %v2429_v27, -inf }
 0x316   : > { %v2431_v31 = vpop.f32.mrf.mxu0 }
 0x318   : > { %v2434_v18 = vpop.f32.mrf.mxu0 }
 0x319   : > { %v5160_v29 = vsel %vm1608_vm10, %v2434_v18, -inf }
 0x31a   : > { %v2436_v62 = vpop.f32.mrf.mxu0 }
 0x31c   : > { %v2437_v45 = vpop.f32.mrf.mxu0 }
 0x31d   : > { %v5165_v54 = vsel %vm1609_vm11, %v2437_v45, -inf }
 0x31e   : > { %v2439_v58 = vpop.f32.mrf.mxu0 }
 0x320   : > { %v2442_v13 = vpop.f32.mrf.mxu0 }
 0x321   : > { %v5170_v50 = vsel %vm1610_vm12, %v2442_v13, -inf }
 0x322   : > { %v2444_v31 = vpop.f32.mrf.mxu0 }
 0x324   : > { %v2445_v27 = vpop.f32.mrf.mxu0 }
 0x325   : > { %v5175_v19 = vsel %vm1611_vm13, %v2445_v27, -inf }
 0x326   : > { %v2447_v18 = vpop.f32.mrf.mxu0 }
 0x328   : > { %v2450_v62 = vpop.f32.mrf.mxu0 }
 0x329   : > { %v5180_v45 = vsel %vm1612_vm14, %v2450_v62, -inf }
 0x32a   : > { %v2452_v14 = vpop.f32.mrf.mxu0 }
 0x32c   : > { %v2453_v58 = vpop.f32.mrf.mxu0 }
 0x32d   : > { %v5185_v12 = vsel %vm1613_vm15, %v2453_v58, -inf }
 0x32e   : > { %v2455_v13 = vpop.f32.mrf.mxu0 }
 0x33b   : > { %v1888_v31 = vpop.xlane.xlu0 %1887 }
 0x33c   : > { %v1919_v9 = vsub.f32 %v4934_v43, %v1888_v31 }
 0x33e   : > { %v1935_v27 = vmul.f32 1.442695, %v1919_v9 }
 0x33f   : > { %v1890_v37 = vpop.xlane.xlu0 %1889 }
 0x340   : > { %3286 = vpow2.f32 %v1935_v27  ;;  %v1920_v18 = vsub.f32 %v4945_v0, %v1890_v37 }
 0x342   : > { %v1937_v28 = vmul.f32 1.442695, %v1920_v18 }
 0x343   : > { %v1892_v59 = vpop.xlane.xlu1 %1891 }
 0x344   : > { %3288 = vpow2.f32 %v1937_v28  ;;  %v1921_v62 = vsub.f32 %v4956_v15, %v1892_v59 }
 0x346   : > { %v1939_v14 = vmul.f32 1.442695, %v1921_v62 }
 0x347   : > { %v1894_v40 = vpop.xlane.xlu1 %1893 }
 0x348   : > { %3290 = vpow2.f32 %v1939_v14  ;;  %v1922_v8 = vsub.f32 %v4967_v1, %v1894_v40 }
 0x34a   : > { %v1941_v44 = vmul.f32 1.442695, %v1922_v8 }
 0x34b   : > { %v1896_v58 = vpop.xlane.xlu0 %1895 }
 0x34c   : > { %3292 = vpow2.f32 %v1941_v44  ;;  %v1923_v43 = vsub.f32 %v4978_v53, %v1896_v58 }
 0x34d   : > { %v5192_v13 = vpop.eup %3286 }
 0x34e   : > { %v1943_v31 = vmul.f32 1.442695, %v1923_v43  ;;  %1967 = vadd.xlane.f32.xlu0 %v5192_v13 }
 0x34f   : > { %v1898_v37 = vpop.xlane.xlu1 %1897 }
 0x350   : > { %3294 = vpow2.f32 %v1943_v31  ;;  %v1924_v28 = vsub.f32 %v4989_v25, %v1898_v37 }
 0x351   : > { %v5196_v0 = vpop.eup %3288 }
 0x352   : > { %v1945_v15 = vmul.f32 1.442695, %v1924_v28  ;;  %1969 = vadd.xlane.f32.xlu1 %v5196_v0  ;;  %2489 = vmax.xlane.f32.xlu0 %v5150_v39 }
 0x353   : > { %v1900_v40 = vpop.xlane.xlu0 %1899 }
 0x354   : > { %3296 = vpow2.f32 %v1945_v15  ;;  %v1925_v1 = vsub.f32 %v5000_v30, %v1900_v40 }
 0x355   : > { %v5201_v53 = vpop.eup %3290 }
 0x356   : > { %v1947_v9 = vmul.f32 1.442695, %v1925_v1  ;;  %1971 = vadd.xlane.f32.xlu0 %v5201_v53  ;;  %2491 = vmax.xlane.f32.xlu1 %v5155_v51 }
 0x357   : > { %v1902_v27 = vpop.xlane.xlu1 %1901 }
 0x358   : > { %3298 = vpow2.f32 %v1947_v9  ;;  %v1926_v25 = vsub.f32 %v5011_v7, %v1902_v27 }
 0x359   : > { %v5206_v18 = vpop.eup %3292 }
 0x35a   : > { %v1949_v59 = vmul.f32 1.442695, %v1926_v25  ;;  %1973 = vadd.xlane.f32.xlu1 %v5206_v18  ;;  %2493 = vmax.xlane.f32.xlu0 %v5160_v29 }
 0x35b   : > { %v1904_v62 = vpop.xlane.xlu0 %1903 }
 0x35c   : > { %3300 = vpow2.f32 %v1949_v59  ;;  %v1927_v30 = vsub.f32 %v5022_v63, %v1904_v62  ;;  %v5633_v59 = vmov 0  }
 0x35d   : > { %v5211_v14 = vpop.eup %3294  ;;  %2087 = vmatprep.mubr.bf16.mxu1 %v5633_v59 }
 0x35e   : > { %v1951_v8 = vmul.f32 1.442695, %v1927_v30  ;;  %1975 = vadd.xlane.f32.xlu0 %v5211_v14  ;;  %2495 = vmax.xlane.f32.xlu1 %v5165_v54 }
 0x35f   : > { %v1906_v44 = vpop.xlane.xlu1 %1905 }
 0x360   : > { %3302 = vpow2.f32 %v1951_v8  ;;  %v1928_v7 = vsub.f32 %v5033_v10, %v1906_v44 }
 0x361   : > { %v5216_v58 = vpop.eup %3296 }
 0x362   : > { %v1953_v43 = vmul.f32 1.442695, %v1928_v7  ;;  %1977 = vadd.xlane.f32.xlu1 %v5216_v58  ;;  %2497 = vmax.xlane.f32.xlu0 %v5170_v50 }
 0x363   : > { %v1908_v31 = vpop.xlane.xlu0 %1907 }
 0x364   : > { %3304 = vpow2.f32 %v1953_v43  ;;  %v1929_v63 = vsub.f32 %v5044_v2, %v1908_v31 }
 0x365   : > { %v5221_v37 = vpop.eup %3298 }
 0x366   : > { %v1955_v28 = vmul.f32 1.442695, %v1929_v63  ;;  %1979 = vadd.xlane.f32.xlu0 %v5221_v37  ;;  %2499 = vmax.xlane.f32.xlu1 %v5175_v19 }
 0x367   : > { %v1910_v15 = vpop.xlane.xlu1 %1909 }
 0x368   : > { %3306 = vpow2.f32 %v1955_v28  ;;  %v1930_v10 = vsub.f32 %v5055_v41, %v1910_v15 }
 0x369   : > { %v5226_v40 = vpop.eup %3300 }
 0x36a   : > { %v1957_v1 = vmul.f32 1.442695, %v1930_v10  ;;  %1981 = vadd.xlane.f32.xlu1 %v5226_v40 }
 0x36b   : > { %v1912_v9 = vpop.xlane.xlu0 %1911 }
 0x36c   : > { %3308 = vpow2.f32 %v1957_v1  ;;  %v1931_v2 = vsub.f32 %v5066_v35, %v1912_v9 }
 0x36d   : > { %v5230_v27 = vpop.eup %3302 }
 0x36e   : > { %v1959_v25 = vmul.f32 1.442695, %v1931_v2  ;;  %1983 = vadd.xlane.f32.xlu0 %v5230_v27 }
 0x36f   : > { %v1914_v62 = vpop.xlane.xlu1 %1913 }
 0x370   : > { %3310 = vpow2.f32 %v1959_v25  ;;  %v1932_v41 = vsub.f32 %v5077_v26, %v1914_v62 }
 0x371   : > { %v5235_v30 = vpop.eup %3304 }
 0x372   : > { %v1961_v8 = vmul.f32 1.442695, %v1932_v41  ;;  %1985 = vadd.xlane.f32.xlu1 %v5235_v30  ;;  %2501 = vmax.xlane.f32.xlu0 %v5180_v45 }
 0x373   : > { %v1916_v35 = vpop.xlane.xlu0 %1915 }
 0x374   : > { %3312 = vpow2.f32 %v1961_v8  ;;  %v1933_v44 = vsub.f32 %v5088_v5, %v1916_v35 }
 0x375   : > { %v5240_v7 = vpop.eup %3306 }
 0x376   : > { %v1963_v43 = vmul.f32 1.442695, %v1933_v44  ;;  %1987 = vadd.xlane.f32.xlu0 %v5240_v7  ;;  %2503 = vmax.xlane.f32.xlu1 %v5185_v12 }
 0x377   : > { %v1918_v31 = vpop.xlane.xlu1 %1917 }
 0x378   : > { %3314 = vpow2.f32 %v1963_v43  ;;  %v1934_v26 = vsub.f32 %v5096_v38, %v1918_v31 }
 0x379   : > { %v5245_v63 = vpop.eup %3308 }
 0x37a   : > { %v1965_v28 = vmul.f32 1.442695, %v1934_v26  ;;  %1989 = vadd.xlane.f32.xlu1 %v5245_v63 }
 0x37b   : > { %v2474_v15 = vpop.xlane.xlu0 %2473 }
 0x37c   : > { %3316 = vpow2.f32 %v1965_v28  ;;  %v2505_v5 = vsub.f32 %v5102_v11, %v2474_v15 }
 0x37d   : > { %v5249_v10 = vpop.eup %3310 }
 0x37e   : > { %v2521_v1 = vmul.f32 1.442695, %v2505_v5  ;;  %1991 = vadd.xlane.f32.xlu0 %v5249_v10 }
 0x37f   : > { %v2476_v9 = vpop.xlane.xlu1 %2475 }
 0x380   : > { %3318 = vpow2.f32 %v2521_v1  ;;  %v2506_v2 = vsub.f32 %v5108_v56, %v2476_v9 }
 0x381   : > { %v5253_v25 = vpop.eup %3312 }
 0x382   : > { %v2523_v38 = vmul.f32 1.442695, %v2506_v2  ;;  %1993 = vadd.xlane.f32.xlu1 %v5253_v25 }
 0x383   : > { %v2478_v62 = vpop.xlane.xlu0 %2477 }
 0x384   : > { %3320 = vpow2.f32 %v2523_v38  ;;  %v2507_v41 = vsub.f32 %v5114_v49, %v2478_v62 }
 0x385   : > { %v5257_v8 = vpop.eup %3314 }
 0x386   : > { %v2525_v11 = vmul.f32 1.442695, %v2507_v41  ;;  %1995 = vadd.xlane.f32.xlu0 %v5257_v8 }
 0x387   : > { %v2480_v35 = vpop.xlane.xlu1 %2479 }
 0x388   : > { %3322 = vpow2.f32 %v2525_v11  ;;  %v2508_v44 = vsub.f32 %v5120_v3, %v2480_v35 }
 0x389   : > { %v5261_v43 = vpop.eup %3316 }
 0x38a   : > { %v2527_v56 = vmul.f32 1.442695, %v2508_v44  ;;  %1997 = vadd.xlane.f32.xlu1 %v5261_v43 }
 0x38b   : > { %v2482_v31 = vpop.xlane.xlu0 %2481 }
 0x38c   : > { %3324 = vpow2.f32 %v2527_v56  ;;  %v2509_v26 = vsub.f32 %v5126_v34, %v2482_v31 }
 0x38d   : > { %v5265_v28 = vpop.eup %3318 }
 0x38e   : > { %v2529_v49 = vmul.f32 1.442695, %v2509_v26  ;;  %2553 = vadd.xlane.f32.xlu0 %v5265_v28 }
 0x38f   : > { %v2484_v15 = vpop.xlane.xlu1 %2483 }
 0x390   : > { %3326 = vpow2.f32 %v2529_v49  ;;  %v2510_v5 = vsub.f32 %v5132_v36, %v2484_v15 }
 0x391   : > { %v5269_v1 = vpop.eup %3320 }
 0x392   : > { %v2531_v3 = vmul.f32 1.442695, %v2510_v5  ;;  %2555 = vadd.xlane.f32.xlu1 %v5269_v1 }
 0x393   : > { %v2486_v9 = vpop.xlane.xlu0 %2485 }
 0x394   : > { %3328 = vpow2.f32 %v2531_v3  ;;  %v2511_v2 = vsub.f32 %v5138_v16, %v2486_v9 }
 0x395   : > { %v5273_v38 = vpop.eup %3322 }
 0x396   : > { %v2533_v34 = vmul.f32 1.442695, %v2511_v2  ;;  %2557 = vadd.xlane.f32.xlu0 %v5273_v38 }
 0x397   : > { %v2488_v62 = vpop.xlane.xlu1 %2487 }
 0x398   : > { %3330 = vpow2.f32 %v2533_v34  ;;  %v2512_v41 = vsub.f32 %v5144_v4, %v2488_v62 }
 0x399   : > { %v5277_v11 = vpop.eup %3324 }
 0x39a   : > { %v2535_v36 = vmul.f32 1.442695, %v2512_v41  ;;  %2559 = vadd.xlane.f32.xlu1 %v5277_v11 }
 0x39c   : > { %3332 = vpow2.f32 %v2535_v36 }
 0x39d   : > { %v5280_v35 = vpop.eup %3326 }
 0x39e   : > { %2561 = vadd.xlane.f32.xlu0 %v5280_v35 }
 0x3a1   : > { %v5283_v16 = vpop.eup %3328 }
 0x3a2   : > { %2563 = vadd.xlane.f32.xlu1 %v5283_v16 }
 0x3a5   : > { %v5286_v44 = vpop.eup %3330 }
 0x3a6   : > { %2565 = vadd.xlane.f32.xlu0 %v5286_v44 }
 0x3a9   : > { %v5289_v56 = vpop.eup %3332 }
 0x3aa   : > { %2567 = vadd.xlane.f32.xlu1 %v5289_v56 }
 0x3d7   : > { %v1968_v4 = vpop.xlane.xlu0 %1967 }
 0x3d8   : > { %3334 = vrcp.f32 %v1968_v4 }
 0x3db   : > { %v1970_v31 = vpop.xlane.xlu1 %1969  ;;  %v2490_v26 = vpop.xlane.xlu0 %2489 }
 0x3dc   : > { %3336 = vrcp.f32 %v1970_v31  ;;  %v2513_v49 = vsub.f32 %v5150_v39, %v2490_v26 }
 0x3de   : > { %v2537_v15 = vmul.f32 1.442695, %v2513_v49 }
 0x3df   : > { %v1972_v5 = vpop.xlane.xlu0 %1971  ;;  %v2492_v3 = vpop.xlane.xlu1 %2491 }
 0x3e0   : > { %3338 = vpow2.f32 %v2537_v15  ;;  %v2514_v9 = vsub.f32 %v5155_v51, %v2492_v3 }
 0x3e1   : > { %3340 = vrcp.f32 %v1972_v5 }
 0x3e2   : > { %v2539_v2 = vmul.f32 1.442695, %v2514_v9 }
 0x3e3   : > { %v1974_v34 = vpop.xlane.xlu1 %1973  ;;  %v2494_v62 = vpop.xlane.xlu0 %2493 }
 0x3e4   : > { %3342 = vpow2.f32 %v2539_v2  ;;  %v2515_v41 = vsub.f32 %v5160_v29, %v2494_v62 }
 0x3e5   : > { %3344 = vrcp.f32 %v1974_v34  ;;  %v3335_v4 = vpop.eup %3334 }
 0x3e6   : > { %v2541_v36 = vmul.f32 1.442695, %v2515_v41  ;;  %v2015_v15 = vmul.f32 %v3335_v4, %v5192_v13 }
 0x3e7   : > { %v1976_v59 = vpop.xlane.xlu0 %1975  ;;  %v2496_v31 = vpop.xlane.xlu1 %2495 }
 0x3e8   : > { %3346 = vpow2.f32 %v2541_v36  ;;  %v2516_v39 = vsub.f32 %v5165_v54, %v2496_v31  ;;  %v5864_v54 = vpack.c.bf16 %v4918_v33, %v4916_v61  ;;  %v5867_v61 = vpack.c.bf16 %v4908_v42, %v4904_v46 }
 0x3e9   : > { %v3337_v26 = vpop.eup %3336  ;;  %3348 = vrcp.f32 %v1976_v59  ;;  %v5869_v42 = vpack.c.bf16 %v4896_v21, %v4892_v20  ;;  %v5871_v20 = vpack.c.bf16 %v4884_v23, %v4880_v47  ;;  %v5873_v47 = vpack.c.bf16 %v4866_v48, %v4856_v57 }
 0x3ea   : > { %v2543_v49 = vmul.f32 1.442695, %v2516_v39  ;;  %v2016_v51 = vmul.f32 %v3337_v26, %v5196_v0  ;;  %v5865_v0 = vmov 0  }
 0x3eb   : > { %v1978_v5 = vpop.xlane.xlu1 %1977  ;;  %v2498_v3 = vpop.xlane.xlu0 %2497 }
 0x3ec   : > { %3350 = vpow2.f32 %v2543_v49  ;;  %v2517_v29 = vsub.f32 %v5170_v50, %v2498_v3  ;;  %v2031_v9 = vpack.c.bf16 %v2016_v51, %v2015_v15  ;;  %v5866_v50 = vpack.c.bf16 %v4912_v22, %v4906_v6 }
 0x3ed   : > { %v5299_v2 = vpop.eup %3338  ;;  %3352 = vrcp.f32 %v1978_v5  ;;  %v5868_v22 = vpack.c.bf16 %v4900_v32, %v4894_v55  ;;  %v5870_v55 = vpack.c.bf16 %v4888_v52, %v4882_v24  ;;  %v5872_v24 = vpack.c.bf16 %v4873_v17, %v4858_v60  ;;  %v5874_v60 = vld [vmem:[#allocation47_spill] sm:$0xff]  ;;  %v5875_v17 = vld [vmem:[#allocation41_spill] sm:$0xff] }
 0x3ee   : > { %v2545_v34 = vmul.f32 1.442695, %v2517_v29  ;;  %2088 = vmatmul.mubr.bf16.vlgmr.msra.gmra.mxu1 %v2031_v9  ;;  %2569 = vadd.xlane.f32.xlu0 %v5299_v2  ;;  %v3341_v59 = vpop.eup %3340 }
 0x3ef   : > { %2642 = vmatpush1.bf16.msra.mxu1 %v5864_v54  ;;  %v2500_v13 = vpop.xlane.xlu1 %2499  ;;  %2097 = vmatprep.mubr.bf16.mxu1 %v5865_v0  ;;  %v1980_v62 = vpop.xlane.xlu0 %1979  ;;  %v2017_v39 = vmul.f32 %v3341_v59, %v5201_v53 }
 0x3f0   : > { %3354 = vpow2.f32 %v2545_v34  ;;  %2643 = vmatprep.subr.bf16.mxu1 %v5866_v50  ;;  %v2518_v41 = vsub.f32 %v5175_v19, %v2500_v13  ;;  %v5876_v34 = vpack.c.bf16 %v5874_v60, %v5875_v17  ;;  %v5878_v50 = vld [vmem:[#allocation20_spill] sm:$0xff] }
 0x3f1   : > { %v5310_v36 = vpop.eup %3342  ;;  %3356 = vrcp.f32 %v1980_v62 }
 0x3f2   : > { %v3345_v4 = vpop.eup %3344  ;;  %v2547_v31 = vmul.f32 1.442695, %v2518_v41  ;;  %2571 = vadd.xlane.f32.xlu1 %v5310_v36  ;;  %v5880_v41 = vld [vmem:[#allocation22_spill] sm:$0xff] }
 0x3f3   : > { %2644 = vmatpush1.bf16.msra.mxu1 %v5867_v61  ;;  %v1982_v33 = vpop.xlane.xlu1 %1981  ;;  %v2018_v6 = vmul.f32 %v3345_v4, %v5206_v18  ;;  %v5881_v4 = vld [vmem:[#allocation27_spill] sm:$0xff] }
 0x3f4   : > { %3358 = vpow2.f32 %v2547_v31  ;;  %2645 = vmatprep.subr.bf16.mxu1 %v5868_v22  ;;  %v5882_v31 = vpack.c.bf16 %v5880_v41, %v5881_v4  ;;  %v5884_v22 = vld [vmem:[#allocation40_spill] sm:$0xff] }
 0x3f5   : > { %v5321_v19 = vpop.eup %3346  ;;  %3360 = vrcp.f32 %v1982_v33  ;;  %v2032_v26 = vpack.c.bf16 %v2018_v6, %v2017_v39  ;;  %v5883_v6 = vld [vmem:[#allocation25_spill] sm:$0xff] }
 0x3f6   : > { %2573 = vadd.xlane.f32.xlu0 %v5321_v19  ;;  %v3349_v46 = vpop.eup %3348 }
 0x3f7   : > { %2098 = vmatmul.mubr.bf16.gmra.mxu1 %v2032_v26  ;;  %v1984_v49 = vpop.xlane.xlu0 %1983  ;;  %v2019_v51 = vmul.f32 %v3349_v46, %v5211_v14  ;;  %v5885_v26 = vpack.c.bf16 %v5883_v6, %v5884_v22 }
 0x3f8   : > { %2646 = vmatpush1.bf16.msra.mxu1 %v5869_v42  ;;  %2107 = vmatprep.mubr.bf16.mxu1 %v5865_v0  ;;  %3362 = vrcp.f32 %v1984_v49  ;;  %v5887_v49 = vld [vmem:[#allocation35_spill] sm:$0xff] }
 0x3f9   : > { %v5328_v53 = vpop.eup %3350  ;;  %2647 = vmatprep.subr.bf16.mxu1 %v5870_v55 }
 0x3fa   : > { %v3353_v32 = vpop.eup %3352  ;;  %2575 = vadd.xlane.f32.xlu1 %v5328_v53 }
 0x3fb   : > { %v1986_v18 = vpop.xlane.xlu1 %1985  ;;  %v2502_v15 = vpop.xlane.xlu0 %2501  ;;  %v2020_v5 = vmul.f32 %v3353_v32, %v5216_v58 }
 0x3fc   : > { %2648 = vmatpush1.bf16.msra.mxu1 %v5871_v20  ;;  %3364 = vrcp.f32 %v1986_v18  ;;  %v2519_v21 = vsub.f32 %v5180_v45, %v2502_v15  ;;  %v5889_v18 = vld [vmem:[#allocation36_spill] sm:$0xff]  ;;  %v5890_v15 = vld [vmem:[#allocation26_spill] sm:$0xff] }
 0x3fd   : > { %v5340_v3 = vpop.eup %3354  ;;  %2649 = vmatprep.subr.bf16.mxu1 %v5872_v24  ;;  %v2033_v52 = vpack.c.bf16 %v2020_v5, %v2019_v51  ;;  %v5891_v51 = vpack.c.bf16 %v5889_v18, %v5890_v15 }
 0x3fe   : > { %v2549_v29 = vmul.f32 1.442695, %v2519_v21  ;;  %2577 = vadd.xlane.f32.xlu0 %v5340_v3  ;;  %v3357_v58 = vpop.eup %3356 }
 0x3ff   : > { %2108 = vmatmul.mubr.bf16.gmra.mxu1 %v2033_v52  ;;  %v2504_v14 = vpop.xlane.xlu1 %2503  ;;  %v1988_v23 = vpop.xlane.xlu0 %1987  ;;  %v2021_v57 = vmul.f32 %v3357_v58, %v5221_v37 }
 0x400   : > { %3366 = vpow2.f32 %v2549_v29  ;;  %2650 = vmatpush1.bf16.msra.mxu1 %v5873_v47  ;;  %v2520_v45 = vsub.f32 %v5185_v12, %v2504_v14  ;;  %2117 = vmatprep.mubr.bf16.mxu1 %v5865_v0  ;;  %v5877_v12 = vld [vmem:[#allocation42_spill] sm:$0xff] }
 0x401   : > { %v5351_v9 = vpop.eup %3358  ;;  %2651 = vmatprep.subr.bf16.mxu1 %v5876_v34  ;;  %3368 = vrcp.f32 %v1988_v23  ;;  %v5879_v62 = vpack.c.bf16 %v5877_v12, %v5878_v50 }
 0x402   : > { %v3361_v54 = vpop.eup %3360  ;;  %v2551_v13 = vmul.f32 1.442695, %v2520_v45  ;;  %2579 = vadd.xlane.f32.xlu1 %v5351_v9 }
 0x403   : > { %v1990_v59 = vpop.xlane.xlu1 %1989  ;;  %v2022_v48 = vmul.f32 %v3361_v54, %v5226_v40  ;;  %v5886_v40 = vld [vmem:[#allocation39_spill] sm:$0xff] }
 0x404   : > { %3370 = vpow2.f32 %v2551_v13  ;;  %2652 = vmatpush1.bf16.msra.mxu1 %v5879_v62  ;;  %v5888_v46 = vpack.c.bf16 %v5886_v40, %v5887_v49 }
 0x405   : > { %2653 = vmatprep.subr.bf16.mxu1 %v5882_v31  ;;  %3372 = vrcp.f32 %v1990_v59  ;;  %v2034_v61 = vpack.c.bf16 %v2022_v48, %v2021_v57  ;;  %v3363_v33 = vpop.eup %3362 }
 0x406   : > { %v2023_v42 = vmul.f32 %v3363_v33, %v5230_v27 }
 0x407   : > { %2118 = vmatmul.mubr.bf16.gmra.mxu1 %v2034_v61  ;;  %v1992_v39 = vpop.xlane.xlu0 %1991 }
 0x408   : > { %2654 = vmatpush1.bf16.msra.mxu1 %v5885_v26  ;;  %2127 = vmatprep.mubr.bf16.mxu1 %v5865_v0  ;;  %3374 = vrcp.f32 %v1992_v39 }
 0x409   : > { %v3365_v37 = vpop.eup %3364  ;;  %2655 = vmatprep.subr.bf16.mxu1 %v5888_v46 }
 0x40a   : > { %v2024_v55 = vmul.f32 %v3365_v37, %v5235_v30 }
 0x40b   : > { %v1994_v32 = vpop.xlane.xlu1 %1993 }
 0x40c   : > { %2656 = vmatpush1.bf16.msra.mxu1 %v5891_v51  ;;  %3376 = vrcp.f32 %v1994_v32  ;;  %v2035_v5 = vpack.c.bf16 %v2024_v55, %v2023_v42 }
 0x40d   : > { %v5377_v20 = vpop.eup %3366 }
 0x40e   : > { %2581 = vadd.xlane.f32.xlu0 %v5377_v20  ;;  %v3369_v24 = vpop.eup %3368 }
 0x40f   : > { %2128 = vmatmul.mubr.bf16.gmra.mxu1 %v2035_v5  ;;  %v1996_v21 = vpop.xlane.xlu0 %1995  ;;  %v2025_v29 = vmul.f32 %v3369_v24, %v5240_v7 }
 0x410   : > { %2137 = vmatprep.mubr.bf16.mxu1 %v5865_v0  ;;  %3378 = vrcp.f32 %v1996_v21 }
 0x411   : > { %v5381_v52 = vpop.eup %3370 }
 0x412   : > { %v3373_v27 = vpop.eup %3372  ;;  %2583 = vadd.xlane.f32.xlu1 %v5381_v52 }
 0x413   : > { %v1998_v30 = vpop.xlane.xlu1 %1997  ;;  %v2026_v14 = vmul.f32 %v3373_v27, %v5245_v63 }
 0x414   : > { %3380 = vrcp.f32 %v1998_v30 }
 0x415   : > { %v2036_v58 = vpack.c.bf16 %v2026_v14, %v2025_v29  ;;  %v3375_v47 = vpop.eup %3374 }
 0x416   : > { %v2027_v60 = vmul.f32 %v3375_v47, %v5249_v10 }
 0x417   : > { %2138 = vmatmul.mubr.bf16.gmra.mxu1 %v2036_v58  ;;  %v2554_v23 = vpop.xlane.xlu0 %2553 }
 0x418   : > { %2147 = vmatprep.mubr.bf16.mxu1 %v5865_v0  ;;  %3382 = vrcp.f32 %v2554_v23 }
 0x419   : > { %v3377_v45 = vpop.eup %3376 }
 0x41a   : > { %v2028_v17 = vmul.f32 %v3377_v45, %v5253_v25 }
 0x41b   : > { %v2556_v34 = vpop.xlane.xlu1 %2555 }
 0x41c   : > { %3384 = vrcp.f32 %v2556_v34  ;;  %v2037_v54 = vpack.c.bf16 %v2028_v17, %v2027_v60 }
 0x41d   : > { %v3379_v13 = vpop.eup %3378 }
 0x41e   : > { %v2029_v59 = vmul.f32 %v3379_v13, %v5257_v8 }
 0x41f   : > { %2148 = vmatmul.mubr.bf16.gmra.mxu1 %v2037_v54  ;;  %v2558_v7 = vpop.xlane.xlu0 %2557 }
 0x420   : > { %2157 = vmatprep.mubr.bf16.mxu1 %v5865_v0  ;;  %3386 = vrcp.f32 %v2558_v7 }
 0x421   : > { %v3381_v63 = vpop.eup %3380 }
 0x422   : > { %v2030_v57 = vmul.f32 %v3381_v63, %v5261_v43 }
 0x423   : > { %v2560_v48 = vpop.xlane.xlu1 %2559 }
 0x424   : > { %3388 = vrcp.f32 %v2560_v48  ;;  %v2038_v12 = vpack.c.bf16 %v2030_v57, %v2029_v59 }
 0x425   : > { %v3383_v10 = vpop.eup %3382 }
 0x426   : > { %v2601_v62 = vmul.f32 %v3383_v10, %v5265_v28 }
 0x427   : > { %2158 = vmatmul.mubr.bf16.gmra.mxu1 %v2038_v12  ;;  %v2562_v25 = vpop.xlane.xlu0 %2561 }
 0x428   : > { %2673 = vmatprep.mubr.bf16.mxu1 %v5865_v0  ;;  %3390 = vrcp.f32 %v2562_v25 }
 0x429   : > { %v3385_v50 = vpop.eup %3384 }
 0x42a   : > { %v2602_v41 = vmul.f32 %v3385_v50, %v5269_v1 }
 0x42b   : > { %v2564_v4 = vpop.xlane.xlu1 %2563 }
 0x42c   : > { %v2617_v31 = vpack.c.bf16 %v2602_v41, %v2601_v62  ;;  %3392 = vrcp.f32 %v2564_v4 }
 0x42d   : > { %v3387_v8 = vpop.eup %3386 }
 0x42e   : > { %v2603_v33 = vmul.f32 %v3387_v8, %v5273_v38 }
 0x42f   : > { %2674 = vmatmul.mubr.bf16.vlgmr.msra.gmra.mxu1 %v2617_v31  ;;  %v2566_v43 = vpop.xlane.xlu0 %2565 }
 0x430   : > { %2683 = vmatprep.mubr.bf16.mxu1 %v5865_v0  ;;  %3394 = vrcp.f32 %v2566_v43 }
 0x431   : > { %v3389_v61 = vpop.eup %3388 }
 0x432   : > { %v2604_v39 = vmul.f32 %v3389_v61, %v5277_v11 }
 0x433   : > { %v2568_v6 = vpop.xlane.xlu1 %2567 }
 0x434   : > { %3396 = vrcp.f32 %v2568_v6  ;;  %v2618_v28 = vpack.c.bf16 %v2604_v39, %v2603_v33 }
 0x435   : > { %v3391_v22 = vpop.eup %3390 }
 0x436   : > { %v2605_v26 = vmul.f32 %v3391_v22, %v5280_v35 }
 0x437   : > { %2684 = vmatmul.mubr.bf16.gmra.mxu1 %v2618_v28 }
 0x438   : > { %2693 = vmatprep.mubr.bf16.mxu1 %v5865_v0 }
 0x439   : > { %v3393_v1 = vpop.eup %3392 }
 0x43a   : > { %v2606_v37 = vmul.f32 %v3393_v1, %v5283_v16 }
 0x43c   : > { %v2619_v40 = vpack.c.bf16 %v2606_v37, %v2605_v26 }
 0x43d   : > { %v3395_v49 = vpop.eup %3394 }
 0x43e   : > { %v2607_v11 = vmul.f32 %v3395_v49, %v5286_v44 }
 0x43f   : > { %2694 = vmatmul.mubr.bf16.gmra.mxu1 %v2619_v40 }
 0x440   : > { %2703 = vmatprep.mubr.bf16.mxu1 %v5865_v0 }
 0x441   : > { %v3397_v38 = vpop.eup %3396 }
 0x442   : > { %v2608_v46 = vmul.f32 %v3397_v38, %v5289_v56 }
 0x444   : > { %v2620_v42 = vpack.c.bf16 %v2608_v46, %v2607_v11 }
 0x447   : > { %2704 = vmatmul.mubr.bf16.gmra.mxu1 %v2620_v42 }
 0x448   : > { %2713 = vmatprep.mubr.bf16.mxu1 %v5865_v0 }
 0x477   : > { %v2570_v55 = vpop.xlane.xlu0 %2569 }
 0x478   : > { %3398 = vrcp.f32 %v2570_v55 }
 0x47b   : > { %v2572_v32 = vpop.xlane.xlu1 %2571 }
 0x47c   : > { %3400 = vrcp.f32 %v2572_v32 }
 0x47f   : > { %v2574_v35 = vpop.xlane.xlu0 %2573 }
 0x480   : > { %3402 = vrcp.f32 %v2574_v35 }
 0x483   : > { %v2576_v16 = vpop.xlane.xlu1 %2575 }
 0x484   : > { %3404 = vrcp.f32 %v2576_v16 }
 0x485   : > { %v3399_v18 = vpop.eup %3398 }
 0x486   : > { %v2609_v44 = vmul.f32 %v3399_v18, %v5299_v2 }
 0x487   : > { %v2578_v15 = vpop.xlane.xlu0 %2577 }
 0x488   : > { %3406 = vrcp.f32 %v2578_v15 }
 0x489   : > { %v3401_v51 = vpop.eup %3400 }
 0x48a   : > { %v2610_v56 = vmul.f32 %v3401_v51, %v5310_v36 }
 0x48b   : > { %v2580_v5 = vpop.xlane.xlu1 %2579 }
 0x48c   : > { %3408 = vrcp.f32 %v2580_v5  ;;  %v2621_v21 = vpack.c.bf16 %v2610_v56, %v2609_v44 }
 0x48d   : > { %v3403_v24 = vpop.eup %3402 }
 0x48e   : > { %2714 = vmatmul.mubr.bf16.gmra.mxu1 %v2621_v21  ;;  %v2611_v30 = vmul.f32 %v3403_v24, %v5321_v19 }
 0x48f   : > { %2723 = vmatprep.mubr.bf16.mxu1 %v5865_v0 }
 0x491   : > { %v3405_v27 = vpop.eup %3404 }
 0x492   : > { %v2612_v29 = vmul.f32 %v3405_v27, %v5328_v53 }
 0x494   : > { %v2622_v14 = vpack.c.bf16 %v2612_v29, %v2611_v30 }
 0x495   : > { %v3407_v58 = vpop.eup %3406 }
 0x496   : > { %2724 = vmatmul.mubr.bf16.gmra.mxu1 %v2622_v14  ;;  %v2613_v36 = vmul.f32 %v3407_v58, %v5340_v3 }
 0x497   : > { %v2582_v47 = vpop.xlane.xlu0 %2581  ;;  %2733 = vmatprep.mubr.bf16.mxu1 %v5865_v0 }
 0x498   : > { %3410 = vrcp.f32 %v2582_v47 }
 0x499   : > { %v3409_v2 = vpop.eup %3408 }
 0x49a   : > { %v2614_v23 = vmul.f32 %v3409_v2, %v5351_v9 }
 0x49b   : > { %v2584_v45 = vpop.xlane.xlu1 %2583 }
 0x49c   : > { %3412 = vrcp.f32 %v2584_v45  ;;  %v2623_v60 = vpack.c.bf16 %v2614_v23, %v2613_v36 }
 0x49e   : > { %2734 = vmatmul.mubr.bf16.gmra.mxu1 %v2623_v60 }
 0x49f   : > { %2743 = vmatprep.mubr.bf16.mxu1 %v5865_v0 }
 0x4a5   : > { %v3411_v19 = vpop.eup %3410 }
 0x4a6   : > { %v2615_v17 = vmul.f32 %v3411_v19, %v5377_v20 }
 0x4a9   : > { %v3413_v53 = vpop.eup %3412 }
 0x4aa   : > { %v2616_v34 = vmul.f32 %v3413_v53, %v5381_v52 }
 0x4ac   : > { %v2624_v54 = vpack.c.bf16 %v2616_v34, %v2615_v17 }
 0x4ae   : > { %v2089_v13 = vpop.f32.mrf.mxu1  ;;  %2744 = vmatmul.mubr.bf16.gmra.mxu1 %v2624_v54 }
 0x4af   : > { %2168 = vst [vmem:[%s5418_s21] sm:$0xff] %v2089_v13 }
 0x4b0   : > { %v2091_v0 = vpop.f32.mrf.mxu1 }
 0x4b1   : > { %2169 = vst [vmem:[%s5418_s21 + $0x8] sm:$0xff] %v2091_v0 }
 0x4b2   : > { %v2093_v3 = vpop.f32.mrf.mxu1 }
 0x4b3   : > { %2170 = vst [vmem:[%s5418_s21 + $0x10] sm:$0xff] %v2093_v3 }
 0x4b4   : > { %v2095_v9 = vpop.f32.mrf.mxu1 }
 0x4b5   : > { %2171 = vst [vmem:[%s5418_s21 + $0x18] sm:$0xff] %v2095_v9 }
 0x4b7   : > { %v2099_v20 = vpop.f32.mrf.mxu1 }
 0x4b8   : > { %2172 = vst [vmem:[%s5418_s21 + $0x20] sm:$0xff] %v2099_v20 }
 0x4b9   : > { %v2101_v52 = vpop.f32.mrf.mxu1 }
 0x4ba   : > { %2173 = vst [vmem:[%s5418_s21 + $0x28] sm:$0xff] %v2101_v52 }
 0x4bb   : > { %v2103_v7 = vpop.f32.mrf.mxu1 }
 0x4bc   : > { %2174 = vst [vmem:[%s5418_s21 + $0x30] sm:$0xff] %v2103_v7 }
 0x4bd   : > { %v2105_v63 = vpop.f32.mrf.mxu1 }
 0x4be   : > { %2175 = vst [vmem:[%s5418_s21 + $0x38] sm:$0xff] %v2105_v63 }
 0x4bf   : > { %v2109_v59 = vpop.f32.mrf.mxu1 }
 0x4c0   : > { %2176 = vst [vmem:[%s5418_s21 + $0x40] sm:$0xff] %v2109_v59 }
 0x4c1   : > { %v2111_v57 = vpop.f32.mrf.mxu1 }
 0x4c2   : > { %2177 = vst [vmem:[%s5418_s21 + $0x48] sm:$0xff] %v2111_v57 }
 0x4c3   : > { %v2113_v48 = vpop.f32.mrf.mxu1 }
 0x4c4   : > { %2178 = vst [vmem:[%s5418_s21 + $0x50] sm:$0xff] %v2113_v48 }
 0x4c5   : > { %v2115_v12 = vpop.f32.mrf.mxu1 }
 0x4c6   : > { %2179 = vst [vmem:[%s5418_s21 + $0x58] sm:$0xff] %v2115_v12 }
 0x4c7   : > { %v2119_v10 = vpop.f32.mrf.mxu1 }
 0x4c8   : > { %2180 = vst [vmem:[%s5418_s21 + $0x60] sm:$0xff] %v2119_v10 }
 0x4c9   : > { %v2121_v25 = vpop.f32.mrf.mxu1 }
 0x4ca   : > { %2181 = vst [vmem:[%s5418_s21 + $0x68] sm:$0xff] %v2121_v25 }
 0x4cb   : > { %v2123_v50 = vpop.f32.mrf.mxu1 }
 0x4cc   : > { %2182 = vst [vmem:[%s5418_s21 + $0x70] sm:$0xff] %v2123_v50 }
 0x4cd   : > { %v2125_v62 = vpop.f32.mrf.mxu1 }
 0x4ce   : > { %2183 = vst [vmem:[%s5418_s21 + $0x78] sm:$0xff] %v2125_v62 }
 0x4cf   : > { %v2129_v41 = vpop.f32.mrf.mxu1 }
 0x4d0   : > { %2184 = vst [vmem:[%s5418_s21 + $0x80] sm:$0xff] %v2129_v41 }
 0x4d1   : > { %v2131_v4 = vpop.f32.mrf.mxu1 }
 0x4d2   : > { %2185 = vst [vmem:[%s5418_s21 + $0x88] sm:$0xff] %v2131_v4 }
 0x4d3   : > { %v2133_v31 = vpop.f32.mrf.mxu1 }
 0x4d4   : > { %2186 = vst [vmem:[%s5418_s21 + $0x90] sm:$0xff] %v2133_v31 }
 0x4d5   : > { %v2135_v8 = vpop.f32.mrf.mxu1 }
 0x4d6   : > { %2187 = vst [vmem:[%s5418_s21 + $0x98] sm:$0xff] %v2135_v8 }
 0x4d7   : > { %v2139_v43 = vpop.f32.mrf.mxu1 }
 0x4d8   : > { %2188 = vst [vmem:[%s5418_s21 + $0xa0] sm:$0xff] %v2139_v43 }
 0x4d9   : > { %v2141_v61 = vpop.f32.mrf.mxu1 }
 0x4da   : > { %2189 = vst [vmem:[%s5418_s21 + $0xa8] sm:$0xff] %v2141_v61 }
 0x4db   : > { %v2143_v33 = vpop.f32.mrf.mxu1 }
 0x4dc   : > { %2190 = vst [vmem:[%s5418_s21 + $0xb0] sm:$0xff] %v2143_v33 }
 0x4dd   : > { %v2145_v39 = vpop.f32.mrf.mxu1 }
 0x4de   : > { %2191 = vst [vmem:[%s5418_s21 + $0xb8] sm:$0xff] %v2145_v39 }
 0x4df   : > { %v2149_v6 = vpop.f32.mrf.mxu1 }
 0x4e0   : > { %2192 = vst [vmem:[%s5418_s21 + $0xc0] sm:$0xff] %v2149_v6 }
 0x4e1   : > { %v2151_v28 = vpop.f32.mrf.mxu1 }
 0x4e2   : > { %2193 = vst [vmem:[%s5418_s21 + $0xc8] sm:$0xff] %v2151_v28 }
 0x4e3   : > { %v2153_v22 = vpop.f32.mrf.mxu1 }
 0x4e4   : > { %2194 = vst [vmem:[%s5418_s21 + $0xd0] sm:$0xff] %v2153_v22 }
 0x4e5   : > { %v2155_v1 = vpop.f32.mrf.mxu1 }
 0x4e6   : > { %2195 = vst [vmem:[%s5418_s21 + $0xd8] sm:$0xff] %v2155_v1 }
 0x4e7   : > { %v2159_v26 = vpop.f32.mrf.mxu1 }
 0x4e8   : > { %2196 = vst [vmem:[%s5418_s21 + $0xe0] sm:$0xff] %v2159_v26 }
 0x4e9   : > { %v2161_v37 = vpop.f32.mrf.mxu1 }
 0x4ea   : > { %2197 = vst [vmem:[%s5418_s21 + $0xe8] sm:$0xff] %v2161_v37 }
 0x4eb   : > { %v2163_v40 = vpop.f32.mrf.mxu1 }
 0x4ec   : > { %2198 = vst [vmem:[%s5418_s21 + $0xf0] sm:$0xff] %v2163_v40 }
 0x4ed   : > { %v2165_v49 = vpop.f32.mrf.mxu1 }
 0x4ee   : > { %2199 = vst [vmem:[%s5418_s21 + $0xf8] sm:$0xff] %v2165_v49 }
 0x4ef   : > { %v2675_v38 = vpop.f32.mrf.mxu1 }
 0x4f0   : > { %3016 = vst [vmem:[%s5418_s21 + $0x100] sm:$0xff] %v2675_v38 }
 0x4f1   : > { %v2677_v11 = vpop.f32.mrf.mxu1 }
 0x4f2   : > { %3017 = vst [vmem:[%s5418_s21 + $0x108] sm:$0xff] %v2677_v11 }
 0x4f3   : > { %v2679_v46 = vpop.f32.mrf.mxu1 }
 0x4f4   : > { %3018 = vst [vmem:[%s5418_s21 + $0x110] sm:$0xff] %v2679_v46 }
 0x4f5   : > { %v2681_v42 = vpop.f32.mrf.mxu1 }
 0x4f6   : > { %3019 = vst [vmem:[%s5418_s21 + $0x118] sm:$0xff] %v2681_v42 }
 0x4f7   : > { %v2685_v55 = vpop.f32.mrf.mxu1 }
 0x4f8   : > { %3020 = vst [vmem:[%s5418_s21 + $0x120] sm:$0xff] %v2685_v55 }
 0x4f9   : > { %v2687_v32 = vpop.f32.mrf.mxu1 }
 0x4fa   : > { %3021 = vst [vmem:[%s5418_s21 + $0x128] sm:$0xff] %v2687_v32 }
 0x4fb   : > { %v2689_v35 = vpop.f32.mrf.mxu1 }
 0x4fc   : > { %3022 = vst [vmem:[%s5418_s21 + $0x130] sm:$0xff] %v2689_v35 }
 0x4fd   : > { %v2691_v16 = vpop.f32.mrf.mxu1 }
 0x4fe   : > { %3023 = vst [vmem:[%s5418_s21 + $0x138] sm:$0xff] %v2691_v16 }
 0x4ff   : > { %v2695_v18 = vpop.f32.mrf.mxu1 }
 0x500   : > { %3024 = vst [vmem:[%s5418_s21 + $0x140] sm:$0xff] %v2695_v18 }
 0x501   : > { %v2697_v15 = vpop.f32.mrf.mxu1 }
 0x502   : > { %3025 = vst [vmem:[%s5418_s21 + $0x148] sm:$0xff] %v2697_v15 }
 0x503   : > { %v2699_v51 = vpop.f32.mrf.mxu1 }
 0x504   : > { %3026 = vst [vmem:[%s5418_s21 + $0x150] sm:$0xff] %v2699_v51 }
 0x505   : > { %v2701_v44 = vpop.f32.mrf.mxu1 }
 0x506   : > { %3027 = vst [vmem:[%s5418_s21 + $0x158] sm:$0xff] %v2701_v44 }
 0x507   : > { %v2705_v56 = vpop.f32.mrf.mxu1 }
 0x508   : > { %3028 = vst [vmem:[%s5418_s21 + $0x160] sm:$0xff] %v2705_v56 }
 0x509   : > { %v2707_v5 = vpop.f32.mrf.mxu1 }
 0x50a   : > { %3029 = vst [vmem:[%s5418_s21 + $0x168] sm:$0xff] %v2707_v5 }
 0x50b   : > { %v2709_v21 = vpop.f32.mrf.mxu1 }
 0x50c   : > { %3030 = vst [vmem:[%s5418_s21 + $0x170] sm:$0xff] %v2709_v21 }
 0x50d   : > { %v2711_v24 = vpop.f32.mrf.mxu1 }
 0x50e   : > { %3031 = vst [vmem:[%s5418_s21 + $0x178] sm:$0xff] %v2711_v24 }
 0x54e   : > { %v2715_v27 = vpop.f32.mrf.mxu1 }
 0x54f   : > { %3032 = vst [vmem:[%s5418_s21 + $0x180] sm:$0xff] %v2715_v27 }
 0x550   : > { %v2717_v30 = vpop.f32.mrf.mxu1 }
 0x551   : > { %3033 = vst [vmem:[%s5418_s21 + $0x188] sm:$0xff] %v2717_v30 }
 0x552   : > { %v2719_v29 = vpop.f32.mrf.mxu1 }
 0x553   : > { %3034 = vst [vmem:[%s5418_s21 + $0x190] sm:$0xff] %v2719_v29 }
 0x554   : > { %v2721_v14 = vpop.f32.mrf.mxu1 }
 0x555   : > { %3035 = vst [vmem:[%s5418_s21 + $0x198] sm:$0xff] %v2721_v14 }
 0x556   : > { %v2725_v58 = vpop.f32.mrf.mxu1 }
 0x557   : > { %3036 = vst [vmem:[%s5418_s21 + $0x1a0] sm:$0xff] %v2725_v58 }
 0x558   : > { %v2727_v47 = vpop.f32.mrf.mxu1 }
 0x559   : > { %3037 = vst [vmem:[%s5418_s21 + $0x1a8] sm:$0xff] %v2727_v47 }
 0x55a   : > { %v2729_v2 = vpop.f32.mrf.mxu1 }
 0x55b   : > { %3038 = vst [vmem:[%s5418_s21 + $0x1b0] sm:$0xff] %v2729_v2 }
 0x55c   : > { %v2731_v36 = vpop.f32.mrf.mxu1 }
 0x55d   : > { %3039 = vst [vmem:[%s5418_s21 + $0x1b8] sm:$0xff] %v2731_v36 }
 0x55e   : > { %v2735_v23 = vpop.f32.mrf.mxu1 }
 0x55f   : > { %3040 = vst [vmem:[%s5418_s21 + $0x1c0] sm:$0xff] %v2735_v23 }
 0x560   : > { %v2737_v45 = vpop.f32.mrf.mxu1 }
 0x561   : > { %3041 = vst [vmem:[%s5418_s21 + $0x1c8] sm:$0xff] %v2737_v45 }
 0x562   : > { %v2739_v60 = vpop.f32.mrf.mxu1 }
 0x563   : > { %3042 = vst [vmem:[%s5418_s21 + $0x1d0] sm:$0xff] %v2739_v60 }
 0x564   : > { %v2741_v19 = vpop.f32.mrf.mxu1 }
 0x565   : > { %3043 = vst [vmem:[%s5418_s21 + $0x1d8] sm:$0xff] %v2741_v19 }
 0x56e   : > { %v2745_v53 = vpop.f32.mrf.mxu1 }
 0x56f   : > { %3044 = vst [vmem:[%s5418_s21 + $0x1e0] sm:$0xff] %v2745_v53 }
 0x570   : > { %v2747_v17 = vpop.f32.mrf.mxu1 }
 0x571   : > { %3045 = vst [vmem:[%s5418_s21 + $0x1e8] sm:$0xff] %v2747_v17 }
 0x572   : > { %v2749_v34 = vpop.f32.mrf.mxu1 }
 0x573   : > { %3046 = vst [vmem:[%s5418_s21 + $0x1f0] sm:$0xff] %v2749_v34 }
 0x574   : > { %v2751_v54 = vpop.f32.mrf.mxu1 }
 0x575   : > { %3047 = vst [vmem:[%s5418_s21 + $0x1f8] sm:$0xff] %v2751_v54 }
 0x576   : > { %3533 = shalt.err (!%p3530_p9)
}
 0x577   : > { %s3534_s11 = scalar_lea.hbm %s5487_s14, 8192  ;;  %s3538_s26 = scalar_lea.hbm %s5538_s4, 16384 }
 0x578   : > { %p3535_p7 = scmp.ne.s32.totalorder %s5487_s14, %s3534_s11  ;;  %p3539_p6 = scmp.lt.s32.totalorder %s5487_s14, %s5538_s4 }
 0x579   : > { %p3540_p11 = scmp.lt.s32.totalorder %s3538_s26, %s3534_s11 }
 0x57a   : > { %p3536_p4 = pnand %p3535_p7, %p5892_p0 }
 0x57b   : > { %p3541_p13 = por %p3540_p11, %p3539_p6 }
 0x57c   : > { %p3537_p8 = pneg %p3536_p4 }
 0x57e   : > { %p3542_p12 = pnand %p3541_p13, %p3537_p8 }
 0x580   : > { %3545 = shalt.err (!%p3542_p12)
}
 0x581   : > { %s3604_s21 = smov 256   ;;  %s3605_s23 = smov 16  }
 0x582   : > { %3072 = dma.vmem_to_hbm [thread:$0]  (%p5892_p0), %s5489_s9, 8192, %s5487_s14, %s2788_s25, %s3604_s21, %s3604_s21, %s3605_s23  }
 0x583 PF: > { %s2817_s10 = sand.u32 1, %s3580_s15   ;;  %p5893_p5 = scmp.ne.s32.totalorder %s5636_s22, 0 }
 0x584   : > { %p5894_p10 = scmp.ge.s32.totalorder %s3592_s18, 2  ;;  %s2818_s12 = scalar_lea.sflag [#allocation4], %s2817_s10 }
 0x586   : > { %p3089_p1 = pnand %p5894_p10, %p5893_p5 }
 0x588   : > { %p3090_p2 = pneg %p3089_p1 }
 0x58a   : > { %3575 = dma.done.wait (%p3090_p2), %s2818_s12, 8192  }
 0x58b   : > { %3577 = vsyncadd (%p3090_p2), %s2818_s12, 4294959104  ;;  %p19_p3 = scmp.ge.s32.totalorder %s3706_s20, 4   ;;  %s5895_s15 = smov %s3584_s16 }
 0x58c   : > { %s5896_s16 = smov %s3588_s17  ;;  %s5897_s17 = smov %s3727_s29 }
 0x58d   : > { %s5898_s18 = smov %s3706_s20  ;;  %21 = sbr.rel (!%p19_p3) target bundleno = 7 (0x7), region = 94 }
 0x592   :  { %2823 = vsyncpa [#allocation3], 1 }
 0x593   :  { %2825 = vsyncpa [#allocation3 + $0x1], 1 }
 0x594   :  { %2826 = vsyncpa [#allocation6], 1 }
 0x595   :  { %2827 = vsyncpa [#allocation9], 1 }
 0x596   :  { %2828 = vsyncpa [#allocation4], 1 }
 0x597   :  { %2830 = vsyncpa [#allocation4 + $0x1], 1 }

</bundles_post_ra>
